<compile_context>
chip_gen: v5e
topology: v5e:2x2
jax: 0.10.0
libtpu: 0.0.40
codegen_flags: <defaults>
</compile_context>

<pallas_src>
import functools

import jax
import jax.numpy as jnp
from jax.experimental import pallas as pl
from jax.experimental.pallas import tpu as pltpu


# ---------------------------------------------------------------------------
# Fused kernel: SA-LSTM -> spatial attention -> 3x bidirectional LSTM -> sum+FC
# ---------------------------------------------------------------------------
def _fused_kernel(x_ref,                       # (T*B, D)      time-major, row = t*B+b
                  sa_wih_ref, sa_whh_ref, sa_b_ref,   # (D,4H) (H,4H) (1,4H)
                  sa_wa_ref, sa_ba_ref,        # (H,D) (1,D)   attention head
                  mwih_ref, mwhh_ref, mb_ref,  # (3,2H,8H) (6,H,4H) (3,1,8H)
                  fcw_ref, fcb_ref,            # (2H,60) (1,60)
                  h0sa_ref, c0sa_ref,          # (B,H) (B,H)
                  h0m_ref, c0m_ref,            # (6,B,H) (6,B,H)
                  out_ref,                     # (B,60)
                  act_a, act_b, gproj,         # VMEM scratch
                  *, T, B, D, H):
    Tm1 = T - 1
    f32 = jnp.float32
    G = 4 * H                                  # gates width per direction

    def cell(gates, c_prev):                   # PyTorch gate order i, f, g, o
        i_g = jax.nn.sigmoid(gates[:, 0 * H:1 * H])
        f_g = jax.nn.sigmoid(gates[:, 1 * H:2 * H])
        g_g = jnp.tanh(gates[:, 2 * H:3 * H])
        o_g = jax.nn.sigmoid(gates[:, 3 * H:4 * H])
        c_new = f_g * c_prev + i_g * g_g
        h_new = o_g * jnp.tanh(c_new)
        return h_new, c_new

    # ----------------- SA-LSTM + spatial attention -----------------
    # act_a holds x[1:] * attn in columns [0:D]; columns [D:2H] stay zero so the
    # (zero-padded) layer-0 W_ih of the main LSTM sees an equivalent input.
    act_a[...] = jnp.zeros_like(act_a)

    # Hoisted input projection for timesteps 0..T-2 (h_{T-1} is never used).
    gproj[0:Tm1 * B, 0:G] = (
        jnp.dot(x_ref[0:Tm1 * B, :], sa_wih_ref[...],
                preferred_element_type=f32) + sa_b_ref[...])

    sa_whh = sa_whh_ref[...]
    sa_wa = sa_wa_ref[...]
    sa_ba = sa_ba_ref[...]
    h = h0sa_ref[...]
    c = c0sa_ref[...]
    for t in range(Tm1):
        gates = gproj[t * B:(t + 1) * B, 0:G] + jnp.dot(
            h, sa_whh, preferred_element_type=f32)
        h, c = cell(gates, c)
        # spatial attention over the D input features, applied to x[t+1]
        logits = jnp.dot(h, sa_wa, preferred_element_type=f32) + sa_ba
        m = jnp.max(logits, axis=-1, keepdims=True)
        e = jnp.exp(logits - m)
        w = e / jnp.sum(e, axis=-1, keepdims=True)
        x_next = x_ref[(t + 1) * B:(t + 2) * B, :]
        act_a[t * B:(t + 1) * B, 0:D] = x_next * w

    # ----------------- 3-layer bidirectional LSTM -----------------
    src, dst = act_a, act_b
    for layer in range(3):
        inp = src[...]                                        # (Tm1*B, 2H)
        # One wide projection for both directions: N = 8H = 256.
        gproj[...] = (jnp.dot(inp, mwih_ref[layer],
                              preferred_element_type=f32) + mb_ref[layer])
        for d in range(2):                                    # 0 = fwd, 1 = bwd
            idx = 2 * layer + d                               # PyTorch h0 layout
            whh = mwhh_ref[idx]
            h = h0m_ref[idx]
            c = c0m_ref[idx]
            for s in range(Tm1):
                t = s if d == 0 else (Tm1 - 1 - s)            # reversed index: no flip
                gates = gproj[t * B:(t + 1) * B, d * G:(d + 1) * G] + jnp.dot(
                    h, whh, preferred_element_type=f32)
                h, c = cell(gates, c)
                dst[t * B:(t + 1) * B, d * H:(d + 1) * H] = h  # concat-free write
        src, dst = dst, src

    # ----------------- sum over time + Linear(2H, 60) -----------------
    acc = jnp.zeros((B, 2 * H), f32)
    for t in range(Tm1):
        acc = acc + src[t * B:(t + 1) * B, :]
    out_ref[...] = (jnp.dot(acc, fcw_ref[...], preferred_element_type=f32)
                    + fcb_ref[...]).astype(out_ref.dtype)


# ---------------------------------------------------------------------------
# Parameter init (deterministic, PyTorch-like uniform(-1/sqrt(H), 1/sqrt(H)))
# ---------------------------------------------------------------------------
def _uniform(key, shape, scale):
    return jax.random.uniform(key, shape, jnp.float32, -scale, scale)


def init_params(key, input_size, hidden_size):
    D, H = input_size, hidden_size
    k = float(H) ** -0.5
    keys = iter(jax.random.split(key, 32))

    p = {}
    # --- salstm: 1-layer LSTM(D,H) + attention head Linear(H,D) ---
    p["sa_wih"] = _uniform(next(keys), (D, 4 * H), k)
    p["sa_whh"] = _uniform(next(keys), (H, 4 * H), k)
    p["sa_b"] = _uniform(next(keys), (4 * H,), k)      # b_ih + b_hh combined
    p["sa_wa"] = _uniform(next(keys), (H, D), k)
    p["sa_ba"] = _uniform(next(keys), (D,), k)

    # --- mainlstm: 3 layers x 2 directions, W_ih stacked per layer to (2H, 8H)
    #     (layer-0 rows D..2H zero-padded; matching input columns are zero).
    wih_layers, b_layers, whh_dirs = [], [], []
    for layer in range(3):
        din = D if layer == 0 else 2 * H
        w_dirs, b_dirs = [], []
        for _direction in range(2):
            w = _uniform(next(keys), (din, 4 * H), k)
            if din < 2 * H:
                w = jnp.concatenate(
                    [w, jnp.zeros((2 * H - din, 4 * H), jnp.float32)], axis=0)
            w_dirs.append(w)
            b_dirs.append(_uniform(next(keys), (4 * H,), k))
            whh_dirs.append(_uniform(next(keys), (H, 4 * H), k))
        wih_layers.append(jnp.concatenate(w_dirs, axis=1))    # (2H, 8H)
        b_layers.append(jnp.concatenate(b_dirs, axis=0))      # (8H,)
    p["main_wih"] = jnp.stack(wih_layers)                     # (3, 2H, 8H)
    p["main_b"] = jnp.stack(b_layers)                         # (3, 8H)
    p["main_whh"] = jnp.stack(whh_dirs)                       # (6, H, 4H)

    # --- mainfc: Linear(2H, 60) ---
    kfc = float(2 * H) ** -0.5
    p["fc_w"] = _uniform(next(keys), (2 * H, 60), kfc)
    p["fc_b"] = _uniform(next(keys), (60,), kfc)
    return p


# ---------------------------------------------------------------------------
# Full forward pass (mirrors STALSTMNet.forward)
# ---------------------------------------------------------------------------
@jax.jit
def stalstm_net_forward(x, params, state_key):
    """x: (T, B, input_size) -> (B, 60)."""
    T, B, D = x.shape                          # static under jit
    H = params["sa_whh"].shape[0]              # static (from weight shape)
    Tm1 = T - 1

    ks = jax.random.split(state_key, 4)
    # h0/c0 = torch.randn(1, B, H) for salstm, torch.randn(6, B, H) for mainlstm
    h0_sa = jax.random.normal(ks[0], (B, H), jnp.float32)
    c0_sa = jax.random.normal(ks[1], (B, H), jnp.float32)
    h0_m = jax.random.normal(ks[2], (6, B, H), jnp.float32)
    c0_m = jax.random.normal(ks[3], (6, B, H), jnp.float32)

    x2d = x.reshape(T * B, D)                  # time-major 2D: row = t*B + b

    kernel = functools.partial(_fused_kernel, T=T, B=B, D=D, H=H)
    out = pl.pallas_call(
        kernel,
        out_shape=jax.ShapeDtypeStruct((B, 60), jnp.float32),
        scratch_shapes=[
            pltpu.VMEM((Tm1 * B, 2 * H), jnp.float32),   # activations slab A
            pltpu.VMEM((Tm1 * B, 2 * H), jnp.float32),   # activations slab B
            pltpu.VMEM((Tm1 * B, 8 * H), jnp.float32),   # hoisted gate projections
        ],
    )(x2d,
      params["sa_wih"], params["sa_whh"], params["sa_b"][None, :],
      params["sa_wa"], params["sa_ba"][None, :],
      params["main_wih"], params["main_whh"], params["main_b"][:, None, :],
      params["fc_w"], params["fc_b"][None, :],
      h0_sa, c0_sa, h0_m, c0_m)
    return out


# ---------------------------------------------------------------------------
if __name__ == "__main__":
    INPUT_SIZE = 12     # e.g. 4 joints x 3 coords (small synthetic)
    HIDDEN_SIZE = 32
    SEQ_LEN = 8
    BATCH = 2

    root = jax.random.PRNGKey(0)
    k_data, k_param, k_state = jax.random.split(root, 3)

    x = jax.random.normal(k_data, (SEQ_LEN, BATCH, INPUT_SIZE), jnp.float32)
    params = init_params(k_param, INPUT_SIZE, HIDDEN_SIZE)

    out = stalstm_net_forward(x, params, k_state)
    out = jax.block_until_ready(out)
    assert out.shape == (BATCH, 60), out.shape
    assert bool(jnp.all(jnp.isfinite(out)))
    print("KERNEL_OK")
</pallas_src>

<mosaic_0001>
module attributes {stable_mosaic.version = 11 : i64} {
  func.func @_fused_kernel(%arg0: memref<16x12xf32, #tpu.memory_space<vmem>>, %arg1: memref<12x128xf32, #tpu.memory_space<vmem>>, %arg2: memref<32x128xf32, #tpu.memory_space<vmem>>, %arg3: memref<1x128xf32, #tpu.memory_space<vmem>>, %arg4: memref<32x12xf32, #tpu.memory_space<vmem>>, %arg5: memref<1x12xf32, #tpu.memory_space<vmem>>, %arg6: memref<3x64x256xf32, #tpu.memory_space<vmem>>, %arg7: memref<6x32x128xf32, #tpu.memory_space<vmem>>, %arg8: memref<3x1x256xf32, #tpu.memory_space<vmem>>, %arg9: memref<64x60xf32, #tpu.memory_space<vmem>>, %arg10: memref<1x60xf32, #tpu.memory_space<vmem>>, %arg11: memref<2x32xf32, #tpu.memory_space<vmem>>, %arg12: memref<2x32xf32, #tpu.memory_space<vmem>>, %arg13: memref<6x2x32xf32, #tpu.memory_space<vmem>>, %arg14: memref<6x2x32xf32, #tpu.memory_space<vmem>>, %arg15: memref<2x60xf32, #tpu.memory_space<vmem>>, %arg16: memref<14x64xf32, #tpu.memory_space<vmem>>, %arg17: memref<14x64xf32, #tpu.memory_space<vmem>>, %arg18: memref<14x256xf32, #tpu.memory_space<vmem>>) attributes {dimension_semantics = [], scalar_prefetch = 0 : i64, scratch_operands = 3 : i64, tpu.core_type = #tpu.core_type<tc>} {
    %cst = arith.constant 0.000000e+00 : f32
    %0 = vector.broadcast %cst : f32 to vector<14x64xf32>
    %c0 = arith.constant 0 : index
    %c0_0 = arith.constant 0 : index
    %1 = vector.load %arg16[%c0, %c0_0] : memref<14x64xf32, #tpu.memory_space<vmem>>, vector<14x64xf32>
    tpu.vector_store %arg16[%c0, %c0_0], %0 {strides = array<i32>} : memref<14x64xf32, #tpu.memory_space<vmem>>, vector<14x64xf32>,
    %c0_1 = arith.constant 0 : index
    %c0_2 = arith.constant 0 : index
    %2 = vector.load %arg0[%c0_1, %c0_2] : memref<16x12xf32, #tpu.memory_space<vmem>>, vector<14x12xf32>
    %c0_3 = arith.constant 0 : index
    %c0_4 = arith.constant 0 : index
    %3 = vector.load %arg1[%c0_3, %c0_4] : memref<12x128xf32, #tpu.memory_space<vmem>>, vector<12x128xf32>
    %cst_5 = arith.constant dense<0.000000e+00> : vector<14x128xf32>
    %4 = tpu.matmul %2, %3, %cst_5 {dimension_numbers = #tpu.dot_dimension_numbers<[1], [0], [0], [1], [0, 0, 1, 1], [], []>} : vector<14x12xf32>, vector<12x128xf32>, vector<14x128xf32> -> vector<14x128xf32>
    %c0_6 = arith.constant 0 : index
    %c0_7 = arith.constant 0 : index
    %5 = vector.load %arg3[%c0_6, %c0_7] : memref<1x128xf32, #tpu.memory_space<vmem>>, vector<1x128xf32>
    %6 = vector.broadcast %5 : vector<1x128xf32> to vector<14x128xf32>
    %7 = arith.addf %4, %6 : vector<14x128xf32>
    %c0_8 = arith.constant 0 : index
    %c0_9 = arith.constant 0 : index
    %8 = vector.load %arg18[%c0_8, %c0_9] : memref<14x256xf32, #tpu.memory_space<vmem>>, vector<14x128xf32>
    tpu.vector_store %arg18[%c0_8, %c0_9], %7 {strides = array<i32>} : memref<14x256xf32, #tpu.memory_space<vmem>>, vector<14x128xf32>,
    %c0_10 = arith.constant 0 : index
    %c0_11 = arith.constant 0 : index
    %9 = vector.load %arg2[%c0_10, %c0_11] : memref<32x128xf32, #tpu.memory_space<vmem>>, vector<32x128xf32>
    %c0_12 = arith.constant 0 : index
    %c0_13 = arith.constant 0 : index
    %10 = vector.load %arg4[%c0_12, %c0_13] : memref<32x12xf32, #tpu.memory_space<vmem>>, vector<32x12xf32>
    %c0_14 = arith.constant 0 : index
    %c0_15 = arith.constant 0 : index
    %11 = vector.load %arg5[%c0_14, %c0_15] : memref<1x12xf32, #tpu.memory_space<vmem>>, vector<1x12xf32>
    %c0_16 = arith.constant 0 : index
    %c0_17 = arith.constant 0 : index
    %12 = vector.load %arg11[%c0_16, %c0_17] : memref<2x32xf32, #tpu.memory_space<vmem>>, vector<2x32xf32>
    %c0_18 = arith.constant 0 : index
    %c0_19 = arith.constant 0 : index
    %13 = vector.load %arg12[%c0_18, %c0_19] : memref<2x32xf32, #tpu.memory_space<vmem>>, vector<2x32xf32>
    %c0_20 = arith.constant 0 : index
    %c0_21 = arith.constant 0 : index
    %14 = vector.load %arg18[%c0_20, %c0_21] : memref<14x256xf32, #tpu.memory_space<vmem>>, vector<2x128xf32>
    %cst_22 = arith.constant dense<0.000000e+00> : vector<2x128xf32>
    %15 = tpu.matmul %12, %9, %cst_22 {dimension_numbers = #tpu.dot_dimension_numbers<[1], [0], [0], [1], [0, 0, 1, 1], [], []>} : vector<2x32xf32>, vector<32x128xf32>, vector<2x128xf32> -> vector<2x128xf32>
    %16 = arith.addf %14, %15 : vector<2x128xf32>
    %17 = vector.extract_strided_slice %16 {offsets = [0, 0], sizes = [2, 32], strides = [1, 1]} : vector<2x128xf32> to vector<2x32xf32>
    %18 = arith.negf %17 : vector<2x32xf32>
    %19 = math.exp %18 : vector<2x32xf32>
    %cst_23 = arith.constant 1.000000e+00 : f32
    %20 = vector.broadcast %cst_23 : f32 to vector<2x32xf32>
    %21 = arith.addf %20, %19 : vector<2x32xf32>
    %22 = arith.divf %20, %21 : vector<2x32xf32>
    %23 = vector.extract_strided_slice %16 {offsets = [0, 32], sizes = [2, 32], strides = [1, 1]} : vector<2x128xf32> to vector<2x32xf32>
    %24 = arith.negf %23 : vector<2x32xf32>
    %25 = math.exp %24 : vector<2x32xf32>
    %cst_24 = arith.constant 1.000000e+00 : f32
    %26 = vector.broadcast %cst_24 : f32 to vector<2x32xf32>
    %27 = arith.addf %26, %25 : vector<2x32xf32>
    %28 = arith.divf %26, %27 : vector<2x32xf32>
    %29 = vector.extract_strided_slice %16 {offsets = [0, 64], sizes = [2, 32], strides = [1, 1]} : vector<2x128xf32> to vector<2x32xf32>
    %30 = math.tanh %29 : vector<2x32xf32>
    %31 = vector.extract_strided_slice %16 {offsets = [0, 96], sizes = [2, 32], strides = [1, 1]} : vector<2x128xf32> to vector<2x32xf32>
    %32 = arith.negf %31 : vector<2x32xf32>
    %33 = math.exp %32 : vector<2x32xf32>
    %cst_25 = arith.constant 1.000000e+00 : f32
    %34 = vector.broadcast %cst_25 : f32 to vector<2x32xf32>
    %35 = arith.addf %34, %33 : vector<2x32xf32>
    %36 = arith.divf %34, %35 : vector<2x32xf32>
    %37 = arith.mulf %28, %13 : vector<2x32xf32>
    %38 = arith.mulf %22, %30 : vector<2x32xf32>
    %39 = arith.addf %37, %38 : vector<2x32xf32>
    %40 = math.tanh %39 : vector<2x32xf32>
    %41 = arith.mulf %36, %40 : vector<2x32xf32>
    %cst_26 = arith.constant dense<0.000000e+00> : vector<2x12xf32>
    %42 = tpu.matmul %41, %10, %cst_26 {dimension_numbers = #tpu.dot_dimension_numbers<[1], [0], [0], [1], [0, 0, 1, 1], [], []>} : vector<2x32xf32>, vector<32x12xf32>, vector<2x12xf32> -> vector<2x12xf32>
    %43 = vector.broadcast %11 : vector<1x12xf32> to vector<2x12xf32>
    %44 = arith.addf %42, %43 : vector<2x12xf32>
    %cst_27 = arith.constant dense<0xFF800000> : vector<2xf32>
    %45 = vector.multi_reduction <maximumf>, %44, %cst_27 [1] : vector<2x12xf32> to vector<2xf32>
    %46 = vector.shape_cast %45 : vector<2xf32> to vector<2x1xf32>
    %47 = vector.broadcast %46 : vector<2x1xf32> to vector<2x12xf32>
    %48 = arith.subf %44, %47 : vector<2x12xf32>
    %49 = math.exp %48 : vector<2x12xf32>
    %cst_28 = arith.constant dense<0.000000e+00> : vector<2xf32>
    %50 = vector.multi_reduction <add>, %49, %cst_28 [1] : vector<2x12xf32> to vector<2xf32>
    %51 = vector.shape_cast %50 : vector<2xf32> to vector<2x1xf32>
    %52 = vector.broadcast %51 : vector<2x1xf32> to vector<2x12xf32>
    %53 = arith.divf %49, %52 : vector<2x12xf32>
    %c2 = arith.constant 2 : index
    %c0_29 = arith.constant 0 : index
    %54 = vector.load %arg0[%c2, %c0_29] : memref<16x12xf32, #tpu.memory_space<vmem>>, vector<2x12xf32>
    %55 = arith.mulf %54, %53 : vector<2x12xf32>
    %c0_30 = arith.constant 0 : index
    %c0_31 = arith.constant 0 : index
    %56 = vector.load %arg16[%c0_30, %c0_31] : memref<14x64xf32, #tpu.memory_space<vmem>>, vector<2x12xf32>
    tpu.vector_store %arg16[%c0_30, %c0_31], %55 {strides = array<i32>} : memref<14x64xf32, #tpu.memory_space<vmem>>, vector<2x12xf32>,
    %c2_32 = arith.constant 2 : index
    %c0_33 = arith.constant 0 : index
    %57 = vector.load %arg18[%c2_32, %c0_33] : memref<14x256xf32, #tpu.memory_space<vmem>>, vector<2x128xf32>
    %cst_34 = arith.constant dense<0.000000e+00> : vector<2x128xf32>
    %58 = tpu.matmul %41, %9, %cst_34 {dimension_numbers = #tpu.dot_dimension_numbers<[1], [0], [0], [1], [0, 0, 1, 1], [], []>} : vector<2x32xf32>, vector<32x128xf32>, vector<2x128xf32> -> vector<2x128xf32>
    %59 = arith.addf %57, %58 : vector<2x128xf32>
    %60 = vector.extract_strided_slice %59 {offsets = [0, 0], sizes = [2, 32], strides = [1, 1]} : vector<2x128xf32> to vector<2x32xf32>
    %61 = arith.negf %60 : vector<2x32xf32>
    %62 = math.exp %61 : vector<2x32xf32>
    %cst_35 = arith.constant 1.000000e+00 : f32
    %63 = vector.broadcast %cst_35 : f32 to vector<2x32xf32>
    %64 = arith.addf %63, %62 : vector<2x32xf32>
    %65 = arith.divf %63, %64 : vector<2x32xf32>
    %66 = vector.extract_strided_slice %59 {offsets = [0, 32], sizes = [2, 32], strides = [1, 1]} : vector<2x128xf32> to vector<2x32xf32>
    %67 = arith.negf %66 : vector<2x32xf32>
    %68 = math.exp %67 : vector<2x32xf32>
    %cst_36 = arith.constant 1.000000e+00 : f32
    %69 = vector.broadcast %cst_36 : f32 to vector<2x32xf32>
    %70 = arith.addf %69, %68 : vector<2x32xf32>
    %71 = arith.divf %69, %70 : vector<2x32xf32>
    %72 = vector.extract_strided_slice %59 {offsets = [0, 64], sizes = [2, 32], strides = [1, 1]} : vector<2x128xf32> to vector<2x32xf32>
    %73 = math.tanh %72 : vector<2x32xf32>
    %74 = vector.extract_strided_slice %59 {offsets = [0, 96], sizes = [2, 32], strides = [1, 1]} : vector<2x128xf32> to vector<2x32xf32>
    %75 = arith.negf %74 : vector<2x32xf32>
    %76 = math.exp %75 : vector<2x32xf32>
    %cst_37 = arith.constant 1.000000e+00 : f32
    %77 = vector.broadcast %cst_37 : f32 to vector<2x32xf32>
    %78 = arith.addf %77, %76 : vector<2x32xf32>
    %79 = arith.divf %77, %78 : vector<2x32xf32>
    %80 = arith.mulf %71, %39 : vector<2x32xf32>
    %81 = arith.mulf %65, %73 : vector<2x32xf32>
    %82 = arith.addf %80, %81 : vector<2x32xf32>
    %83 = math.tanh %82 : vector<2x32xf32>
    %84 = arith.mulf %79, %83 : vector<2x32xf32>
    %cst_38 = arith.constant dense<0.000000e+00> : vector<2x12xf32>
    %85 = tpu.matmul %84, %10, %cst_38 {dimension_numbers = #tpu.dot_dimension_numbers<[1], [0], [0], [1], [0, 0, 1, 1], [], []>} : vector<2x32xf32>, vector<32x12xf32>, vector<2x12xf32> -> vector<2x12xf32>
    %86 = vector.broadcast %11 : vector<1x12xf32> to vector<2x12xf32>
    %87 = arith.addf %85, %86 : vector<2x12xf32>
    %cst_39 = arith.constant dense<0xFF800000> : vector<2xf32>
    %88 = vector.multi_reduction <maximumf>, %87, %cst_39 [1] : vector<2x12xf32> to vector<2xf32>
    %89 = vector.shape_cast %88 : vector<2xf32> to vector<2x1xf32>
    %90 = vector.broadcast %89 : vector<2x1xf32> to vector<2x12xf32>
    %91 = arith.subf %87, %90 : vector<2x12xf32>
    %92 = math.exp %91 : vector<2x12xf32>
    %cst_40 = arith.constant dense<0.000000e+00> : vector<2xf32>
    %93 = vector.multi_reduction <add>, %92, %cst_40 [1] : vector<2x12xf32> to vector<2xf32>
    %94 = vector.shape_cast %93 : vector<2xf32> to vector<2x1xf32>
    %95 = vector.broadcast %94 : vector<2x1xf32> to vector<2x12xf32>
    %96 = arith.divf %92, %95 : vector<2x12xf32>
    %c4 = arith.constant 4 : index
    %c0_41 = arith.constant 0 : index
    %97 = vector.load %arg0[%c4, %c0_41] : memref<16x12xf32, #tpu.memory_space<vmem>>, vector<2x12xf32>
    %98 = arith.mulf %97, %96 : vector<2x12xf32>
    %c2_42 = arith.constant 2 : index
    %c0_43 = arith.constant 0 : index
    %99 = vector.load %arg16[%c2_42, %c0_43] : memref<14x64xf32, #tpu.memory_space<vmem>>, vector<2x12xf32>
    tpu.vector_store %arg16[%c2_42, %c0_43], %98 {strides = array<i32>} : memref<14x64xf32, #tpu.memory_space<vmem>>, vector<2x12xf32>,
    %c4_44 = arith.constant 4 : index
    %c0_45 = arith.constant 0 : index
    %100 = vector.load %arg18[%c4_44, %c0_45] : memref<14x256xf32, #tpu.memory_space<vmem>>, vector<2x128xf32>
    %cst_46 = arith.constant dense<0.000000e+00> : vector<2x128xf32>
    %101 = tpu.matmul %84, %9, %cst_46 {dimension_numbers = #tpu.dot_dimension_numbers<[1], [0], [0], [1], [0, 0, 1, 1], [], []>} : vector<2x32xf32>, vector<32x128xf32>, vector<2x128xf32> -> vector<2x128xf32>
    %102 = arith.addf %100, %101 : vector<2x128xf32>
    %103 = vector.extract_strided_slice %102 {offsets = [0, 0], sizes = [2, 32], strides = [1, 1]} : vector<2x128xf32> to vector<2x32xf32>
    %104 = arith.negf %103 : vector<2x32xf32>
    %105 = math.exp %104 : vector<2x32xf32>
    %cst_47 = arith.constant 1.000000e+00 : f32
    %106 = vector.broadcast %cst_47 : f32 to vector<2x32xf32>
    %107 = arith.addf %106, %105 : vector<2x32xf32>
    %108 = arith.divf %106, %107 : vector<2x32xf32>
    %109 = vector.extract_strided_slice %102 {offsets = [0, 32], sizes = [2, 32], strides = [1, 1]} : vector<2x128xf32> to vector<2x32xf32>
    %110 = arith.negf %109 : vector<2x32xf32>
    %111 = math.exp %110 : vector<2x32xf32>
    %cst_48 = arith.constant 1.000000e+00 : f32
    %112 = vector.broadcast %cst_48 : f32 to vector<2x32xf32>
    %113 = arith.addf %112, %111 : vector<2x32xf32>
    %114 = arith.divf %112, %113 : vector<2x32xf32>
    %115 = vector.extract_strided_slice %102 {offsets = [0, 64], sizes = [2, 32], strides = [1, 1]} : vector<2x128xf32> to vector<2x32xf32>
    %116 = math.tanh %115 : vector<2x32xf32>
    %117 = vector.extract_strided_slice %102 {offsets = [0, 96], sizes = [2, 32], strides = [1, 1]} : vector<2x128xf32> to vector<2x32xf32>
    %118 = arith.negf %117 : vector<2x32xf32>
    %119 = math.exp %118 : vector<2x32xf32>
    %cst_49 = arith.constant 1.000000e+00 : f32
    %120 = vector.broadcast %cst_49 : f32 to vector<2x32xf32>
    %121 = arith.addf %120, %119 : vector<2x32xf32>
    %122 = arith.divf %120, %121 : vector<2x32xf32>
    %123 = arith.mulf %114, %82 : vector<2x32xf32>
    %124 = arith.mulf %108, %116 : vector<2x32xf32>
    %125 = arith.addf %123, %124 : vector<2x32xf32>
    %126 = math.tanh %125 : vector<2x32xf32>
    %127 = arith.mulf %122, %126 : vector<2x32xf32>
    %cst_50 = arith.constant dense<0.000000e+00> : vector<2x12xf32>
    %128 = tpu.matmul %127, %10, %cst_50 {dimension_numbers = #tpu.dot_dimension_numbers<[1], [0], [0], [1], [0, 0, 1, 1], [], []>} : vector<2x32xf32>, vector<32x12xf32>, vector<2x12xf32> -> vector<2x12xf32>
    %129 = vector.broadcast %11 : vector<1x12xf32> to vector<2x12xf32>
    %130 = arith.addf %128, %129 : vector<2x12xf32>
    %cst_51 = arith.constant dense<0xFF800000> : vector<2xf32>
    %131 = vector.multi_reduction <maximumf>, %130, %cst_51 [1] : vector<2x12xf32> to vector<2xf32>
    %132 = vector.shape_cast %131 : vector<2xf32> to vector<2x1xf32>
    %133 = vector.broadcast %132 : vector<2x1xf32> to vector<2x12xf32>
    %134 = arith.subf %130, %133 : vector<2x12xf32>
    %135 = math.exp %134 : vector<2x12xf32>
    %cst_52 = arith.constant dense<0.000000e+00> : vector<2xf32>
    %136 = vector.multi_reduction <add>, %135, %cst_52 [1] : vector<2x12xf32> to vector<2xf32>
    %137 = vector.shape_cast %136 : vector<2xf32> to vector<2x1xf32>
    %138 = vector.broadcast %137 : vector<2x1xf32> to vector<2x12xf32>
    %139 = arith.divf %135, %138 : vector<2x12xf32>
    %c6 = arith.constant 6 : index
    %c0_53 = arith.constant 0 : index
    %140 = vector.load %arg0[%c6, %c0_53] : memref<16x12xf32, #tpu.memory_space<vmem>>, vector<2x12xf32>
    %141 = arith.mulf %140, %139 : vector<2x12xf32>
    %c4_54 = arith.constant 4 : index
    %c0_55 = arith.constant 0 : index
    %142 = vector.load %arg16[%c4_54, %c0_55] : memref<14x64xf32, #tpu.memory_space<vmem>>, vector<2x12xf32>
    tpu.vector_store %arg16[%c4_54, %c0_55], %141 {strides = array<i32>} : memref<14x64xf32, #tpu.memory_space<vmem>>, vector<2x12xf32>,
    %c6_56 = arith.constant 6 : index
    %c0_57 = arith.constant 0 : index
    %143 = vector.load %arg18[%c6_56, %c0_57] : memref<14x256xf32, #tpu.memory_space<vmem>>, vector<2x128xf32>
    %cst_58 = arith.constant dense<0.000000e+00> : vector<2x128xf32>
    %144 = tpu.matmul %127, %9, %cst_58 {dimension_numbers = #tpu.dot_dimension_numbers<[1], [0], [0], [1], [0, 0, 1, 1], [], []>} : vector<2x32xf32>, vector<32x128xf32>, vector<2x128xf32> -> vector<2x128xf32>
    %145 = arith.addf %143, %144 : vector<2x128xf32>
    %146 = vector.extract_strided_slice %145 {offsets = [0, 0], sizes = [2, 32], strides = [1, 1]} : vector<2x128xf32> to vector<2x32xf32>
    %147 = arith.negf %146 : vector<2x32xf32>
    %148 = math.exp %147 : vector<2x32xf32>
    %cst_59 = arith.constant 1.000000e+00 : f32
    %149 = vector.broadcast %cst_59 : f32 to vector<2x32xf32>
    %150 = arith.addf %149, %148 : vector<2x32xf32>
    %151 = arith.divf %149, %150 : vector<2x32xf32>
    %152 = vector.extract_strided_slice %145 {offsets = [0, 32], sizes = [2, 32], strides = [1, 1]} : vector<2x128xf32> to vector<2x32xf32>
    %153 = arith.negf %152 : vector<2x32xf32>
    %154 = math.exp %153 : vector<2x32xf32>
    %cst_60 = arith.constant 1.000000e+00 : f32
    %155 = vector.broadcast %cst_60 : f32 to vector<2x32xf32>
    %156 = arith.addf %155, %154 : vector<2x32xf32>
    %157 = arith.divf %155, %156 : vector<2x32xf32>
    %158 = vector.extract_strided_slice %145 {offsets = [0, 64], sizes = [2, 32], strides = [1, 1]} : vector<2x128xf32> to vector<2x32xf32>
    %159 = math.tanh %158 : vector<2x32xf32>
    %160 = vector.extract_strided_slice %145 {offsets = [0, 96], sizes = [2, 32], strides = [1, 1]} : vector<2x128xf32> to vector<2x32xf32>
    %161 = arith.negf %160 : vector<2x32xf32>
    %162 = math.exp %161 : vector<2x32xf32>
    %cst_61 = arith.constant 1.000000e+00 : f32
    %163 = vector.broadcast %cst_61 : f32 to vector<2x32xf32>
    %164 = arith.addf %163, %162 : vector<2x32xf32>
    %165 = arith.divf %163, %164 : vector<2x32xf32>
    %166 = arith.mulf %157, %125 : vector<2x32xf32>
    %167 = arith.mulf %151, %159 : vector<2x32xf32>
    %168 = arith.addf %166, %167 : vector<2x32xf32>
    %169 = math.tanh %168 : vector<2x32xf32>
    %170 = arith.mulf %165, %169 : vector<2x32xf32>
    %cst_62 = arith.constant dense<0.000000e+00> : vector<2x12xf32>
    %171 = tpu.matmul %170, %10, %cst_62 {dimension_numbers = #tpu.dot_dimension_numbers<[1], [0], [0], [1], [0, 0, 1, 1], [], []>} : vector<2x32xf32>, vector<32x12xf32>, vector<2x12xf32> -> vector<2x12xf32>
    %172 = vector.broadcast %11 : vector<1x12xf32> to vector<2x12xf32>
    %173 = arith.addf %171, %172 : vector<2x12xf32>
    %cst_63 = arith.constant dense<0xFF800000> : vector<2xf32>
    %174 = vector.multi_reduction <maximumf>, %173, %cst_63 [1] : vector<2x12xf32> to vector<2xf32>
    %175 = vector.shape_cast %174 : vector<2xf32> to vector<2x1xf32>
    %176 = vector.broadcast %175 : vector<2x1xf32> to vector<2x12xf32>
    %177 = arith.subf %173, %176 : vector<2x12xf32>
    %178 = math.exp %177 : vector<2x12xf32>
    %cst_64 = arith.constant dense<0.000000e+00> : vector<2xf32>
    %179 = vector.multi_reduction <add>, %178, %cst_64 [1] : vector<2x12xf32> to vector<2xf32>
    %180 = vector.shape_cast %179 : vector<2xf32> to vector<2x1xf32>
    %181 = vector.broadcast %180 : vector<2x1xf32> to vector<2x12xf32>
    %182 = arith.divf %178, %181 : vector<2x12xf32>
    %c8 = arith.constant 8 : index
    %c0_65 = arith.constant 0 : index
    %183 = vector.load %arg0[%c8, %c0_65] : memref<16x12xf32, #tpu.memory_space<vmem>>, vector<2x12xf32>
    %184 = arith.mulf %183, %182 : vector<2x12xf32>
    %c6_66 = arith.constant 6 : index
    %c0_67 = arith.constant 0 : index
    %185 = vector.load %arg16[%c6_66, %c0_67] : memref<14x64xf32, #tpu.memory_space<vmem>>, vector<2x12xf32>
    tpu.vector_store %arg16[%c6_66, %c0_67], %184 {strides = array<i32>} : memref<14x64xf32, #tpu.memory_space<vmem>>, vector<2x12xf32>,
    %c8_68 = arith.constant 8 : index
    %c0_69 = arith.constant 0 : index
    %186 = vector.load %arg18[%c8_68, %c0_69] : memref<14x256xf32, #tpu.memory_space<vmem>>, vector<2x128xf32>
    %cst_70 = arith.constant dense<0.000000e+00> : vector<2x128xf32>
    %187 = tpu.matmul %170, %9, %cst_70 {dimension_numbers = #tpu.dot_dimension_numbers<[1], [0], [0], [1], [0, 0, 1, 1], [], []>} : vector<2x32xf32>, vector<32x128xf32>, vector<2x128xf32> -> vector<2x128xf32>
    %188 = arith.addf %186, %187 : vector<2x128xf32>
    %189 = vector.extract_strided_slice %188 {offsets = [0, 0], sizes = [2, 32], strides = [1, 1]} : vector<2x128xf32> to vector<2x32xf32>
    %190 = arith.negf %189 : vector<2x32xf32>
    %191 = math.exp %190 : vector<2x32xf32>
    %cst_71 = arith.constant 1.000000e+00 : f32
    %192 = vector.broadcast %cst_71 : f32 to vector<2x32xf32>
    %193 = arith.addf %192, %191 : vector<2x32xf32>
    %194 = arith.divf %192, %193 : vector<2x32xf32>
    %195 = vector.extract_strided_slice %188 {offsets = [0, 32], sizes = [2, 32], strides = [1, 1]} : vector<2x128xf32> to vector<2x32xf32>
    %196 = arith.negf %195 : vector<2x32xf32>
    %197 = math.exp %196 : vector<2x32xf32>
    %cst_72 = arith.constant 1.000000e+00 : f32
    %198 = vector.broadcast %cst_72 : f32 to vector<2x32xf32>
    %199 = arith.addf %198, %197 : vector<2x32xf32>
    %200 = arith.divf %198, %199 : vector<2x32xf32>
    %201 = vector.extract_strided_slice %188 {offsets = [0, 64], sizes = [2, 32], strides = [1, 1]} : vector<2x128xf32> to vector<2x32xf32>
    %202 = math.tanh %201 : vector<2x32xf32>
    %203 = vector.extract_strided_slice %188 {offsets = [0, 96], sizes = [2, 32], strides = [1, 1]} : vector<2x128xf32> to vector<2x32xf32>
    %204 = arith.negf %203 : vector<2x32xf32>
    %205 = math.exp %204 : vector<2x32xf32>
    %cst_73 = arith.constant 1.000000e+00 : f32
    %206 = vector.broadcast %cst_73 : f32 to vector<2x32xf32>
    %207 = arith.addf %206, %205 : vector<2x32xf32>
    %208 = arith.divf %206, %207 : vector<2x32xf32>
    %209 = arith.mulf %200, %168 : vector<2x32xf32>
    %210 = arith.mulf %194, %202 : vector<2x32xf32>
    %211 = arith.addf %209, %210 : vector<2x32xf32>
    %212 = math.tanh %211 : vector<2x32xf32>
    %213 = arith.mulf %208, %212 : vector<2x32xf32>
    %cst_74 = arith.constant dense<0.000000e+00> : vector<2x12xf32>
    %214 = tpu.matmul %213, %10, %cst_74 {dimension_numbers = #tpu.dot_dimension_numbers<[1], [0], [0], [1], [0, 0, 1, 1], [], []>} : vector<2x32xf32>, vector<32x12xf32>, vector<2x12xf32> -> vector<2x12xf32>
    %215 = vector.broadcast %11 : vector<1x12xf32> to vector<2x12xf32>
    %216 = arith.addf %214, %215 : vector<2x12xf32>
    %cst_75 = arith.constant dense<0xFF800000> : vector<2xf32>
    %217 = vector.multi_reduction <maximumf>, %216, %cst_75 [1] : vector<2x12xf32> to vector<2xf32>
    %218 = vector.shape_cast %217 : vector<2xf32> to vector<2x1xf32>
    %219 = vector.broadcast %218 : vector<2x1xf32> to vector<2x12xf32>
    %220 = arith.subf %216, %219 : vector<2x12xf32>
    %221 = math.exp %220 : vector<2x12xf32>
    %cst_76 = arith.constant dense<0.000000e+00> : vector<2xf32>
    %222 = vector.multi_reduction <add>, %221, %cst_76 [1] : vector<2x12xf32> to vector<2xf32>
    %223 = vector.shape_cast %222 : vector<2xf32> to vector<2x1xf32>
    %224 = vector.broadcast %223 : vector<2x1xf32> to vector<2x12xf32>
    %225 = arith.divf %221, %224 : vector<2x12xf32>
    %c10 = arith.constant 10 : index
    %c0_77 = arith.constant 0 : index
    %226 = vector.load %arg0[%c10, %c0_77] : memref<16x12xf32, #tpu.memory_space<vmem>>, vector<2x12xf32>
    %227 = arith.mulf %226, %225 : vector<2x12xf32>
    %c8_78 = arith.constant 8 : index
    %c0_79 = arith.constant 0 : index
    %228 = vector.load %arg16[%c8_78, %c0_79] : memref<14x64xf32, #tpu.memory_space<vmem>>, vector<2x12xf32>
    tpu.vector_store %arg16[%c8_78, %c0_79], %227 {strides = array<i32>} : memref<14x64xf32, #tpu.memory_space<vmem>>, vector<2x12xf32>,
    %c10_80 = arith.constant 10 : index
    %c0_81 = arith.constant 0 : index
    %229 = vector.load %arg18[%c10_80, %c0_81] : memref<14x256xf32, #tpu.memory_space<vmem>>, vector<2x128xf32>
    %cst_82 = arith.constant dense<0.000000e+00> : vector<2x128xf32>
    %230 = tpu.matmul %213, %9, %cst_82 {dimension_numbers = #tpu.dot_dimension_numbers<[1], [0], [0], [1], [0, 0, 1, 1], [], []>} : vector<2x32xf32>, vector<32x128xf32>, vector<2x128xf32> -> vector<2x128xf32>
    %231 = arith.addf %229, %230 : vector<2x128xf32>
    %232 = vector.extract_strided_slice %231 {offsets = [0, 0], sizes = [2, 32], strides = [1, 1]} : vector<2x128xf32> to vector<2x32xf32>
    %233 = arith.negf %232 : vector<2x32xf32>
    %234 = math.exp %233 : vector<2x32xf32>
    %cst_83 = arith.constant 1.000000e+00 : f32
    %235 = vector.broadcast %cst_83 : f32 to vector<2x32xf32>
    %236 = arith.addf %235, %234 : vector<2x32xf32>
    %237 = arith.divf %235, %236 : vector<2x32xf32>
    %238 = vector.extract_strided_slice %231 {offsets = [0, 32], sizes = [2, 32], strides = [1, 1]} : vector<2x128xf32> to vector<2x32xf32>
    %239 = arith.negf %238 : vector<2x32xf32>
    %240 = math.exp %239 : vector<2x32xf32>
    %cst_84 = arith.constant 1.000000e+00 : f32
    %241 = vector.broadcast %cst_84 : f32 to vector<2x32xf32>
    %242 = arith.addf %241, %240 : vector<2x32xf32>
    %243 = arith.divf %241, %242 : vector<2x32xf32>
    %244 = vector.extract_strided_slice %231 {offsets = [0, 64], sizes = [2, 32], strides = [1, 1]} : vector<2x128xf32> to vector<2x32xf32>
    %245 = math.tanh %244 : vector<2x32xf32>
    %246 = vector.extract_strided_slice %231 {offsets = [0, 96], sizes = [2, 32], strides = [1, 1]} : vector<2x128xf32> to vector<2x32xf32>
    %247 = arith.negf %246 : vector<2x32xf32>
    %248 = math.exp %247 : vector<2x32xf32>
    %cst_85 = arith.constant 1.000000e+00 : f32
    %249 = vector.broadcast %cst_85 : f32 to vector<2x32xf32>
    %250 = arith.addf %249, %248 : vector<2x32xf32>
    %251 = arith.divf %249, %250 : vector<2x32xf32>
    %252 = arith.mulf %243, %211 : vector<2x32xf32>
    %253 = arith.mulf %237, %245 : vector<2x32xf32>
    %254 = arith.addf %252, %253 : vector<2x32xf32>
    %255 = math.tanh %254 : vector<2x32xf32>
    %256 = arith.mulf %251, %255 : vector<2x32xf32>
    %cst_86 = arith.constant dense<0.000000e+00> : vector<2x12xf32>
    %257 = tpu.matmul %256, %10, %cst_86 {dimension_numbers = #tpu.dot_dimension_numbers<[1], [0], [0], [1], [0, 0, 1, 1], [], []>} : vector<2x32xf32>, vector<32x12xf32>, vector<2x12xf32> -> vector<2x12xf32>
    %258 = vector.broadcast %11 : vector<1x12xf32> to vector<2x12xf32>
    %259 = arith.addf %257, %258 : vector<2x12xf32>
    %cst_87 = arith.constant dense<0xFF800000> : vector<2xf32>
    %260 = vector.multi_reduction <maximumf>, %259, %cst_87 [1] : vector<2x12xf32> to vector<2xf32>
    %261 = vector.shape_cast %260 : vector<2xf32> to vector<2x1xf32>
    %262 = vector.broadcast %261 : vector<2x1xf32> to vector<2x12xf32>
    %263 = arith.subf %259, %262 : vector<2x12xf32>
    %264 = math.exp %263 : vector<2x12xf32>
    %cst_88 = arith.constant dense<0.000000e+00> : vector<2xf32>
    %265 = vector.multi_reduction <add>, %264, %cst_88 [1] : vector<2x12xf32> to vector<2xf32>
    %266 = vector.shape_cast %265 : vector<2xf32> to vector<2x1xf32>
    %267 = vector.broadcast %266 : vector<2x1xf32> to vector<2x12xf32>
    %268 = arith.divf %264, %267 : vector<2x12xf32>
    %c12 = arith.constant 12 : index
    %c0_89 = arith.constant 0 : index
    %269 = vector.load %arg0[%c12, %c0_89] : memref<16x12xf32, #tpu.memory_space<vmem>>, vector<2x12xf32>
    %270 = arith.mulf %269, %268 : vector<2x12xf32>
    %c10_90 = arith.constant 10 : index
    %c0_91 = arith.constant 0 : index
    %271 = vector.load %arg16[%c10_90, %c0_91] : memref<14x64xf32, #tpu.memory_space<vmem>>, vector<2x12xf32>
    tpu.vector_store %arg16[%c10_90, %c0_91], %270 {strides = array<i32>} : memref<14x64xf32, #tpu.memory_space<vmem>>, vector<2x12xf32>,
    %c12_92 = arith.constant 12 : index
    %c0_93 = arith.constant 0 : index
    %272 = vector.load %arg18[%c12_92, %c0_93] : memref<14x256xf32, #tpu.memory_space<vmem>>, vector<2x128xf32>
    %cst_94 = arith.constant dense<0.000000e+00> : vector<2x128xf32>
    %273 = tpu.matmul %256, %9, %cst_94 {dimension_numbers = #tpu.dot_dimension_numbers<[1], [0], [0], [1], [0, 0, 1, 1], [], []>} : vector<2x32xf32>, vector<32x128xf32>, vector<2x128xf32> -> vector<2x128xf32>
    %274 = arith.addf %272, %273 : vector<2x128xf32>
    %275 = vector.extract_strided_slice %274 {offsets = [0, 0], sizes = [2, 32], strides = [1, 1]} : vector<2x128xf32> to vector<2x32xf32>
    %276 = arith.negf %275 : vector<2x32xf32>
    %277 = math.exp %276 : vector<2x32xf32>
    %cst_95 = arith.constant 1.000000e+00 : f32
    %278 = vector.broadcast %cst_95 : f32 to vector<2x32xf32>
    %279 = arith.addf %278, %277 : vector<2x32xf32>
    %280 = arith.divf %278, %279 : vector<2x32xf32>
    %281 = vector.extract_strided_slice %274 {offsets = [0, 32], sizes = [2, 32], strides = [1, 1]} : vector<2x128xf32> to vector<2x32xf32>
    %282 = arith.negf %281 : vector<2x32xf32>
    %283 = math.exp %282 : vector<2x32xf32>
    %cst_96 = arith.constant 1.000000e+00 : f32
    %284 = vector.broadcast %cst_96 : f32 to vector<2x32xf32>
    %285 = arith.addf %284, %283 : vector<2x32xf32>
    %286 = arith.divf %284, %285 : vector<2x32xf32>
    %287 = vector.extract_strided_slice %274 {offsets = [0, 64], sizes = [2, 32], strides = [1, 1]} : vector<2x128xf32> to vector<2x32xf32>
    %288 = math.tanh %287 : vector<2x32xf32>
    %289 = vector.extract_strided_slice %274 {offsets = [0, 96], sizes = [2, 32], strides = [1, 1]} : vector<2x128xf32> to vector<2x32xf32>
    %290 = arith.negf %289 : vector<2x32xf32>
    %291 = math.exp %290 : vector<2x32xf32>
    %cst_97 = arith.constant 1.000000e+00 : f32
    %292 = vector.broadcast %cst_97 : f32 to vector<2x32xf32>
    %293 = arith.addf %292, %291 : vector<2x32xf32>
    %294 = arith.divf %292, %293 : vector<2x32xf32>
    %295 = arith.mulf %286, %254 : vector<2x32xf32>
    %296 = arith.mulf %280, %288 : vector<2x32xf32>
    %297 = arith.addf %295, %296 : vector<2x32xf32>
    %298 = math.tanh %297 : vector<2x32xf32>
    %299 = arith.mulf %294, %298 : vector<2x32xf32>
    %cst_98 = arith.constant dense<0.000000e+00> : vector<2x12xf32>
    %300 = tpu.matmul %299, %10, %cst_98 {dimension_numbers = #tpu.dot_dimension_numbers<[1], [0], [0], [1], [0, 0, 1, 1], [], []>} : vector<2x32xf32>, vector<32x12xf32>, vector<2x12xf32> -> vector<2x12xf32>
    %301 = vector.broadcast %11 : vector<1x12xf32> to vector<2x12xf32>
    %302 = arith.addf %300, %301 : vector<2x12xf32>
    %cst_99 = arith.constant dense<0xFF800000> : vector<2xf32>
    %303 = vector.multi_reduction <maximumf>, %302, %cst_99 [1] : vector<2x12xf32> to vector<2xf32>
    %304 = vector.shape_cast %303 : vector<2xf32> to vector<2x1xf32>
    %305 = vector.broadcast %304 : vector<2x1xf32> to vector<2x12xf32>
    %306 = arith.subf %302, %305 : vector<2x12xf32>
    %307 = math.exp %306 : vector<2x12xf32>
    %cst_100 = arith.constant dense<0.000000e+00> : vector<2xf32>
    %308 = vector.multi_reduction <add>, %307, %cst_100 [1] : vector<2x12xf32> to vector<2xf32>
    %309 = vector.shape_cast %308 : vector<2xf32> to vector<2x1xf32>
    %310 = vector.broadcast %309 : vector<2x1xf32> to vector<2x12xf32>
    %311 = arith.divf %307, %310 : vector<2x12xf32>
    %c14 = arith.constant 14 : index
    %c0_101 = arith.constant 0 : index
    %312 = vector.load %arg0[%c14, %c0_101] : memref<16x12xf32, #tpu.memory_space<vmem>>, vector<2x12xf32>
    %313 = arith.mulf %312, %311 : vector<2x12xf32>
    %c12_102 = arith.constant 12 : index
    %c0_103 = arith.constant 0 : index
    %314 = vector.load %arg16[%c12_102, %c0_103] : memref<14x64xf32, #tpu.memory_space<vmem>>, vector<2x12xf32>
    tpu.vector_store %arg16[%c12_102, %c0_103], %313 {strides = array<i32>} : memref<14x64xf32, #tpu.memory_space<vmem>>, vector<2x12xf32>,
    %c0_104 = arith.constant 0 : index
    %c0_105 = arith.constant 0 : index
    %315 = vector.load %arg16[%c0_104, %c0_105] : memref<14x64xf32, #tpu.memory_space<vmem>>, vector<14x64xf32>
    %c0_106 = arith.constant 0 : index
    %c0_107 = arith.constant 0 : index
    %c0_108 = arith.constant 0 : index
    %316 = vector.load %arg6[%c0_106, %c0_107, %c0_108] : memref<3x64x256xf32, #tpu.memory_space<vmem>>, vector<1x64x256xf32>
    %317 = vector.shape_cast %316 : vector<1x64x256xf32> to vector<64x256xf32>
    %cst_109 = arith.constant dense<0.000000e+00> : vector<14x256xf32>
    %318 = tpu.matmul %315, %317, %cst_109 {dimension_numbers = #tpu.dot_dimension_numbers<[1], [0], [0], [1], [0, 0, 1, 1], [], []>} : vector<14x64xf32>, vector<64x256xf32>, vector<14x256xf32> -> vector<14x256xf32>
    %c0_110 = arith.constant 0 : index
    %c0_111 = arith.constant 0 : index
    %c0_112 = arith.constant 0 : index
    %319 = vector.load %arg8[%c0_110, %c0_111, %c0_112] : memref<3x1x256xf32, #tpu.memory_space<vmem>>, vector<1x1x256xf32>
    %320 = vector.shape_cast %319 : vector<1x1x256xf32> to vector<1x256xf32>
    %321 = vector.broadcast %320 : vector<1x256xf32> to vector<14x256xf32>
    %322 = arith.addf %318, %321 : vector<14x256xf32>
    %c0_113 = arith.constant 0 : index
    %c0_114 = arith.constant 0 : index
    %323 = vector.load %arg18[%c0_113, %c0_114] : memref<14x256xf32, #tpu.memory_space<vmem>>, vector<14x256xf32>
    tpu.vector_store %arg18[%c0_113, %c0_114], %322 {strides = array<i32>} : memref<14x256xf32, #tpu.memory_space<vmem>>, vector<14x256xf32>,
    %c0_115 = arith.constant 0 : index
    %c0_116 = arith.constant 0 : index
    %c0_117 = arith.constant 0 : index
    %324 = vector.load %arg7[%c0_115, %c0_116, %c0_117] : memref<6x32x128xf32, #tpu.memory_space<vmem>>, vector<1x32x128xf32>
    %325 = vector.shape_cast %324 : vector<1x32x128xf32> to vector<32x128xf32>
    %c0_118 = arith.constant 0 : index
    %c0_119 = arith.constant 0 : index
    %c0_120 = arith.constant 0 : index
    %326 = vector.load %arg13[%c0_118, %c0_119, %c0_120] : memref<6x2x32xf32, #tpu.memory_space<vmem>>, vector<1x2x32xf32>
    %327 = vector.shape_cast %326 : vector<1x2x32xf32> to vector<2x32xf32>
    %c0_121 = arith.constant 0 : index
    %c0_122 = arith.constant 0 : index
    %c0_123 = arith.constant 0 : index
    %328 = vector.load %arg14[%c0_121, %c0_122, %c0_123] : memref<6x2x32xf32, #tpu.memory_space<vmem>>, vector<1x2x32xf32>
    %329 = vector.shape_cast %328 : vector<1x2x32xf32> to vector<2x32xf32>
    %c0_124 = arith.constant 0 : index
    %c0_125 = arith.constant 0 : index
    %330 = vector.load %arg18[%c0_124, %c0_125] : memref<14x256xf32, #tpu.memory_space<vmem>>, vector<2x128xf32>
    %cst_126 = arith.constant dense<0.000000e+00> : vector<2x128xf32>
    %331 = tpu.matmul %327, %325, %cst_126 {dimension_numbers = #tpu.dot_dimension_numbers<[1], [0], [0], [1], [0, 0, 1, 1], [], []>} : vector<2x32xf32>, vector<32x128xf32>, vector<2x128xf32> -> vector<2x128xf32>
    %332 = arith.addf %330, %331 : vector<2x128xf32>
    %333 = vector.extract_strided_slice %332 {offsets = [0, 0], sizes = [2, 32], strides = [1, 1]} : vector<2x128xf32> to vector<2x32xf32>
    %334 = arith.negf %333 : vector<2x32xf32>
    %335 = math.exp %334 : vector<2x32xf32>
    %cst_127 = arith.constant 1.000000e+00 : f32
    %336 = vector.broadcast %cst_127 : f32 to vector<2x32xf32>
    %337 = arith.addf %336, %335 : vector<2x32xf32>
    %338 = arith.divf %336, %337 : vector<2x32xf32>
    %339 = vector.extract_strided_slice %332 {offsets = [0, 32], sizes = [2, 32], strides = [1, 1]} : vector<2x128xf32> to vector<2x32xf32>
    %340 = arith.negf %339 : vector<2x32xf32>
    %341 = math.exp %340 : vector<2x32xf32>
    %cst_128 = arith.constant 1.000000e+00 : f32
    %342 = vector.broadcast %cst_128 : f32 to vector<2x32xf32>
    %343 = arith.addf %342, %341 : vector<2x32xf32>
    %344 = arith.divf %342, %343 : vector<2x32xf32>
    %345 = vector.extract_strided_slice %332 {offsets = [0, 64], sizes = [2, 32], strides = [1, 1]} : vector<2x128xf32> to vector<2x32xf32>
    %346 = math.tanh %345 : vector<2x32xf32>
    %347 = vector.extract_strided_slice %332 {offsets = [0, 96], sizes = [2, 32], strides = [1, 1]} : vector<2x128xf32> to vector<2x32xf32>
    %348 = arith.negf %347 : vector<2x32xf32>
    %349 = math.exp %348 : vector<2x32xf32>
    %cst_129 = arith.constant 1.000000e+00 : f32
    %350 = vector.broadcast %cst_129 : f32 to vector<2x32xf32>
    %351 = arith.addf %350, %349 : vector<2x32xf32>
    %352 = arith.divf %350, %351 : vector<2x32xf32>
    %353 = arith.mulf %344, %329 : vector<2x32xf32>
    %354 = arith.mulf %338, %346 : vector<2x32xf32>
    %355 = arith.addf %353, %354 : vector<2x32xf32>
    %356 = math.tanh %355 : vector<2x32xf32>
    %357 = arith.mulf %352, %356 : vector<2x32xf32>
    %c0_130 = arith.constant 0 : index
    %c0_131 = arith.constant 0 : index
    %358 = vector.load %arg17[%c0_130, %c0_131] : memref<14x64xf32, #tpu.memory_space<vmem>>, vector<2x32xf32>
    tpu.vector_store %arg17[%c0_130, %c0_131], %357 {strides = array<i32>} : memref<14x64xf32, #tpu.memory_space<vmem>>, vector<2x32xf32>,
    %c2_132 = arith.constant 2 : index
    %c0_133 = arith.constant 0 : index
    %359 = vector.load %arg18[%c2_132, %c0_133] : memref<14x256xf32, #tpu.memory_space<vmem>>, vector<2x128xf32>
    %cst_134 = arith.constant dense<0.000000e+00> : vector<2x128xf32>
    %360 = tpu.matmul %357, %325, %cst_134 {dimension_numbers = #tpu.dot_dimension_numbers<[1], [0], [0], [1], [0, 0, 1, 1], [], []>} : vector<2x32xf32>, vector<32x128xf32>, vector<2x128xf32> -> vector<2x128xf32>
    %361 = arith.addf %359, %360 : vector<2x128xf32>
    %362 = vector.extract_strided_slice %361 {offsets = [0, 0], sizes = [2, 32], strides = [1, 1]} : vector<2x128xf32> to vector<2x32xf32>
    %363 = arith.negf %362 : vector<2x32xf32>
    %364 = math.exp %363 : vector<2x32xf32>
    %cst_135 = arith.constant 1.000000e+00 : f32
    %365 = vector.broadcast %cst_135 : f32 to vector<2x32xf32>
    %366 = arith.addf %365, %364 : vector<2x32xf32>
    %367 = arith.divf %365, %366 : vector<2x32xf32>
    %368 = vector.extract_strided_slice %361 {offsets = [0, 32], sizes = [2, 32], strides = [1, 1]} : vector<2x128xf32> to vector<2x32xf32>
    %369 = arith.negf %368 : vector<2x32xf32>
    %370 = math.exp %369 : vector<2x32xf32>
    %cst_136 = arith.constant 1.000000e+00 : f32
    %371 = vector.broadcast %cst_136 : f32 to vector<2x32xf32>
    %372 = arith.addf %371, %370 : vector<2x32xf32>
    %373 = arith.divf %371, %372 : vector<2x32xf32>
    %374 = vector.extract_strided_slice %361 {offsets = [0, 64], sizes = [2, 32], strides = [1, 1]} : vector<2x128xf32> to vector<2x32xf32>
    %375 = math.tanh %374 : vector<2x32xf32>
    %376 = vector.extract_strided_slice %361 {offsets = [0, 96], sizes = [2, 32], strides = [1, 1]} : vector<2x128xf32> to vector<2x32xf32>
    %377 = arith.negf %376 : vector<2x32xf32>
    %378 = math.exp %377 : vector<2x32xf32>
    %cst_137 = arith.constant 1.000000e+00 : f32
    %379 = vector.broadcast %cst_137 : f32 to vector<2x32xf32>
    %380 = arith.addf %379, %378 : vector<2x32xf32>
    %381 = arith.divf %379, %380 : vector<2x32xf32>
    %382 = arith.mulf %373, %355 : vector<2x32xf32>
    %383 = arith.mulf %367, %375 : vector<2x32xf32>
    %384 = arith.addf %382, %383 : vector<2x32xf32>
    %385 = math.tanh %384 : vector<2x32xf32>
    %386 = arith.mulf %381, %385 : vector<2x32xf32>
    %c2_138 = arith.constant 2 : index
    %c0_139 = arith.constant 0 : index
    %387 = vector.load %arg17[%c2_138, %c0_139] : memref<14x64xf32, #tpu.memory_space<vmem>>, vector<2x32xf32>
    tpu.vector_store %arg17[%c2_138, %c0_139], %386 {strides = array<i32>} : memref<14x64xf32, #tpu.memory_space<vmem>>, vector<2x32xf32>,
    %c4_140 = arith.constant 4 : index
    %c0_141 = arith.constant 0 : index
    %388 = vector.load %arg18[%c4_140, %c0_141] : memref<14x256xf32, #tpu.memory_space<vmem>>, vector<2x128xf32>
    %cst_142 = arith.constant dense<0.000000e+00> : vector<2x128xf32>
    %389 = tpu.matmul %386, %325, %cst_142 {dimension_numbers = #tpu.dot_dimension_numbers<[1], [0], [0], [1], [0, 0, 1, 1], [], []>} : vector<2x32xf32>, vector<32x128xf32>, vector<2x128xf32> -> vector<2x128xf32>
    %390 = arith.addf %388, %389 : vector<2x128xf32>
    %391 = vector.extract_strided_slice %390 {offsets = [0, 0], sizes = [2, 32], strides = [1, 1]} : vector<2x128xf32> to vector<2x32xf32>
    %392 = arith.negf %391 : vector<2x32xf32>
    %393 = math.exp %392 : vector<2x32xf32>
    %cst_143 = arith.constant 1.000000e+00 : f32
    %394 = vector.broadcast %cst_143 : f32 to vector<2x32xf32>
    %395 = arith.addf %394, %393 : vector<2x32xf32>
    %396 = arith.divf %394, %395 : vector<2x32xf32>
    %397 = vector.extract_strided_slice %390 {offsets = [0, 32], sizes = [2, 32], strides = [1, 1]} : vector<2x128xf32> to vector<2x32xf32>
    %398 = arith.negf %397 : vector<2x32xf32>
    %399 = math.exp %398 : vector<2x32xf32>
    %cst_144 = arith.constant 1.000000e+00 : f32
    %400 = vector.broadcast %cst_144 : f32 to vector<2x32xf32>
    %401 = arith.addf %400, %399 : vector<2x32xf32>
    %402 = arith.divf %400, %401 : vector<2x32xf32>
    %403 = vector.extract_strided_slice %390 {offsets = [0, 64], sizes = [2, 32], strides = [1, 1]} : vector<2x128xf32> to vector<2x32xf32>
    %404 = math.tanh %403 : vector<2x32xf32>
    %405 = vector.extract_strided_slice %390 {offsets = [0, 96], sizes = [2, 32], strides = [1, 1]} : vector<2x128xf32> to vector<2x32xf32>
    %406 = arith.negf %405 : vector<2x32xf32>
    %407 = math.exp %406 : vector<2x32xf32>
    %cst_145 = arith.constant 1.000000e+00 : f32
    %408 = vector.broadcast %cst_145 : f32 to vector<2x32xf32>
    %409 = arith.addf %408, %407 : vector<2x32xf32>
    %410 = arith.divf %408, %409 : vector<2x32xf32>
    %411 = arith.mulf %402, %384 : vector<2x32xf32>
    %412 = arith.mulf %396, %404 : vector<2x32xf32>
    %413 = arith.addf %411, %412 : vector<2x32xf32>
    %414 = math.tanh %413 : vector<2x32xf32>
    %415 = arith.mulf %410, %414 : vector<2x32xf32>
    %c4_146 = arith.constant 4 : index
    %c0_147 = arith.constant 0 : index
    %416 = vector.load %arg17[%c4_146, %c0_147] : memref<14x64xf32, #tpu.memory_space<vmem>>, vector<2x32xf32>
    tpu.vector_store %arg17[%c4_146, %c0_147], %415 {strides = array<i32>} : memref<14x64xf32, #tpu.memory_space<vmem>>, vector<2x32xf32>,
    %c6_148 = arith.constant 6 : index
    %c0_149 = arith.constant 0 : index
    %417 = vector.load %arg18[%c6_148, %c0_149] : memref<14x256xf32, #tpu.memory_space<vmem>>, vector<2x128xf32>
    %cst_150 = arith.constant dense<0.000000e+00> : vector<2x128xf32>
    %418 = tpu.matmul %415, %325, %cst_150 {dimension_numbers = #tpu.dot_dimension_numbers<[1], [0], [0], [1], [0, 0, 1, 1], [], []>} : vector<2x32xf32>, vector<32x128xf32>, vector<2x128xf32> -> vector<2x128xf32>
    %419 = arith.addf %417, %418 : vector<2x128xf32>
    %420 = vector.extract_strided_slice %419 {offsets = [0, 0], sizes = [2, 32], strides = [1, 1]} : vector<2x128xf32> to vector<2x32xf32>
    %421 = arith.negf %420 : vector<2x32xf32>
    %422 = math.exp %421 : vector<2x32xf32>
    %cst_151 = arith.constant 1.000000e+00 : f32
    %423 = vector.broadcast %cst_151 : f32 to vector<2x32xf32>
    %424 = arith.addf %423, %422 : vector<2x32xf32>
    %425 = arith.divf %423, %424 : vector<2x32xf32>
    %426 = vector.extract_strided_slice %419 {offsets = [0, 32], sizes = [2, 32], strides = [1, 1]} : vector<2x128xf32> to vector<2x32xf32>
    %427 = arith.negf %426 : vector<2x32xf32>
    %428 = math.exp %427 : vector<2x32xf32>
    %cst_152 = arith.constant 1.000000e+00 : f32
    %429 = vector.broadcast %cst_152 : f32 to vector<2x32xf32>
    %430 = arith.addf %429, %428 : vector<2x32xf32>
    %431 = arith.divf %429, %430 : vector<2x32xf32>
    %432 = vector.extract_strided_slice %419 {offsets = [0, 64], sizes = [2, 32], strides = [1, 1]} : vector<2x128xf32> to vector<2x32xf32>
    %433 = math.tanh %432 : vector<2x32xf32>
    %434 = vector.extract_strided_slice %419 {offsets = [0, 96], sizes = [2, 32], strides = [1, 1]} : vector<2x128xf32> to vector<2x32xf32>
    %435 = arith.negf %434 : vector<2x32xf32>
    %436 = math.exp %435 : vector<2x32xf32>
    %cst_153 = arith.constant 1.000000e+00 : f32
    %437 = vector.broadcast %cst_153 : f32 to vector<2x32xf32>
    %438 = arith.addf %437, %436 : vector<2x32xf32>
    %439 = arith.divf %437, %438 : vector<2x32xf32>
    %440 = arith.mulf %431, %413 : vector<2x32xf32>
    %441 = arith.mulf %425, %433 : vector<2x32xf32>
    %442 = arith.addf %440, %441 : vector<2x32xf32>
    %443 = math.tanh %442 : vector<2x32xf32>
    %444 = arith.mulf %439, %443 : vector<2x32xf32>
    %c6_154 = arith.constant 6 : index
    %c0_155 = arith.constant 0 : index
    %445 = vector.load %arg17[%c6_154, %c0_155] : memref<14x64xf32, #tpu.memory_space<vmem>>, vector<2x32xf32>
    tpu.vector_store %arg17[%c6_154, %c0_155], %444 {strides = array<i32>} : memref<14x64xf32, #tpu.memory_space<vmem>>, vector<2x32xf32>,
    %c8_156 = arith.constant 8 : index
    %c0_157 = arith.constant 0 : index
    %446 = vector.load %arg18[%c8_156, %c0_157] : memref<14x256xf32, #tpu.memory_space<vmem>>, vector<2x128xf32>
    %cst_158 = arith.constant dense<0.000000e+00> : vector<2x128xf32>
    %447 = tpu.matmul %444, %325, %cst_158 {dimension_numbers = #tpu.dot_dimension_numbers<[1], [0], [0], [1], [0, 0, 1, 1], [], []>} : vector<2x32xf32>, vector<32x128xf32>, vector<2x128xf32> -> vector<2x128xf32>
    %448 = arith.addf %446, %447 : vector<2x128xf32>
    %449 = vector.extract_strided_slice %448 {offsets = [0, 0], sizes = [2, 32], strides = [1, 1]} : vector<2x128xf32> to vector<2x32xf32>
    %450 = arith.negf %449 : vector<2x32xf32>
    %451 = math.exp %450 : vector<2x32xf32>
    %cst_159 = arith.constant 1.000000e+00 : f32
    %452 = vector.broadcast %cst_159 : f32 to vector<2x32xf32>
    %453 = arith.addf %452, %451 : vector<2x32xf32>
    %454 = arith.divf %452, %453 : vector<2x32xf32>
    %455 = vector.extract_strided_slice %448 {offsets = [0, 32], sizes = [2, 32], strides = [1, 1]} : vector<2x128xf32> to vector<2x32xf32>
    %456 = arith.negf %455 : vector<2x32xf32>
    %457 = math.exp %456 : vector<2x32xf32>
    %cst_160 = arith.constant 1.000000e+00 : f32
    %458 = vector.broadcast %cst_160 : f32 to vector<2x32xf32>
    %459 = arith.addf %458, %457 : vector<2x32xf32>
    %460 = arith.divf %458, %459 : vector<2x32xf32>
    %461 = vector.extract_strided_slice %448 {offsets = [0, 64], sizes = [2, 32], strides = [1, 1]} : vector<2x128xf32> to vector<2x32xf32>
    %462 = math.tanh %461 : vector<2x32xf32>
    %463 = vector.extract_strided_slice %448 {offsets = [0, 96], sizes = [2, 32], strides = [1, 1]} : vector<2x128xf32> to vector<2x32xf32>
    %464 = arith.negf %463 : vector<2x32xf32>
    %465 = math.exp %464 : vector<2x32xf32>
    %cst_161 = arith.constant 1.000000e+00 : f32
    %466 = vector.broadcast %cst_161 : f32 to vector<2x32xf32>
    %467 = arith.addf %466, %465 : vector<2x32xf32>
    %468 = arith.divf %466, %467 : vector<2x32xf32>
    %469 = arith.mulf %460, %442 : vector<2x32xf32>
    %470 = arith.mulf %454, %462 : vector<2x32xf32>
    %471 = arith.addf %469, %470 : vector<2x32xf32>
    %472 = math.tanh %471 : vector<2x32xf32>
    %473 = arith.mulf %468, %472 : vector<2x32xf32>
    %c8_162 = arith.constant 8 : index
    %c0_163 = arith.constant 0 : index
    %474 = vector.load %arg17[%c8_162, %c0_163] : memref<14x64xf32, #tpu.memory_space<vmem>>, vector<2x32xf32>
    tpu.vector_store %arg17[%c8_162, %c0_163], %473 {strides = array<i32>} : memref<14x64xf32, #tpu.memory_space<vmem>>, vector<2x32xf32>,
    %c10_164 = arith.constant 10 : index
    %c0_165 = arith.constant 0 : index
    %475 = vector.load %arg18[%c10_164, %c0_165] : memref<14x256xf32, #tpu.memory_space<vmem>>, vector<2x128xf32>
    %cst_166 = arith.constant dense<0.000000e+00> : vector<2x128xf32>
    %476 = tpu.matmul %473, %325, %cst_166 {dimension_numbers = #tpu.dot_dimension_numbers<[1], [0], [0], [1], [0, 0, 1, 1], [], []>} : vector<2x32xf32>, vector<32x128xf32>, vector<2x128xf32> -> vector<2x128xf32>
    %477 = arith.addf %475, %476 : vector<2x128xf32>
    %478 = vector.extract_strided_slice %477 {offsets = [0, 0], sizes = [2, 32], strides = [1, 1]} : vector<2x128xf32> to vector<2x32xf32>
    %479 = arith.negf %478 : vector<2x32xf32>
    %480 = math.exp %479 : vector<2x32xf32>
    %cst_167 = arith.constant 1.000000e+00 : f32
    %481 = vector.broadcast %cst_167 : f32 to vector<2x32xf32>
    %482 = arith.addf %481, %480 : vector<2x32xf32>
    %483 = arith.divf %481, %482 : vector<2x32xf32>
    %484 = vector.extract_strided_slice %477 {offsets = [0, 32], sizes = [2, 32], strides = [1, 1]} : vector<2x128xf32> to vector<2x32xf32>
    %485 = arith.negf %484 : vector<2x32xf32>
    %486 = math.exp %485 : vector<2x32xf32>
    %cst_168 = arith.constant 1.000000e+00 : f32
    %487 = vector.broadcast %cst_168 : f32 to vector<2x32xf32>
    %488 = arith.addf %487, %486 : vector<2x32xf32>
    %489 = arith.divf %487, %488 : vector<2x32xf32>
    %490 = vector.extract_strided_slice %477 {offsets = [0, 64], sizes = [2, 32], strides = [1, 1]} : vector<2x128xf32> to vector<2x32xf32>
    %491 = math.tanh %490 : vector<2x32xf32>
    %492 = vector.extract_strided_slice %477 {offsets = [0, 96], sizes = [2, 32], strides = [1, 1]} : vector<2x128xf32> to vector<2x32xf32>
    %493 = arith.negf %492 : vector<2x32xf32>
    %494 = math.exp %493 : vector<2x32xf32>
    %cst_169 = arith.constant 1.000000e+00 : f32
    %495 = vector.broadcast %cst_169 : f32 to vector<2x32xf32>
    %496 = arith.addf %495, %494 : vector<2x32xf32>
    %497 = arith.divf %495, %496 : vector<2x32xf32>
    %498 = arith.mulf %489, %471 : vector<2x32xf32>
    %499 = arith.mulf %483, %491 : vector<2x32xf32>
    %500 = arith.addf %498, %499 : vector<2x32xf32>
    %501 = math.tanh %500 : vector<2x32xf32>
    %502 = arith.mulf %497, %501 : vector<2x32xf32>
    %c10_170 = arith.constant 10 : index
    %c0_171 = arith.constant 0 : index
    %503 = vector.load %arg17[%c10_170, %c0_171] : memref<14x64xf32, #tpu.memory_space<vmem>>, vector<2x32xf32>
    tpu.vector_store %arg17[%c10_170, %c0_171], %502 {strides = array<i32>} : memref<14x64xf32, #tpu.memory_space<vmem>>, vector<2x32xf32>,
    %c12_172 = arith.constant 12 : index
    %c0_173 = arith.constant 0 : index
    %504 = vector.load %arg18[%c12_172, %c0_173] : memref<14x256xf32, #tpu.memory_space<vmem>>, vector<2x128xf32>
    %cst_174 = arith.constant dense<0.000000e+00> : vector<2x128xf32>
    %505 = tpu.matmul %502, %325, %cst_174 {dimension_numbers = #tpu.dot_dimension_numbers<[1], [0], [0], [1], [0, 0, 1, 1], [], []>} : vector<2x32xf32>, vector<32x128xf32>, vector<2x128xf32> -> vector<2x128xf32>
    %506 = arith.addf %504, %505 : vector<2x128xf32>
    %507 = vector.extract_strided_slice %506 {offsets = [0, 0], sizes = [2, 32], strides = [1, 1]} : vector<2x128xf32> to vector<2x32xf32>
    %508 = arith.negf %507 : vector<2x32xf32>
    %509 = math.exp %508 : vector<2x32xf32>
    %cst_175 = arith.constant 1.000000e+00 : f32
    %510 = vector.broadcast %cst_175 : f32 to vector<2x32xf32>
    %511 = arith.addf %510, %509 : vector<2x32xf32>
    %512 = arith.divf %510, %511 : vector<2x32xf32>
    %513 = vector.extract_strided_slice %506 {offsets = [0, 32], sizes = [2, 32], strides = [1, 1]} : vector<2x128xf32> to vector<2x32xf32>
    %514 = arith.negf %513 : vector<2x32xf32>
    %515 = math.exp %514 : vector<2x32xf32>
    %cst_176 = arith.constant 1.000000e+00 : f32
    %516 = vector.broadcast %cst_176 : f32 to vector<2x32xf32>
    %517 = arith.addf %516, %515 : vector<2x32xf32>
    %518 = arith.divf %516, %517 : vector<2x32xf32>
    %519 = vector.extract_strided_slice %506 {offsets = [0, 64], sizes = [2, 32], strides = [1, 1]} : vector<2x128xf32> to vector<2x32xf32>
    %520 = math.tanh %519 : vector<2x32xf32>
    %521 = vector.extract_strided_slice %506 {offsets = [0, 96], sizes = [2, 32], strides = [1, 1]} : vector<2x128xf32> to vector<2x32xf32>
    %522 = arith.negf %521 : vector<2x32xf32>
    %523 = math.exp %522 : vector<2x32xf32>
    %cst_177 = arith.constant 1.000000e+00 : f32
    %524 = vector.broadcast %cst_177 : f32 to vector<2x32xf32>
    %525 = arith.addf %524, %523 : vector<2x32xf32>
    %526 = arith.divf %524, %525 : vector<2x32xf32>
    %527 = arith.mulf %518, %500 : vector<2x32xf32>
    %528 = arith.mulf %512, %520 : vector<2x32xf32>
    %529 = arith.addf %527, %528 : vector<2x32xf32>
    %530 = math.tanh %529 : vector<2x32xf32>
    %531 = arith.mulf %526, %530 : vector<2x32xf32>
    %c12_178 = arith.constant 12 : index
    %c0_179 = arith.constant 0 : index
    %532 = vector.load %arg17[%c12_178, %c0_179] : memref<14x64xf32, #tpu.memory_space<vmem>>, vector<2x32xf32>
    tpu.vector_store %arg17[%c12_178, %c0_179], %531 {strides = array<i32>} : memref<14x64xf32, #tpu.memory_space<vmem>>, vector<2x32xf32>,
    %c1 = arith.constant 1 : index
    %c0_180 = arith.constant 0 : index
    %c0_181 = arith.constant 0 : index
    %533 = vector.load %arg7[%c1, %c0_180, %c0_181] : memref<6x32x128xf32, #tpu.memory_space<vmem>>, vector<1x32x128xf32>
    %534 = vector.shape_cast %533 : vector<1x32x128xf32> to vector<32x128xf32>
    %c1_182 = arith.constant 1 : index
    %c0_183 = arith.constant 0 : index
    %c0_184 = arith.constant 0 : index
    %535 = vector.load %arg13[%c1_182, %c0_183, %c0_184] : memref<6x2x32xf32, #tpu.memory_space<vmem>>, vector<1x2x32xf32>
    %536 = vector.shape_cast %535 : vector<1x2x32xf32> to vector<2x32xf32>
    %c1_185 = arith.constant 1 : index
    %c0_186 = arith.constant 0 : index
    %c0_187 = arith.constant 0 : index
    %537 = vector.load %arg14[%c1_185, %c0_186, %c0_187] : memref<6x2x32xf32, #tpu.memory_space<vmem>>, vector<1x2x32xf32>
    %538 = vector.shape_cast %537 : vector<1x2x32xf32> to vector<2x32xf32>
    %c12_188 = arith.constant 12 : index
    %c128 = arith.constant 128 : index
    %539 = vector.load %arg18[%c12_188, %c128] : memref<14x256xf32, #tpu.memory_space<vmem>>, vector<2x128xf32>
    %cst_189 = arith.constant dense<0.000000e+00> : vector<2x128xf32>
    %540 = tpu.matmul %536, %534, %cst_189 {dimension_numbers = #tpu.dot_dimension_numbers<[1], [0], [0], [1], [0, 0, 1, 1], [], []>} : vector<2x32xf32>, vector<32x128xf32>, vector<2x128xf32> -> vector<2x128xf32>
    %541 = arith.addf %539, %540 : vector<2x128xf32>
    %542 = vector.extract_strided_slice %541 {offsets = [0, 0], sizes = [2, 32], strides = [1, 1]} : vector<2x128xf32> to vector<2x32xf32>
    %543 = arith.negf %542 : vector<2x32xf32>
    %544 = math.exp %543 : vector<2x32xf32>
    %cst_190 = arith.constant 1.000000e+00 : f32
    %545 = vector.broadcast %cst_190 : f32 to vector<2x32xf32>
    %546 = arith.addf %545, %544 : vector<2x32xf32>
    %547 = arith.divf %545, %546 : vector<2x32xf32>
    %548 = vector.extract_strided_slice %541 {offsets = [0, 32], sizes = [2, 32], strides = [1, 1]} : vector<2x128xf32> to vector<2x32xf32>
    %549 = arith.negf %548 : vector<2x32xf32>
    %550 = math.exp %549 : vector<2x32xf32>
    %cst_191 = arith.constant 1.000000e+00 : f32
    %551 = vector.broadcast %cst_191 : f32 to vector<2x32xf32>
    %552 = arith.addf %551, %550 : vector<2x32xf32>
    %553 = arith.divf %551, %552 : vector<2x32xf32>
    %554 = vector.extract_strided_slice %541 {offsets = [0, 64], sizes = [2, 32], strides = [1, 1]} : vector<2x128xf32> to vector<2x32xf32>
    %555 = math.tanh %554 : vector<2x32xf32>
    %556 = vector.extract_strided_slice %541 {offsets = [0, 96], sizes = [2, 32], strides = [1, 1]} : vector<2x128xf32> to vector<2x32xf32>
    %557 = arith.negf %556 : vector<2x32xf32>
    %558 = math.exp %557 : vector<2x32xf32>
    %cst_192 = arith.constant 1.000000e+00 : f32
    %559 = vector.broadcast %cst_192 : f32 to vector<2x32xf32>
    %560 = arith.addf %559, %558 : vector<2x32xf32>
    %561 = arith.divf %559, %560 : vector<2x32xf32>
    %562 = arith.mulf %553, %538 : vector<2x32xf32>
    %563 = arith.mulf %547, %555 : vector<2x32xf32>
    %564 = arith.addf %562, %563 : vector<2x32xf32>
    %565 = math.tanh %564 : vector<2x32xf32>
    %566 = arith.mulf %561, %565 : vector<2x32xf32>
    %c12_193 = arith.constant 12 : index
    %c32 = arith.constant 32 : index
    %567 = vector.load %arg17[%c12_193, %c32] : memref<14x64xf32, #tpu.memory_space<vmem>>, vector<2x32xf32>
    tpu.vector_store %arg17[%c12_193, %c32], %566 {strides = array<i32>} : memref<14x64xf32, #tpu.memory_space<vmem>>, vector<2x32xf32>,
    %c10_194 = arith.constant 10 : index
    %c128_195 = arith.constant 128 : index
    %568 = vector.load %arg18[%c10_194, %c128_195] : memref<14x256xf32, #tpu.memory_space<vmem>>, vector<2x128xf32>
    %cst_196 = arith.constant dense<0.000000e+00> : vector<2x128xf32>
    %569 = tpu.matmul %566, %534, %cst_196 {dimension_numbers = #tpu.dot_dimension_numbers<[1], [0], [0], [1], [0, 0, 1, 1], [], []>} : vector<2x32xf32>, vector<32x128xf32>, vector<2x128xf32> -> vector<2x128xf32>
    %570 = arith.addf %568, %569 : vector<2x128xf32>
    %571 = vector.extract_strided_slice %570 {offsets = [0, 0], sizes = [2, 32], strides = [1, 1]} : vector<2x128xf32> to vector<2x32xf32>
    %572 = arith.negf %571 : vector<2x32xf32>
    %573 = math.exp %572 : vector<2x32xf32>
    %cst_197 = arith.constant 1.000000e+00 : f32
    %574 = vector.broadcast %cst_197 : f32 to vector<2x32xf32>
    %575 = arith.addf %574, %573 : vector<2x32xf32>
    %576 = arith.divf %574, %575 : vector<2x32xf32>
    %577 = vector.extract_strided_slice %570 {offsets = [0, 32], sizes = [2, 32], strides = [1, 1]} : vector<2x128xf32> to vector<2x32xf32>
    %578 = arith.negf %577 : vector<2x32xf32>
    %579 = math.exp %578 : vector<2x32xf32>
    %cst_198 = arith.constant 1.000000e+00 : f32
    %580 = vector.broadcast %cst_198 : f32 to vector<2x32xf32>
    %581 = arith.addf %580, %579 : vector<2x32xf32>
    %582 = arith.divf %580, %581 : vector<2x32xf32>
    %583 = vector.extract_strided_slice %570 {offsets = [0, 64], sizes = [2, 32], strides = [1, 1]} : vector<2x128xf32> to vector<2x32xf32>
    %584 = math.tanh %583 : vector<2x32xf32>
    %585 = vector.extract_strided_slice %570 {offsets = [0, 96], sizes = [2, 32], strides = [1, 1]} : vector<2x128xf32> to vector<2x32xf32>
    %586 = arith.negf %585 : vector<2x32xf32>
    %587 = math.exp %586 : vector<2x32xf32>
    %cst_199 = arith.constant 1.000000e+00 : f32
    %588 = vector.broadcast %cst_199 : f32 to vector<2x32xf32>
    %589 = arith.addf %588, %587 : vector<2x32xf32>
    %590 = arith.divf %588, %589 : vector<2x32xf32>
    %591 = arith.mulf %582, %564 : vector<2x32xf32>
    %592 = arith.mulf %576, %584 : vector<2x32xf32>
    %593 = arith.addf %591, %592 : vector<2x32xf32>
    %594 = math.tanh %593 : vector<2x32xf32>
    %595 = arith.mulf %590, %594 : vector<2x32xf32>
    %c10_200 = arith.constant 10 : index
    %c32_201 = arith.constant 32 : index
    %596 = vector.load %arg17[%c10_200, %c32_201] : memref<14x64xf32, #tpu.memory_space<vmem>>, vector<2x32xf32>
    tpu.vector_store %arg17[%c10_200, %c32_201], %595 {strides = array<i32>} : memref<14x64xf32, #tpu.memory_space<vmem>>, vector<2x32xf32>,
    %c8_202 = arith.constant 8 : index
    %c128_203 = arith.constant 128 : index
    %597 = vector.load %arg18[%c8_202, %c128_203] : memref<14x256xf32, #tpu.memory_space<vmem>>, vector<2x128xf32>
    %cst_204 = arith.constant dense<0.000000e+00> : vector<2x128xf32>
    %598 = tpu.matmul %595, %534, %cst_204 {dimension_numbers = #tpu.dot_dimension_numbers<[1], [0], [0], [1], [0, 0, 1, 1], [], []>} : vector<2x32xf32>, vector<32x128xf32>, vector<2x128xf32> -> vector<2x128xf32>
    %599 = arith.addf %597, %598 : vector<2x128xf32>
    %600 = vector.extract_strided_slice %599 {offsets = [0, 0], sizes = [2, 32], strides = [1, 1]} : vector<2x128xf32> to vector<2x32xf32>
    %601 = arith.negf %600 : vector<2x32xf32>
    %602 = math.exp %601 : vector<2x32xf32>
    %cst_205 = arith.constant 1.000000e+00 : f32
    %603 = vector.broadcast %cst_205 : f32 to vector<2x32xf32>
    %604 = arith.addf %603, %602 : vector<2x32xf32>
    %605 = arith.divf %603, %604 : vector<2x32xf32>
    %606 = vector.extract_strided_slice %599 {offsets = [0, 32], sizes = [2, 32], strides = [1, 1]} : vector<2x128xf32> to vector<2x32xf32>
    %607 = arith.negf %606 : vector<2x32xf32>
    %608 = math.exp %607 : vector<2x32xf32>
    %cst_206 = arith.constant 1.000000e+00 : f32
    %609 = vector.broadcast %cst_206 : f32 to vector<2x32xf32>
    %610 = arith.addf %609, %608 : vector<2x32xf32>
    %611 = arith.divf %609, %610 : vector<2x32xf32>
    %612 = vector.extract_strided_slice %599 {offsets = [0, 64], sizes = [2, 32], strides = [1, 1]} : vector<2x128xf32> to vector<2x32xf32>
    %613 = math.tanh %612 : vector<2x32xf32>
    %614 = vector.extract_strided_slice %599 {offsets = [0, 96], sizes = [2, 32], strides = [1, 1]} : vector<2x128xf32> to vector<2x32xf32>
    %615 = arith.negf %614 : vector<2x32xf32>
    %616 = math.exp %615 : vector<2x32xf32>
    %cst_207 = arith.constant 1.000000e+00 : f32
    %617 = vector.broadcast %cst_207 : f32 to vector<2x32xf32>
    %618 = arith.addf %617, %616 : vector<2x32xf32>
    %619 = arith.divf %617, %618 : vector<2x32xf32>
    %620 = arith.mulf %611, %593 : vector<2x32xf32>
    %621 = arith.mulf %605, %613 : vector<2x32xf32>
    %622 = arith.addf %620, %621 : vector<2x32xf32>
    %623 = math.tanh %622 : vector<2x32xf32>
    %624 = arith.mulf %619, %623 : vector<2x32xf32>
    %c8_208 = arith.constant 8 : index
    %c32_209 = arith.constant 32 : index
    %625 = vector.load %arg17[%c8_208, %c32_209] : memref<14x64xf32, #tpu.memory_space<vmem>>, vector<2x32xf32>
    tpu.vector_store %arg17[%c8_208, %c32_209], %624 {strides = array<i32>} : memref<14x64xf32, #tpu.memory_space<vmem>>, vector<2x32xf32>,
    %c6_210 = arith.constant 6 : index
    %c128_211 = arith.constant 128 : index
    %626 = vector.load %arg18[%c6_210, %c128_211] : memref<14x256xf32, #tpu.memory_space<vmem>>, vector<2x128xf32>
    %cst_212 = arith.constant dense<0.000000e+00> : vector<2x128xf32>
    %627 = tpu.matmul %624, %534, %cst_212 {dimension_numbers = #tpu.dot_dimension_numbers<[1], [0], [0], [1], [0, 0, 1, 1], [], []>} : vector<2x32xf32>, vector<32x128xf32>, vector<2x128xf32> -> vector<2x128xf32>
    %628 = arith.addf %626, %627 : vector<2x128xf32>
    %629 = vector.extract_strided_slice %628 {offsets = [0, 0], sizes = [2, 32], strides = [1, 1]} : vector<2x128xf32> to vector<2x32xf32>
    %630 = arith.negf %629 : vector<2x32xf32>
    %631 = math.exp %630 : vector<2x32xf32>
    %cst_213 = arith.constant 1.000000e+00 : f32
    %632 = vector.broadcast %cst_213 : f32 to vector<2x32xf32>
    %633 = arith.addf %632, %631 : vector<2x32xf32>
    %634 = arith.divf %632, %633 : vector<2x32xf32>
    %635 = vector.extract_strided_slice %628 {offsets = [0, 32], sizes = [2, 32], strides = [1, 1]} : vector<2x128xf32> to vector<2x32xf32>
    %636 = arith.negf %635 : vector<2x32xf32>
    %637 = math.exp %636 : vector<2x32xf32>
    %cst_214 = arith.constant 1.000000e+00 : f32
    %638 = vector.broadcast %cst_214 : f32 to vector<2x32xf32>
    %639 = arith.addf %638, %637 : vector<2x32xf32>
    %640 = arith.divf %638, %639 : vector<2x32xf32>
    %641 = vector.extract_strided_slice %628 {offsets = [0, 64], sizes = [2, 32], strides = [1, 1]} : vector<2x128xf32> to vector<2x32xf32>
    %642 = math.tanh %641 : vector<2x32xf32>
    %643 = vector.extract_strided_slice %628 {offsets = [0, 96], sizes = [2, 32], strides = [1, 1]} : vector<2x128xf32> to vector<2x32xf32>
    %644 = arith.negf %643 : vector<2x32xf32>
    %645 = math.exp %644 : vector<2x32xf32>
    %cst_215 = arith.constant 1.000000e+00 : f32
    %646 = vector.broadcast %cst_215 : f32 to vector<2x32xf32>
    %647 = arith.addf %646, %645 : vector<2x32xf32>
    %648 = arith.divf %646, %647 : vector<2x32xf32>
    %649 = arith.mulf %640, %622 : vector<2x32xf32>
    %650 = arith.mulf %634, %642 : vector<2x32xf32>
    %651 = arith.addf %649, %650 : vector<2x32xf32>
    %652 = math.tanh %651 : vector<2x32xf32>
    %653 = arith.mulf %648, %652 : vector<2x32xf32>
    %c6_216 = arith.constant 6 : index
    %c32_217 = arith.constant 32 : index
    %654 = vector.load %arg17[%c6_216, %c32_217] : memref<14x64xf32, #tpu.memory_space<vmem>>, vector<2x32xf32>
    tpu.vector_store %arg17[%c6_216, %c32_217], %653 {strides = array<i32>} : memref<14x64xf32, #tpu.memory_space<vmem>>, vector<2x32xf32>,
    %c4_218 = arith.constant 4 : index
    %c128_219 = arith.constant 128 : index
    %655 = vector.load %arg18[%c4_218, %c128_219] : memref<14x256xf32, #tpu.memory_space<vmem>>, vector<2x128xf32>
    %cst_220 = arith.constant dense<0.000000e+00> : vector<2x128xf32>
    %656 = tpu.matmul %653, %534, %cst_220 {dimension_numbers = #tpu.dot_dimension_numbers<[1], [0], [0], [1], [0, 0, 1, 1], [], []>} : vector<2x32xf32>, vector<32x128xf32>, vector<2x128xf32> -> vector<2x128xf32>
    %657 = arith.addf %655, %656 : vector<2x128xf32>
    %658 = vector.extract_strided_slice %657 {offsets = [0, 0], sizes = [2, 32], strides = [1, 1]} : vector<2x128xf32> to vector<2x32xf32>
    %659 = arith.negf %658 : vector<2x32xf32>
    %660 = math.exp %659 : vector<2x32xf32>
    %cst_221 = arith.constant 1.000000e+00 : f32
    %661 = vector.broadcast %cst_221 : f32 to vector<2x32xf32>
    %662 = arith.addf %661, %660 : vector<2x32xf32>
    %663 = arith.divf %661, %662 : vector<2x32xf32>
    %664 = vector.extract_strided_slice %657 {offsets = [0, 32], sizes = [2, 32], strides = [1, 1]} : vector<2x128xf32> to vector<2x32xf32>
    %665 = arith.negf %664 : vector<2x32xf32>
    %666 = math.exp %665 : vector<2x32xf32>
    %cst_222 = arith.constant 1.000000e+00 : f32
    %667 = vector.broadcast %cst_222 : f32 to vector<2x32xf32>
    %668 = arith.addf %667, %666 : vector<2x32xf32>
    %669 = arith.divf %667, %668 : vector<2x32xf32>
    %670 = vector.extract_strided_slice %657 {offsets = [0, 64], sizes = [2, 32], strides = [1, 1]} : vector<2x128xf32> to vector<2x32xf32>
    %671 = math.tanh %670 : vector<2x32xf32>
    %672 = vector.extract_strided_slice %657 {offsets = [0, 96], sizes = [2, 32], strides = [1, 1]} : vector<2x128xf32> to vector<2x32xf32>
    %673 = arith.negf %672 : vector<2x32xf32>
    %674 = math.exp %673 : vector<2x32xf32>
    %cst_223 = arith.constant 1.000000e+00 : f32
    %675 = vector.broadcast %cst_223 : f32 to vector<2x32xf32>
    %676 = arith.addf %675, %674 : vector<2x32xf32>
    %677 = arith.divf %675, %676 : vector<2x32xf32>
    %678 = arith.mulf %669, %651 : vector<2x32xf32>
    %679 = arith.mulf %663, %671 : vector<2x32xf32>
    %680 = arith.addf %678, %679 : vector<2x32xf32>
    %681 = math.tanh %680 : vector<2x32xf32>
    %682 = arith.mulf %677, %681 : vector<2x32xf32>
    %c4_224 = arith.constant 4 : index
    %c32_225 = arith.constant 32 : index
    %683 = vector.load %arg17[%c4_224, %c32_225] : memref<14x64xf32, #tpu.memory_space<vmem>>, vector<2x32xf32>
    tpu.vector_store %arg17[%c4_224, %c32_225], %682 {strides = array<i32>} : memref<14x64xf32, #tpu.memory_space<vmem>>, vector<2x32xf32>,
    %c2_226 = arith.constant 2 : index
    %c128_227 = arith.constant 128 : index
    %684 = vector.load %arg18[%c2_226, %c128_227] : memref<14x256xf32, #tpu.memory_space<vmem>>, vector<2x128xf32>
    %cst_228 = arith.constant dense<0.000000e+00> : vector<2x128xf32>
    %685 = tpu.matmul %682, %534, %cst_228 {dimension_numbers = #tpu.dot_dimension_numbers<[1], [0], [0], [1], [0, 0, 1, 1], [], []>} : vector<2x32xf32>, vector<32x128xf32>, vector<2x128xf32> -> vector<2x128xf32>
    %686 = arith.addf %684, %685 : vector<2x128xf32>
    %687 = vector.extract_strided_slice %686 {offsets = [0, 0], sizes = [2, 32], strides = [1, 1]} : vector<2x128xf32> to vector<2x32xf32>
    %688 = arith.negf %687 : vector<2x32xf32>
    %689 = math.exp %688 : vector<2x32xf32>
    %cst_229 = arith.constant 1.000000e+00 : f32
    %690 = vector.broadcast %cst_229 : f32 to vector<2x32xf32>
    %691 = arith.addf %690, %689 : vector<2x32xf32>
    %692 = arith.divf %690, %691 : vector<2x32xf32>
    %693 = vector.extract_strided_slice %686 {offsets = [0, 32], sizes = [2, 32], strides = [1, 1]} : vector<2x128xf32> to vector<2x32xf32>
    %694 = arith.negf %693 : vector<2x32xf32>
    %695 = math.exp %694 : vector<2x32xf32>
    %cst_230 = arith.constant 1.000000e+00 : f32
    %696 = vector.broadcast %cst_230 : f32 to vector<2x32xf32>
    %697 = arith.addf %696, %695 : vector<2x32xf32>
    %698 = arith.divf %696, %697 : vector<2x32xf32>
    %699 = vector.extract_strided_slice %686 {offsets = [0, 64], sizes = [2, 32], strides = [1, 1]} : vector<2x128xf32> to vector<2x32xf32>
    %700 = math.tanh %699 : vector<2x32xf32>
    %701 = vector.extract_strided_slice %686 {offsets = [0, 96], sizes = [2, 32], strides = [1, 1]} : vector<2x128xf32> to vector<2x32xf32>
    %702 = arith.negf %701 : vector<2x32xf32>
    %703 = math.exp %702 : vector<2x32xf32>
    %cst_231 = arith.constant 1.000000e+00 : f32
    %704 = vector.broadcast %cst_231 : f32 to vector<2x32xf32>
    %705 = arith.addf %704, %703 : vector<2x32xf32>
    %706 = arith.divf %704, %705 : vector<2x32xf32>
    %707 = arith.mulf %698, %680 : vector<2x32xf32>
    %708 = arith.mulf %692, %700 : vector<2x32xf32>
    %709 = arith.addf %707, %708 : vector<2x32xf32>
    %710 = math.tanh %709 : vector<2x32xf32>
    %711 = arith.mulf %706, %710 : vector<2x32xf32>
    %c2_232 = arith.constant 2 : index
    %c32_233 = arith.constant 32 : index
    %712 = vector.load %arg17[%c2_232, %c32_233] : memref<14x64xf32, #tpu.memory_space<vmem>>, vector<2x32xf32>
    tpu.vector_store %arg17[%c2_232, %c32_233], %711 {strides = array<i32>} : memref<14x64xf32, #tpu.memory_space<vmem>>, vector<2x32xf32>,
    %c0_234 = arith.constant 0 : index
    %c128_235 = arith.constant 128 : index
    %713 = vector.load %arg18[%c0_234, %c128_235] : memref<14x256xf32, #tpu.memory_space<vmem>>, vector<2x128xf32>
    %cst_236 = arith.constant dense<0.000000e+00> : vector<2x128xf32>
    %714 = tpu.matmul %711, %534, %cst_236 {dimension_numbers = #tpu.dot_dimension_numbers<[1], [0], [0], [1], [0, 0, 1, 1], [], []>} : vector<2x32xf32>, vector<32x128xf32>, vector<2x128xf32> -> vector<2x128xf32>
    %715 = arith.addf %713, %714 : vector<2x128xf32>
    %716 = vector.extract_strided_slice %715 {offsets = [0, 0], sizes = [2, 32], strides = [1, 1]} : vector<2x128xf32> to vector<2x32xf32>
    %717 = arith.negf %716 : vector<2x32xf32>
    %718 = math.exp %717 : vector<2x32xf32>
    %cst_237 = arith.constant 1.000000e+00 : f32
    %719 = vector.broadcast %cst_237 : f32 to vector<2x32xf32>
    %720 = arith.addf %719, %718 : vector<2x32xf32>
    %721 = arith.divf %719, %720 : vector<2x32xf32>
    %722 = vector.extract_strided_slice %715 {offsets = [0, 32], sizes = [2, 32], strides = [1, 1]} : vector<2x128xf32> to vector<2x32xf32>
    %723 = arith.negf %722 : vector<2x32xf32>
    %724 = math.exp %723 : vector<2x32xf32>
    %cst_238 = arith.constant 1.000000e+00 : f32
    %725 = vector.broadcast %cst_238 : f32 to vector<2x32xf32>
    %726 = arith.addf %725, %724 : vector<2x32xf32>
    %727 = arith.divf %725, %726 : vector<2x32xf32>
    %728 = vector.extract_strided_slice %715 {offsets = [0, 64], sizes = [2, 32], strides = [1, 1]} : vector<2x128xf32> to vector<2x32xf32>
    %729 = math.tanh %728 : vector<2x32xf32>
    %730 = vector.extract_strided_slice %715 {offsets = [0, 96], sizes = [2, 32], strides = [1, 1]} : vector<2x128xf32> to vector<2x32xf32>
    %731 = arith.negf %730 : vector<2x32xf32>
    %732 = math.exp %731 : vector<2x32xf32>
    %cst_239 = arith.constant 1.000000e+00 : f32
    %733 = vector.broadcast %cst_239 : f32 to vector<2x32xf32>
    %734 = arith.addf %733, %732 : vector<2x32xf32>
    %735 = arith.divf %733, %734 : vector<2x32xf32>
    %736 = arith.mulf %727, %709 : vector<2x32xf32>
    %737 = arith.mulf %721, %729 : vector<2x32xf32>
    %738 = arith.addf %736, %737 : vector<2x32xf32>
    %739 = math.tanh %738 : vector<2x32xf32>
    %740 = arith.mulf %735, %739 : vector<2x32xf32>
    %c0_240 = arith.constant 0 : index
    %c32_241 = arith.constant 32 : index
    %741 = vector.load %arg17[%c0_240, %c32_241] : memref<14x64xf32, #tpu.memory_space<vmem>>, vector<2x32xf32>
    tpu.vector_store %arg17[%c0_240, %c32_241], %740 {strides = array<i32>} : memref<14x64xf32, #tpu.memory_space<vmem>>, vector<2x32xf32>,
    %c0_242 = arith.constant 0 : index
    %c0_243 = arith.constant 0 : index
    %742 = vector.load %arg17[%c0_242, %c0_243] : memref<14x64xf32, #tpu.memory_space<vmem>>, vector<14x64xf32>
    %c1_244 = arith.constant 1 : index
    %c0_245 = arith.constant 0 : index
    %c0_246 = arith.constant 0 : index
    %743 = vector.load %arg6[%c1_244, %c0_245, %c0_246] : memref<3x64x256xf32, #tpu.memory_space<vmem>>, vector<1x64x256xf32>
    %744 = vector.shape_cast %743 : vector<1x64x256xf32> to vector<64x256xf32>
    %cst_247 = arith.constant dense<0.000000e+00> : vector<14x256xf32>
    %745 = tpu.matmul %742, %744, %cst_247 {dimension_numbers = #tpu.dot_dimension_numbers<[1], [0], [0], [1], [0, 0, 1, 1], [], []>} : vector<14x64xf32>, vector<64x256xf32>, vector<14x256xf32> -> vector<14x256xf32>
    %c1_248 = arith.constant 1 : index
    %c0_249 = arith.constant 0 : index
    %c0_250 = arith.constant 0 : index
    %746 = vector.load %arg8[%c1_248, %c0_249, %c0_250] : memref<3x1x256xf32, #tpu.memory_space<vmem>>, vector<1x1x256xf32>
    %747 = vector.shape_cast %746 : vector<1x1x256xf32> to vector<1x256xf32>
    %748 = vector.broadcast %747 : vector<1x256xf32> to vector<14x256xf32>
    %749 = arith.addf %745, %748 : vector<14x256xf32>
    %c0_251 = arith.constant 0 : index
    %c0_252 = arith.constant 0 : index
    %750 = vector.load %arg18[%c0_251, %c0_252] : memref<14x256xf32, #tpu.memory_space<vmem>>, vector<14x256xf32>
    tpu.vector_store %arg18[%c0_251, %c0_252], %749 {strides = array<i32>} : memref<14x256xf32, #tpu.memory_space<vmem>>, vector<14x256xf32>,
    %c2_253 = arith.constant 2 : index
    %c0_254 = arith.constant 0 : index
    %c0_255 = arith.constant 0 : index
    %751 = vector.load %arg7[%c2_253, %c0_254, %c0_255] : memref<6x32x128xf32, #tpu.memory_space<vmem>>, vector<1x32x128xf32>
    %752 = vector.shape_cast %751 : vector<1x32x128xf32> to vector<32x128xf32>
    %c2_256 = arith.constant 2 : index
    %c0_257 = arith.constant 0 : index
    %c0_258 = arith.constant 0 : index
    %753 = vector.load %arg13[%c2_256, %c0_257, %c0_258] : memref<6x2x32xf32, #tpu.memory_space<vmem>>, vector<1x2x32xf32>
    %754 = vector.shape_cast %753 : vector<1x2x32xf32> to vector<2x32xf32>
    %c2_259 = arith.constant 2 : index
    %c0_260 = arith.constant 0 : index
    %c0_261 = arith.constant 0 : index
    %755 = vector.load %arg14[%c2_259, %c0_260, %c0_261] : memref<6x2x32xf32, #tpu.memory_space<vmem>>, vector<1x2x32xf32>
    %756 = vector.shape_cast %755 : vector<1x2x32xf32> to vector<2x32xf32>
    %c0_262 = arith.constant 0 : index
    %c0_263 = arith.constant 0 : index
    %757 = vector.load %arg18[%c0_262, %c0_263] : memref<14x256xf32, #tpu.memory_space<vmem>>, vector<2x128xf32>
    %cst_264 = arith.constant dense<0.000000e+00> : vector<2x128xf32>
    %758 = tpu.matmul %754, %752, %cst_264 {dimension_numbers = #tpu.dot_dimension_numbers<[1], [0], [0], [1], [0, 0, 1, 1], [], []>} : vector<2x32xf32>, vector<32x128xf32>, vector<2x128xf32> -> vector<2x128xf32>
    %759 = arith.addf %757, %758 : vector<2x128xf32>
    %760 = vector.extract_strided_slice %759 {offsets = [0, 0], sizes = [2, 32], strides = [1, 1]} : vector<2x128xf32> to vector<2x32xf32>
    %761 = arith.negf %760 : vector<2x32xf32>
    %762 = math.exp %761 : vector<2x32xf32>
    %cst_265 = arith.constant 1.000000e+00 : f32
    %763 = vector.broadcast %cst_265 : f32 to vector<2x32xf32>
    %764 = arith.addf %763, %762 : vector<2x32xf32>
    %765 = arith.divf %763, %764 : vector<2x32xf32>
    %766 = vector.extract_strided_slice %759 {offsets = [0, 32], sizes = [2, 32], strides = [1, 1]} : vector<2x128xf32> to vector<2x32xf32>
    %767 = arith.negf %766 : vector<2x32xf32>
    %768 = math.exp %767 : vector<2x32xf32>
    %cst_266 = arith.constant 1.000000e+00 : f32
    %769 = vector.broadcast %cst_266 : f32 to vector<2x32xf32>
    %770 = arith.addf %769, %768 : vector<2x32xf32>
    %771 = arith.divf %769, %770 : vector<2x32xf32>
    %772 = vector.extract_strided_slice %759 {offsets = [0, 64], sizes = [2, 32], strides = [1, 1]} : vector<2x128xf32> to vector<2x32xf32>
    %773 = math.tanh %772 : vector<2x32xf32>
    %774 = vector.extract_strided_slice %759 {offsets = [0, 96], sizes = [2, 32], strides = [1, 1]} : vector<2x128xf32> to vector<2x32xf32>
    %775 = arith.negf %774 : vector<2x32xf32>
    %776 = math.exp %775 : vector<2x32xf32>
    %cst_267 = arith.constant 1.000000e+00 : f32
    %777 = vector.broadcast %cst_267 : f32 to vector<2x32xf32>
    %778 = arith.addf %777, %776 : vector<2x32xf32>
    %779 = arith.divf %777, %778 : vector<2x32xf32>
    %780 = arith.mulf %771, %756 : vector<2x32xf32>
    %781 = arith.mulf %765, %773 : vector<2x32xf32>
    %782 = arith.addf %780, %781 : vector<2x32xf32>
    %783 = math.tanh %782 : vector<2x32xf32>
    %784 = arith.mulf %779, %783 : vector<2x32xf32>
    %c0_268 = arith.constant 0 : index
    %c0_269 = arith.constant 0 : index
    %785 = vector.load %arg16[%c0_268, %c0_269] : memref<14x64xf32, #tpu.memory_space<vmem>>, vector<2x32xf32>
    tpu.vector_store %arg16[%c0_268, %c0_269], %784 {strides = array<i32>} : memref<14x64xf32, #tpu.memory_space<vmem>>, vector<2x32xf32>,
    %c2_270 = arith.constant 2 : index
    %c0_271 = arith.constant 0 : index
    %786 = vector.load %arg18[%c2_270, %c0_271] : memref<14x256xf32, #tpu.memory_space<vmem>>, vector<2x128xf32>
    %cst_272 = arith.constant dense<0.000000e+00> : vector<2x128xf32>
    %787 = tpu.matmul %784, %752, %cst_272 {dimension_numbers = #tpu.dot_dimension_numbers<[1], [0], [0], [1], [0, 0, 1, 1], [], []>} : vector<2x32xf32>, vector<32x128xf32>, vector<2x128xf32> -> vector<2x128xf32>
    %788 = arith.addf %786, %787 : vector<2x128xf32>
    %789 = vector.extract_strided_slice %788 {offsets = [0, 0], sizes = [2, 32], strides = [1, 1]} : vector<2x128xf32> to vector<2x32xf32>
    %790 = arith.negf %789 : vector<2x32xf32>
    %791 = math.exp %790 : vector<2x32xf32>
    %cst_273 = arith.constant 1.000000e+00 : f32
    %792 = vector.broadcast %cst_273 : f32 to vector<2x32xf32>
    %793 = arith.addf %792, %791 : vector<2x32xf32>
    %794 = arith.divf %792, %793 : vector<2x32xf32>
    %795 = vector.extract_strided_slice %788 {offsets = [0, 32], sizes = [2, 32], strides = [1, 1]} : vector<2x128xf32> to vector<2x32xf32>
    %796 = arith.negf %795 : vector<2x32xf32>
    %797 = math.exp %796 : vector<2x32xf32>
    %cst_274 = arith.constant 1.000000e+00 : f32
    %798 = vector.broadcast %cst_274 : f32 to vector<2x32xf32>
    %799 = arith.addf %798, %797 : vector<2x32xf32>
    %800 = arith.divf %798, %799 : vector<2x32xf32>
    %801 = vector.extract_strided_slice %788 {offsets = [0, 64], sizes = [2, 32], strides = [1, 1]} : vector<2x128xf32> to vector<2x32xf32>
    %802 = math.tanh %801 : vector<2x32xf32>
    %803 = vector.extract_strided_slice %788 {offsets = [0, 96], sizes = [2, 32], strides = [1, 1]} : vector<2x128xf32> to vector<2x32xf32>
    %804 = arith.negf %803 : vector<2x32xf32>
    %805 = math.exp %804 : vector<2x32xf32>
    %cst_275 = arith.constant 1.000000e+00 : f32
    %806 = vector.broadcast %cst_275 : f32 to vector<2x32xf32>
    %807 = arith.addf %806, %805 : vector<2x32xf32>
    %808 = arith.divf %806, %807 : vector<2x32xf32>
    %809 = arith.mulf %800, %782 : vector<2x32xf32>
    %810 = arith.mulf %794, %802 : vector<2x32xf32>
    %811 = arith.addf %809, %810 : vector<2x32xf32>
    %812 = math.tanh %811 : vector<2x32xf32>
    %813 = arith.mulf %808, %812 : vector<2x32xf32>
    %c2_276 = arith.constant 2 : index
    %c0_277 = arith.constant 0 : index
    %814 = vector.load %arg16[%c2_276, %c0_277] : memref<14x64xf32, #tpu.memory_space<vmem>>, vector<2x32xf32>
    tpu.vector_store %arg16[%c2_276, %c0_277], %813 {strides = array<i32>} : memref<14x64xf32, #tpu.memory_space<vmem>>, vector<2x32xf32>,
    %c4_278 = arith.constant 4 : index
    %c0_279 = arith.constant 0 : index
    %815 = vector.load %arg18[%c4_278, %c0_279] : memref<14x256xf32, #tpu.memory_space<vmem>>, vector<2x128xf32>
    %cst_280 = arith.constant dense<0.000000e+00> : vector<2x128xf32>
    %816 = tpu.matmul %813, %752, %cst_280 {dimension_numbers = #tpu.dot_dimension_numbers<[1], [0], [0], [1], [0, 0, 1, 1], [], []>} : vector<2x32xf32>, vector<32x128xf32>, vector<2x128xf32> -> vector<2x128xf32>
    %817 = arith.addf %815, %816 : vector<2x128xf32>
    %818 = vector.extract_strided_slice %817 {offsets = [0, 0], sizes = [2, 32], strides = [1, 1]} : vector<2x128xf32> to vector<2x32xf32>
    %819 = arith.negf %818 : vector<2x32xf32>
    %820 = math.exp %819 : vector<2x32xf32>
    %cst_281 = arith.constant 1.000000e+00 : f32
    %821 = vector.broadcast %cst_281 : f32 to vector<2x32xf32>
    %822 = arith.addf %821, %820 : vector<2x32xf32>
    %823 = arith.divf %821, %822 : vector<2x32xf32>
    %824 = vector.extract_strided_slice %817 {offsets = [0, 32], sizes = [2, 32], strides = [1, 1]} : vector<2x128xf32> to vector<2x32xf32>
    %825 = arith.negf %824 : vector<2x32xf32>
    %826 = math.exp %825 : vector<2x32xf32>
    %cst_282 = arith.constant 1.000000e+00 : f32
    %827 = vector.broadcast %cst_282 : f32 to vector<2x32xf32>
    %828 = arith.addf %827, %826 : vector<2x32xf32>
    %829 = arith.divf %827, %828 : vector<2x32xf32>
    %830 = vector.extract_strided_slice %817 {offsets = [0, 64], sizes = [2, 32], strides = [1, 1]} : vector<2x128xf32> to vector<2x32xf32>
    %831 = math.tanh %830 : vector<2x32xf32>
    %832 = vector.extract_strided_slice %817 {offsets = [0, 96], sizes = [2, 32], strides = [1, 1]} : vector<2x128xf32> to vector<2x32xf32>
    %833 = arith.negf %832 : vector<2x32xf32>
    %834 = math.exp %833 : vector<2x32xf32>
    %cst_283 = arith.constant 1.000000e+00 : f32
    %835 = vector.broadcast %cst_283 : f32 to vector<2x32xf32>
    %836 = arith.addf %835, %834 : vector<2x32xf32>
    %837 = arith.divf %835, %836 : vector<2x32xf32>
    %838 = arith.mulf %829, %811 : vector<2x32xf32>
    %839 = arith.mulf %823, %831 : vector<2x32xf32>
    %840 = arith.addf %838, %839 : vector<2x32xf32>
    %841 = math.tanh %840 : vector<2x32xf32>
    %842 = arith.mulf %837, %841 : vector<2x32xf32>
    %c4_284 = arith.constant 4 : index
    %c0_285 = arith.constant 0 : index
    %843 = vector.load %arg16[%c4_284, %c0_285] : memref<14x64xf32, #tpu.memory_space<vmem>>, vector<2x32xf32>
    tpu.vector_store %arg16[%c4_284, %c0_285], %842 {strides = array<i32>} : memref<14x64xf32, #tpu.memory_space<vmem>>, vector<2x32xf32>,
    %c6_286 = arith.constant 6 : index
    %c0_287 = arith.constant 0 : index
    %844 = vector.load %arg18[%c6_286, %c0_287] : memref<14x256xf32, #tpu.memory_space<vmem>>, vector<2x128xf32>
    %cst_288 = arith.constant dense<0.000000e+00> : vector<2x128xf32>
    %845 = tpu.matmul %842, %752, %cst_288 {dimension_numbers = #tpu.dot_dimension_numbers<[1], [0], [0], [1], [0, 0, 1, 1], [], []>} : vector<2x32xf32>, vector<32x128xf32>, vector<2x128xf32> -> vector<2x128xf32>
    %846 = arith.addf %844, %845 : vector<2x128xf32>
    %847 = vector.extract_strided_slice %846 {offsets = [0, 0], sizes = [2, 32], strides = [1, 1]} : vector<2x128xf32> to vector<2x32xf32>
    %848 = arith.negf %847 : vector<2x32xf32>
    %849 = math.exp %848 : vector<2x32xf32>
    %cst_289 = arith.constant 1.000000e+00 : f32
    %850 = vector.broadcast %cst_289 : f32 to vector<2x32xf32>
    %851 = arith.addf %850, %849 : vector<2x32xf32>
    %852 = arith.divf %850, %851 : vector<2x32xf32>
    %853 = vector.extract_strided_slice %846 {offsets = [0, 32], sizes = [2, 32], strides = [1, 1]} : vector<2x128xf32> to vector<2x32xf32>
    %854 = arith.negf %853 : vector<2x32xf32>
    %855 = math.exp %854 : vector<2x32xf32>
    %cst_290 = arith.constant 1.000000e+00 : f32
    %856 = vector.broadcast %cst_290 : f32 to vector<2x32xf32>
    %857 = arith.addf %856, %855 : vector<2x32xf32>
    %858 = arith.divf %856, %857 : vector<2x32xf32>
    %859 = vector.extract_strided_slice %846 {offsets = [0, 64], sizes = [2, 32], strides = [1, 1]} : vector<2x128xf32> to vector<2x32xf32>
    %860 = math.tanh %859 : vector<2x32xf32>
    %861 = vector.extract_strided_slice %846 {offsets = [0, 96], sizes = [2, 32], strides = [1, 1]} : vector<2x128xf32> to vector<2x32xf32>
    %862 = arith.negf %861 : vector<2x32xf32>
    %863 = math.exp %862 : vector<2x32xf32>
    %cst_291 = arith.constant 1.000000e+00 : f32
    %864 = vector.broadcast %cst_291 : f32 to vector<2x32xf32>
    %865 = arith.addf %864, %863 : vector<2x32xf32>
    %866 = arith.divf %864, %865 : vector<2x32xf32>
    %867 = arith.mulf %858, %840 : vector<2x32xf32>
    %868 = arith.mulf %852, %860 : vector<2x32xf32>
    %869 = arith.addf %867, %868 : vector<2x32xf32>
    %870 = math.tanh %869 : vector<2x32xf32>
    %871 = arith.mulf %866, %870 : vector<2x32xf32>
    %c6_292 = arith.constant 6 : index
    %c0_293 = arith.constant 0 : index
    %872 = vector.load %arg16[%c6_292, %c0_293] : memref<14x64xf32, #tpu.memory_space<vmem>>, vector<2x32xf32>
    tpu.vector_store %arg16[%c6_292, %c0_293], %871 {strides = array<i32>} : memref<14x64xf32, #tpu.memory_space<vmem>>, vector<2x32xf32>,
    %c8_294 = arith.constant 8 : index
    %c0_295 = arith.constant 0 : index
    %873 = vector.load %arg18[%c8_294, %c0_295] : memref<14x256xf32, #tpu.memory_space<vmem>>, vector<2x128xf32>
    %cst_296 = arith.constant dense<0.000000e+00> : vector<2x128xf32>
    %874 = tpu.matmul %871, %752, %cst_296 {dimension_numbers = #tpu.dot_dimension_numbers<[1], [0], [0], [1], [0, 0, 1, 1], [], []>} : vector<2x32xf32>, vector<32x128xf32>, vector<2x128xf32> -> vector<2x128xf32>
    %875 = arith.addf %873, %874 : vector<2x128xf32>
    %876 = vector.extract_strided_slice %875 {offsets = [0, 0], sizes = [2, 32], strides = [1, 1]} : vector<2x128xf32> to vector<2x32xf32>
    %877 = arith.negf %876 : vector<2x32xf32>
    %878 = math.exp %877 : vector<2x32xf32>
    %cst_297 = arith.constant 1.000000e+00 : f32
    %879 = vector.broadcast %cst_297 : f32 to vector<2x32xf32>
    %880 = arith.addf %879, %878 : vector<2x32xf32>
    %881 = arith.divf %879, %880 : vector<2x32xf32>
    %882 = vector.extract_strided_slice %875 {offsets = [0, 32], sizes = [2, 32], strides = [1, 1]} : vector<2x128xf32> to vector<2x32xf32>
    %883 = arith.negf %882 : vector<2x32xf32>
    %884 = math.exp %883 : vector<2x32xf32>
    %cst_298 = arith.constant 1.000000e+00 : f32
    %885 = vector.broadcast %cst_298 : f32 to vector<2x32xf32>
    %886 = arith.addf %885, %884 : vector<2x32xf32>
    %887 = arith.divf %885, %886 : vector<2x32xf32>
    %888 = vector.extract_strided_slice %875 {offsets = [0, 64], sizes = [2, 32], strides = [1, 1]} : vector<2x128xf32> to vector<2x32xf32>
    %889 = math.tanh %888 : vector<2x32xf32>
    %890 = vector.extract_strided_slice %875 {offsets = [0, 96], sizes = [2, 32], strides = [1, 1]} : vector<2x128xf32> to vector<2x32xf32>
    %891 = arith.negf %890 : vector<2x32xf32>
    %892 = math.exp %891 : vector<2x32xf32>
    %cst_299 = arith.constant 1.000000e+00 : f32
    %893 = vector.broadcast %cst_299 : f32 to vector<2x32xf32>
    %894 = arith.addf %893, %892 : vector<2x32xf32>
    %895 = arith.divf %893, %894 : vector<2x32xf32>
    %896 = arith.mulf %887, %869 : vector<2x32xf32>
    %897 = arith.mulf %881, %889 : vector<2x32xf32>
    %898 = arith.addf %896, %897 : vector<2x32xf32>
    %899 = math.tanh %898 : vector<2x32xf32>
    %900 = arith.mulf %895, %899 : vector<2x32xf32>
    %c8_300 = arith.constant 8 : index
    %c0_301 = arith.constant 0 : index
    %901 = vector.load %arg16[%c8_300, %c0_301] : memref<14x64xf32, #tpu.memory_space<vmem>>, vector<2x32xf32>
    tpu.vector_store %arg16[%c8_300, %c0_301], %900 {strides = array<i32>} : memref<14x64xf32, #tpu.memory_space<vmem>>, vector<2x32xf32>,
    %c10_302 = arith.constant 10 : index
    %c0_303 = arith.constant 0 : index
    %902 = vector.load %arg18[%c10_302, %c0_303] : memref<14x256xf32, #tpu.memory_space<vmem>>, vector<2x128xf32>
    %cst_304 = arith.constant dense<0.000000e+00> : vector<2x128xf32>
    %903 = tpu.matmul %900, %752, %cst_304 {dimension_numbers = #tpu.dot_dimension_numbers<[1], [0], [0], [1], [0, 0, 1, 1], [], []>} : vector<2x32xf32>, vector<32x128xf32>, vector<2x128xf32> -> vector<2x128xf32>
    %904 = arith.addf %902, %903 : vector<2x128xf32>
    %905 = vector.extract_strided_slice %904 {offsets = [0, 0], sizes = [2, 32], strides = [1, 1]} : vector<2x128xf32> to vector<2x32xf32>
    %906 = arith.negf %905 : vector<2x32xf32>
    %907 = math.exp %906 : vector<2x32xf32>
    %cst_305 = arith.constant 1.000000e+00 : f32
    %908 = vector.broadcast %cst_305 : f32 to vector<2x32xf32>
    %909 = arith.addf %908, %907 : vector<2x32xf32>
    %910 = arith.divf %908, %909 : vector<2x32xf32>
    %911 = vector.extract_strided_slice %904 {offsets = [0, 32], sizes = [2, 32], strides = [1, 1]} : vector<2x128xf32> to vector<2x32xf32>
    %912 = arith.negf %911 : vector<2x32xf32>
    %913 = math.exp %912 : vector<2x32xf32>
    %cst_306 = arith.constant 1.000000e+00 : f32
    %914 = vector.broadcast %cst_306 : f32 to vector<2x32xf32>
    %915 = arith.addf %914, %913 : vector<2x32xf32>
    %916 = arith.divf %914, %915 : vector<2x32xf32>
    %917 = vector.extract_strided_slice %904 {offsets = [0, 64], sizes = [2, 32], strides = [1, 1]} : vector<2x128xf32> to vector<2x32xf32>
    %918 = math.tanh %917 : vector<2x32xf32>
    %919 = vector.extract_strided_slice %904 {offsets = [0, 96], sizes = [2, 32], strides = [1, 1]} : vector<2x128xf32> to vector<2x32xf32>
    %920 = arith.negf %919 : vector<2x32xf32>
    %921 = math.exp %920 : vector<2x32xf32>
    %cst_307 = arith.constant 1.000000e+00 : f32
    %922 = vector.broadcast %cst_307 : f32 to vector<2x32xf32>
    %923 = arith.addf %922, %921 : vector<2x32xf32>
    %924 = arith.divf %922, %923 : vector<2x32xf32>
    %925 = arith.mulf %916, %898 : vector<2x32xf32>
    %926 = arith.mulf %910, %918 : vector<2x32xf32>
    %927 = arith.addf %925, %926 : vector<2x32xf32>
    %928 = math.tanh %927 : vector<2x32xf32>
    %929 = arith.mulf %924, %928 : vector<2x32xf32>
    %c10_308 = arith.constant 10 : index
    %c0_309 = arith.constant 0 : index
    %930 = vector.load %arg16[%c10_308, %c0_309] : memref<14x64xf32, #tpu.memory_space<vmem>>, vector<2x32xf32>
    tpu.vector_store %arg16[%c10_308, %c0_309], %929 {strides = array<i32>} : memref<14x64xf32, #tpu.memory_space<vmem>>, vector<2x32xf32>,
    %c12_310 = arith.constant 12 : index
    %c0_311 = arith.constant 0 : index
    %931 = vector.load %arg18[%c12_310, %c0_311] : memref<14x256xf32, #tpu.memory_space<vmem>>, vector<2x128xf32>
    %cst_312 = arith.constant dense<0.000000e+00> : vector<2x128xf32>
    %932 = tpu.matmul %929, %752, %cst_312 {dimension_numbers = #tpu.dot_dimension_numbers<[1], [0], [0], [1], [0, 0, 1, 1], [], []>} : vector<2x32xf32>, vector<32x128xf32>, vector<2x128xf32> -> vector<2x128xf32>
    %933 = arith.addf %931, %932 : vector<2x128xf32>
    %934 = vector.extract_strided_slice %933 {offsets = [0, 0], sizes = [2, 32], strides = [1, 1]} : vector<2x128xf32> to vector<2x32xf32>
    %935 = arith.negf %934 : vector<2x32xf32>
    %936 = math.exp %935 : vector<2x32xf32>
    %cst_313 = arith.constant 1.000000e+00 : f32
    %937 = vector.broadcast %cst_313 : f32 to vector<2x32xf32>
    %938 = arith.addf %937, %936 : vector<2x32xf32>
    %939 = arith.divf %937, %938 : vector<2x32xf32>
    %940 = vector.extract_strided_slice %933 {offsets = [0, 32], sizes = [2, 32], strides = [1, 1]} : vector<2x128xf32> to vector<2x32xf32>
    %941 = arith.negf %940 : vector<2x32xf32>
    %942 = math.exp %941 : vector<2x32xf32>
    %cst_314 = arith.constant 1.000000e+00 : f32
    %943 = vector.broadcast %cst_314 : f32 to vector<2x32xf32>
    %944 = arith.addf %943, %942 : vector<2x32xf32>
    %945 = arith.divf %943, %944 : vector<2x32xf32>
    %946 = vector.extract_strided_slice %933 {offsets = [0, 64], sizes = [2, 32], strides = [1, 1]} : vector<2x128xf32> to vector<2x32xf32>
    %947 = math.tanh %946 : vector<2x32xf32>
    %948 = vector.extract_strided_slice %933 {offsets = [0, 96], sizes = [2, 32], strides = [1, 1]} : vector<2x128xf32> to vector<2x32xf32>
    %949 = arith.negf %948 : vector<2x32xf32>
    %950 = math.exp %949 : vector<2x32xf32>
    %cst_315 = arith.constant 1.000000e+00 : f32
    %951 = vector.broadcast %cst_315 : f32 to vector<2x32xf32>
    %952 = arith.addf %951, %950 : vector<2x32xf32>
    %953 = arith.divf %951, %952 : vector<2x32xf32>
    %954 = arith.mulf %945, %927 : vector<2x32xf32>
    %955 = arith.mulf %939, %947 : vector<2x32xf32>
    %956 = arith.addf %954, %955 : vector<2x32xf32>
    %957 = math.tanh %956 : vector<2x32xf32>
    %958 = arith.mulf %953, %957 : vector<2x32xf32>
    %c12_316 = arith.constant 12 : index
    %c0_317 = arith.constant 0 : index
    %959 = vector.load %arg16[%c12_316, %c0_317] : memref<14x64xf32, #tpu.memory_space<vmem>>, vector<2x32xf32>
    tpu.vector_store %arg16[%c12_316, %c0_317], %958 {strides = array<i32>} : memref<14x64xf32, #tpu.memory_space<vmem>>, vector<2x32xf32>,
    %c3 = arith.constant 3 : index
    %c0_318 = arith.constant 0 : index
    %c0_319 = arith.constant 0 : index
    %960 = vector.load %arg7[%c3, %c0_318, %c0_319] : memref<6x32x128xf32, #tpu.memory_space<vmem>>, vector<1x32x128xf32>
    %961 = vector.shape_cast %960 : vector<1x32x128xf32> to vector<32x128xf32>
    %c3_320 = arith.constant 3 : index
    %c0_321 = arith.constant 0 : index
    %c0_322 = arith.constant 0 : index
    %962 = vector.load %arg13[%c3_320, %c0_321, %c0_322] : memref<6x2x32xf32, #tpu.memory_space<vmem>>, vector<1x2x32xf32>
    %963 = vector.shape_cast %962 : vector<1x2x32xf32> to vector<2x32xf32>
    %c3_323 = arith.constant 3 : index
    %c0_324 = arith.constant 0 : index
    %c0_325 = arith.constant 0 : index
    %964 = vector.load %arg14[%c3_323, %c0_324, %c0_325] : memref<6x2x32xf32, #tpu.memory_space<vmem>>, vector<1x2x32xf32>
    %965 = vector.shape_cast %964 : vector<1x2x32xf32> to vector<2x32xf32>
    %c12_326 = arith.constant 12 : index
    %c128_327 = arith.constant 128 : index
    %966 = vector.load %arg18[%c12_326, %c128_327] : memref<14x256xf32, #tpu.memory_space<vmem>>, vector<2x128xf32>
    %cst_328 = arith.constant dense<0.000000e+00> : vector<2x128xf32>
    %967 = tpu.matmul %963, %961, %cst_328 {dimension_numbers = #tpu.dot_dimension_numbers<[1], [0], [0], [1], [0, 0, 1, 1], [], []>} : vector<2x32xf32>, vector<32x128xf32>, vector<2x128xf32> -> vector<2x128xf32>
    %968 = arith.addf %966, %967 : vector<2x128xf32>
    %969 = vector.extract_strided_slice %968 {offsets = [0, 0], sizes = [2, 32], strides = [1, 1]} : vector<2x128xf32> to vector<2x32xf32>
    %970 = arith.negf %969 : vector<2x32xf32>
    %971 = math.exp %970 : vector<2x32xf32>
    %cst_329 = arith.constant 1.000000e+00 : f32
    %972 = vector.broadcast %cst_329 : f32 to vector<2x32xf32>
    %973 = arith.addf %972, %971 : vector<2x32xf32>
    %974 = arith.divf %972, %973 : vector<2x32xf32>
    %975 = vector.extract_strided_slice %968 {offsets = [0, 32], sizes = [2, 32], strides = [1, 1]} : vector<2x128xf32> to vector<2x32xf32>
    %976 = arith.negf %975 : vector<2x32xf32>
    %977 = math.exp %976 : vector<2x32xf32>
    %cst_330 = arith.constant 1.000000e+00 : f32
    %978 = vector.broadcast %cst_330 : f32 to vector<2x32xf32>
    %979 = arith.addf %978, %977 : vector<2x32xf32>
    %980 = arith.divf %978, %979 : vector<2x32xf32>
    %981 = vector.extract_strided_slice %968 {offsets = [0, 64], sizes = [2, 32], strides = [1, 1]} : vector<2x128xf32> to vector<2x32xf32>
    %982 = math.tanh %981 : vector<2x32xf32>
    %983 = vector.extract_strided_slice %968 {offsets = [0, 96], sizes = [2, 32], strides = [1, 1]} : vector<2x128xf32> to vector<2x32xf32>
    %984 = arith.negf %983 : vector<2x32xf32>
    %985 = math.exp %984 : vector<2x32xf32>
    %cst_331 = arith.constant 1.000000e+00 : f32
    %986 = vector.broadcast %cst_331 : f32 to vector<2x32xf32>
    %987 = arith.addf %986, %985 : vector<2x32xf32>
    %988 = arith.divf %986, %987 : vector<2x32xf32>
    %989 = arith.mulf %980, %965 : vector<2x32xf32>
    %990 = arith.mulf %974, %982 : vector<2x32xf32>
    %991 = arith.addf %989, %990 : vector<2x32xf32>
    %992 = math.tanh %991 : vector<2x32xf32>
    %993 = arith.mulf %988, %992 : vector<2x32xf32>
    %c12_332 = arith.constant 12 : index
    %c32_333 = arith.constant 32 : index
    %994 = vector.load %arg16[%c12_332, %c32_333] : memref<14x64xf32, #tpu.memory_space<vmem>>, vector<2x32xf32>
    tpu.vector_store %arg16[%c12_332, %c32_333], %993 {strides = array<i32>} : memref<14x64xf32, #tpu.memory_space<vmem>>, vector<2x32xf32>,
    %c10_334 = arith.constant 10 : index
    %c128_335 = arith.constant 128 : index
    %995 = vector.load %arg18[%c10_334, %c128_335] : memref<14x256xf32, #tpu.memory_space<vmem>>, vector<2x128xf32>
    %cst_336 = arith.constant dense<0.000000e+00> : vector<2x128xf32>
    %996 = tpu.matmul %993, %961, %cst_336 {dimension_numbers = #tpu.dot_dimension_numbers<[1], [0], [0], [1], [0, 0, 1, 1], [], []>} : vector<2x32xf32>, vector<32x128xf32>, vector<2x128xf32> -> vector<2x128xf32>
    %997 = arith.addf %995, %996 : vector<2x128xf32>
    %998 = vector.extract_strided_slice %997 {offsets = [0, 0], sizes = [2, 32], strides = [1, 1]} : vector<2x128xf32> to vector<2x32xf32>
    %999 = arith.negf %998 : vector<2x32xf32>
    %1000 = math.exp %999 : vector<2x32xf32>
    %cst_337 = arith.constant 1.000000e+00 : f32
    %1001 = vector.broadcast %cst_337 : f32 to vector<2x32xf32>
    %1002 = arith.addf %1001, %1000 : vector<2x32xf32>
    %1003 = arith.divf %1001, %1002 : vector<2x32xf32>
    %1004 = vector.extract_strided_slice %997 {offsets = [0, 32], sizes = [2, 32], strides = [1, 1]} : vector<2x128xf32> to vector<2x32xf32>
    %1005 = arith.negf %1004 : vector<2x32xf32>
    %1006 = math.exp %1005 : vector<2x32xf32>
    %cst_338 = arith.constant 1.000000e+00 : f32
    %1007 = vector.broadcast %cst_338 : f32 to vector<2x32xf32>
    %1008 = arith.addf %1007, %1006 : vector<2x32xf32>
    %1009 = arith.divf %1007, %1008 : vector<2x32xf32>
    %1010 = vector.extract_strided_slice %997 {offsets = [0, 64], sizes = [2, 32], strides = [1, 1]} : vector<2x128xf32> to vector<2x32xf32>
    %1011 = math.tanh %1010 : vector<2x32xf32>
    %1012 = vector.extract_strided_slice %997 {offsets = [0, 96], sizes = [2, 32], strides = [1, 1]} : vector<2x128xf32> to vector<2x32xf32>
    %1013 = arith.negf %1012 : vector<2x32xf32>
    %1014 = math.exp %1013 : vector<2x32xf32>
    %cst_339 = arith.constant 1.000000e+00 : f32
    %1015 = vector.broadcast %cst_339 : f32 to vector<2x32xf32>
    %1016 = arith.addf %1015, %1014 : vector<2x32xf32>
    %1017 = arith.divf %1015, %1016 : vector<2x32xf32>
    %1018 = arith.mulf %1009, %991 : vector<2x32xf32>
    %1019 = arith.mulf %1003, %1011 : vector<2x32xf32>
    %1020 = arith.addf %1018, %1019 : vector<2x32xf32>
    %1021 = math.tanh %1020 : vector<2x32xf32>
    %1022 = arith.mulf %1017, %1021 : vector<2x32xf32>
    %c10_340 = arith.constant 10 : index
    %c32_341 = arith.constant 32 : index
    %1023 = vector.load %arg16[%c10_340, %c32_341] : memref<14x64xf32, #tpu.memory_space<vmem>>, vector<2x32xf32>
    tpu.vector_store %arg16[%c10_340, %c32_341], %1022 {strides = array<i32>} : memref<14x64xf32, #tpu.memory_space<vmem>>, vector<2x32xf32>,
    %c8_342 = arith.constant 8 : index
    %c128_343 = arith.constant 128 : index
    %1024 = vector.load %arg18[%c8_342, %c128_343] : memref<14x256xf32, #tpu.memory_space<vmem>>, vector<2x128xf32>
    %cst_344 = arith.constant dense<0.000000e+00> : vector<2x128xf32>
    %1025 = tpu.matmul %1022, %961, %cst_344 {dimension_numbers = #tpu.dot_dimension_numbers<[1], [0], [0], [1], [0, 0, 1, 1], [], []>} : vector<2x32xf32>, vector<32x128xf32>, vector<2x128xf32> -> vector<2x128xf32>
    %1026 = arith.addf %1024, %1025 : vector<2x128xf32>
    %1027 = vector.extract_strided_slice %1026 {offsets = [0, 0], sizes = [2, 32], strides = [1, 1]} : vector<2x128xf32> to vector<2x32xf32>
    %1028 = arith.negf %1027 : vector<2x32xf32>
    %1029 = math.exp %1028 : vector<2x32xf32>
    %cst_345 = arith.constant 1.000000e+00 : f32
    %1030 = vector.broadcast %cst_345 : f32 to vector<2x32xf32>
    %1031 = arith.addf %1030, %1029 : vector<2x32xf32>
    %1032 = arith.divf %1030, %1031 : vector<2x32xf32>
    %1033 = vector.extract_strided_slice %1026 {offsets = [0, 32], sizes = [2, 32], strides = [1, 1]} : vector<2x128xf32> to vector<2x32xf32>
    %1034 = arith.negf %1033 : vector<2x32xf32>
    %1035 = math.exp %1034 : vector<2x32xf32>
    %cst_346 = arith.constant 1.000000e+00 : f32
    %1036 = vector.broadcast %cst_346 : f32 to vector<2x32xf32>
    %1037 = arith.addf %1036, %1035 : vector<2x32xf32>
    %1038 = arith.divf %1036, %1037 : vector<2x32xf32>
    %1039 = vector.extract_strided_slice %1026 {offsets = [0, 64], sizes = [2, 32], strides = [1, 1]} : vector<2x128xf32> to vector<2x32xf32>
    %1040 = math.tanh %1039 : vector<2x32xf32>
    %1041 = vector.extract_strided_slice %1026 {offsets = [0, 96], sizes = [2, 32], strides = [1, 1]} : vector<2x128xf32> to vector<2x32xf32>
    %1042 = arith.negf %1041 : vector<2x32xf32>
    %1043 = math.exp %1042 : vector<2x32xf32>
    %cst_347 = arith.constant 1.000000e+00 : f32
    %1044 = vector.broadcast %cst_347 : f32 to vector<2x32xf32>
    %1045 = arith.addf %1044, %1043 : vector<2x32xf32>
    %1046 = arith.divf %1044, %1045 : vector<2x32xf32>
    %1047 = arith.mulf %1038, %1020 : vector<2x32xf32>
    %1048 = arith.mulf %1032, %1040 : vector<2x32xf32>
    %1049 = arith.addf %1047, %1048 : vector<2x32xf32>
    %1050 = math.tanh %1049 : vector<2x32xf32>
    %1051 = arith.mulf %1046, %1050 : vector<2x32xf32>
    %c8_348 = arith.constant 8 : index
    %c32_349 = arith.constant 32 : index
    %1052 = vector.load %arg16[%c8_348, %c32_349] : memref<14x64xf32, #tpu.memory_space<vmem>>, vector<2x32xf32>
    tpu.vector_store %arg16[%c8_348, %c32_349], %1051 {strides = array<i32>} : memref<14x64xf32, #tpu.memory_space<vmem>>, vector<2x32xf32>,
    %c6_350 = arith.constant 6 : index
    %c128_351 = arith.constant 128 : index
    %1053 = vector.load %arg18[%c6_350, %c128_351] : memref<14x256xf32, #tpu.memory_space<vmem>>, vector<2x128xf32>
    %cst_352 = arith.constant dense<0.000000e+00> : vector<2x128xf32>
    %1054 = tpu.matmul %1051, %961, %cst_352 {dimension_numbers = #tpu.dot_dimension_numbers<[1], [0], [0], [1], [0, 0, 1, 1], [], []>} : vector<2x32xf32>, vector<32x128xf32>, vector<2x128xf32> -> vector<2x128xf32>
    %1055 = arith.addf %1053, %1054 : vector<2x128xf32>
    %1056 = vector.extract_strided_slice %1055 {offsets = [0, 0], sizes = [2, 32], strides = [1, 1]} : vector<2x128xf32> to vector<2x32xf32>
    %1057 = arith.negf %1056 : vector<2x32xf32>
    %1058 = math.exp %1057 : vector<2x32xf32>
    %cst_353 = arith.constant 1.000000e+00 : f32
    %1059 = vector.broadcast %cst_353 : f32 to vector<2x32xf32>
    %1060 = arith.addf %1059, %1058 : vector<2x32xf32>
    %1061 = arith.divf %1059, %1060 : vector<2x32xf32>
    %1062 = vector.extract_strided_slice %1055 {offsets = [0, 32], sizes = [2, 32], strides = [1, 1]} : vector<2x128xf32> to vector<2x32xf32>
    %1063 = arith.negf %1062 : vector<2x32xf32>
    %1064 = math.exp %1063 : vector<2x32xf32>
    %cst_354 = arith.constant 1.000000e+00 : f32
    %1065 = vector.broadcast %cst_354 : f32 to vector<2x32xf32>
    %1066 = arith.addf %1065, %1064 : vector<2x32xf32>
    %1067 = arith.divf %1065, %1066 : vector<2x32xf32>
    %1068 = vector.extract_strided_slice %1055 {offsets = [0, 64], sizes = [2, 32], strides = [1, 1]} : vector<2x128xf32> to vector<2x32xf32>
    %1069 = math.tanh %1068 : vector<2x32xf32>
    %1070 = vector.extract_strided_slice %1055 {offsets = [0, 96], sizes = [2, 32], strides = [1, 1]} : vector<2x128xf32> to vector<2x32xf32>
    %1071 = arith.negf %1070 : vector<2x32xf32>
    %1072 = math.exp %1071 : vector<2x32xf32>
    %cst_355 = arith.constant 1.000000e+00 : f32
    %1073 = vector.broadcast %cst_355 : f32 to vector<2x32xf32>
    %1074 = arith.addf %1073, %1072 : vector<2x32xf32>
    %1075 = arith.divf %1073, %1074 : vector<2x32xf32>
    %1076 = arith.mulf %1067, %1049 : vector<2x32xf32>
    %1077 = arith.mulf %1061, %1069 : vector<2x32xf32>
    %1078 = arith.addf %1076, %1077 : vector<2x32xf32>
    %1079 = math.tanh %1078 : vector<2x32xf32>
    %1080 = arith.mulf %1075, %1079 : vector<2x32xf32>
    %c6_356 = arith.constant 6 : index
    %c32_357 = arith.constant 32 : index
    %1081 = vector.load %arg16[%c6_356, %c32_357] : memref<14x64xf32, #tpu.memory_space<vmem>>, vector<2x32xf32>
    tpu.vector_store %arg16[%c6_356, %c32_357], %1080 {strides = array<i32>} : memref<14x64xf32, #tpu.memory_space<vmem>>, vector<2x32xf32>,
    %c4_358 = arith.constant 4 : index
    %c128_359 = arith.constant 128 : index
    %1082 = vector.load %arg18[%c4_358, %c128_359] : memref<14x256xf32, #tpu.memory_space<vmem>>, vector<2x128xf32>
    %cst_360 = arith.constant dense<0.000000e+00> : vector<2x128xf32>
    %1083 = tpu.matmul %1080, %961, %cst_360 {dimension_numbers = #tpu.dot_dimension_numbers<[1], [0], [0], [1], [0, 0, 1, 1], [], []>} : vector<2x32xf32>, vector<32x128xf32>, vector<2x128xf32> -> vector<2x128xf32>
    %1084 = arith.addf %1082, %1083 : vector<2x128xf32>
    %1085 = vector.extract_strided_slice %1084 {offsets = [0, 0], sizes = [2, 32], strides = [1, 1]} : vector<2x128xf32> to vector<2x32xf32>
    %1086 = arith.negf %1085 : vector<2x32xf32>
    %1087 = math.exp %1086 : vector<2x32xf32>
    %cst_361 = arith.constant 1.000000e+00 : f32
    %1088 = vector.broadcast %cst_361 : f32 to vector<2x32xf32>
    %1089 = arith.addf %1088, %1087 : vector<2x32xf32>
    %1090 = arith.divf %1088, %1089 : vector<2x32xf32>
    %1091 = vector.extract_strided_slice %1084 {offsets = [0, 32], sizes = [2, 32], strides = [1, 1]} : vector<2x128xf32> to vector<2x32xf32>
    %1092 = arith.negf %1091 : vector<2x32xf32>
    %1093 = math.exp %1092 : vector<2x32xf32>
    %cst_362 = arith.constant 1.000000e+00 : f32
    %1094 = vector.broadcast %cst_362 : f32 to vector<2x32xf32>
    %1095 = arith.addf %1094, %1093 : vector<2x32xf32>
    %1096 = arith.divf %1094, %1095 : vector<2x32xf32>
    %1097 = vector.extract_strided_slice %1084 {offsets = [0, 64], sizes = [2, 32], strides = [1, 1]} : vector<2x128xf32> to vector<2x32xf32>
    %1098 = math.tanh %1097 : vector<2x32xf32>
    %1099 = vector.extract_strided_slice %1084 {offsets = [0, 96], sizes = [2, 32], strides = [1, 1]} : vector<2x128xf32> to vector<2x32xf32>
    %1100 = arith.negf %1099 : vector<2x32xf32>
    %1101 = math.exp %1100 : vector<2x32xf32>
    %cst_363 = arith.constant 1.000000e+00 : f32
    %1102 = vector.broadcast %cst_363 : f32 to vector<2x32xf32>
    %1103 = arith.addf %1102, %1101 : vector<2x32xf32>
    %1104 = arith.divf %1102, %1103 : vector<2x32xf32>
    %1105 = arith.mulf %1096, %1078 : vector<2x32xf32>
    %1106 = arith.mulf %1090, %1098 : vector<2x32xf32>
    %1107 = arith.addf %1105, %1106 : vector<2x32xf32>
    %1108 = math.tanh %1107 : vector<2x32xf32>
    %1109 = arith.mulf %1104, %1108 : vector<2x32xf32>
    %c4_364 = arith.constant 4 : index
    %c32_365 = arith.constant 32 : index
    %1110 = vector.load %arg16[%c4_364, %c32_365] : memref<14x64xf32, #tpu.memory_space<vmem>>, vector<2x32xf32>
    tpu.vector_store %arg16[%c4_364, %c32_365], %1109 {strides = array<i32>} : memref<14x64xf32, #tpu.memory_space<vmem>>, vector<2x32xf32>,
    %c2_366 = arith.constant 2 : index
    %c128_367 = arith.constant 128 : index
    %1111 = vector.load %arg18[%c2_366, %c128_367] : memref<14x256xf32, #tpu.memory_space<vmem>>, vector<2x128xf32>
    %cst_368 = arith.constant dense<0.000000e+00> : vector<2x128xf32>
    %1112 = tpu.matmul %1109, %961, %cst_368 {dimension_numbers = #tpu.dot_dimension_numbers<[1], [0], [0], [1], [0, 0, 1, 1], [], []>} : vector<2x32xf32>, vector<32x128xf32>, vector<2x128xf32> -> vector<2x128xf32>
    %1113 = arith.addf %1111, %1112 : vector<2x128xf32>
    %1114 = vector.extract_strided_slice %1113 {offsets = [0, 0], sizes = [2, 32], strides = [1, 1]} : vector<2x128xf32> to vector<2x32xf32>
    %1115 = arith.negf %1114 : vector<2x32xf32>
    %1116 = math.exp %1115 : vector<2x32xf32>
    %cst_369 = arith.constant 1.000000e+00 : f32
    %1117 = vector.broadcast %cst_369 : f32 to vector<2x32xf32>
    %1118 = arith.addf %1117, %1116 : vector<2x32xf32>
    %1119 = arith.divf %1117, %1118 : vector<2x32xf32>
    %1120 = vector.extract_strided_slice %1113 {offsets = [0, 32], sizes = [2, 32], strides = [1, 1]} : vector<2x128xf32> to vector<2x32xf32>
    %1121 = arith.negf %1120 : vector<2x32xf32>
    %1122 = math.exp %1121 : vector<2x32xf32>
    %cst_370 = arith.constant 1.000000e+00 : f32
    %1123 = vector.broadcast %cst_370 : f32 to vector<2x32xf32>
    %1124 = arith.addf %1123, %1122 : vector<2x32xf32>
    %1125 = arith.divf %1123, %1124 : vector<2x32xf32>
    %1126 = vector.extract_strided_slice %1113 {offsets = [0, 64], sizes = [2, 32], strides = [1, 1]} : vector<2x128xf32> to vector<2x32xf32>
    %1127 = math.tanh %1126 : vector<2x32xf32>
    %1128 = vector.extract_strided_slice %1113 {offsets = [0, 96], sizes = [2, 32], strides = [1, 1]} : vector<2x128xf32> to vector<2x32xf32>
    %1129 = arith.negf %1128 : vector<2x32xf32>
    %1130 = math.exp %1129 : vector<2x32xf32>
    %cst_371 = arith.constant 1.000000e+00 : f32
    %1131 = vector.broadcast %cst_371 : f32 to vector<2x32xf32>
    %1132 = arith.addf %1131, %1130 : vector<2x32xf32>
    %1133 = arith.divf %1131, %1132 : vector<2x32xf32>
    %1134 = arith.mulf %1125, %1107 : vector<2x32xf32>
    %1135 = arith.mulf %1119, %1127 : vector<2x32xf32>
    %1136 = arith.addf %1134, %1135 : vector<2x32xf32>
    %1137 = math.tanh %1136 : vector<2x32xf32>
    %1138 = arith.mulf %1133, %1137 : vector<2x32xf32>
    %c2_372 = arith.constant 2 : index
    %c32_373 = arith.constant 32 : index
    %1139 = vector.load %arg16[%c2_372, %c32_373] : memref<14x64xf32, #tpu.memory_space<vmem>>, vector<2x32xf32>
    tpu.vector_store %arg16[%c2_372, %c32_373], %1138 {strides = array<i32>} : memref<14x64xf32, #tpu.memory_space<vmem>>, vector<2x32xf32>,
    %c0_374 = arith.constant 0 : index
    %c128_375 = arith.constant 128 : index
    %1140 = vector.load %arg18[%c0_374, %c128_375] : memref<14x256xf32, #tpu.memory_space<vmem>>, vector<2x128xf32>
    %cst_376 = arith.constant dense<0.000000e+00> : vector<2x128xf32>
    %1141 = tpu.matmul %1138, %961, %cst_376 {dimension_numbers = #tpu.dot_dimension_numbers<[1], [0], [0], [1], [0, 0, 1, 1], [], []>} : vector<2x32xf32>, vector<32x128xf32>, vector<2x128xf32> -> vector<2x128xf32>
    %1142 = arith.addf %1140, %1141 : vector<2x128xf32>
    %1143 = vector.extract_strided_slice %1142 {offsets = [0, 0], sizes = [2, 32], strides = [1, 1]} : vector<2x128xf32> to vector<2x32xf32>
    %1144 = arith.negf %1143 : vector<2x32xf32>
    %1145 = math.exp %1144 : vector<2x32xf32>
    %cst_377 = arith.constant 1.000000e+00 : f32
    %1146 = vector.broadcast %cst_377 : f32 to vector<2x32xf32>
    %1147 = arith.addf %1146, %1145 : vector<2x32xf32>
    %1148 = arith.divf %1146, %1147 : vector<2x32xf32>
    %1149 = vector.extract_strided_slice %1142 {offsets = [0, 32], sizes = [2, 32], strides = [1, 1]} : vector<2x128xf32> to vector<2x32xf32>
    %1150 = arith.negf %1149 : vector<2x32xf32>
    %1151 = math.exp %1150 : vector<2x32xf32>
    %cst_378 = arith.constant 1.000000e+00 : f32
    %1152 = vector.broadcast %cst_378 : f32 to vector<2x32xf32>
    %1153 = arith.addf %1152, %1151 : vector<2x32xf32>
    %1154 = arith.divf %1152, %1153 : vector<2x32xf32>
    %1155 = vector.extract_strided_slice %1142 {offsets = [0, 64], sizes = [2, 32], strides = [1, 1]} : vector<2x128xf32> to vector<2x32xf32>
    %1156 = math.tanh %1155 : vector<2x32xf32>
    %1157 = vector.extract_strided_slice %1142 {offsets = [0, 96], sizes = [2, 32], strides = [1, 1]} : vector<2x128xf32> to vector<2x32xf32>
    %1158 = arith.negf %1157 : vector<2x32xf32>
    %1159 = math.exp %1158 : vector<2x32xf32>
    %cst_379 = arith.constant 1.000000e+00 : f32
    %1160 = vector.broadcast %cst_379 : f32 to vector<2x32xf32>
    %1161 = arith.addf %1160, %1159 : vector<2x32xf32>
    %1162 = arith.divf %1160, %1161 : vector<2x32xf32>
    %1163 = arith.mulf %1154, %1136 : vector<2x32xf32>
    %1164 = arith.mulf %1148, %1156 : vector<2x32xf32>
    %1165 = arith.addf %1163, %1164 : vector<2x32xf32>
    %1166 = math.tanh %1165 : vector<2x32xf32>
    %1167 = arith.mulf %1162, %1166 : vector<2x32xf32>
    %c0_380 = arith.constant 0 : index
    %c32_381 = arith.constant 32 : index
    %1168 = vector.load %arg16[%c0_380, %c32_381] : memref<14x64xf32, #tpu.memory_space<vmem>>, vector<2x32xf32>
    tpu.vector_store %arg16[%c0_380, %c32_381], %1167 {strides = array<i32>} : memref<14x64xf32, #tpu.memory_space<vmem>>, vector<2x32xf32>,
    %c0_382 = arith.constant 0 : index
    %c0_383 = arith.constant 0 : index
    %1169 = vector.load %arg16[%c0_382, %c0_383] : memref<14x64xf32, #tpu.memory_space<vmem>>, vector<14x64xf32>
    %c2_384 = arith.constant 2 : index
    %c0_385 = arith.constant 0 : index
    %c0_386 = arith.constant 0 : index
    %1170 = vector.load %arg6[%c2_384, %c0_385, %c0_386] : memref<3x64x256xf32, #tpu.memory_space<vmem>>, vector<1x64x256xf32>
    %1171 = vector.shape_cast %1170 : vector<1x64x256xf32> to vector<64x256xf32>
    %cst_387 = arith.constant dense<0.000000e+00> : vector<14x256xf32>
    %1172 = tpu.matmul %1169, %1171, %cst_387 {dimension_numbers = #tpu.dot_dimension_numbers<[1], [0], [0], [1], [0, 0, 1, 1], [], []>} : vector<14x64xf32>, vector<64x256xf32>, vector<14x256xf32> -> vector<14x256xf32>
    %c2_388 = arith.constant 2 : index
    %c0_389 = arith.constant 0 : index
    %c0_390 = arith.constant 0 : index
    %1173 = vector.load %arg8[%c2_388, %c0_389, %c0_390] : memref<3x1x256xf32, #tpu.memory_space<vmem>>, vector<1x1x256xf32>
    %1174 = vector.shape_cast %1173 : vector<1x1x256xf32> to vector<1x256xf32>
    %1175 = vector.broadcast %1174 : vector<1x256xf32> to vector<14x256xf32>
    %1176 = arith.addf %1172, %1175 : vector<14x256xf32>
    %c0_391 = arith.constant 0 : index
    %c0_392 = arith.constant 0 : index
    %1177 = vector.load %arg18[%c0_391, %c0_392] : memref<14x256xf32, #tpu.memory_space<vmem>>, vector<14x256xf32>
    tpu.vector_store %arg18[%c0_391, %c0_392], %1176 {strides = array<i32>} : memref<14x256xf32, #tpu.memory_space<vmem>>, vector<14x256xf32>,
    %c4_393 = arith.constant 4 : index
    %c0_394 = arith.constant 0 : index
    %c0_395 = arith.constant 0 : index
    %1178 = vector.load %arg7[%c4_393, %c0_394, %c0_395] : memref<6x32x128xf32, #tpu.memory_space<vmem>>, vector<1x32x128xf32>
    %1179 = vector.shape_cast %1178 : vector<1x32x128xf32> to vector<32x128xf32>
    %c4_396 = arith.constant 4 : index
    %c0_397 = arith.constant 0 : index
    %c0_398 = arith.constant 0 : index
    %1180 = vector.load %arg13[%c4_396, %c0_397, %c0_398] : memref<6x2x32xf32, #tpu.memory_space<vmem>>, vector<1x2x32xf32>
    %1181 = vector.shape_cast %1180 : vector<1x2x32xf32> to vector<2x32xf32>
    %c4_399 = arith.constant 4 : index
    %c0_400 = arith.constant 0 : index
    %c0_401 = arith.constant 0 : index
    %1182 = vector.load %arg14[%c4_399, %c0_400, %c0_401] : memref<6x2x32xf32, #tpu.memory_space<vmem>>, vector<1x2x32xf32>
    %1183 = vector.shape_cast %1182 : vector<1x2x32xf32> to vector<2x32xf32>
    %c0_402 = arith.constant 0 : index
    %c0_403 = arith.constant 0 : index
    %1184 = vector.load %arg18[%c0_402, %c0_403] : memref<14x256xf32, #tpu.memory_space<vmem>>, vector<2x128xf32>
    %cst_404 = arith.constant dense<0.000000e+00> : vector<2x128xf32>
    %1185 = tpu.matmul %1181, %1179, %cst_404 {dimension_numbers = #tpu.dot_dimension_numbers<[1], [0], [0], [1], [0, 0, 1, 1], [], []>} : vector<2x32xf32>, vector<32x128xf32>, vector<2x128xf32> -> vector<2x128xf32>
    %1186 = arith.addf %1184, %1185 : vector<2x128xf32>
    %1187 = vector.extract_strided_slice %1186 {offsets = [0, 0], sizes = [2, 32], strides = [1, 1]} : vector<2x128xf32> to vector<2x32xf32>
    %1188 = arith.negf %1187 : vector<2x32xf32>
    %1189 = math.exp %1188 : vector<2x32xf32>
    %cst_405 = arith.constant 1.000000e+00 : f32
    %1190 = vector.broadcast %cst_405 : f32 to vector<2x32xf32>
    %1191 = arith.addf %1190, %1189 : vector<2x32xf32>
    %1192 = arith.divf %1190, %1191 : vector<2x32xf32>
    %1193 = vector.extract_strided_slice %1186 {offsets = [0, 32], sizes = [2, 32], strides = [1, 1]} : vector<2x128xf32> to vector<2x32xf32>
    %1194 = arith.negf %1193 : vector<2x32xf32>
    %1195 = math.exp %1194 : vector<2x32xf32>
    %cst_406 = arith.constant 1.000000e+00 : f32
    %1196 = vector.broadcast %cst_406 : f32 to vector<2x32xf32>
    %1197 = arith.addf %1196, %1195 : vector<2x32xf32>
    %1198 = arith.divf %1196, %1197 : vector<2x32xf32>
    %1199 = vector.extract_strided_slice %1186 {offsets = [0, 64], sizes = [2, 32], strides = [1, 1]} : vector<2x128xf32> to vector<2x32xf32>
    %1200 = math.tanh %1199 : vector<2x32xf32>
    %1201 = vector.extract_strided_slice %1186 {offsets = [0, 96], sizes = [2, 32], strides = [1, 1]} : vector<2x128xf32> to vector<2x32xf32>
    %1202 = arith.negf %1201 : vector<2x32xf32>
    %1203 = math.exp %1202 : vector<2x32xf32>
    %cst_407 = arith.constant 1.000000e+00 : f32
    %1204 = vector.broadcast %cst_407 : f32 to vector<2x32xf32>
    %1205 = arith.addf %1204, %1203 : vector<2x32xf32>
    %1206 = arith.divf %1204, %1205 : vector<2x32xf32>
    %1207 = arith.mulf %1198, %1183 : vector<2x32xf32>
    %1208 = arith.mulf %1192, %1200 : vector<2x32xf32>
    %1209 = arith.addf %1207, %1208 : vector<2x32xf32>
    %1210 = math.tanh %1209 : vector<2x32xf32>
    %1211 = arith.mulf %1206, %1210 : vector<2x32xf32>
    %c0_408 = arith.constant 0 : index
    %c0_409 = arith.constant 0 : index
    %1212 = vector.load %arg17[%c0_408, %c0_409] : memref<14x64xf32, #tpu.memory_space<vmem>>, vector<2x32xf32>
    tpu.vector_store %arg17[%c0_408, %c0_409], %1211 {strides = array<i32>} : memref<14x64xf32, #tpu.memory_space<vmem>>, vector<2x32xf32>,
    %c2_410 = arith.constant 2 : index
    %c0_411 = arith.constant 0 : index
    %1213 = vector.load %arg18[%c2_410, %c0_411] : memref<14x256xf32, #tpu.memory_space<vmem>>, vector<2x128xf32>
    %cst_412 = arith.constant dense<0.000000e+00> : vector<2x128xf32>
    %1214 = tpu.matmul %1211, %1179, %cst_412 {dimension_numbers = #tpu.dot_dimension_numbers<[1], [0], [0], [1], [0, 0, 1, 1], [], []>} : vector<2x32xf32>, vector<32x128xf32>, vector<2x128xf32> -> vector<2x128xf32>
    %1215 = arith.addf %1213, %1214 : vector<2x128xf32>
    %1216 = vector.extract_strided_slice %1215 {offsets = [0, 0], sizes = [2, 32], strides = [1, 1]} : vector<2x128xf32> to vector<2x32xf32>
    %1217 = arith.negf %1216 : vector<2x32xf32>
    %1218 = math.exp %1217 : vector<2x32xf32>
    %cst_413 = arith.constant 1.000000e+00 : f32
    %1219 = vector.broadcast %cst_413 : f32 to vector<2x32xf32>
    %1220 = arith.addf %1219, %1218 : vector<2x32xf32>
    %1221 = arith.divf %1219, %1220 : vector<2x32xf32>
    %1222 = vector.extract_strided_slice %1215 {offsets = [0, 32], sizes = [2, 32], strides = [1, 1]} : vector<2x128xf32> to vector<2x32xf32>
    %1223 = arith.negf %1222 : vector<2x32xf32>
    %1224 = math.exp %1223 : vector<2x32xf32>
    %cst_414 = arith.constant 1.000000e+00 : f32
    %1225 = vector.broadcast %cst_414 : f32 to vector<2x32xf32>
    %1226 = arith.addf %1225, %1224 : vector<2x32xf32>
    %1227 = arith.divf %1225, %1226 : vector<2x32xf32>
    %1228 = vector.extract_strided_slice %1215 {offsets = [0, 64], sizes = [2, 32], strides = [1, 1]} : vector<2x128xf32> to vector<2x32xf32>
    %1229 = math.tanh %1228 : vector<2x32xf32>
    %1230 = vector.extract_strided_slice %1215 {offsets = [0, 96], sizes = [2, 32], strides = [1, 1]} : vector<2x128xf32> to vector<2x32xf32>
    %1231 = arith.negf %1230 : vector<2x32xf32>
    %1232 = math.exp %1231 : vector<2x32xf32>
    %cst_415 = arith.constant 1.000000e+00 : f32
    %1233 = vector.broadcast %cst_415 : f32 to vector<2x32xf32>
    %1234 = arith.addf %1233, %1232 : vector<2x32xf32>
    %1235 = arith.divf %1233, %1234 : vector<2x32xf32>
    %1236 = arith.mulf %1227, %1209 : vector<2x32xf32>
    %1237 = arith.mulf %1221, %1229 : vector<2x32xf32>
    %1238 = arith.addf %1236, %1237 : vector<2x32xf32>
    %1239 = math.tanh %1238 : vector<2x32xf32>
    %1240 = arith.mulf %1235, %1239 : vector<2x32xf32>
    %c2_416 = arith.constant 2 : index
    %c0_417 = arith.constant 0 : index
    %1241 = vector.load %arg17[%c2_416, %c0_417] : memref<14x64xf32, #tpu.memory_space<vmem>>, vector<2x32xf32>
    tpu.vector_store %arg17[%c2_416, %c0_417], %1240 {strides = array<i32>} : memref<14x64xf32, #tpu.memory_space<vmem>>, vector<2x32xf32>,
    %c4_418 = arith.constant 4 : index
    %c0_419 = arith.constant 0 : index
    %1242 = vector.load %arg18[%c4_418, %c0_419] : memref<14x256xf32, #tpu.memory_space<vmem>>, vector<2x128xf32>
    %cst_420 = arith.constant dense<0.000000e+00> : vector<2x128xf32>
    %1243 = tpu.matmul %1240, %1179, %cst_420 {dimension_numbers = #tpu.dot_dimension_numbers<[1], [0], [0], [1], [0, 0, 1, 1], [], []>} : vector<2x32xf32>, vector<32x128xf32>, vector<2x128xf32> -> vector<2x128xf32>
    %1244 = arith.addf %1242, %1243 : vector<2x128xf32>
    %1245 = vector.extract_strided_slice %1244 {offsets = [0, 0], sizes = [2, 32], strides = [1, 1]} : vector<2x128xf32> to vector<2x32xf32>
    %1246 = arith.negf %1245 : vector<2x32xf32>
    %1247 = math.exp %1246 : vector<2x32xf32>
    %cst_421 = arith.constant 1.000000e+00 : f32
    %1248 = vector.broadcast %cst_421 : f32 to vector<2x32xf32>
    %1249 = arith.addf %1248, %1247 : vector<2x32xf32>
    %1250 = arith.divf %1248, %1249 : vector<2x32xf32>
    %1251 = vector.extract_strided_slice %1244 {offsets = [0, 32], sizes = [2, 32], strides = [1, 1]} : vector<2x128xf32> to vector<2x32xf32>
    %1252 = arith.negf %1251 : vector<2x32xf32>
    %1253 = math.exp %1252 : vector<2x32xf32>
    %cst_422 = arith.constant 1.000000e+00 : f32
    %1254 = vector.broadcast %cst_422 : f32 to vector<2x32xf32>
    %1255 = arith.addf %1254, %1253 : vector<2x32xf32>
    %1256 = arith.divf %1254, %1255 : vector<2x32xf32>
    %1257 = vector.extract_strided_slice %1244 {offsets = [0, 64], sizes = [2, 32], strides = [1, 1]} : vector<2x128xf32> to vector<2x32xf32>
    %1258 = math.tanh %1257 : vector<2x32xf32>
    %1259 = vector.extract_strided_slice %1244 {offsets = [0, 96], sizes = [2, 32], strides = [1, 1]} : vector<2x128xf32> to vector<2x32xf32>
    %1260 = arith.negf %1259 : vector<2x32xf32>
    %1261 = math.exp %1260 : vector<2x32xf32>
    %cst_423 = arith.constant 1.000000e+00 : f32
    %1262 = vector.broadcast %cst_423 : f32 to vector<2x32xf32>
    %1263 = arith.addf %1262, %1261 : vector<2x32xf32>
    %1264 = arith.divf %1262, %1263 : vector<2x32xf32>
    %1265 = arith.mulf %1256, %1238 : vector<2x32xf32>
    %1266 = arith.mulf %1250, %1258 : vector<2x32xf32>
    %1267 = arith.addf %1265, %1266 : vector<2x32xf32>
    %1268 = math.tanh %1267 : vector<2x32xf32>
    %1269 = arith.mulf %1264, %1268 : vector<2x32xf32>
    %c4_424 = arith.constant 4 : index
    %c0_425 = arith.constant 0 : index
    %1270 = vector.load %arg17[%c4_424, %c0_425] : memref<14x64xf32, #tpu.memory_space<vmem>>, vector<2x32xf32>
    tpu.vector_store %arg17[%c4_424, %c0_425], %1269 {strides = array<i32>} : memref<14x64xf32, #tpu.memory_space<vmem>>, vector<2x32xf32>,
    %c6_426 = arith.constant 6 : index
    %c0_427 = arith.constant 0 : index
    %1271 = vector.load %arg18[%c6_426, %c0_427] : memref<14x256xf32, #tpu.memory_space<vmem>>, vector<2x128xf32>
    %cst_428 = arith.constant dense<0.000000e+00> : vector<2x128xf32>
    %1272 = tpu.matmul %1269, %1179, %cst_428 {dimension_numbers = #tpu.dot_dimension_numbers<[1], [0], [0], [1], [0, 0, 1, 1], [], []>} : vector<2x32xf32>, vector<32x128xf32>, vector<2x128xf32> -> vector<2x128xf32>
    %1273 = arith.addf %1271, %1272 : vector<2x128xf32>
    %1274 = vector.extract_strided_slice %1273 {offsets = [0, 0], sizes = [2, 32], strides = [1, 1]} : vector<2x128xf32> to vector<2x32xf32>
    %1275 = arith.negf %1274 : vector<2x32xf32>
    %1276 = math.exp %1275 : vector<2x32xf32>
    %cst_429 = arith.constant 1.000000e+00 : f32
    %1277 = vector.broadcast %cst_429 : f32 to vector<2x32xf32>
    %1278 = arith.addf %1277, %1276 : vector<2x32xf32>
    %1279 = arith.divf %1277, %1278 : vector<2x32xf32>
    %1280 = vector.extract_strided_slice %1273 {offsets = [0, 32], sizes = [2, 32], strides = [1, 1]} : vector<2x128xf32> to vector<2x32xf32>
    %1281 = arith.negf %1280 : vector<2x32xf32>
    %1282 = math.exp %1281 : vector<2x32xf32>
    %cst_430 = arith.constant 1.000000e+00 : f32
    %1283 = vector.broadcast %cst_430 : f32 to vector<2x32xf32>
    %1284 = arith.addf %1283, %1282 : vector<2x32xf32>
    %1285 = arith.divf %1283, %1284 : vector<2x32xf32>
    %1286 = vector.extract_strided_slice %1273 {offsets = [0, 64], sizes = [2, 32], strides = [1, 1]} : vector<2x128xf32> to vector<2x32xf32>
    %1287 = math.tanh %1286 : vector<2x32xf32>
    %1288 = vector.extract_strided_slice %1273 {offsets = [0, 96], sizes = [2, 32], strides = [1, 1]} : vector<2x128xf32> to vector<2x32xf32>
    %1289 = arith.negf %1288 : vector<2x32xf32>
    %1290 = math.exp %1289 : vector<2x32xf32>
    %cst_431 = arith.constant 1.000000e+00 : f32
    %1291 = vector.broadcast %cst_431 : f32 to vector<2x32xf32>
    %1292 = arith.addf %1291, %1290 : vector<2x32xf32>
    %1293 = arith.divf %1291, %1292 : vector<2x32xf32>
    %1294 = arith.mulf %1285, %1267 : vector<2x32xf32>
    %1295 = arith.mulf %1279, %1287 : vector<2x32xf32>
    %1296 = arith.addf %1294, %1295 : vector<2x32xf32>
    %1297 = math.tanh %1296 : vector<2x32xf32>
    %1298 = arith.mulf %1293, %1297 : vector<2x32xf32>
    %c6_432 = arith.constant 6 : index
    %c0_433 = arith.constant 0 : index
    %1299 = vector.load %arg17[%c6_432, %c0_433] : memref<14x64xf32, #tpu.memory_space<vmem>>, vector<2x32xf32>
    tpu.vector_store %arg17[%c6_432, %c0_433], %1298 {strides = array<i32>} : memref<14x64xf32, #tpu.memory_space<vmem>>, vector<2x32xf32>,
    %c8_434 = arith.constant 8 : index
    %c0_435 = arith.constant 0 : index
    %1300 = vector.load %arg18[%c8_434, %c0_435] : memref<14x256xf32, #tpu.memory_space<vmem>>, vector<2x128xf32>
    %cst_436 = arith.constant dense<0.000000e+00> : vector<2x128xf32>
    %1301 = tpu.matmul %1298, %1179, %cst_436 {dimension_numbers = #tpu.dot_dimension_numbers<[1], [0], [0], [1], [0, 0, 1, 1], [], []>} : vector<2x32xf32>, vector<32x128xf32>, vector<2x128xf32> -> vector<2x128xf32>
    %1302 = arith.addf %1300, %1301 : vector<2x128xf32>
    %1303 = vector.extract_strided_slice %1302 {offsets = [0, 0], sizes = [2, 32], strides = [1, 1]} : vector<2x128xf32> to vector<2x32xf32>
    %1304 = arith.negf %1303 : vector<2x32xf32>
    %1305 = math.exp %1304 : vector<2x32xf32>
    %cst_437 = arith.constant 1.000000e+00 : f32
    %1306 = vector.broadcast %cst_437 : f32 to vector<2x32xf32>
    %1307 = arith.addf %1306, %1305 : vector<2x32xf32>
    %1308 = arith.divf %1306, %1307 : vector<2x32xf32>
    %1309 = vector.extract_strided_slice %1302 {offsets = [0, 32], sizes = [2, 32], strides = [1, 1]} : vector<2x128xf32> to vector<2x32xf32>
    %1310 = arith.negf %1309 : vector<2x32xf32>
    %1311 = math.exp %1310 : vector<2x32xf32>
    %cst_438 = arith.constant 1.000000e+00 : f32
    %1312 = vector.broadcast %cst_438 : f32 to vector<2x32xf32>
    %1313 = arith.addf %1312, %1311 : vector<2x32xf32>
    %1314 = arith.divf %1312, %1313 : vector<2x32xf32>
    %1315 = vector.extract_strided_slice %1302 {offsets = [0, 64], sizes = [2, 32], strides = [1, 1]} : vector<2x128xf32> to vector<2x32xf32>
    %1316 = math.tanh %1315 : vector<2x32xf32>
    %1317 = vector.extract_strided_slice %1302 {offsets = [0, 96], sizes = [2, 32], strides = [1, 1]} : vector<2x128xf32> to vector<2x32xf32>
    %1318 = arith.negf %1317 : vector<2x32xf32>
    %1319 = math.exp %1318 : vector<2x32xf32>
    %cst_439 = arith.constant 1.000000e+00 : f32
    %1320 = vector.broadcast %cst_439 : f32 to vector<2x32xf32>
    %1321 = arith.addf %1320, %1319 : vector<2x32xf32>
    %1322 = arith.divf %1320, %1321 : vector<2x32xf32>
    %1323 = arith.mulf %1314, %1296 : vector<2x32xf32>
    %1324 = arith.mulf %1308, %1316 : vector<2x32xf32>
    %1325 = arith.addf %1323, %1324 : vector<2x32xf32>
    %1326 = math.tanh %1325 : vector<2x32xf32>
    %1327 = arith.mulf %1322, %1326 : vector<2x32xf32>
    %c8_440 = arith.constant 8 : index
    %c0_441 = arith.constant 0 : index
    %1328 = vector.load %arg17[%c8_440, %c0_441] : memref<14x64xf32, #tpu.memory_space<vmem>>, vector<2x32xf32>
    tpu.vector_store %arg17[%c8_440, %c0_441], %1327 {strides = array<i32>} : memref<14x64xf32, #tpu.memory_space<vmem>>, vector<2x32xf32>,
    %c10_442 = arith.constant 10 : index
    %c0_443 = arith.constant 0 : index
    %1329 = vector.load %arg18[%c10_442, %c0_443] : memref<14x256xf32, #tpu.memory_space<vmem>>, vector<2x128xf32>
    %cst_444 = arith.constant dense<0.000000e+00> : vector<2x128xf32>
    %1330 = tpu.matmul %1327, %1179, %cst_444 {dimension_numbers = #tpu.dot_dimension_numbers<[1], [0], [0], [1], [0, 0, 1, 1], [], []>} : vector<2x32xf32>, vector<32x128xf32>, vector<2x128xf32> -> vector<2x128xf32>
    %1331 = arith.addf %1329, %1330 : vector<2x128xf32>
    %1332 = vector.extract_strided_slice %1331 {offsets = [0, 0], sizes = [2, 32], strides = [1, 1]} : vector<2x128xf32> to vector<2x32xf32>
    %1333 = arith.negf %1332 : vector<2x32xf32>
    %1334 = math.exp %1333 : vector<2x32xf32>
    %cst_445 = arith.constant 1.000000e+00 : f32
    %1335 = vector.broadcast %cst_445 : f32 to vector<2x32xf32>
    %1336 = arith.addf %1335, %1334 : vector<2x32xf32>
    %1337 = arith.divf %1335, %1336 : vector<2x32xf32>
    %1338 = vector.extract_strided_slice %1331 {offsets = [0, 32], sizes = [2, 32], strides = [1, 1]} : vector<2x128xf32> to vector<2x32xf32>
    %1339 = arith.negf %1338 : vector<2x32xf32>
    %1340 = math.exp %1339 : vector<2x32xf32>
    %cst_446 = arith.constant 1.000000e+00 : f32
    %1341 = vector.broadcast %cst_446 : f32 to vector<2x32xf32>
    %1342 = arith.addf %1341, %1340 : vector<2x32xf32>
    %1343 = arith.divf %1341, %1342 : vector<2x32xf32>
    %1344 = vector.extract_strided_slice %1331 {offsets = [0, 64], sizes = [2, 32], strides = [1, 1]} : vector<2x128xf32> to vector<2x32xf32>
    %1345 = math.tanh %1344 : vector<2x32xf32>
    %1346 = vector.extract_strided_slice %1331 {offsets = [0, 96], sizes = [2, 32], strides = [1, 1]} : vector<2x128xf32> to vector<2x32xf32>
    %1347 = arith.negf %1346 : vector<2x32xf32>
    %1348 = math.exp %1347 : vector<2x32xf32>
    %cst_447 = arith.constant 1.000000e+00 : f32
    %1349 = vector.broadcast %cst_447 : f32 to vector<2x32xf32>
    %1350 = arith.addf %1349, %1348 : vector<2x32xf32>
    %1351 = arith.divf %1349, %1350 : vector<2x32xf32>
    %1352 = arith.mulf %1343, %1325 : vector<2x32xf32>
    %1353 = arith.mulf %1337, %1345 : vector<2x32xf32>
    %1354 = arith.addf %1352, %1353 : vector<2x32xf32>
    %1355 = math.tanh %1354 : vector<2x32xf32>
    %1356 = arith.mulf %1351, %1355 : vector<2x32xf32>
    %c10_448 = arith.constant 10 : index
    %c0_449 = arith.constant 0 : index
    %1357 = vector.load %arg17[%c10_448, %c0_449] : memref<14x64xf32, #tpu.memory_space<vmem>>, vector<2x32xf32>
    tpu.vector_store %arg17[%c10_448, %c0_449], %1356 {strides = array<i32>} : memref<14x64xf32, #tpu.memory_space<vmem>>, vector<2x32xf32>,
    %c12_450 = arith.constant 12 : index
    %c0_451 = arith.constant 0 : index
    %1358 = vector.load %arg18[%c12_450, %c0_451] : memref<14x256xf32, #tpu.memory_space<vmem>>, vector<2x128xf32>
    %cst_452 = arith.constant dense<0.000000e+00> : vector<2x128xf32>
    %1359 = tpu.matmul %1356, %1179, %cst_452 {dimension_numbers = #tpu.dot_dimension_numbers<[1], [0], [0], [1], [0, 0, 1, 1], [], []>} : vector<2x32xf32>, vector<32x128xf32>, vector<2x128xf32> -> vector<2x128xf32>
    %1360 = arith.addf %1358, %1359 : vector<2x128xf32>
    %1361 = vector.extract_strided_slice %1360 {offsets = [0, 0], sizes = [2, 32], strides = [1, 1]} : vector<2x128xf32> to vector<2x32xf32>
    %1362 = arith.negf %1361 : vector<2x32xf32>
    %1363 = math.exp %1362 : vector<2x32xf32>
    %cst_453 = arith.constant 1.000000e+00 : f32
    %1364 = vector.broadcast %cst_453 : f32 to vector<2x32xf32>
    %1365 = arith.addf %1364, %1363 : vector<2x32xf32>
    %1366 = arith.divf %1364, %1365 : vector<2x32xf32>
    %1367 = vector.extract_strided_slice %1360 {offsets = [0, 32], sizes = [2, 32], strides = [1, 1]} : vector<2x128xf32> to vector<2x32xf32>
    %1368 = arith.negf %1367 : vector<2x32xf32>
    %1369 = math.exp %1368 : vector<2x32xf32>
    %cst_454 = arith.constant 1.000000e+00 : f32
    %1370 = vector.broadcast %cst_454 : f32 to vector<2x32xf32>
    %1371 = arith.addf %1370, %1369 : vector<2x32xf32>
    %1372 = arith.divf %1370, %1371 : vector<2x32xf32>
    %1373 = vector.extract_strided_slice %1360 {offsets = [0, 64], sizes = [2, 32], strides = [1, 1]} : vector<2x128xf32> to vector<2x32xf32>
    %1374 = math.tanh %1373 : vector<2x32xf32>
    %1375 = vector.extract_strided_slice %1360 {offsets = [0, 96], sizes = [2, 32], strides = [1, 1]} : vector<2x128xf32> to vector<2x32xf32>
    %1376 = arith.negf %1375 : vector<2x32xf32>
    %1377 = math.exp %1376 : vector<2x32xf32>
    %cst_455 = arith.constant 1.000000e+00 : f32
    %1378 = vector.broadcast %cst_455 : f32 to vector<2x32xf32>
    %1379 = arith.addf %1378, %1377 : vector<2x32xf32>
    %1380 = arith.divf %1378, %1379 : vector<2x32xf32>
    %1381 = arith.mulf %1372, %1354 : vector<2x32xf32>
    %1382 = arith.mulf %1366, %1374 : vector<2x32xf32>
    %1383 = arith.addf %1381, %1382 : vector<2x32xf32>
    %1384 = math.tanh %1383 : vector<2x32xf32>
    %1385 = arith.mulf %1380, %1384 : vector<2x32xf32>
    %c12_456 = arith.constant 12 : index
    %c0_457 = arith.constant 0 : index
    %1386 = vector.load %arg17[%c12_456, %c0_457] : memref<14x64xf32, #tpu.memory_space<vmem>>, vector<2x32xf32>
    tpu.vector_store %arg17[%c12_456, %c0_457], %1385 {strides = array<i32>} : memref<14x64xf32, #tpu.memory_space<vmem>>, vector<2x32xf32>,
    %c5 = arith.constant 5 : index
    %c0_458 = arith.constant 0 : index
    %c0_459 = arith.constant 0 : index
    %1387 = vector.load %arg7[%c5, %c0_458, %c0_459] : memref<6x32x128xf32, #tpu.memory_space<vmem>>, vector<1x32x128xf32>
    %1388 = vector.shape_cast %1387 : vector<1x32x128xf32> to vector<32x128xf32>
    %c5_460 = arith.constant 5 : index
    %c0_461 = arith.constant 0 : index
    %c0_462 = arith.constant 0 : index
    %1389 = vector.load %arg13[%c5_460, %c0_461, %c0_462] : memref<6x2x32xf32, #tpu.memory_space<vmem>>, vector<1x2x32xf32>
    %1390 = vector.shape_cast %1389 : vector<1x2x32xf32> to vector<2x32xf32>
    %c5_463 = arith.constant 5 : index
    %c0_464 = arith.constant 0 : index
    %c0_465 = arith.constant 0 : index
    %1391 = vector.load %arg14[%c5_463, %c0_464, %c0_465] : memref<6x2x32xf32, #tpu.memory_space<vmem>>, vector<1x2x32xf32>
    %1392 = vector.shape_cast %1391 : vector<1x2x32xf32> to vector<2x32xf32>
    %c12_466 = arith.constant 12 : index
    %c128_467 = arith.constant 128 : index
    %1393 = vector.load %arg18[%c12_466, %c128_467] : memref<14x256xf32, #tpu.memory_space<vmem>>, vector<2x128xf32>
    %cst_468 = arith.constant dense<0.000000e+00> : vector<2x128xf32>
    %1394 = tpu.matmul %1390, %1388, %cst_468 {dimension_numbers = #tpu.dot_dimension_numbers<[1], [0], [0], [1], [0, 0, 1, 1], [], []>} : vector<2x32xf32>, vector<32x128xf32>, vector<2x128xf32> -> vector<2x128xf32>
    %1395 = arith.addf %1393, %1394 : vector<2x128xf32>
    %1396 = vector.extract_strided_slice %1395 {offsets = [0, 0], sizes = [2, 32], strides = [1, 1]} : vector<2x128xf32> to vector<2x32xf32>
    %1397 = arith.negf %1396 : vector<2x32xf32>
    %1398 = math.exp %1397 : vector<2x32xf32>
    %cst_469 = arith.constant 1.000000e+00 : f32
    %1399 = vector.broadcast %cst_469 : f32 to vector<2x32xf32>
    %1400 = arith.addf %1399, %1398 : vector<2x32xf32>
    %1401 = arith.divf %1399, %1400 : vector<2x32xf32>
    %1402 = vector.extract_strided_slice %1395 {offsets = [0, 32], sizes = [2, 32], strides = [1, 1]} : vector<2x128xf32> to vector<2x32xf32>
    %1403 = arith.negf %1402 : vector<2x32xf32>
    %1404 = math.exp %1403 : vector<2x32xf32>
    %cst_470 = arith.constant 1.000000e+00 : f32
    %1405 = vector.broadcast %cst_470 : f32 to vector<2x32xf32>
    %1406 = arith.addf %1405, %1404 : vector<2x32xf32>
    %1407 = arith.divf %1405, %1406 : vector<2x32xf32>
    %1408 = vector.extract_strided_slice %1395 {offsets = [0, 64], sizes = [2, 32], strides = [1, 1]} : vector<2x128xf32> to vector<2x32xf32>
    %1409 = math.tanh %1408 : vector<2x32xf32>
    %1410 = vector.extract_strided_slice %1395 {offsets = [0, 96], sizes = [2, 32], strides = [1, 1]} : vector<2x128xf32> to vector<2x32xf32>
    %1411 = arith.negf %1410 : vector<2x32xf32>
    %1412 = math.exp %1411 : vector<2x32xf32>
    %cst_471 = arith.constant 1.000000e+00 : f32
    %1413 = vector.broadcast %cst_471 : f32 to vector<2x32xf32>
    %1414 = arith.addf %1413, %1412 : vector<2x32xf32>
    %1415 = arith.divf %1413, %1414 : vector<2x32xf32>
    %1416 = arith.mulf %1407, %1392 : vector<2x32xf32>
    %1417 = arith.mulf %1401, %1409 : vector<2x32xf32>
    %1418 = arith.addf %1416, %1417 : vector<2x32xf32>
    %1419 = math.tanh %1418 : vector<2x32xf32>
    %1420 = arith.mulf %1415, %1419 : vector<2x32xf32>
    %c12_472 = arith.constant 12 : index
    %c32_473 = arith.constant 32 : index
    %1421 = vector.load %arg17[%c12_472, %c32_473] : memref<14x64xf32, #tpu.memory_space<vmem>>, vector<2x32xf32>
    tpu.vector_store %arg17[%c12_472, %c32_473], %1420 {strides = array<i32>} : memref<14x64xf32, #tpu.memory_space<vmem>>, vector<2x32xf32>,
    %c10_474 = arith.constant 10 : index
    %c128_475 = arith.constant 128 : index
    %1422 = vector.load %arg18[%c10_474, %c128_475] : memref<14x256xf32, #tpu.memory_space<vmem>>, vector<2x128xf32>
    %cst_476 = arith.constant dense<0.000000e+00> : vector<2x128xf32>
    %1423 = tpu.matmul %1420, %1388, %cst_476 {dimension_numbers = #tpu.dot_dimension_numbers<[1], [0], [0], [1], [0, 0, 1, 1], [], []>} : vector<2x32xf32>, vector<32x128xf32>, vector<2x128xf32> -> vector<2x128xf32>
    %1424 = arith.addf %1422, %1423 : vector<2x128xf32>
    %1425 = vector.extract_strided_slice %1424 {offsets = [0, 0], sizes = [2, 32], strides = [1, 1]} : vector<2x128xf32> to vector<2x32xf32>
    %1426 = arith.negf %1425 : vector<2x32xf32>
    %1427 = math.exp %1426 : vector<2x32xf32>
    %cst_477 = arith.constant 1.000000e+00 : f32
    %1428 = vector.broadcast %cst_477 : f32 to vector<2x32xf32>
    %1429 = arith.addf %1428, %1427 : vector<2x32xf32>
    %1430 = arith.divf %1428, %1429 : vector<2x32xf32>
    %1431 = vector.extract_strided_slice %1424 {offsets = [0, 32], sizes = [2, 32], strides = [1, 1]} : vector<2x128xf32> to vector<2x32xf32>
    %1432 = arith.negf %1431 : vector<2x32xf32>
    %1433 = math.exp %1432 : vector<2x32xf32>
    %cst_478 = arith.constant 1.000000e+00 : f32
    %1434 = vector.broadcast %cst_478 : f32 to vector<2x32xf32>
    %1435 = arith.addf %1434, %1433 : vector<2x32xf32>
    %1436 = arith.divf %1434, %1435 : vector<2x32xf32>
    %1437 = vector.extract_strided_slice %1424 {offsets = [0, 64], sizes = [2, 32], strides = [1, 1]} : vector<2x128xf32> to vector<2x32xf32>
    %1438 = math.tanh %1437 : vector<2x32xf32>
    %1439 = vector.extract_strided_slice %1424 {offsets = [0, 96], sizes = [2, 32], strides = [1, 1]} : vector<2x128xf32> to vector<2x32xf32>
    %1440 = arith.negf %1439 : vector<2x32xf32>
    %1441 = math.exp %1440 : vector<2x32xf32>
    %cst_479 = arith.constant 1.000000e+00 : f32
    %1442 = vector.broadcast %cst_479 : f32 to vector<2x32xf32>
    %1443 = arith.addf %1442, %1441 : vector<2x32xf32>
    %1444 = arith.divf %1442, %1443 : vector<2x32xf32>
    %1445 = arith.mulf %1436, %1418 : vector<2x32xf32>
    %1446 = arith.mulf %1430, %1438 : vector<2x32xf32>
    %1447 = arith.addf %1445, %1446 : vector<2x32xf32>
    %1448 = math.tanh %1447 : vector<2x32xf32>
    %1449 = arith.mulf %1444, %1448 : vector<2x32xf32>
    %c10_480 = arith.constant 10 : index
    %c32_481 = arith.constant 32 : index
    %1450 = vector.load %arg17[%c10_480, %c32_481] : memref<14x64xf32, #tpu.memory_space<vmem>>, vector<2x32xf32>
    tpu.vector_store %arg17[%c10_480, %c32_481], %1449 {strides = array<i32>} : memref<14x64xf32, #tpu.memory_space<vmem>>, vector<2x32xf32>,
    %c8_482 = arith.constant 8 : index
    %c128_483 = arith.constant 128 : index
    %1451 = vector.load %arg18[%c8_482, %c128_483] : memref<14x256xf32, #tpu.memory_space<vmem>>, vector<2x128xf32>
    %cst_484 = arith.constant dense<0.000000e+00> : vector<2x128xf32>
    %1452 = tpu.matmul %1449, %1388, %cst_484 {dimension_numbers = #tpu.dot_dimension_numbers<[1], [0], [0], [1], [0, 0, 1, 1], [], []>} : vector<2x32xf32>, vector<32x128xf32>, vector<2x128xf32> -> vector<2x128xf32>
    %1453 = arith.addf %1451, %1452 : vector<2x128xf32>
    %1454 = vector.extract_strided_slice %1453 {offsets = [0, 0], sizes = [2, 32], strides = [1, 1]} : vector<2x128xf32> to vector<2x32xf32>
    %1455 = arith.negf %1454 : vector<2x32xf32>
    %1456 = math.exp %1455 : vector<2x32xf32>
    %cst_485 = arith.constant 1.000000e+00 : f32
    %1457 = vector.broadcast %cst_485 : f32 to vector<2x32xf32>
    %1458 = arith.addf %1457, %1456 : vector<2x32xf32>
    %1459 = arith.divf %1457, %1458 : vector<2x32xf32>
    %1460 = vector.extract_strided_slice %1453 {offsets = [0, 32], sizes = [2, 32], strides = [1, 1]} : vector<2x128xf32> to vector<2x32xf32>
    %1461 = arith.negf %1460 : vector<2x32xf32>
    %1462 = math.exp %1461 : vector<2x32xf32>
    %cst_486 = arith.constant 1.000000e+00 : f32
    %1463 = vector.broadcast %cst_486 : f32 to vector<2x32xf32>
    %1464 = arith.addf %1463, %1462 : vector<2x32xf32>
    %1465 = arith.divf %1463, %1464 : vector<2x32xf32>
    %1466 = vector.extract_strided_slice %1453 {offsets = [0, 64], sizes = [2, 32], strides = [1, 1]} : vector<2x128xf32> to vector<2x32xf32>
    %1467 = math.tanh %1466 : vector<2x32xf32>
    %1468 = vector.extract_strided_slice %1453 {offsets = [0, 96], sizes = [2, 32], strides = [1, 1]} : vector<2x128xf32> to vector<2x32xf32>
    %1469 = arith.negf %1468 : vector<2x32xf32>
    %1470 = math.exp %1469 : vector<2x32xf32>
    %cst_487 = arith.constant 1.000000e+00 : f32
    %1471 = vector.broadcast %cst_487 : f32 to vector<2x32xf32>
    %1472 = arith.addf %1471, %1470 : vector<2x32xf32>
    %1473 = arith.divf %1471, %1472 : vector<2x32xf32>
    %1474 = arith.mulf %1465, %1447 : vector<2x32xf32>
    %1475 = arith.mulf %1459, %1467 : vector<2x32xf32>
    %1476 = arith.addf %1474, %1475 : vector<2x32xf32>
    %1477 = math.tanh %1476 : vector<2x32xf32>
    %1478 = arith.mulf %1473, %1477 : vector<2x32xf32>
    %c8_488 = arith.constant 8 : index
    %c32_489 = arith.constant 32 : index
    %1479 = vector.load %arg17[%c8_488, %c32_489] : memref<14x64xf32, #tpu.memory_space<vmem>>, vector<2x32xf32>
    tpu.vector_store %arg17[%c8_488, %c32_489], %1478 {strides = array<i32>} : memref<14x64xf32, #tpu.memory_space<vmem>>, vector<2x32xf32>,
    %c6_490 = arith.constant 6 : index
    %c128_491 = arith.constant 128 : index
    %1480 = vector.load %arg18[%c6_490, %c128_491] : memref<14x256xf32, #tpu.memory_space<vmem>>, vector<2x128xf32>
    %cst_492 = arith.constant dense<0.000000e+00> : vector<2x128xf32>
    %1481 = tpu.matmul %1478, %1388, %cst_492 {dimension_numbers = #tpu.dot_dimension_numbers<[1], [0], [0], [1], [0, 0, 1, 1], [], []>} : vector<2x32xf32>, vector<32x128xf32>, vector<2x128xf32> -> vector<2x128xf32>
    %1482 = arith.addf %1480, %1481 : vector<2x128xf32>
    %1483 = vector.extract_strided_slice %1482 {offsets = [0, 0], sizes = [2, 32], strides = [1, 1]} : vector<2x128xf32> to vector<2x32xf32>
    %1484 = arith.negf %1483 : vector<2x32xf32>
    %1485 = math.exp %1484 : vector<2x32xf32>
    %cst_493 = arith.constant 1.000000e+00 : f32
    %1486 = vector.broadcast %cst_493 : f32 to vector<2x32xf32>
    %1487 = arith.addf %1486, %1485 : vector<2x32xf32>
    %1488 = arith.divf %1486, %1487 : vector<2x32xf32>
    %1489 = vector.extract_strided_slice %1482 {offsets = [0, 32], sizes = [2, 32], strides = [1, 1]} : vector<2x128xf32> to vector<2x32xf32>
    %1490 = arith.negf %1489 : vector<2x32xf32>
    %1491 = math.exp %1490 : vector<2x32xf32>
    %cst_494 = arith.constant 1.000000e+00 : f32
    %1492 = vector.broadcast %cst_494 : f32 to vector<2x32xf32>
    %1493 = arith.addf %1492, %1491 : vector<2x32xf32>
    %1494 = arith.divf %1492, %1493 : vector<2x32xf32>
    %1495 = vector.extract_strided_slice %1482 {offsets = [0, 64], sizes = [2, 32], strides = [1, 1]} : vector<2x128xf32> to vector<2x32xf32>
    %1496 = math.tanh %1495 : vector<2x32xf32>
    %1497 = vector.extract_strided_slice %1482 {offsets = [0, 96], sizes = [2, 32], strides = [1, 1]} : vector<2x128xf32> to vector<2x32xf32>
    %1498 = arith.negf %1497 : vector<2x32xf32>
    %1499 = math.exp %1498 : vector<2x32xf32>
    %cst_495 = arith.constant 1.000000e+00 : f32
    %1500 = vector.broadcast %cst_495 : f32 to vector<2x32xf32>
    %1501 = arith.addf %1500, %1499 : vector<2x32xf32>
    %1502 = arith.divf %1500, %1501 : vector<2x32xf32>
    %1503 = arith.mulf %1494, %1476 : vector<2x32xf32>
    %1504 = arith.mulf %1488, %1496 : vector<2x32xf32>
    %1505 = arith.addf %1503, %1504 : vector<2x32xf32>
    %1506 = math.tanh %1505 : vector<2x32xf32>
    %1507 = arith.mulf %1502, %1506 : vector<2x32xf32>
    %c6_496 = arith.constant 6 : index
    %c32_497 = arith.constant 32 : index
    %1508 = vector.load %arg17[%c6_496, %c32_497] : memref<14x64xf32, #tpu.memory_space<vmem>>, vector<2x32xf32>
    tpu.vector_store %arg17[%c6_496, %c32_497], %1507 {strides = array<i32>} : memref<14x64xf32, #tpu.memory_space<vmem>>, vector<2x32xf32>,
    %c4_498 = arith.constant 4 : index
    %c128_499 = arith.constant 128 : index
    %1509 = vector.load %arg18[%c4_498, %c128_499] : memref<14x256xf32, #tpu.memory_space<vmem>>, vector<2x128xf32>
    %cst_500 = arith.constant dense<0.000000e+00> : vector<2x128xf32>
    %1510 = tpu.matmul %1507, %1388, %cst_500 {dimension_numbers = #tpu.dot_dimension_numbers<[1], [0], [0], [1], [0, 0, 1, 1], [], []>} : vector<2x32xf32>, vector<32x128xf32>, vector<2x128xf32> -> vector<2x128xf32>
    %1511 = arith.addf %1509, %1510 : vector<2x128xf32>
    %1512 = vector.extract_strided_slice %1511 {offsets = [0, 0], sizes = [2, 32], strides = [1, 1]} : vector<2x128xf32> to vector<2x32xf32>
    %1513 = arith.negf %1512 : vector<2x32xf32>
    %1514 = math.exp %1513 : vector<2x32xf32>
    %cst_501 = arith.constant 1.000000e+00 : f32
    %1515 = vector.broadcast %cst_501 : f32 to vector<2x32xf32>
    %1516 = arith.addf %1515, %1514 : vector<2x32xf32>
    %1517 = arith.divf %1515, %1516 : vector<2x32xf32>
    %1518 = vector.extract_strided_slice %1511 {offsets = [0, 32], sizes = [2, 32], strides = [1, 1]} : vector<2x128xf32> to vector<2x32xf32>
    %1519 = arith.negf %1518 : vector<2x32xf32>
    %1520 = math.exp %1519 : vector<2x32xf32>
    %cst_502 = arith.constant 1.000000e+00 : f32
    %1521 = vector.broadcast %cst_502 : f32 to vector<2x32xf32>
    %1522 = arith.addf %1521, %1520 : vector<2x32xf32>
    %1523 = arith.divf %1521, %1522 : vector<2x32xf32>
    %1524 = vector.extract_strided_slice %1511 {offsets = [0, 64], sizes = [2, 32], strides = [1, 1]} : vector<2x128xf32> to vector<2x32xf32>
    %1525 = math.tanh %1524 : vector<2x32xf32>
    %1526 = vector.extract_strided_slice %1511 {offsets = [0, 96], sizes = [2, 32], strides = [1, 1]} : vector<2x128xf32> to vector<2x32xf32>
    %1527 = arith.negf %1526 : vector<2x32xf32>
    %1528 = math.exp %1527 : vector<2x32xf32>
    %cst_503 = arith.constant 1.000000e+00 : f32
    %1529 = vector.broadcast %cst_503 : f32 to vector<2x32xf32>
    %1530 = arith.addf %1529, %1528 : vector<2x32xf32>
    %1531 = arith.divf %1529, %1530 : vector<2x32xf32>
    %1532 = arith.mulf %1523, %1505 : vector<2x32xf32>
    %1533 = arith.mulf %1517, %1525 : vector<2x32xf32>
    %1534 = arith.addf %1532, %1533 : vector<2x32xf32>
    %1535 = math.tanh %1534 : vector<2x32xf32>
    %1536 = arith.mulf %1531, %1535 : vector<2x32xf32>
    %c4_504 = arith.constant 4 : index
    %c32_505 = arith.constant 32 : index
    %1537 = vector.load %arg17[%c4_504, %c32_505] : memref<14x64xf32, #tpu.memory_space<vmem>>, vector<2x32xf32>
    tpu.vector_store %arg17[%c4_504, %c32_505], %1536 {strides = array<i32>} : memref<14x64xf32, #tpu.memory_space<vmem>>, vector<2x32xf32>,
    %c2_506 = arith.constant 2 : index
    %c128_507 = arith.constant 128 : index
    %1538 = vector.load %arg18[%c2_506, %c128_507] : memref<14x256xf32, #tpu.memory_space<vmem>>, vector<2x128xf32>
    %cst_508 = arith.constant dense<0.000000e+00> : vector<2x128xf32>
    %1539 = tpu.matmul %1536, %1388, %cst_508 {dimension_numbers = #tpu.dot_dimension_numbers<[1], [0], [0], [1], [0, 0, 1, 1], [], []>} : vector<2x32xf32>, vector<32x128xf32>, vector<2x128xf32> -> vector<2x128xf32>
    %1540 = arith.addf %1538, %1539 : vector<2x128xf32>
    %1541 = vector.extract_strided_slice %1540 {offsets = [0, 0], sizes = [2, 32], strides = [1, 1]} : vector<2x128xf32> to vector<2x32xf32>
    %1542 = arith.negf %1541 : vector<2x32xf32>
    %1543 = math.exp %1542 : vector<2x32xf32>
    %cst_509 = arith.constant 1.000000e+00 : f32
    %1544 = vector.broadcast %cst_509 : f32 to vector<2x32xf32>
    %1545 = arith.addf %1544, %1543 : vector<2x32xf32>
    %1546 = arith.divf %1544, %1545 : vector<2x32xf32>
    %1547 = vector.extract_strided_slice %1540 {offsets = [0, 32], sizes = [2, 32], strides = [1, 1]} : vector<2x128xf32> to vector<2x32xf32>
    %1548 = arith.negf %1547 : vector<2x32xf32>
    %1549 = math.exp %1548 : vector<2x32xf32>
    %cst_510 = arith.constant 1.000000e+00 : f32
    %1550 = vector.broadcast %cst_510 : f32 to vector<2x32xf32>
    %1551 = arith.addf %1550, %1549 : vector<2x32xf32>
    %1552 = arith.divf %1550, %1551 : vector<2x32xf32>
    %1553 = vector.extract_strided_slice %1540 {offsets = [0, 64], sizes = [2, 32], strides = [1, 1]} : vector<2x128xf32> to vector<2x32xf32>
    %1554 = math.tanh %1553 : vector<2x32xf32>
    %1555 = vector.extract_strided_slice %1540 {offsets = [0, 96], sizes = [2, 32], strides = [1, 1]} : vector<2x128xf32> to vector<2x32xf32>
    %1556 = arith.negf %1555 : vector<2x32xf32>
    %1557 = math.exp %1556 : vector<2x32xf32>
    %cst_511 = arith.constant 1.000000e+00 : f32
    %1558 = vector.broadcast %cst_511 : f32 to vector<2x32xf32>
    %1559 = arith.addf %1558, %1557 : vector<2x32xf32>
    %1560 = arith.divf %1558, %1559 : vector<2x32xf32>
    %1561 = arith.mulf %1552, %1534 : vector<2x32xf32>
    %1562 = arith.mulf %1546, %1554 : vector<2x32xf32>
    %1563 = arith.addf %1561, %1562 : vector<2x32xf32>
    %1564 = math.tanh %1563 : vector<2x32xf32>
    %1565 = arith.mulf %1560, %1564 : vector<2x32xf32>
    %c2_512 = arith.constant 2 : index
    %c32_513 = arith.constant 32 : index
    %1566 = vector.load %arg17[%c2_512, %c32_513] : memref<14x64xf32, #tpu.memory_space<vmem>>, vector<2x32xf32>
    tpu.vector_store %arg17[%c2_512, %c32_513], %1565 {strides = array<i32>} : memref<14x64xf32, #tpu.memory_space<vmem>>, vector<2x32xf32>,
    %c0_514 = arith.constant 0 : index
    %c128_515 = arith.constant 128 : index
    %1567 = vector.load %arg18[%c0_514, %c128_515] : memref<14x256xf32, #tpu.memory_space<vmem>>, vector<2x128xf32>
    %cst_516 = arith.constant dense<0.000000e+00> : vector<2x128xf32>
    %1568 = tpu.matmul %1565, %1388, %cst_516 {dimension_numbers = #tpu.dot_dimension_numbers<[1], [0], [0], [1], [0, 0, 1, 1], [], []>} : vector<2x32xf32>, vector<32x128xf32>, vector<2x128xf32> -> vector<2x128xf32>
    %1569 = arith.addf %1567, %1568 : vector<2x128xf32>
    %1570 = vector.extract_strided_slice %1569 {offsets = [0, 0], sizes = [2, 32], strides = [1, 1]} : vector<2x128xf32> to vector<2x32xf32>
    %1571 = arith.negf %1570 : vector<2x32xf32>
    %1572 = math.exp %1571 : vector<2x32xf32>
    %cst_517 = arith.constant 1.000000e+00 : f32
    %1573 = vector.broadcast %cst_517 : f32 to vector<2x32xf32>
    %1574 = arith.addf %1573, %1572 : vector<2x32xf32>
    %1575 = arith.divf %1573, %1574 : vector<2x32xf32>
    %1576 = vector.extract_strided_slice %1569 {offsets = [0, 32], sizes = [2, 32], strides = [1, 1]} : vector<2x128xf32> to vector<2x32xf32>
    %1577 = arith.negf %1576 : vector<2x32xf32>
    %1578 = math.exp %1577 : vector<2x32xf32>
    %cst_518 = arith.constant 1.000000e+00 : f32
    %1579 = vector.broadcast %cst_518 : f32 to vector<2x32xf32>
    %1580 = arith.addf %1579, %1578 : vector<2x32xf32>
    %1581 = arith.divf %1579, %1580 : vector<2x32xf32>
    %1582 = vector.extract_strided_slice %1569 {offsets = [0, 64], sizes = [2, 32], strides = [1, 1]} : vector<2x128xf32> to vector<2x32xf32>
    %1583 = math.tanh %1582 : vector<2x32xf32>
    %1584 = vector.extract_strided_slice %1569 {offsets = [0, 96], sizes = [2, 32], strides = [1, 1]} : vector<2x128xf32> to vector<2x32xf32>
    %1585 = arith.negf %1584 : vector<2x32xf32>
    %1586 = math.exp %1585 : vector<2x32xf32>
    %cst_519 = arith.constant 1.000000e+00 : f32
    %1587 = vector.broadcast %cst_519 : f32 to vector<2x32xf32>
    %1588 = arith.addf %1587, %1586 : vector<2x32xf32>
    %1589 = arith.divf %1587, %1588 : vector<2x32xf32>
    %1590 = arith.mulf %1581, %1563 : vector<2x32xf32>
    %1591 = arith.mulf %1575, %1583 : vector<2x32xf32>
    %1592 = arith.addf %1590, %1591 : vector<2x32xf32>
    %1593 = math.tanh %1592 : vector<2x32xf32>
    %1594 = arith.mulf %1589, %1593 : vector<2x32xf32>
    %c0_520 = arith.constant 0 : index
    %c32_521 = arith.constant 32 : index
    %1595 = vector.load %arg17[%c0_520, %c32_521] : memref<14x64xf32, #tpu.memory_space<vmem>>, vector<2x32xf32>
    tpu.vector_store %arg17[%c0_520, %c32_521], %1594 {strides = array<i32>} : memref<14x64xf32, #tpu.memory_space<vmem>>, vector<2x32xf32>,
    %cst_522 = arith.constant 0.000000e+00 : f32
    %1596 = vector.broadcast %cst_522 : f32 to vector<2x64xf32>
    %c0_523 = arith.constant 0 : index
    %c0_524 = arith.constant 0 : index
    %1597 = vector.load %arg17[%c0_523, %c0_524] : memref<14x64xf32, #tpu.memory_space<vmem>>, vector<2x64xf32>
    %1598 = arith.addf %1596, %1597 : vector<2x64xf32>
    %c2_525 = arith.constant 2 : index
    %c0_526 = arith.constant 0 : index
    %1599 = vector.load %arg17[%c2_525, %c0_526] : memref<14x64xf32, #tpu.memory_space<vmem>>, vector<2x64xf32>
    %1600 = arith.addf %1598, %1599 : vector<2x64xf32>
    %c4_527 = arith.constant 4 : index
    %c0_528 = arith.constant 0 : index
    %1601 = vector.load %arg17[%c4_527, %c0_528] : memref<14x64xf32, #tpu.memory_space<vmem>>, vector<2x64xf32>
    %1602 = arith.addf %1600, %1601 : vector<2x64xf32>
    %c6_529 = arith.constant 6 : index
    %c0_530 = arith.constant 0 : index
    %1603 = vector.load %arg17[%c6_529, %c0_530] : memref<14x64xf32, #tpu.memory_space<vmem>>, vector<2x64xf32>
    %1604 = arith.addf %1602, %1603 : vector<2x64xf32>
    %c8_531 = arith.constant 8 : index
    %c0_532 = arith.constant 0 : index
    %1605 = vector.load %arg17[%c8_531, %c0_532] : memref<14x64xf32, #tpu.memory_space<vmem>>, vector<2x64xf32>
    %1606 = arith.addf %1604, %1605 : vector<2x64xf32>
    %c10_533 = arith.constant 10 : index
    %c0_534 = arith.constant 0 : index
    %1607 = vector.load %arg17[%c10_533, %c0_534] : memref<14x64xf32, #tpu.memory_space<vmem>>, vector<2x64xf32>
    %1608 = arith.addf %1606, %1607 : vector<2x64xf32>
    %c12_535 = arith.constant 12 : index
    %c0_536 = arith.constant 0 : index
    %1609 = vector.load %arg17[%c12_535, %c0_536] : memref<14x64xf32, #tpu.memory_space<vmem>>, vector<2x64xf32>
    %1610 = arith.addf %1608, %1609 : vector<2x64xf32>
    %c0_537 = arith.constant 0 : index
    %c0_538 = arith.constant 0 : index
    %1611 = vector.load %arg9[%c0_537, %c0_538] : memref<64x60xf32, #tpu.memory_space<vmem>>, vector<64x60xf32>
    %cst_539 = arith.constant dense<0.000000e+00> : vector<2x60xf32>
    %1612 = tpu.matmul %1610, %1611, %cst_539 {dimension_numbers = #tpu.dot_dimension_numbers<[1], [0], [0], [1], [0, 0, 1, 1], [], []>} : vector<2x64xf32>, vector<64x60xf32>, vector<2x60xf32> -> vector<2x60xf32>
    %c0_540 = arith.constant 0 : index
    %c0_541 = arith.constant 0 : index
    %1613 = vector.load %arg10[%c0_540, %c0_541] : memref<1x60xf32, #tpu.memory_space<vmem>>, vector<1x60xf32>
    %1614 = vector.broadcast %1613 : vector<1x60xf32> to vector<2x60xf32>
    %1615 = arith.addf %1612, %1614 : vector<2x60xf32>
    %c0_542 = arith.constant 0 : index
    %c0_543 = arith.constant 0 : index
    %1616 = vector.load %arg15[%c0_542, %c0_543] : memref<2x60xf32, #tpu.memory_space<vmem>>, vector<2x60xf32>
    tpu.vector_store %arg15[%c0_542, %c0_543], %1615 {strides = array<i32>} : memref<2x60xf32, #tpu.memory_space<vmem>>, vector<2x60xf32>,
    return
  }
}

</mosaic_0001>

<bundles_post_ra>
// kernel: stalstm_net_forward.3
= control target key start
LH: loop header
LB: loop body
LE: loop exit
PB: predicated region body
PF: predicated region fallthrough
CT: control target
= control target key end

     0   :  { %20 = vsyncpa [#allocation6], 0  ;;  %s6274_s0 = inlined_call_operand.vmem [shape: f32[16,12], index: 0, kind: input, shape index: {}]   ;;  %s6275_s1 = inlined_call_operand.vmem [shape: f32[12,128], index: 1, kind: input, shape index: {}]   ;;  %s6276_s2 = inlined_call_operand.vmem [shape: f32[32,128], index: 2, kind: input, shape index: {}]   ;;  %s6277_s3 = inlined_call_operand.vmem [shape: f32[1,128], index: 3, kind: input, shape index: {}]   ;;  %s6278_s4 = inlined_call_operand.vmem [shape: f32[32,12], index: 4, kind: input, shape index: {}]   ;;  %s6279_s5 = inlined_call_operand.vmem [shape: f32[1,12], index: 5, kind: input, shape index: {}]   ;;  %s6280_s6 = inlined_call_operand.hbm [shape: f32[3,64,256], index: 6, kind: input, shape index: {}]   ;;  %s6281_s7 = inlined_call_operand.hbm [shape: f32[6,32,128], index: 7, kind: input, shape index: {}]   ;;  %s6282_s8 = inlined_call_operand.vmem [shape: f32[3,1,256], index: 8, kind: input, shape index: {}]   ;;  %s6283_s9 = inlined_call_operand.vmem [shape: f32[64,60], index: 9, kind: input, shape index: {}]   ;;  %s6284_s10 = inlined_call_operand.vmem [shape: f32[1,60], index: 10, kind: input, shape index: {}]   ;;  %s6285_s11 = inlined_call_operand.vmem [shape: f32[2,32], index: 11, kind: input, shape index: {}]   ;;  %s6286_s12 = inlined_call_operand.vmem [shape: f32[2,32], index: 12, kind: input, shape index: {}]   ;;  %s6287_s13 = inlined_call_operand.vmem [shape: f32[6,2,32], index: 13, kind: input, shape index: {}]   ;;  %s6288_s14 = inlined_call_operand.vmem [shape: f32[6,2,32], index: 14, kind: input, shape index: {}]   ;;  %s6289_s15 = inlined_call_operand.hbm [shape: f32[2,60], index: 15, kind: output, shape index: {}]  }
   0x1   :  { %21 = vsyncpa [#allocation9], 0 }
   0x2   :  { %22 = vsyncpa [#allocation7], 0  ;;  %s39_s20 = sshll.u32 %s6280_s6, 4  ;;  %s5077_s21 = smov [#allocation5]   ;;  %s40_s20 = int_to_ptr.hbm [resolvable:$true] %s39_s20 }
   0x3   :  { %s41_s22 = sshll.u32 %s5077_s21, 4  ;;  %s52_s25 = sshll.u32 %s6281_s7, 4  ;;  %s42_s22 = int_to_ptr.vmem [resolvable:$true] %s41_s22  ;;  %s53_s25 = int_to_ptr.hbm [resolvable:$true] %s52_s25 }
   0x4   :  { %s5078_s26 = smov 256   ;;  %s5079_s27 = smov 16  }
   0x5   :  { %47 = dma.hbm_to_vmem [thread:$0]  %s40_s20, 6144, %s42_s22, [#allocation6], %s5078_s26, %s5078_s26, %s5079_s27  }
   0x6   :  { %s5080_s28 = smov [#allocation8]   ;;  %s5081_s30 = smov 128  }
   0x7   :  { %s54_s29 = sshll.u32 %s5080_s28, 4  ;;  %s5082_s16 = smov 8   ;;  %s55_s29 = int_to_ptr.vmem [resolvable:$true] %s54_s29 }
   0x8   :  { %60 = dma.hbm_to_vmem [thread:$0]  %s53_s25, 3072, %s55_s29, [#allocation9], %s5081_s30, %s5081_s30, %s5082_s16  }
   0x9   :  { %5071 = dma.done.wait [#allocation6], 6144  }
   0xa   :  { %5072 = vsyncadd [#allocation6], 4294961152 }
   0xb   :  { %5073 = dma.done.wait [#allocation9], 3072  }
   0xc   :  { %5074 = vsyncadd [#allocation9], 4294964224  ;;  %vm102_vm0 = vcmask 1043456   ;;  %v90_v0 = vld [vmem:[%s6275_s1 + $0x8] sm:$0xf]  ;;  %v89_v1 = vld [vmem:[%s6275_s1] sm:$0xff] }
   0xd   :  { %4431 = vmatpush.msk.msra.mxu0 %vm102_vm0, %v90_v0  ;;  %4564 = vmatpush.msk.msra.mxu1 %vm102_vm0, %v90_v0  ;;  %v87_v2 = vld [vmem:[%s6274_s0] sm:$0xff]  ;;  %vm95_vm1 = vcmask 97280   ;;  %v88_v3 = vld [vmem:[%s6274_s0 + $0x8] sm:$0x3f]  ;;  %v5188_v4 = vld [vmem:[%s6276_s2 + $0x18] sm:$0xff]  ;;  %vm143_vm2 = vcmask 261120  }
   0xe   :  { %278 = vmatpush.msra.mxu3 %v5188_v4  ;;  %v5194_v5 = vld [vmem:[%s6276_s2 + $0x10] sm:$0xff]  ;;  %v5201_v6 = vld [vmem:[%s6276_s2 + $0x8] sm:$0xff]  ;;  %v5209_v7 = vld [vmem:[%s6276_s2] sm:$0xff]  ;;  %s5083_s6 = smov 64   ;;  %s5084_s18 = smov 32  }
   0xf   :  { %121 = vmatpush.msra.mxu0 %v89_v1  ;;  %4565 = vmatpush.msra.mxu1 %v89_v1  ;;  %v140_v8 = vld [vmem:[%s6285_s11] sm:$0x3]  ;;  %v5241_v39 = vld [vmem:[%s6278_s4 + $0x18] sm:$0xff]  ;;  %v5246_v40 = vld [vmem:[%s6278_s4 + $0x10] sm:$0xff]  ;;  %s5086_s17 = smov [#allocation10]   ;;  %s4420_s19 = sshll.u32 %s6289_s15, 4  ;;  %s4421_s19 = int_to_ptr.hbm [resolvable:$true] %s4420_s19 }
  0x10   :  { %4432 = vmatmul.msk.f32.vlgmr.msra.gmra.mxu0 %vm95_vm1, %v87_v2  ;;  %4433 = vmatmul.msk.f32.vlgmr.msra.gmra.mxu1 %vm95_vm1, %v88_v3  ;;  %v4576_v9 = vld [vmem:[%s6277_s3] ss:$0 sm:$0xff]  ;;  %v5253_v41 = vld [vmem:[%s6278_s4 + $0x8] sm:$0xff]  ;;  %s4418_s7 = sshll.u32 %s5086_s17, 4  ;;  %s4419_s7 = int_to_ptr.vmem [resolvable:$true] %s4418_s7 }
  0x11   :  { %159 = vmatpush.msrb.mxu1 %v5188_v4  ;;  %279 = vmatpush.msra.mxu3 %v5194_v5  ;;  %v141_v18 = vld [vmem:[%s6286_s12] sm:$0x3] }
  0x12   :  { %514 = vmatpush.msrb.mxu0 %v5188_v4  ;;  %229 = vmatpush.msra.mxu2 %v5241_v39  ;;  %v5261_v42 = vld [vmem:[%s6278_s4] sm:$0xff] }
  0x13   :  { %160 = vmatpush.msrb.mxu1 %v5194_v5  ;;  %280 = vmatpush.msra.mxu3 %v5201_v6 }
  0x14   :  { %515 = vmatpush.msrb.mxu0 %v5194_v5  ;;  %230 = vmatpush.msra.mxu2 %v5246_v40 }
  0x15   :  { %161 = vmatpush.msrb.mxu1 %v5201_v6  ;;  %281 = vmatpush.msra.mxu3 %v5209_v7 }
  0x16   :  { %516 = vmatpush.msrb.mxu0 %v5201_v6  ;;  %231 = vmatpush.msra.mxu2 %v5253_v41 }
  0x17   :  { %162 = vmatpush.msrb.mxu1 %v5209_v7  ;;  %466 = vmatpush.msrb.mxu3 %v5241_v39 }
  0x18   :  { %4434 = vmatmul.msk.f32.vlgmr.msrb.gmra.mxu1 %vm143_vm2, %v140_v8  ;;  %517 = vmatpush.msrb.mxu0 %v5209_v7 }
  0x19   :  { %348 = vmatpush.msra.mxu1 %v5241_v39  ;;  %467 = vmatpush.msrb.mxu3 %v5246_v40 }
  0x1a   :  { %746 = vmatpush.msra.mxu0 %v5188_v4  ;;  %232 = vmatpush.msra.mxu2 %v5261_v42 }
  0x1b   :  { %349 = vmatpush.msra.mxu1 %v5246_v40  ;;  %468 = vmatpush.msrb.mxu3 %v5253_v41 }
  0x1c   :  { %747 = vmatpush.msra.mxu0 %v5194_v5  ;;  %396 = vmatpush.msrb.mxu2 %v5188_v4 }
  0x1d   :  { %350 = vmatpush.msra.mxu1 %v5253_v41  ;;  %469 = vmatpush.msrb.mxu3 %v5261_v42 }
  0x1e   :  { %748 = vmatpush.msra.mxu0 %v5201_v6  ;;  %397 = vmatpush.msrb.mxu2 %v5194_v5 }
  0x1f   :  { %351 = vmatpush.msra.mxu1 %v5261_v42 }
  0x20   :  { %749 = vmatpush.msra.mxu0 %v5209_v7  ;;  %398 = vmatpush.msrb.mxu2 %v5201_v6 }
  0x21   :  { %584 = vmatpush.msrb.mxu1 %v5241_v39 }
  0x22   :  { %399 = vmatpush.msrb.mxu2 %v5209_v7 }
  0x23   :  { %585 = vmatpush.msrb.mxu1 %v5246_v40 }
  0x25   :  { %586 = vmatpush.msrb.mxu1 %v5253_v41 }
  0x27   :  { %587 = vmatpush.msrb.mxu1 %v5261_v42 }
  0x8d   :  { %v123_v10 = vpop.f32.mrf.mxu0  ;;  %v126_v11 = vpop.f32.mrf.mxu1 }
  0x8e   :  { %v124_v12 = vadd.f32 %v4576_v9, %v123_v10  ;;  %v127_v13 = vadd.f32 %v4576_v9, %v126_v11 }
  0x90   :  { %129 = vst [vmem:[#allocation4 + $0x8] sm:$0xff] %v124_v12 }
  0x91   :  { %130 = vst [vmem:[#allocation4] sm:$0x3f] %v127_v13 }
  0x95   :  { %v164_v14 = vpop.f32.mrf.mxu1 }
  0x97   :  { %v142_v15 = vld [vmem:[#allocation4 + $0x8] sm:$0x3]  ;;  %v265_v48 = vld [vmem:[#allocation4 + $0x8] sm:$0xc] }
  0x98   :  { %v167_v16 = vadd.f32 %v164_v14, %v142_v15 }
  0x9a   :  { %4579 = vtanh.f32 %v167_v16  ;;  %v4435_v19 = vmul.f32 -1.442695, %v167_v16 }
  0x9c   :  { %4581 = vpow2.f32 %v4435_v19 }
  0xa0   :  { %v4580_v17 = vpop.eup %4579 }
  0xa1   :  { %194 = vrot.lane.b32.xlu0 %v4580_v17, %s5083_s6 }
  0xa2   :  { %v4582_v20 = vpop.eup %4581 }
  0xa3   :  { %v171_v21 = vadd.f32 1.0, %v4582_v20 }
  0xa5   :  { %4583 = vrcp.f32 %v171_v21  ;;  %v183_v27 = vand.u32 2147483648, %v171_v21  ;;  %vm177_vm4 = vweird.f32 %v171_v21  ;;  %v181_v28 = vand.u32 2147483647, %v171_v21 }
  0xa7   :  { %v184_v30 = vor.u32 1.1754944e-38, %v183_v27  ;;  %vm182_vm6 = vcmp.eq.f32.partialorder %v181_v28, 8.507059e+37 }
  0xa9   :  { %189 = vrot.lane.b32.xlu0 %v141_v18, %s5084_s18  ;;  %v383_v18 = vld [vmem:[#allocation4 + $0x8] sm:$0x30] }
  0xab   :  { %v4584_v22 = vpop.eup %4583 }
  0xac   :  { %v173_v23 = vmul.f32 %v4584_v22, %v171_v21  ;;  %vm178_vm3 = vweird.f32 %v4584_v22 }
  0xad   :  { %vm179_vm5 = vmor %vm177_vm4, %vm178_vm3 }
  0xae   :  { %v174_v24 = vsub.f32 1.0, %v173_v23 }
  0xb0   :  { %v175_v25 = vmul.f32 %v4584_v22, %v174_v24 }
  0xb2   :  { %v176_v26 = vadd.f32 %v4584_v22, %v175_v25 }
  0xb4   :  { %v180_v29 = vsel %vm179_vm5, %v4584_v22, %v176_v26 }
  0xb5   :  { %v185_v32 = vsel %vm182_vm6, %v184_v30, %v180_v29 }
 0x113   :  { %v195_v31 = vpop.permute.xlu0 %194 }
 0x114   :  { %v197_v33 = vmul.f32 %v195_v31, %v185_v32 }
 0x116   :  { %199 = vrot.lane.b32.xlu1 %v197_v33, %s5084_s18 }
 0x11b   :  { %v190_v34 = vpop.permute.xlu0 %189 }
 0x11c   :  { %v192_v35 = vmul.f32 %v190_v34, %v185_v32 }
 0x188   :  { %v200_v36 = vpop.permute.xlu1 %199 }
 0x189   :  { %v5234_v37 = vadd.f32 %v200_v36, %v192_v35 }
 0x18b   :  { %4585 = vtanh.f32 %v5234_v37  ;;  %v311_v2 = vrot.slane %v5234_v37, 6 }
 0x191   :  { %v4586_v38 = vpop.eup %4585 }
 0x192   :  { %205 = vrot.lane.b32.xlu1 %v4586_v38, %s5083_s6 }
 0x204   :  { %v206_v43 = vpop.permute.xlu1 %205 }
 0x205   :  { %v208_v44 = vmul.f32 %v206_v43, %v185_v32 }
 0x207   :  { %213 = vrot.lane.b32.xlu2 %v208_v44, %s5084_s18 }
 0x261   :  { %v214_v45 = vpop.permute.xlu2 %213 }
 0x262   :  { %4436 = vmatmul.msk.f32.vlgmr.msra.gmra.mxu2 %vm143_vm2, %v214_v45  ;;  %4437 = vmatmul.msk.f32.vlgmr.msra.gmra.mxu3 %vm143_vm2, %v214_v45 }
 0x263   :  { %632 = vmatpush.msra.mxu2 %v5188_v4  ;;  %698 = vmatpush.msra.mxu3 %v5241_v39 }
 0x265   :  { %633 = vmatpush.msra.mxu2 %v5194_v5  ;;  %699 = vmatpush.msra.mxu3 %v5246_v40 }
 0x267   :  { %634 = vmatpush.msra.mxu2 %v5201_v6  ;;  %700 = vmatpush.msra.mxu3 %v5253_v41 }
 0x269   :  { %635 = vmatpush.msra.mxu2 %v5209_v7  ;;  %701 = vmatpush.msra.mxu3 %v5261_v42 }
 0x2e5   :  { %v283_v46 = vpop.f32.mrf.mxu3  ;;  %v5304_v15 = vpop.f32.mrf.mxu2 }
 0x2e6   :  { %v287_v47 = vrot.slane %v283_v46, 6 }
 0x2e8   :  { %v289_v49 = vadd.f32 %v287_v47, %v265_v48  ;;  %v501_v47 = vld [vmem:[#allocation4 + $0x8] sm:$0xc0] }
 0x2ea   :  { %4587 = vtanh.f32 %v289_v49  ;;  %v4438_v51 = vmul.f32 -1.442695, %v289_v49 }
 0x2ec   :  { %4589 = vpow2.f32 %v4438_v51 }
 0x2f0   :  { %v4588_v50 = vpop.eup %4587 }
 0x2f1   :  { %315 = vrot.lane.b32.xlu2 %v4588_v50, %s5083_s6 }
 0x2f2   :  { %v4590_v52 = vpop.eup %4589 }
 0x2f3   :  { %v293_v53 = vadd.f32 1.0, %v4590_v52 }
 0x2f5   :  { %4591 = vrcp.f32 %v293_v53  ;;  %v305_v59 = vand.u32 2147483648, %v293_v53  ;;  %vm299_vm8 = vweird.f32 %v293_v53  ;;  %v303_v60 = vand.u32 2147483647, %v293_v53 }
 0x2f7   :  { %v306_v62 = vor.u32 1.1754944e-38, %v305_v59  ;;  %vm304_vm10 = vcmp.eq.f32.partialorder %v303_v60, 8.507059e+37 }
 0x2fb   :  { %v4592_v54 = vpop.eup %4591 }
 0x2fc   :  { %v295_v55 = vmul.f32 %v4592_v54, %v293_v53  ;;  %vm300_vm7 = vweird.f32 %v4592_v54 }
 0x2fd   :  { %vm301_vm9 = vmor %vm299_vm8, %vm300_vm7  ;;  %vm237_vm8 = vcmask 91136  }
 0x2fe   :  { %v296_v56 = vsub.f32 1.0, %v295_v55 }
 0x300   :  { %v297_v57 = vmul.f32 %v4592_v54, %v296_v56 }
 0x302   :  { %v298_v58 = vadd.f32 %v4592_v54, %v297_v57 }
 0x304   :  { %v302_v61 = vsel %vm301_vm9, %v4592_v54, %v298_v58 }
 0x305   :  { %v307_v0 = vsel %vm304_vm10, %v306_v62, %v302_v61 }
 0x306   :  { %v313_v3 = vmul.f32 %v311_v2, %v307_v0 }
 0x34b   :  { %v316_v63 = vpop.permute.xlu2 %315 }
 0x34c   :  { %v318_v1 = vmul.f32 %v316_v63, %v307_v0 }
 0x34e   :  { %320 = vrot.lane.b32.xlu0 %v318_v1, %s5084_s18 }
 0x3c0   :  { %v321_v8 = vpop.permute.xlu0 %320 }
 0x3c1   :  { %v323_v9 = vadd.f32 %v321_v8, %v313_v3 }
 0x3c3   :  { %4593 = vtanh.f32 %v323_v9  ;;  %v429_v32 = vrot.slane %v323_v9, 6 }
 0x3c9   :  { %v4594_v10 = vpop.eup %4593 }
 0x3ca   :  { %326 = vrot.lane.b32.xlu1 %v4594_v10, %s5083_s6  ;;  %v619_v10 = vld [vmem:[#allocation4] sm:$0x3] }
 0x43c   :  { %v327_v11 = vpop.permute.xlu1 %326 }
 0x43d   :  { %v329_v12 = vmul.f32 %v327_v11, %v307_v0 }
 0x43f   :  { %v331_v13 = vrot.slane %v329_v12, 2 }
 0x441   :  { %332 = vrot.lane.b32.xlu2 %v331_v13, %s5084_s18 }
 0x49b   :  { %v333_v14 = vpop.permute.xlu2 %332 }
 0x49c   :  { %4439 = vmatmul.msk.f32.vlgmr.msra.gmra.mxu1 %vm143_vm2, %v333_v14  ;;  %4440 = vmatmul.msk.f32.vlgmr.msrb.gmra.mxu2 %vm143_vm2, %v333_v14 }
 0x49d   :  { %816 = vmatpush.msra.mxu1 %v5241_v39  ;;  %864 = vmatpush.msrb.mxu2 %v5188_v4 }
 0x49f   :  { %817 = vmatpush.msra.mxu1 %v5246_v40  ;;  %865 = vmatpush.msrb.mxu2 %v5194_v5 }
 0x4a1   :  { %818 = vmatpush.msra.mxu1 %v5253_v41  ;;  %866 = vmatpush.msrb.mxu2 %v5201_v6 }
 0x4a3   :  { %819 = vmatpush.msra.mxu1 %v5261_v42  ;;  %867 = vmatpush.msrb.mxu2 %v5209_v7 }
 0x51f   :  { %v401_v16 = vpop.f32.mrf.mxu2 }
 0x520   :  { %v405_v17 = vrot.slane %v401_v16, 4 }
 0x522   :  { %v407_v19 = vadd.f32 %v405_v17, %v383_v18 }
 0x524   :  { %4595 = vtanh.f32 %v407_v19  ;;  %v4441_v20 = vmul.f32 -1.442695, %v407_v19 }
 0x526   :  { %4597 = vpow2.f32 %v4441_v20 }
 0x52a   :  { %v4596_v4 = vpop.eup %4595 }
 0x52b   :  { %433 = vrot.lane.b32.xlu0 %v4596_v4, %s5083_s6 }
 0x52c   :  { %v4598_v5 = vpop.eup %4597 }
 0x52d   :  { %v411_v21 = vadd.f32 1.0, %v4598_v5 }
 0x52f   :  { %4599 = vrcp.f32 %v411_v21  ;;  %v423_v25 = vand.u32 2147483648, %v411_v21  ;;  %vm417_vm12 = vweird.f32 %v411_v21  ;;  %v421_v26 = vand.u32 2147483647, %v411_v21 }
 0x531   :  { %v424_v28 = vor.u32 1.1754944e-38, %v423_v25  ;;  %vm422_vm14 = vcmp.eq.f32.partialorder %v421_v26, 8.507059e+37 }
 0x535   :  { %v4600_v6 = vpop.eup %4599 }
 0x536   :  { %v413_v22 = vmul.f32 %v4600_v6, %v411_v21  ;;  %vm418_vm11 = vweird.f32 %v4600_v6 }
 0x537   :  { %vm419_vm13 = vmor %vm417_vm12, %vm418_vm11 }
 0x538   :  { %v414_v23 = vsub.f32 1.0, %v413_v22 }
 0x53a   :  { %v415_v24 = vmul.f32 %v4600_v6, %v414_v23 }
 0x53c   :  { %v416_v7 = vadd.f32 %v4600_v6, %v415_v24 }
 0x53e   :  { %v420_v27 = vsel %vm419_vm13, %v4600_v6, %v416_v7  ;;  %vm6291_vm13 = vcmask 523264  }
 0x53f   :  { %v425_v30 = vsel %vm422_vm14, %v424_v28, %v420_v27 }
 0x540   :  { %v431_v33 = vmul.f32 %v429_v32, %v425_v30 }
 0x59d   :  { %v434_v29 = vpop.permute.xlu0 %433 }
 0x59e   :  { %v436_v31 = vmul.f32 %v434_v29, %v425_v30 }
 0x5a0   :  { %438 = vrot.lane.b32.xlu1 %v436_v31, %s5084_s18 }
 0x612   :  { %v439_v34 = vpop.permute.xlu1 %438 }
 0x613   :  { %v441_v35 = vadd.f32 %v439_v34, %v431_v33  ;;  %v5332_v33 = vld [vmem:[%s6279_s5] ss:$0 sm:$0xff]  ;;  %v353_v34 = vpop.f32.mrf.mxu1 }
 0x615   :  { %4601 = vtanh.f32 %v441_v35  ;;  %v547_v61 = vrot.slane %v441_v35, 6  ;;  %v235_v35 = vadd.f32 %v5332_v33, %v5304_v15 }
 0x61b   :  { %v4602_v36 = vpop.eup %4601 }
 0x61c   :  { %444 = vrot.lane.b32.xlu2 %v4602_v36, %s5083_s6  ;;  %v238_v36 = vsel %vm237_vm8, %v235_v35, -inf }
 0x676   :  { %v445_v37 = vpop.permute.xlu2 %444 }
 0x677   :  { %v447_v38 = vmul.f32 %v445_v37, %v425_v30 }
 0x679   :  { %v449_v43 = vrot.slane %v447_v38, 4 }
 0x67b   :  { %450 = vrot.lane.b32.xlu0 %v449_v43, %s5084_s18 }
 0x6ed   :  { %v451_v44 = vpop.permute.xlu0 %450 }
 0x6ee   :  { %4442 = vmatmul.msk.f32.vlgmr.msrb.gmra.mxu3 %vm143_vm2, %v451_v44  ;;  %4443 = vmatmul.msk.f32.vlgmr.msrb.gmra.mxu0 %vm143_vm2, %v451_v44 }
 0x6ef   :  { %934 = vmatpush.msrb.mxu3 %v5241_v39 }
 0x6f1   :  { %935 = vmatpush.msrb.mxu3 %v5246_v40 }
 0x6f3   :  { %936 = vmatpush.msrb.mxu3 %v5253_v41 }
 0x6f5   :  { %937 = vmatpush.msrb.mxu3 %v5261_v42 }
 0x76b   :  { %v519_v45 = vpop.f32.mrf.mxu0 }
 0x76c   :  { %v523_v46 = vrot.slane %v519_v45, 2 }
 0x76e   :  { %v525_v48 = vadd.f32 %v523_v46, %v501_v47  ;;  %v733_v47 = vld [vmem:[#allocation4] sm:$0xc] }
 0x770   :  { %4603 = vtanh.f32 %v525_v48  ;;  %v4444_v50 = vmul.f32 -1.442695, %v525_v48 }
 0x772   :  { %4605 = vpow2.f32 %v4444_v50 }
 0x776   :  { %v4604_v49 = vpop.eup %4603 }
 0x777   :  { %551 = vrot.lane.b32.xlu1 %v4604_v49, %s5083_s6 }
 0x778   :  { %v4606_v51 = vpop.eup %4605 }
 0x779   :  { %v529_v52 = vadd.f32 1.0, %v4606_v51 }
 0x77b   :  { %4607 = vrcp.f32 %v529_v52  ;;  %v541_v42 = vand.u32 2147483648, %v529_v52  ;;  %vm535_vm0 = vweird.f32 %v529_v52  ;;  %v539_v55 = vand.u32 2147483647, %v529_v52 }
 0x77d   :  { %v542_v57 = vor.u32 1.1754944e-38, %v541_v42  ;;  %vm540_vm3 = vcmp.eq.f32.partialorder %v539_v55, 8.507059e+37 }
 0x781   :  { %v4608_v39 = vpop.eup %4607 }
 0x782   :  { %v531_v53 = vmul.f32 %v4608_v39, %v529_v52  ;;  %vm536_vm15 = vweird.f32 %v4608_v39  ;;  %v354_v52 = vadd.f32 %v5332_v33, %v353_v34 }
 0x783   :  { %vm537_vm1 = vmor %vm535_vm0, %vm536_vm15 }
 0x784   :  { %v532_v40 = vsub.f32 1.0, %v531_v53 }
 0x786   :  { %v533_v54 = vmul.f32 %v4608_v39, %v532_v40 }
 0x788   :  { %v534_v41 = vadd.f32 %v4608_v39, %v533_v54 }
 0x78a   :  { %v538_v56 = vsel %vm537_vm1, %v4608_v39, %v534_v41  ;;  %v356_v39 = vsel %vm237_vm8, %v354_v52, -inf }
 0x78b   :  { %v543_v59 = vsel %vm540_vm3, %v542_v57, %v538_v56 }
 0x78c   :  { %v549_v62 = vmul.f32 %v547_v61, %v543_v59 }
 0x7e9   :  { %v552_v58 = vpop.permute.xlu1 %551 }
 0x7ea   :  { %v554_v60 = vmul.f32 %v552_v58, %v543_v59 }
 0x7ec   :  { %556 = vrot.lane.b32.xlu2 %v554_v60, %s5084_s18 }
 0x846   :  { %v557_v63 = vpop.permute.xlu2 %556 }
 0x847   :  { %v559_v0 = vadd.f32 %v557_v63, %v549_v62 }
 0x849   :  { %4609 = vtanh.f32 %v559_v0  ;;  %v662_v26 = vrot.slane %v559_v0, 6 }
 0x84f   :  { %v4610_v1 = vpop.eup %4609 }
 0x850   :  { %562 = vrot.lane.b32.xlu0 %v4610_v1, %s5083_s6 }
 0x8c2   :  { %v563_v2 = vpop.permute.xlu0 %562 }
 0x8c3   :  { %v565_v3 = vmul.f32 %v563_v2, %v543_v59 }
 0x8c5   :  { %v567_v8 = vrot.slane %v565_v3, 6  ;;  %v5085_v3 = vmov 0.0  }
 0x8c6   :  { %84 = vst.msk [vmem:[#allocation2] sm:$0xff] %vm6291_vm13, %v5085_v3 }
 0x8c7   :  { %568 = vrot.lane.b32.xlu1 %v567_v8, %s5084_s18  ;;  %v471_v8 = vpop.f32.mrf.mxu3 }
 0x939   :  { %v569_v9 = vpop.permute.xlu1 %568 }
 0x93a   :  { %4445 = vmatmul.msk.f32.vlgmr.msrb.gmra.mxu1 %vm143_vm2, %v569_v9  ;;  %4446 = vmatmul.msk.f32.vlgmr.msra.gmra.mxu2 %vm143_vm2, %v569_v9  ;;  %v472_v9 = vadd.f32 %v5332_v33, %v471_v8  ;;  %v616_v8 = vld [vmem:[%s6274_s0 + $0x8] sm:$0x3] }
 0x9b7   :  { %v589_v37 = vpop.f32.mrf.mxu1 }
 0x9b8   :  { %v590_v38 = vadd.f32 %v5332_v33, %v589_v37 }
 0x9ba   :  { %v592_v43 = vsel %vm237_vm8, %v590_v38, -inf }
 0x9bd   :  { %v637_v11 = vpop.f32.mrf.mxu2 }
 0x9be   :  { %v640_v12 = vadd.f32 %v637_v11, %v619_v10 }
 0x9c0   :  { %4611 = vtanh.f32 %v640_v12  ;;  %v4447_v14 = vmul.f32 -1.442695, %v640_v12 }
 0x9c2   :  { %4613 = vpow2.f32 %v4447_v14 }
 0x9c6   :  { %v4612_v13 = vpop.eup %4611 }
 0x9c7   :  { %666 = vrot.lane.b32.xlu2 %v4612_v13, %s5083_s6  ;;  %v474_v13 = vsel %vm237_vm8, %v472_v9, -inf }
 0x9c8   :  { %v4614_v16 = vpop.eup %4613 }
 0x9c9   :  { %v644_v17 = vadd.f32 1.0, %v4614_v16 }
 0x9cb   :  { %4615 = vrcp.f32 %v644_v17  ;;  %v656_v21 = vand.u32 2147483648, %v644_v17  ;;  %vm650_vm5 = vweird.f32 %v644_v17  ;;  %v654_v6 = vand.u32 2147483647, %v644_v17 }
 0x9cd   :  { %v657_v23 = vor.u32 1.1754944e-38, %v656_v21  ;;  %vm655_vm7 = vcmp.eq.f32.partialorder %v654_v6, 8.507059e+37 }
 0x9d1   :  { %v4616_v18 = vpop.eup %4615 }
 0x9d2   :  { %v646_v19 = vmul.f32 %v4616_v18, %v644_v17  ;;  %vm651_vm4 = vweird.f32 %v4616_v18 }
 0x9d3   :  { %vm652_vm6 = vmor %vm650_vm5, %vm651_vm4 }
 0x9d4   :  { %v647_v4 = vsub.f32 1.0, %v646_v19 }
 0x9d6   :  { %v648_v20 = vmul.f32 %v4616_v18, %v647_v4 }
 0x9d8   :  { %v649_v5 = vadd.f32 %v4616_v18, %v648_v20 }
 0x9da   :  { %v653_v22 = vsel %vm652_vm6, %v4616_v18, %v649_v5 }
 0x9db   :  { %v658_v7 = vsel %vm655_vm7, %v657_v23, %v653_v22 }
 0x9dc   :  { %v664_v27 = vmul.f32 %v662_v26, %v658_v7 }
 0xa21   :  { %v667_v24 = vpop.permute.xlu2 %666 }
 0xa22   :  { %v669_v25 = vmul.f32 %v667_v24, %v658_v7 }
 0xa24   :  { %671 = vrot.lane.b32.xlu0 %v669_v25, %s5084_s18 }
 0xa96   :  { %v672_v28 = vpop.permute.xlu0 %671 }
 0xa97   :  { %v5324_v29 = vadd.f32 %v672_v28, %v664_v27  ;;  %v262_v28 = vld [vmem:[%s6274_s0 + $0x2] sm:$0x3] }
 0xa99   :  { %4617 = vtanh.f32 %v5324_v29  ;;  %v779_v34 = vrot.slane %v5324_v29, 6 }
 0xa9f   :  { %v4618_v30 = vpop.eup %4617 }
 0xaa0   :  { %677 = vrot.lane.b32.xlu1 %v4618_v30, %s5083_s6 }
 0xb12   :  { %v678_v31 = vpop.permute.xlu1 %677 }
 0xb13   :  { %v680_v32 = vmul.f32 %v678_v31, %v658_v7 }
 0xb15   :  { %682 = vrot.lane.b32.xlu2 %v680_v32, %s5084_s18 }
 0xb3e   :  { %239 = vmax.xlane.f32.xlu2 %v238_v36 }
 0xb46   :  { %593 = vmax.xlane.f32.xlu2 %v592_v43 }
 0xb6f   :  { %v683_v44 = vpop.permute.xlu2 %682 }
 0xb70   :  { %4448 = vmatmul.msk.f32.vlgmr.msra.gmra.mxu3 %vm143_vm2, %v683_v44  ;;  %4449 = vmatmul.msk.f32.vlgmr.msra.gmra.mxu0 %vm143_vm2, %v683_v44 }
 0xbb1   :  { %v240_v49 = vpop.xlane.xlu2 %239 }
 0xbb2   :  { %v241_v50 = vsub.f32 %v235_v35, %v240_v49 }
 0xbb4   :  { %v242_v51 = vmul.f32 1.442695, %v241_v50 }
 0xbb9   :  { %v594_v10 = vpop.xlane.xlu2 %593 }
 0xbba   :  { %v595_v14 = vsub.f32 %v590_v38, %v594_v10 }
 0xbbc   :  { %v596_v17 = vmul.f32 1.442695, %v595_v14 }
 0xbed   :  { %v751_v45 = vpop.f32.mrf.mxu0 }
 0xbee   :  { %v755_v46 = vrot.slane %v751_v45, 6 }
 0xbf0   :  { %v757_v48 = vadd.f32 %v755_v46, %v733_v47 }
 0xbf2   :  { %4619 = vtanh.f32 %v757_v48  ;;  %v4450_v54 = vmul.f32 -1.442695, %v757_v48 }
 0xbf3   :  { %4621 = vpow2.f32 %v242_v51 }
 0xbf4   :  { %4623 = vpow2.f32 %v4450_v54 }
 0xbf8   :  { %v4620_v15 = vpop.eup %4619 }
 0xbf9   :  { %783 = vrot.lane.b32.xlu0 %v4620_v15, %s5083_s6  ;;  %v5344_v53 = vpop.eup %4621 }
 0xbfa   :  { %v244_v40 = vsel %vm237_vm8, %v5344_v53, 0.0  ;;  %v4624_v41 = vpop.eup %4623 }
 0xbfb   :  { %v761_v42 = vadd.f32 1.0, %v4624_v41 }
 0xbfd   :  { %4625 = vrcp.f32 %v761_v42  ;;  %v773_v60 = vand.u32 2147483648, %v761_v42  ;;  %vm767_vm10 = vweird.f32 %v761_v42  ;;  %v771_v61 = vand.u32 2147483647, %v761_v42 }
 0xbff   :  { %v774_v63 = vor.u32 1.1754944e-38, %v773_v60  ;;  %vm772_vm12 = vcmp.eq.f32.partialorder %v771_v61, 8.507059e+37 }
 0xc03   :  { %v4626_v55 = vpop.eup %4625 }
 0xc04   :  { %v763_v56 = vmul.f32 %v4626_v55, %v761_v42  ;;  %vm768_vm9 = vweird.f32 %v4626_v55 }
 0xc05   :  { %vm769_vm11 = vmor %vm767_vm10, %vm768_vm9 }
 0xc06   :  { %v764_v57 = vsub.f32 1.0, %v763_v56 }
 0xc08   :  { %v765_v58 = vmul.f32 %v4626_v55, %v764_v57 }
 0xc0a   :  { %v766_v59 = vadd.f32 %v4626_v55, %v765_v58 }
 0xc0c   :  { %v770_v62 = vsel %vm769_vm11, %v4626_v55, %v766_v59  ;;  %v380_v55 = vld [vmem:[%s6274_s0 + $0x4] sm:$0x3] }
 0xc0d   :  { %v5348_v1 = vsel %vm772_vm12, %v774_v63, %v770_v62 }
 0xc0e   :  { %v781_v35 = vmul.f32 %v779_v34, %v5348_v1 }
 0xc23   :  { %357 = vmax.xlane.f32.xlu0 %v356_v39 }
 0xc2b   :  { %245 = vadd.xlane.f32.xlu0 %v244_v40 }
 0xc6b   :  { %v784_v0 = vpop.permute.xlu0 %783 }
 0xc6c   :  { %v786_v2 = vmul.f32 %v784_v0, %v5348_v1 }
 0xc6e   :  { %788 = vrot.lane.b32.xlu1 %v786_v2, %s5084_s18 }
 0xc96   :  { %v358_v11 = vpop.xlane.xlu0 %357 }
 0xc97   :  { %v359_v12 = vsub.f32 %v354_v52, %v358_v11 }
 0xc98   :  { %475 = vmax.xlane.f32.xlu1 %v474_v13 }
 0xc99   :  { %v360_v16 = vmul.f32 1.442695, %v359_v12 }
 0xc9b   :  { %4627 = vpow2.f32 %v360_v16  ;;  %v985_v16 = vld [vmem:[#allocation5 + $0x70] sm:$0xff] }
 0xc9c   :  { %1007 = vmatpush.msrb.mxu0 %v985_v16 }
 0xc9e   :  { %v246_v18 = vpop.xlane.xlu0 %245 }
 0xc9f   :  { %4629 = vrcp.f32 %v246_v18  ;;  %v258_v22 = vand.u32 2147483648, %v246_v18  ;;  %v256_v24 = vand.u32 2147483647, %v246_v18  ;;  %vm252_vm15 = vweird.f32 %v246_v18 }
 0xca0   :  { %4631 = vpow2.f32 %v596_v17  ;;  %v983_v17 = vld [vmem:[#allocation5 + $0x60] sm:$0xff] }
 0xca1   :  { %v4628_v19 = vpop.eup %4627  ;;  %v259_v26 = vor.u32 1.1754944e-38, %v258_v22  ;;  %vm257_vm1 = vcmp.eq.f32.partialorder %v256_v24, 8.507059e+37  ;;  %1008 = vmatpush.msrb.mxu0 %v983_v17  ;;  %v980_v24 = vld [vmem:[#allocation5 + $0x48] sm:$0xff] }
 0xca2   :  { %v362_v4 = vsel %vm237_vm8, %v4628_v19, 0.0 }
 0xca3   :  { %363 = vadd.xlane.f32.xlu1 %v362_v4  ;;  %v977_v4 = vld [vmem:[#allocation5 + $0x30] sm:$0xff] }
 0xca5   :  { %v4630_v20 = vpop.eup %4629 }
 0xca6   :  { %v248_v5 = vmul.f32 %v4630_v20, %v246_v18  ;;  %v5357_v21 = vpop.eup %4631  ;;  %vm253_vm14 = vweird.f32 %v4630_v20  ;;  %v981_v18 = vld [vmem:[#allocation5 + $0x50] sm:$0xff] }
 0xca7   :  { %v598_v7 = vsel %vm237_vm8, %v5357_v21, 0.0  ;;  %vm254_vm0 = vmor %vm252_vm15, %vm253_vm14  ;;  %1009 = vmatpush.msrb.mxu0 %v981_v18 }
 0xca8   :  { %v249_v6 = vsub.f32 1.0, %v248_v5  ;;  %v973_v5 = vld [vmem:[#allocation5 + $0x10] sm:$0xff] }
 0xcaa   :  { %v250_v23 = vmul.f32 %v4630_v20, %v249_v6  ;;  %v984_v6 = vld [vmem:[#allocation5 + $0x68] sm:$0xff] }
 0xcab   :  { %599 = vadd.xlane.f32.xlu1 %v598_v7 }
 0xcac   :  { %v251_v25 = vadd.f32 %v4630_v20, %v250_v23  ;;  %v982_v23 = vld [vmem:[#allocation5 + $0x58] sm:$0xff] }
 0xcae   :  { %v255_v27 = vsel %vm254_vm0, %v4630_v20, %v251_v25  ;;  %v975_v20 = vld [vmem:[#allocation5 + $0x20] sm:$0xff] }
 0xcaf   :  { %v260_v30 = vsel %vm257_vm1, %v259_v26, %v255_v27 }
 0xcb0   :  { %v261_v31 = vmul.f32 %v5344_v53, %v260_v30 }
 0xcb2   :  { %v263_v32 = vmul.f32 %v262_v28, %v261_v31 }
 0xcb4   :  { %264 = vst.msk [vmem:[#allocation2] sm:$0x3] %vm237_vm8, %v263_v32 }
 0xce0   :  { %v789_v36 = vpop.permute.xlu1 %788 }
 0xce1   :  { %v5368_v37 = vadd.f32 %v789_v36, %v781_v35  ;;  %v978_v35 = vld [vmem:[#allocation5 + $0x38] sm:$0xff] }
 0xce2   :  { %v5387_v36 = vld [vmem:[#allocation8 + $0x18] sm:$0xff] }
 0xce3   :  { %4633 = vtanh.f32 %v5368_v37  ;;  %1071 = vmatpush.msra.mxu2 %v5387_v36  ;;  %1142 = vmatpush.msra.mxu3 %v5387_v36 }
 0xce9   :  { %v4634_v38 = vpop.eup %4633 }
 0xcea   :  { %794 = vrot.lane.b32.xlu2 %v4634_v38, %s5083_s6  ;;  %v976_v38 = vld [vmem:[#allocation5 + $0x28] sm:$0xff] }
 0xd0b   :  { %v476_v43 = vpop.xlane.xlu1 %475 }
 0xd0c   :  { %v477_v44 = vsub.f32 %v472_v9, %v476_v43  ;;  %v498_v43 = vld [vmem:[%s6274_s0 + $0x6] sm:$0x3] }
 0xd0e   :  { %v478_v45 = vmul.f32 1.442695, %v477_v44 }
 0xd10   :  { %4635 = vpow2.f32 %v478_v45  ;;  %v5393_v45 = vld [vmem:[#allocation8 + $0x10] sm:$0xff] }
 0xd11   :  { %1072 = vmatpush.msra.mxu2 %v5393_v45  ;;  %1143 = vmatpush.msra.mxu3 %v5393_v45 }
 0xd16   :  { %v5372_v46 = vpop.eup %4635  ;;  %v364_v47 = vpop.xlane.xlu1 %363 }
 0xd17   :  { %4637 = vrcp.f32 %v364_v47  ;;  %v480_v29 = vsel %vm237_vm8, %v5372_v46, 0.0  ;;  %v376_v51 = vand.u32 2147483648, %v364_v47  ;;  %v374_v39 = vand.u32 2147483647, %v364_v47 }
 0xd18   :  { %481 = vadd.xlane.f32.xlu0 %v480_v29  ;;  %vm370_vm4 = vweird.f32 %v364_v47  ;;  %v974_v29 = vld [vmem:[#allocation5 + $0x18] sm:$0xff] }
 0xd19   :  { %v377_v54 = vor.u32 1.1754944e-38, %v376_v51  ;;  %vm375_vm6 = vcmp.eq.f32.partialorder %v374_v39, 8.507059e+37  ;;  %v1053_v39 = vld [vmem:[%s6287_s13] sm:$0x3] }
 0xd1d   :  { %v4638_v48 = vpop.eup %4637 }
 0xd1e   :  { %v366_v15 = vmul.f32 %v4638_v48, %v364_v47  ;;  %v600_v49 = vpop.xlane.xlu1 %599  ;;  %vm371_vm3 = vweird.f32 %v4638_v48 }
 0xd1f   :  { %4639 = vrcp.f32 %v600_v49  ;;  %vm372_vm5 = vmor %vm370_vm4, %vm371_vm3  ;;  %v612_v59 = vand.u32 2147483648, %v600_v49  ;;  %v610_v62 = vand.u32 2147483647, %v600_v49  ;;  %vm606_vm9 = vweird.f32 %v600_v49 }
 0xd20   :  { %v367_v50 = vsub.f32 1.0, %v366_v15 }
 0xd21   :  { %v613_v0 = vor.u32 1.1754944e-38, %v612_v59  ;;  %vm611_vm11 = vcmp.eq.f32.partialorder %v610_v62, 8.507059e+37 }
 0xd22   :  { %v368_v52 = vmul.f32 %v4638_v48, %v367_v50  ;;  %v5401_v50 = vld [vmem:[#allocation8] sm:$0xff] }
 0xd24   :  { %v369_v53 = vadd.f32 %v4638_v48, %v368_v52 }
 0xd25   :  { %v4640_v40 = vpop.eup %4639 }
 0xd26   :  { %v373_v41 = vsel %vm372_vm5, %v4638_v48, %v369_v53  ;;  %v602_v42 = vmul.f32 %v4640_v40, %v600_v49  ;;  %vm607_vm7 = vweird.f32 %v4640_v40  ;;  %v5396_v48 = vld [vmem:[#allocation8 + $0x8] sm:$0xff]  ;;  %v5435_v53 = vld [vmem:[%s6282_s8] sm:$0x3] }
 0xd27   :  { %v378_v56 = vsel %vm375_vm6, %v377_v54, %v373_v41  ;;  %vm608_vm10 = vmor %vm606_vm9, %vm607_vm7  ;;  %v972_v49 = vld [vmem:[#allocation5 + $0x8] sm:$0xff]  ;;  %1073 = vmatpush.msra.mxu2 %v5396_v48  ;;  %1144 = vmatpush.msra.mxu3 %v5396_v48 }
 0xd28   :  { %v379_v57 = vmul.f32 %v4628_v19, %v378_v56  ;;  %v603_v58 = vsub.f32 1.0, %v602_v42  ;;  %v979_v19 = vld [vmem:[#allocation5 + $0x40] sm:$0xff] }
 0xd29   :  { %1010 = vmatpush.msrb.mxu0 %v979_v19  ;;  %1074 = vmatpush.msra.mxu2 %v5401_v50 }
 0xd2a   :  { %v381_v60 = vmul.f32 %v380_v55, %v379_v57  ;;  %v604_v61 = vmul.f32 %v4640_v40, %v603_v58  ;;  %1145 = vmatpush.msra.mxu3 %v5401_v50  ;;  %v990_v55 = vperm.slane %v5435_v53, 1  ;;  %v851_v58 = vld [vmem:[#allocation4] sm:$0x30] }
 0xd2b   :  { %1011 = vmatpush.msrb.mxu0 %v977_v4 }
 0xd2c   :  { %382 = vst.msk [vmem:[#allocation2 + $0x2] sm:$0x3] %vm237_vm8, %v381_v60  ;;  %v605_v63 = vadd.f32 %v4640_v40, %v604_v61 }
 0xd2d   :  { %1012 = vmatpush.msrb.mxu0 %v975_v20 }
 0xd2e   :  { %v609_v2 = vsel %vm608_vm10, %v4640_v40, %v605_v63  ;;  %v989_v40 = vperm.slane %v5435_v53, 0 }
 0xd2f   :  { %v614_v9 = vsel %vm611_vm11, %v613_v0, %v609_v2  ;;  %1013 = vmatpush.msrb.mxu0 %v973_v5  ;;  %vm6290_vm11 = vcmask 254976  }
 0xd30   :  { %v615_v10 = vmul.f32 %v5357_v21, %v614_v9  ;;  %v971_v21 = vld [vmem:[#allocation5] sm:$0xff] }
 0xd31   :  { %1014 = vmatpush.msrb.mxu0 %v971_v21 }
 0xd32   :  { %v617_v11 = vmul.f32 %v616_v8, %v615_v10 }
 0xd33   :  { %1514 = vmatpush.msra.mxu0 %v5387_v36 }
 0xd34   :  { %618 = vst.msk [vmem:[#allocation2 + $0x6] sm:$0x3] %vm237_vm8, %v617_v11 }
 0xd35   :  { %1515 = vmatpush.msra.mxu0 %v5393_v45 }
 0xd37   :  { %1516 = vmatpush.msra.mxu0 %v5396_v48 }
 0xd39   :  { %1517 = vmatpush.msra.mxu0 %v5401_v50 }
 0xd44   :  { %v795_v12 = vpop.permute.xlu2 %794 }
 0xd45   :  { %v797_v13 = vmul.f32 %v795_v12, %v5348_v1  ;;  %v986_v1 = vld [vmem:[#allocation5 + $0x78] sm:$0xff] }
 0xd46   :  { %1030 = vmatpush.msrb.mxu1 %v986_v1 }
 0xd47   :  { %v799_v14 = vrot.slane %v797_v13, 2 }
 0xd48   :  { %1031 = vmatpush.msrb.mxu1 %v984_v6 }
 0xd49   :  { %800 = vrot.lane.b32.xlu0 %v799_v14, %s5084_s18 }
 0xd4a   :  { %1032 = vmatpush.msrb.mxu1 %v982_v23 }
 0xd4c   :  { %1033 = vmatpush.msrb.mxu1 %v980_v24 }
 0xd4e   :  { %1034 = vmatpush.msrb.mxu1 %v978_v35 }
 0xd50   :  { %1035 = vmatpush.msrb.mxu1 %v976_v38 }
 0xd52   :  { %1036 = vmatpush.msrb.mxu1 %v974_v29 }
 0xd54   :  { %1037 = vmatpush.msrb.mxu1 %v972_v49 }
 0xd8b   :  { %v482_v22 = vpop.xlane.xlu0 %481 }
 0xd8c   :  { %4641 = vrcp.f32 %v482_v22  ;;  %v494_v27 = vand.u32 2147483648, %v482_v22  ;;  %v492_v30 = vand.u32 2147483647, %v482_v22  ;;  %vm488_vm14 = vweird.f32 %v482_v22 }
 0xd8e   :  { %v495_v32 = vor.u32 1.1754944e-38, %v494_v27  ;;  %vm493_vm0 = vcmp.eq.f32.partialorder %v492_v30, 8.507059e+37 }
 0xd92   :  { %v4642_v7 = vpop.eup %4641 }
 0xd93   :  { %v484_v25 = vmul.f32 %v4642_v7, %v482_v22  ;;  %vm489_vm12 = vweird.f32 %v4642_v7 }
 0xd94   :  { %vm490_vm15 = vmor %vm488_vm14, %vm489_vm12 }
 0xd95   :  { %v485_v26 = vsub.f32 1.0, %v484_v25 }
 0xd97   :  { %v486_v28 = vmul.f32 %v4642_v7, %v485_v26 }
 0xd99   :  { %v487_v31 = vadd.f32 %v4642_v7, %v486_v28 }
 0xd9b   :  { %v491_v34 = vsel %vm490_vm15, %v4642_v7, %v487_v31 }
 0xd9c   :  { %v496_v44 = vsel %vm493_vm0, %v495_v32, %v491_v34 }
 0xd9d   :  { %v497_v47 = vmul.f32 %v5372_v46, %v496_v44  ;;  %v1054_v46 = vld [vmem:[%s6288_s14] sm:$0x3] }
 0xd9e   :  { %1101 = vrot.lane.b32.xlu0 %v1054_v46, %s5084_s18 }
 0xd9f   :  { %v499_v15 = vmul.f32 %v498_v43, %v497_v47  ;;  %v897_v43 = vrot.slane %v5368_v37, 6 }
 0xda1   :  { %500 = vst.msk [vmem:[#allocation2 + $0x4] sm:$0x3] %vm237_vm8, %v499_v15 }
 0xda8   :  { %v969_v51 = vld [vmem:[#allocation2] sm:$0xff] }
 0xda9   :  { %4455 = vmatmul.msk.f32.vlgmr.msrb.gmra.mxu0 %vm6291_vm13, %v969_v51 }
 0xdbb   :  { %v801_v52 = vpop.permute.xlu0 %800 }
 0xdbc   :  { %4451 = vmatmul.msk.f32.vlgmr.msra.gmra.mxu1 %vm143_vm2, %v801_v52  ;;  %4452 = vmatmul.msk.f32.vlgmr.msrb.gmra.mxu2 %vm143_vm2, %v801_v52 }
 0xdbd   :  { %1218 = vmatpush.msrb.mxu2 %v5387_v36 }
 0xdbf   :  { %1219 = vmatpush.msrb.mxu2 %v5393_v45 }
 0xdc1   :  { %1220 = vmatpush.msrb.mxu2 %v5396_v48 }
 0xdc3   :  { %1221 = vmatpush.msrb.mxu2 %v5401_v50 }
 0xdc4   :  { %4457 = vmatmul.msk.f32.vlgmr.msrb.gmra.mxu1 %vm6291_vm13, %v969_v51  ;;  %4459 = vmatmul.msk.f32.vlgmr.msra.gmra.mxu2 %vm143_vm2, %v1053_v39 }
 0xdc5   :  { %1370 = vmatpush.msra.mxu2 %v5387_v36 }
 0xdc7   :  { %1371 = vmatpush.msra.mxu2 %v5393_v45 }
 0xdc9   :  { %1372 = vmatpush.msra.mxu2 %v5396_v48 }
 0xdcb   :  { %1373 = vmatpush.msra.mxu2 %v5401_v50 }
 0xe10   :  { %v1102_v15 = vpop.permute.xlu0 %1101 }
 0xe26   :  { %v1016_v54 = vpop.f32.mrf.mxu0 }
 0xe27   :  { %v1017_v41 = vadd.f32 %v1016_v54, %v989_v40 }
 0xe29   :  { %1045 = vst [vmem:[#allocation4 + $0x8] sm:$0xff] %v1017_v41 }
 0xe30   :  { %v1055_v62 = vld [vmem:[#allocation4 + $0x8] sm:$0x3] }
 0xe39   :  { %v5440_v42 = vpop.f32.mrf.mxu1 }
 0xe3f   :  { %v869_v56 = vpop.f32.mrf.mxu2 }
 0xe40   :  { %v873_v57 = vrot.slane %v869_v56, 4 }
 0xe41   :  { %v1039_v59 = vpop.f32.mrf.mxu1 }
 0xe42   :  { %v875_v60 = vadd.f32 %v873_v57, %v851_v58  ;;  %v1040_v61 = vadd.f32 %v1039_v59, %v990_v55 }
 0xe44   :  { %4643 = vtanh.f32 %v875_v60  ;;  %1046 = vst [vmem:[#allocation4 + $0x18] sm:$0xff] %v1040_v61  ;;  %v4453_v9 = vmul.f32 -1.442695, %v875_v60  ;;  %v703_v60 = vpop.f32.mrf.mxu3 }
 0xe47   :  { %v1076_v63 = vpop.f32.mrf.mxu2 }
 0xe48   :  { %v1079_v0 = vadd.f32 %v1076_v63, %v1055_v62 }
 0xe4a   :  { %v4644_v2 = vpop.eup %4643  ;;  %4645 = vtanh.f32 %v1079_v0  ;;  %v4460_v10 = vmul.f32 -1.442695, %v1079_v0  ;;  %v1127_v0 = vld [vmem:[#allocation4 + $0x8] sm:$0xc] }
 0xe4b   :  { %901 = vrot.lane.b32.xlu1 %v4644_v2, %s5083_s6  ;;  %4647 = vpow2.f32 %v4453_v9 }
 0xe4c   :  { %4649 = vpow2.f32 %v4460_v10 }
 0xe50   :  { %v4646_v8 = vpop.eup %4645 }
 0xe51   :  { %1106 = vrot.lane.b32.xlu2 %v4646_v8, %s5083_s6  ;;  %v4648_v11 = vpop.eup %4647 }
 0xe52   :  { %v879_v12 = vadd.f32 1.0, %v4648_v11  ;;  %v4650_v13 = vpop.eup %4649 }
 0xe53   :  { %v1083_v14 = vadd.f32 1.0, %v4650_v13 }
 0xe54   :  { %4651 = vrcp.f32 %v879_v12  ;;  %v891_v1 = vand.u32 2147483648, %v879_v12  ;;  %vm885_vm3 = vweird.f32 %v879_v12  ;;  %v889_v6 = vand.u32 2147483647, %v879_v12 }
 0xe55   :  { %4653 = vrcp.f32 %v1083_v14  ;;  %v1095_v28 = vand.u32 2147483648, %v1083_v14  ;;  %vm1089_vm7 = vweird.f32 %v1083_v14  ;;  %v1093_v30 = vand.u32 2147483647, %v1083_v14 }
 0xe56   :  { %v892_v24 = vor.u32 1.1754944e-38, %v891_v1  ;;  %vm890_vm5 = vcmp.eq.f32.partialorder %v889_v6, 8.507059e+37 }
 0xe57   :  { %v1096_v32 = vor.u32 1.1754944e-38, %v1095_v28  ;;  %vm1094_vm10 = vcmp.eq.f32.partialorder %v1093_v30, 8.507059e+37  ;;  %v1200_v30 = vld [vmem:[#allocation4 + $0x8] sm:$0x30] }
 0xe5a   :  { %v4652_v16 = vpop.eup %4651 }
 0xe5b   :  { %v881_v17 = vmul.f32 %v4652_v16, %v879_v12  ;;  %v4654_v19 = vpop.eup %4653  ;;  %vm886_vm1 = vweird.f32 %v4652_v16 }
 0xe5c   :  { %v1085_v4 = vmul.f32 %v4654_v19, %v1083_v14  ;;  %vm887_vm4 = vmor %vm885_vm3, %vm886_vm1  ;;  %vm1090_vm6 = vweird.f32 %v4654_v19 }
 0xe5d   :  { %v882_v18 = vsub.f32 1.0, %v881_v17  ;;  %vm1091_vm9 = vmor %vm1089_vm7, %vm1090_vm6  ;;  %vm85_vm6 = vcmask 521216  }
 0xe5e   :  { %v1086_v5 = vsub.f32 1.0, %v1085_v4  ;;  %86 = vst.msk [vmem:[#allocation2 + $0x8] sm:$0x3f] %vm85_vm6, %v5085_v3 }
 0xe5f   :  { %v883_v20 = vmul.f32 %v4652_v16, %v882_v18 }
 0xe60   :  { %v1087_v22 = vmul.f32 %v4654_v19, %v1086_v5 }
 0xe61   :  { %v884_v21 = vadd.f32 %v4652_v16, %v883_v20 }
 0xe62   :  { %v1088_v26 = vadd.f32 %v4654_v19, %v1087_v22 }
 0xe63   :  { %v888_v23 = vsel %vm887_vm4, %v4652_v16, %v884_v21 }
 0xe64   :  { %v893_v25 = vsel %vm890_vm5, %v892_v24, %v888_v23  ;;  %v1092_v31 = vsel %vm1091_vm9, %v4654_v19, %v1088_v26 }
 0xe65   :  { %v1097_v35 = vsel %vm1094_vm10, %v1096_v32, %v1092_v31  ;;  %v899_v44 = vmul.f32 %v897_v43, %v893_v25  ;;  %v822_v43 = vadd.f32 %v5332_v33, %v5440_v42 }
 0xe66   :  { %v1104_v49 = vmul.f32 %v1102_v15, %v1097_v35 }
 0xeab   :  { %v1107_v34 = vpop.permute.xlu2 %1106 }
 0xeac   :  { %v1109_v38 = vmul.f32 %v1107_v34, %v1097_v35 }
 0xebd   :  { %v902_v7 = vpop.permute.xlu1 %901 }
 0xebe   :  { %v904_v27 = vmul.f32 %v902_v7, %v893_v25  ;;  %v704_v7 = vadd.f32 %v5332_v33, %v703_v60 }
 0xec0   :  { %906 = vrot.lane.b32.xlu2 %v904_v27, %s5084_s18 }
 0xec8   :  { %1111 = vrot.lane.b32.xlu2 %v1109_v38, %s5084_s18 }
 0xf1a   :  { %v907_v47 = vpop.permute.xlu2 %906 }
 0xf1b   :  { %v909_v29 = vadd.f32 %v907_v47, %v899_v44  ;;  %v824_v44 = vsel %vm237_vm8, %v822_v43, -inf }
 0xf1d   :  { %4655 = vtanh.f32 %v909_v29 }
 0xf22   :  { %v1112_v46 = vpop.permute.xlu2 %1111 }
 0xf23   :  { %v4656_v51 = vpop.eup %4655  ;;  %v1114_v52 = vadd.f32 %v1112_v46, %v1104_v49 }
 0xf24   :  { %912 = vrot.lane.b32.xlu1 %v4656_v51, %s5083_s6 }
 0xf25   :  { %4657 = vtanh.f32 %v1114_v52  ;;  %v1175_v20 = vrot.slane %v1114_v52, 6 }
 0xf2b   :  { %v4658_v39 = vpop.eup %4657 }
 0xf2c   :  { %1117 = vrot.lane.b32.xlu0 %v4658_v39, %s5083_s6 }
 0xf96   :  { %v913_v54 = vpop.permute.xlu1 %912 }
 0xf97   :  { %v915_v41 = vmul.f32 %v913_v54, %v893_v25  ;;  %v706_v25 = vsel %vm237_vm8, %v704_v7, -inf }
 0xf99   :  { %v917_v56 = vrot.slane %v915_v41, 4 }
 0xf9b   :  { %918 = vrot.lane.b32.xlu2 %v917_v56, %s5084_s18 }
 0xf9e   :  { %v1118_v37 = vpop.permute.xlu0 %1117 }
 0xf9f   :  { %v1120_v57 = vmul.f32 %v1118_v37, %v1097_v35 }
 0xfa1   :  { %1122 = vrot.lane.b32.xlu1 %v1120_v57, %s5084_s18 }
 0xff5   :  { %v919_v58 = vpop.permute.xlu2 %918 }
 0xff6   :  { %4454 = vmatmul.msk.f32.vlgmr.msrb.gmra.mxu3 %vm143_vm2, %v919_v58 }
 0xff7   :  { %1294 = vmatpush.msrb.mxu3 %v5387_v36 }
 0xff9   :  { %1295 = vmatpush.msrb.mxu3 %v5393_v45 }
 0xffb   :  { %1296 = vmatpush.msrb.mxu3 %v5396_v48 }
 0xffd   :  { %1297 = vmatpush.msrb.mxu3 %v5401_v50 }
0x1013   :  { %v1123_v59 = vpop.permute.xlu1 %1122 }
0x1014   :  { %1126 = vst.msk [vmem:[#allocation3] sm:$0x3] %vm6290_vm11, %v1123_v59  ;;  %4461 = vmatmul.msk.f32.vlgmr.msra.gmra.mxu3 %vm143_vm2, %v1123_v59 }
0x1015   :  { %1439 = vmatpush.msra.mxu3 %v5387_v36 }
0x1017   :  { %1440 = vmatpush.msra.mxu3 %v5393_v45 }
0x1019   :  { %1441 = vmatpush.msra.mxu3 %v5396_v48 }
0x101b   :  { %1442 = vmatpush.msra.mxu3 %v5401_v50 }
0x1079   :  { %v5465_v61 = vpop.f32.mrf.mxu3 }
0x1097   :  { %v1147_v62 = vpop.f32.mrf.mxu3 }
0x1098   :  { %v1151_v63 = vrot.slane %v1147_v62, 6  ;;  %v940_v62 = vadd.f32 %v5332_v33, %v5465_v61 }
0x109a   :  { %v1153_v2 = vadd.f32 %v1151_v63, %v1127_v0  ;;  %v942_v63 = vsel %vm237_vm8, %v940_v62, -inf }
0x109c   :  { %4659 = vtanh.f32 %v1153_v2  ;;  %v4462_v9 = vmul.f32 -1.442695, %v1153_v2 }
0x109e   :  { %4661 = vpow2.f32 %v4462_v9 }
0x10a2   :  { %v4660_v8 = vpop.eup %4659 }
0x10a3   :  { %1179 = vrot.lane.b32.xlu0 %v4660_v8, %s5083_s6 }
0x10a4   :  { %v4662_v36 = vpop.eup %4661 }
0x10a5   :  { %v1157_v10 = vadd.f32 1.0, %v4662_v36 }
0x10a7   :  { %4663 = vrcp.f32 %v1157_v10  ;;  %v1169_v13 = vand.u32 2147483648, %v1157_v10  ;;  %vm1163_vm14 = vweird.f32 %v1157_v10  ;;  %v1167_v14 = vand.u32 2147483647, %v1157_v10 }
0x10a9   :  { %v1170_v17 = vor.u32 1.1754944e-38, %v1169_v13  ;;  %vm1168_vm0 = vcmp.eq.f32.partialorder %v1167_v14, 8.507059e+37  ;;  %v730_v14 = vld [vmem:[%s6274_s0 + $0xa] sm:$0x3] }
0x10ad   :  { %v4664_v45 = vpop.eup %4663 }
0x10ae   :  { %v1159_v48 = vmul.f32 %v4664_v45, %v1157_v10  ;;  %vm1164_vm12 = vweird.f32 %v4664_v45 }
0x10af   :  { %vm1165_vm15 = vmor %vm1163_vm14, %vm1164_vm12 }
0x10b0   :  { %v1160_v11 = vsub.f32 1.0, %v1159_v48 }
0x10b2   :  { %v1161_v50 = vmul.f32 %v4664_v45, %v1160_v11 }
0x10b4   :  { %v1162_v12 = vadd.f32 %v4664_v45, %v1161_v50 }
0x10b6   :  { %v1166_v16 = vsel %vm1165_vm15, %v4664_v45, %v1162_v12 }
0x10b7   :  { %v1171_v19 = vsel %vm1168_vm0, %v1170_v17, %v1166_v16 }
0x10b8   :  { %v1177_v5 = vmul.f32 %v1175_v20, %v1171_v19 }
0x1115   :  { %v1180_v18 = vpop.permute.xlu0 %1179 }
0x1116   :  { %v1182_v4 = vmul.f32 %v1180_v18, %v1171_v19 }
0x1118   :  { %1184 = vrot.lane.b32.xlu2 %v1182_v4, %s5084_s18 }
0x1172   :  { %v1185_v21 = vpop.permute.xlu2 %1184 }
0x1173   :  { %v5469_v1 = vadd.f32 %v1185_v21, %v1177_v5 }
0x1175   :  { %4665 = vtanh.f32 %v5469_v1 }
0x117b   :  { %v4666_v6 = vpop.eup %4665 }
0x117c   :  { %1190 = vrot.lane.b32.xlu1 %v4666_v6, %s5083_s6 }
0x11ee   :  { %v1191_v22 = vpop.permute.xlu1 %1190 }
0x11ef   :  { %v5473_v23 = vmul.f32 %v1191_v22, %v1171_v19  ;;  %v1251_v19 = vrot.slane %v5469_v1, 6 }
0x11f1   :  { %v1201_v24 = vrot.slane %v5473_v23, 2 }
0x11f3   :  { %1202 = vrot.lane.b32.xlu0 %v1201_v24, %s5084_s18 }
0x121d   :  { %707 = vmax.xlane.f32.xlu0 %v706_v25 }
0x1265   :  { %v1203_v26 = vpop.permute.xlu0 %1202 }
0x1266   :  { %4463 = vmatmul.msk.f32.vlgmr.msrb.gmra.mxu2 %vm143_vm2, %v1203_v26 }
0x1290   :  { %v708_v34 = vpop.xlane.xlu0 %707 }
0x1291   :  { %v709_v35 = vsub.f32 %v704_v7, %v708_v34 }
0x1293   :  { %v710_v38 = vmul.f32 1.442695, %v709_v35 }
0x12e9   :  { %v1223_v27 = vpop.f32.mrf.mxu2 }
0x12ea   :  { %v1227_v28 = vrot.slane %v1223_v27, 4 }
0x12ec   :  { %v1229_v31 = vadd.f32 %v1227_v28, %v1200_v30 }
0x12ee   :  { %4667 = vtanh.f32 %v1229_v31  ;;  %v4464_v29 = vmul.f32 -1.442695, %v1229_v31 }
0x12ef   :  { %4669 = vpow2.f32 %v710_v38 }
0x12f0   :  { %4671 = vpow2.f32 %v4464_v29 }
0x12f4   :  { %v4668_v32 = vpop.eup %4667 }
0x12f5   :  { %1255 = vrot.lane.b32.xlu2 %v4668_v32, %s5083_s6  ;;  %v4670_v47 = vpop.eup %4669 }
0x12f6   :  { %v712_v15 = vsel %vm237_vm8, %v4670_v47, 0.0  ;;  %v4672_v49 = vpop.eup %4671 }
0x12f7   :  { %v1233_v46 = vadd.f32 1.0, %v4672_v49 }
0x12f9   :  { %4673 = vrcp.f32 %v1233_v46  ;;  %v1245_v42 = vand.u32 2147483648, %v1233_v46  ;;  %vm1239_vm3 = vweird.f32 %v1233_v46  ;;  %v1243_v56 = vand.u32 2147483647, %v1233_v46 }
0x12fb   :  { %v1246_v57 = vor.u32 1.1754944e-38, %v1245_v42  ;;  %vm1244_vm5 = vcmp.eq.f32.partialorder %v1243_v56, 8.507059e+37 }
0x12ff   :  { %v4674_v51 = vpop.eup %4673 }
0x1300   :  { %v1235_v52 = vmul.f32 %v4674_v51, %v1233_v46  ;;  %vm1240_vm1 = vweird.f32 %v4674_v51 }
0x1301   :  { %vm1241_vm4 = vmor %vm1239_vm3, %vm1240_vm1 }
0x1302   :  { %v1236_v39 = vsub.f32 1.0, %v1235_v52  ;;  %v5519_v52 = vld [vmem:[#allocation8 + $0x30] sm:$0xff] }
0x1304   :  { %v1237_v54 = vmul.f32 %v4674_v51, %v1236_v39 }
0x1306   :  { %v1238_v41 = vadd.f32 %v4674_v51, %v1237_v54  ;;  %v5523_v54 = vld [vmem:[#allocation8 + $0x28] sm:$0xff] }
0x1308   :  { %v1242_v37 = vsel %vm1241_vm4, %v4674_v51, %v1238_v41  ;;  %v5517_v51 = vld [vmem:[#allocation8 + $0x38] sm:$0xff]  ;;  %v5528_v41 = vld [vmem:[#allocation8 + $0x20] sm:$0xff] }
0x1309   :  { %v5485_v59 = vsel %vm1244_vm5, %v1246_v57, %v1242_v37  ;;  %1596 = vmatpush.msra.mxu1 %v5517_v51  ;;  %1674 = vmatpush.msrb.mxu2 %v5517_v51 }
0x130a   :  { %v1253_v4 = vmul.f32 %v1251_v19, %v5485_v59  ;;  %1822 = vmatpush.msrb.mxu0 %v5517_v51 }
0x130b   :  { %1597 = vmatpush.msra.mxu1 %v5519_v52  ;;  %1675 = vmatpush.msrb.mxu2 %v5519_v52 }
0x130c   :  { %1823 = vmatpush.msrb.mxu0 %v5519_v52 }
0x130d   :  { %1598 = vmatpush.msra.mxu1 %v5523_v54  ;;  %1676 = vmatpush.msrb.mxu2 %v5523_v54 }
0x130e   :  { %1824 = vmatpush.msrb.mxu0 %v5523_v54 }
0x130f   :  { %1599 = vmatpush.msra.mxu1 %v5528_v41  ;;  %1677 = vmatpush.msrb.mxu2 %v5528_v41 }
0x1310   :  { %1825 = vmatpush.msrb.mxu0 %v5528_v41 }
0x1311   :  { %1898 = vmatpush.msrb.mxu1 %v5517_v51 }
0x1313   :  { %1899 = vmatpush.msrb.mxu1 %v5519_v52 }
0x1315   :  { %1900 = vmatpush.msrb.mxu1 %v5523_v54 }
0x1317   :  { %1901 = vmatpush.msrb.mxu1 %v5528_v41 }
0x131e   :  { %825 = vmax.xlane.f32.xlu2 %v824_v44 }
0x1326   :  { %713 = vadd.xlane.f32.xlu2 %v712_v15 }
0x134f   :  { %v1256_v58 = vpop.permute.xlu2 %1255 }
0x1350   :  { %v1258_v60 = vmul.f32 %v1256_v58, %v5485_v59 }
0x1352   :  { %1260 = vrot.lane.b32.xlu1 %v1258_v60, %s5084_s18 }
0x137c   :  { %943 = vmax.xlane.f32.xlu1 %v942_v63 }
0x1391   :  { %v826_v0 = vpop.xlane.xlu2 %825 }
0x1392   :  { %v827_v2 = vsub.f32 %v822_v43, %v826_v0  ;;  %v848_v43 = vld [vmem:[%s6274_s0 + $0xc] sm:$0x3]  ;;  %v966_v0 = vld [vmem:[%s6274_s0 + $0xe] sm:$0x3] }
0x1394   :  { %v828_v8 = vmul.f32 1.442695, %v827_v2 }
0x1396   :  { %4675 = vpow2.f32 %v828_v8 }
0x1399   :  { %v714_v9 = vpop.xlane.xlu2 %713 }
0x139a   :  { %4677 = vrcp.f32 %v714_v9  ;;  %v726_v50 = vand.u32 2147483648, %v714_v9  ;;  %v724_v3 = vand.u32 2147483647, %v714_v9  ;;  %vm720_vm9 = vweird.f32 %v714_v9 }
0x139c   :  { %v4676_v36 = vpop.eup %4675  ;;  %v727_v12 = vor.u32 1.1754944e-38, %v726_v50  ;;  %vm725_vm12 = vcmp.eq.f32.partialorder %v724_v3, 8.507059e+37 }
0x139d   :  { %v830_v10 = vsel %vm237_vm8, %v4676_v36, 0.0 }
0x139e   :  { %831 = vadd.xlane.f32.xlu1 %v830_v10  ;;  %v4473_v10 = vld [vmem:[%s6287_s13 + $0x2] sm:$0x3] }
0x13a0   :  { %v4678_v45 = vpop.eup %4677 }
0x13a1   :  { %v716_v48 = vmul.f32 %v4678_v45, %v714_v9  ;;  %vm721_vm7 = vweird.f32 %v4678_v45 }
0x13a2   :  { %vm722_vm10 = vmor %vm720_vm9, %vm721_vm7 }
0x13a3   :  { %v717_v11 = vsub.f32 1.0, %v716_v48 }
0x13a5   :  { %v718_v33 = vmul.f32 %v4678_v45, %v717_v11 }
0x13a7   :  { %v719_v61 = vadd.f32 %v4678_v45, %v718_v33 }
0x13a9   :  { %v723_v13 = vsel %vm722_vm10, %v4678_v45, %v719_v61 }
0x13aa   :  { %v728_v16 = vsel %vm725_vm12, %v727_v12, %v723_v13 }
0x13ab   :  { %v729_v17 = vmul.f32 %v4670_v47, %v728_v16 }
0x13ad   :  { %v731_v18 = vmul.f32 %v730_v14, %v729_v17 }
0x13af   :  { %732 = vst.msk [vmem:[#allocation2 + $0x8] sm:$0x3] %vm237_vm8, %v731_v18  ;;  %v1276_v18 = vld [vmem:[#allocation4 + $0x8] sm:$0xc0] }
0x13c4   :  { %v1261_v20 = vpop.permute.xlu1 %1260 }
0x13c5   :  { %v5500_v5 = vadd.f32 %v1261_v20, %v1253_v4 }
0x13c7   :  { %4679 = vtanh.f32 %v5500_v5 }
0x13cd   :  { %v4680_v21 = vpop.eup %4679 }
0x13ce   :  { %1266 = vrot.lane.b32.xlu0 %v4680_v21, %s5083_s6 }
0x13ef   :  { %v944_v6 = vpop.xlane.xlu1 %943 }
0x13f0   :  { %v945_v22 = vsub.f32 %v940_v62, %v944_v6 }
0x13f2   :  { %v946_v24 = vmul.f32 1.442695, %v945_v22 }
0x13f4   :  { %4681 = vpow2.f32 %v946_v24 }
0x13fa   :  { %v5504_v7 = vpop.eup %4681 }
0x13fb   :  { %v948_v25 = vsel %vm237_vm8, %v5504_v7, 0.0 }
0x13fc   :  { %949 = vadd.xlane.f32.xlu2 %v948_v25 }
0x1411   :  { %v832_v1 = vpop.xlane.xlu1 %831 }
0x1412   :  { %4683 = vrcp.f32 %v832_v1  ;;  %v844_v30 = vand.u32 2147483648, %v832_v1  ;;  %v842_v32 = vand.u32 2147483647, %v832_v1  ;;  %vm838_vm15 = vweird.f32 %v832_v1 }
0x1414   :  { %v845_v35 = vor.u32 1.1754944e-38, %v844_v30  ;;  %vm843_vm1 = vcmp.eq.f32.partialorder %v842_v32, 8.507059e+37 }
0x1418   :  { %v4684_v26 = vpop.eup %4683 }
0x1419   :  { %v834_v27 = vmul.f32 %v4684_v26, %v832_v1  ;;  %vm839_vm14 = vweird.f32 %v4684_v26 }
0x141a   :  { %vm840_vm0 = vmor %vm838_vm15, %vm839_vm14 }
0x141b   :  { %v835_v28 = vsub.f32 1.0, %v834_v27 }
0x141d   :  { %v836_v31 = vmul.f32 %v4684_v26, %v835_v28 }
0x141f   :  { %v837_v34 = vadd.f32 %v4684_v26, %v836_v31 }
0x1421   :  { %v841_v38 = vsel %vm840_vm0, %v4684_v26, %v837_v34 }
0x1422   :  { %v846_v44 = vsel %vm843_vm1, %v845_v35, %v841_v38 }
0x1423   :  { %v847_v47 = vmul.f32 %v4676_v36, %v846_v44 }
0x1425   :  { %v849_v29 = vmul.f32 %v848_v43, %v847_v47 }
0x1427   :  { %850 = vst.msk [vmem:[#allocation2 + $0xa] sm:$0x3] %vm237_vm8, %v849_v29 }
0x1440   :  { %v1267_v15 = vpop.permute.xlu0 %1266 }
0x1441   :  { %v5513_v49 = vmul.f32 %v1267_v15, %v5485_v59 }
0x1443   :  { %v1277_v46 = vrot.slane %v5513_v49, 4 }
0x1445   :  { %1278 = vrot.lane.b32.xlu1 %v1277_v46, %s5084_s18 }
0x146f   :  { %v950_v39 = vpop.xlane.xlu2 %949 }
0x1470   :  { %4685 = vrcp.f32 %v950_v39  ;;  %v962_v57 = vand.u32 2147483648, %v950_v39  ;;  %v960_v59 = vand.u32 2147483647, %v950_v39  ;;  %vm956_vm4 = vweird.f32 %v950_v39 }
0x1472   :  { %v963_v62 = vor.u32 1.1754944e-38, %v962_v57  ;;  %vm961_vm6 = vcmp.eq.f32.partialorder %v960_v59, 8.507059e+37  ;;  %v4474_v57 = vld [vmem:[%s6288_s14 + $0x2] sm:$0x3]  ;;  %v1327_v59 = vrot.slane %v5500_v5, 6 }
0x1476   :  { %v4686_v42 = vpop.eup %4685 }
0x1477   :  { %v952_v56 = vmul.f32 %v4686_v42, %v950_v39  ;;  %vm957_vm3 = vweird.f32 %v4686_v42 }
0x1478   :  { %vm958_vm5 = vmor %vm956_vm4, %vm957_vm3 }
0x1479   :  { %v953_v37 = vsub.f32 1.0, %v952_v56 }
0x147b   :  { %v954_v58 = vmul.f32 %v4686_v42, %v953_v37 }
0x147d   :  { %v955_v60 = vadd.f32 %v4686_v42, %v954_v58  ;;  %v1629_v58 = vrot.slane %v4474_v57, 4 }
0x147f   :  { %v959_v63 = vsel %vm958_vm5, %v4686_v42, %v955_v60 }
0x1480   :  { %v964_v2 = vsel %vm961_vm6, %v963_v62, %v959_v63 }
0x1481   :  { %v965_v8 = vmul.f32 %v5504_v7, %v964_v2 }
0x1483   :  { %v967_v9 = vmul.f32 %v966_v0, %v965_v8 }
0x1485   :  { %968 = vst.msk [vmem:[#allocation2 + $0xc] sm:$0x3] %vm237_vm8, %v967_v9 }
0x148c   :  { %v970_v36 = vld [vmem:[#allocation2 + $0x8] sm:$0x3f] }
0x148d   :  { %4456 = vmatmul.msk.f32.gmra.mxu0 %vm6291_vm13, %v970_v36  ;;  %4458 = vmatmul.msk.f32.gmra.mxu1 %vm6291_vm13, %v970_v36 }
0x1495   :  { %4475 = vmatmul.msk.f32.vlgmr.msra.gmra.mxu1 %vm143_vm2, %v4473_v10 }
0x14b7   :  { %v1279_v45 = vpop.permute.xlu1 %1278 }
0x14b8   :  { %4465 = vmatmul.msk.f32.vlgmr.msrb.gmra.mxu3 %vm143_vm2, %v1279_v45 }
0x14b9   :  { %1750 = vmatpush.msrb.mxu3 %v5517_v51 }
0x14bb   :  { %1751 = vmatpush.msrb.mxu3 %v5519_v52 }
0x14bd   :  { %1752 = vmatpush.msrb.mxu3 %v5523_v54 }
0x14bf   :  { %1753 = vmatpush.msrb.mxu3 %v5528_v41 }
0x150a   :  { %v1019_v48 = vpop.f32.mrf.mxu0  ;;  %v1042_v11 = vpop.f32.mrf.mxu1 }
0x150b   :  { %v1020_v50 = vadd.f32 %v1019_v48, %v989_v40  ;;  %v1043_v33 = vadd.f32 %v1042_v11, %v990_v55 }
0x150d   :  { %1047 = vst [vmem:[#allocation4] sm:$0x3f] %v1020_v50 }
0x150e   :  { %1048 = vst [vmem:[#allocation4 + $0x10] sm:$0x3f] %v1043_v33 }
0x1512   :  { %v1601_v3 = vpop.f32.mrf.mxu1 }
0x1513   :  { %v1605_v61 = vrot.slane %v1601_v3, 4 }
0x1515   :  { %v1580_v12 = vld [vmem:[#allocation4 + $0x10] sm:$0x30] }
0x1516   :  { %v1607_v13 = vadd.f32 %v1605_v61, %v1580_v12  ;;  %v1352_v12 = vld [vmem:[#allocation4] sm:$0x3] }
0x1518   :  { %4687 = vtanh.f32 %v1607_v13  ;;  %v4476_v53 = vmul.f32 -1.442695, %v1607_v13 }
0x151e   :  { %v4688_v14 = vpop.eup %4687 }
0x151f   :  { %1635 = vrot.lane.b32.xlu0 %v4688_v14, %s5083_s6 }
0x153b   :  { %v1299_v16 = vpop.f32.mrf.mxu3 }
0x153c   :  { %v1303_v17 = vrot.slane %v1299_v16, 2 }
0x153e   :  { %v1305_v19 = vadd.f32 %v1303_v17, %v1276_v18 }
0x1540   :  { %4689 = vtanh.f32 %v1305_v19  ;;  %v4466_v20 = vmul.f32 -1.442695, %v1305_v19  ;;  %v1656_v19 = vld [vmem:[#allocation4 + $0x10] sm:$0xc] }
0x1541   :  { %4691 = vpow2.f32 %v4476_v53 }
0x1546   :  { %v4690_v4 = vpop.eup %4689 }
0x1547   :  { %1331 = vrot.lane.b32.xlu2 %v4690_v4, %s5083_s6  ;;  %v4692_v40 = vpop.eup %4691 }
0x1548   :  { %v1611_v55 = vadd.f32 1.0, %v4692_v40 }
0x154a   :  { %4693 = vrcp.f32 %v1611_v55  ;;  %v1623_v27 = vand.u32 2147483648, %v1611_v55  ;;  %vm1617_vm7 = vweird.f32 %v1611_v55  ;;  %v1621_v28 = vand.u32 2147483647, %v1611_v55 }
0x154b   :  { %4695 = vpow2.f32 %v4466_v20 }
0x154c   :  { %v1624_v32 = vor.u32 1.1754944e-38, %v1623_v27  ;;  %vm1622_vm10 = vcmp.eq.f32.partialorder %v1621_v28, 8.507059e+37 }
0x1550   :  { %v4694_v21 = vpop.eup %4693 }
0x1551   :  { %v4696_v6 = vpop.eup %4695  ;;  %v1613_v22 = vmul.f32 %v4694_v21, %v1611_v55  ;;  %vm1618_vm8 = vweird.f32 %v4694_v21 }
0x1552   :  { %v1309_v24 = vadd.f32 1.0, %v4696_v6  ;;  %vm1619_vm9 = vmor %vm1617_vm7, %vm1618_vm8 }
0x1553   :  { %v1614_v7 = vsub.f32 1.0, %v1613_v22 }
0x1554   :  { %4697 = vrcp.f32 %v1309_v24  ;;  %v1321_v29 = vand.u32 2147483648, %v1309_v24  ;;  %vm1315_vm14 = vweird.f32 %v1309_v24  ;;  %v1319_v15 = vand.u32 2147483647, %v1309_v24 }
0x1555   :  { %v1615_v25 = vmul.f32 %v4694_v21, %v1614_v7 }
0x1556   :  { %v1322_v39 = vor.u32 1.1754944e-38, %v1321_v29  ;;  %vm1320_vm0 = vcmp.eq.f32.partialorder %v1319_v15, 8.507059e+37 }
0x1557   :  { %v1616_v1 = vadd.f32 %v4694_v21, %v1615_v25 }
0x1559   :  { %v1620_v30 = vsel %vm1619_vm9, %v4694_v21, %v1616_v1 }
0x155a   :  { %v4698_v26 = vpop.eup %4697  ;;  %v1625_v34 = vsel %vm1622_vm10, %v1624_v32, %v1620_v30 }
0x155b   :  { %v1311_v31 = vmul.f32 %v4698_v26, %v1309_v24  ;;  %vm1316_vm12 = vweird.f32 %v4698_v26 }
0x155c   :  { %vm1317_vm15 = vmor %vm1315_vm14, %vm1316_vm12 }
0x155d   :  { %v1312_v43 = vsub.f32 1.0, %v1311_v31 }
0x155f   :  { %v1313_v44 = vmul.f32 %v4698_v26, %v1312_v43 }
0x1561   :  { %v1314_v47 = vadd.f32 %v4698_v26, %v1313_v44 }
0x1563   :  { %v1318_v46 = vsel %vm1317_vm15, %v4698_v26, %v1314_v47 }
0x1564   :  { %v1323_v56 = vsel %vm1320_vm0, %v1322_v39, %v1318_v46 }
0x1565   :  { %v1329_v60 = vmul.f32 %v1327_v59, %v1323_v56 }
0x1591   :  { %v1636_v35 = vpop.permute.xlu0 %1635 }
0x1592   :  { %v1638_v38 = vmul.f32 %v1636_v35, %v1625_v34 }
0x1594   :  { %1640 = vrot.lane.b32.xlu1 %v1638_v38, %s5084_s18 }
0x15a1   :  { %v1332_v42 = vpop.permute.xlu2 %1331 }
0x15a2   :  { %v1334_v37 = vmul.f32 %v1332_v42, %v1323_v56 }
0x15a4   :  { %1336 = vrot.lane.b32.xlu0 %v1334_v37, %s5084_s18 }
0x15ac   :  { %1630 = vrot.lane.b32.xlu0 %v1629_v58, %s5084_s18 }
0x1606   :  { %v1641_v9 = vpop.permute.xlu1 %1640 }
0x1616   :  { %v1337_v62 = vpop.permute.xlu0 %1336 }
0x1617   :  { %v5570_v63 = vadd.f32 %v1337_v62, %v1329_v60 }
0x1619   :  { %4699 = vtanh.f32 %v5570_v63  ;;  %v1400_v58 = vrot.slane %v5570_v63, 6 }
0x161e   :  { %v1631_v0 = vpop.permute.xlu0 %1630 }
0x161f   :  { %v4700_v2 = vpop.eup %4699  ;;  %v1633_v8 = vmul.f32 %v1631_v0, %v1625_v34 }
0x1620   :  { %1342 = vrot.lane.b32.xlu2 %v4700_v2, %s5083_s6 }
0x1621   :  { %v5574_v36 = vadd.f32 %v1641_v9, %v1633_v8 }
0x1623   :  { %4701 = vtanh.f32 %v5574_v36  ;;  %v1707_v2 = vrot.slane %v5574_v36, 2 }
0x1629   :  { %v4702_v10 = vpop.eup %4701 }
0x162a   :  { %1646 = vrot.lane.b32.xlu0 %v4702_v10, %s5083_s6 }
0x167a   :  { %v1343_v5 = vpop.permute.xlu2 %1342 }
0x167b   :  { %v5578_v45 = vmul.f32 %v1343_v5, %v1323_v56 }
0x167d   :  { %v1353_v48 = vrot.slane %v5578_v45, 6 }
0x167f   :  { %1354 = vrot.lane.b32.xlu1 %v1353_v48, %s5084_s18 }
0x169c   :  { %v1647_v11 = vpop.permute.xlu0 %1646 }
0x169d   :  { %v5582_v50 = vmul.f32 %v1647_v11, %v1625_v34 }
0x169f   :  { %v1657_v33 = vrot.slane %v5582_v50, 4 }
0x16a1   :  { %1658 = vrot.lane.b32.xlu2 %v1657_v33, %s5084_s18 }
0x16f1   :  { %v1355_v3 = vpop.permute.xlu1 %1354 }
0x16f2   :  { %4467 = vmatmul.msk.f32.vlgmr.msra.gmra.mxu2 %vm143_vm2, %v1355_v3 }
0x16f3   :  { %1973 = vmatpush.msra.mxu2 %v5517_v51 }
0x16f5   :  { %1974 = vmatpush.msra.mxu2 %v5519_v52 }
0x16f7   :  { %1975 = vmatpush.msra.mxu2 %v5523_v54 }
0x16f9   :  { %1976 = vmatpush.msra.mxu2 %v5528_v41 }
0x16fb   :  { %v1659_v61 = vpop.permute.xlu2 %1658 }
0x16fc   :  { %4477 = vmatmul.msk.f32.vlgmr.msrb.gmra.mxu2 %vm143_vm2, %v1659_v61 }
0x1775   :  { %v1375_v13 = vpop.f32.mrf.mxu2 }
0x1776   :  { %v1378_v14 = vadd.f32 %v1375_v13, %v1352_v12 }
0x1778   :  { %4703 = vtanh.f32 %v1378_v14  ;;  %v4468_v40 = vmul.f32 -1.442695, %v1378_v14  ;;  %v1424_v14 = vld [vmem:[#allocation4] sm:$0xc] }
0x177e   :  { %v4704_v16 = vpop.eup %4703 }
0x177f   :  { %1404 = vrot.lane.b32.xlu0 %v4704_v16, %s5083_s6  ;;  %v1679_v17 = vpop.f32.mrf.mxu2 }
0x1780   :  { %v1683_v18 = vrot.slane %v1679_v17, 6 }
0x1782   :  { %v1685_v4 = vadd.f32 %v1683_v18, %v1656_v19  ;;  %v1732_v18 = vld [vmem:[#allocation4 + $0x10] sm:$0x3] }
0x1784   :  { %4705 = vtanh.f32 %v1685_v4  ;;  %v4478_v20 = vmul.f32 -1.442695, %v1685_v4 }
0x1785   :  { %4707 = vpow2.f32 %v4468_v40 }
0x1786   :  { %4709 = vpow2.f32 %v4478_v20 }
0x178a   :  { %v4706_v53 = vpop.eup %4705 }
0x178b   :  { %1711 = vrot.lane.b32.xlu1 %v4706_v53, %s5083_s6  ;;  %v4708_v55 = vpop.eup %4707 }
0x178c   :  { %v1382_v21 = vadd.f32 1.0, %v4708_v55  ;;  %v4710_v6 = vpop.eup %4709 }
0x178d   :  { %v1689_v24 = vadd.f32 1.0, %v4710_v6 }
0x178e   :  { %4711 = vrcp.f32 %v1382_v21  ;;  %v1394_v30 = vand.u32 2147483648, %v1382_v21  ;;  %vm1388_vm3 = vweird.f32 %v1382_v21  ;;  %v1392_v31 = vand.u32 2147483647, %v1382_v21 }
0x178f   :  { %4713 = vrcp.f32 %v1689_v24  ;;  %v1701_v15 = vand.u32 2147483648, %v1689_v24  ;;  %vm1695_vm8 = vweird.f32 %v1689_v24  ;;  %v1699_v46 = vand.u32 2147483647, %v1689_v24 }
0x1790   :  { %v1395_v35 = vor.u32 1.1754944e-38, %v1394_v30  ;;  %vm1393_vm5 = vcmp.eq.f32.partialorder %v1392_v31, 8.507059e+37 }
0x1791   :  { %v1702_v42 = vor.u32 1.1754944e-38, %v1701_v15  ;;  %vm1700_vm9 = vcmp.eq.f32.partialorder %v1699_v46, 8.507059e+37 }
0x1794   :  { %v4712_v22 = vpop.eup %4711 }
0x1795   :  { %v1384_v7 = vmul.f32 %v4712_v22, %v1382_v21  ;;  %v4714_v26 = vpop.eup %4713  ;;  %vm1389_vm1 = vweird.f32 %v4712_v22 }
0x1796   :  { %v1691_v28 = vmul.f32 %v4714_v26, %v1689_v24  ;;  %vm1390_vm4 = vmor %vm1388_vm3, %vm1389_vm1  ;;  %vm1696_vm6 = vweird.f32 %v4714_v26 }
0x1797   :  { %v1385_v25 = vsub.f32 1.0, %v1384_v7  ;;  %vm1697_vm7 = vmor %vm1695_vm8, %vm1696_vm6 }
0x1798   :  { %v1692_v34 = vsub.f32 1.0, %v1691_v28 }
0x1799   :  { %v1386_v1 = vmul.f32 %v4712_v22, %v1385_v25 }
0x179a   :  { %v1693_v47 = vmul.f32 %v4714_v26, %v1692_v34 }
0x179b   :  { %v1387_v27 = vadd.f32 %v4712_v22, %v1386_v1 }
0x179c   :  { %v1694_v29 = vadd.f32 %v4714_v26, %v1693_v47 }
0x179d   :  { %v1391_v32 = vsel %vm1390_vm4, %v4712_v22, %v1387_v27 }
0x179e   :  { %v1396_v38 = vsel %vm1393_vm5, %v1395_v35, %v1391_v32  ;;  %v1698_v39 = vsel %vm1697_vm7, %v4714_v26, %v1694_v29 }
0x179f   :  { %v1703_v37 = vsel %vm1700_vm9, %v1702_v42, %v1698_v39  ;;  %v1402_v59 = vmul.f32 %v1400_v58, %v1396_v38 }
0x17a0   :  { %v1709_v8 = vmul.f32 %v1707_v2, %v1703_v37 }
0x17f1   :  { %v1405_v43 = vpop.permute.xlu0 %1404 }
0x17f2   :  { %v1407_v44 = vmul.f32 %v1405_v43, %v1396_v38 }
0x17f4   :  { %1409 = vrot.lane.b32.xlu2 %v1407_v44, %s5084_s18 }
0x17fd   :  { %v1712_v56 = vpop.permute.xlu1 %1711 }
0x17fe   :  { %v1714_v57 = vmul.f32 %v1712_v56, %v1703_v37 }
0x1800   :  { %1716 = vrot.lane.b32.xlu0 %v1714_v57, %s5084_s18 }
0x184e   :  { %v1410_v60 = vpop.permute.xlu2 %1409 }
0x184f   :  { %v5597_v62 = vadd.f32 %v1410_v60, %v1402_v59 }
0x1851   :  { %4715 = vtanh.f32 %v5597_v62  ;;  %v1472_v42 = vrot.slane %v5597_v62, 6 }
0x1857   :  { %v4716_v0 = vpop.eup %4715 }
0x1858   :  { %1415 = vrot.lane.b32.xlu1 %v4716_v0, %s5083_s6 }
0x1872   :  { %v1717_v9 = vpop.permute.xlu0 %1716 }
0x1873   :  { %v5602_v10 = vadd.f32 %v1717_v9, %v1709_v8 }
0x1875   :  { %4717 = vtanh.f32 %v5602_v10  ;;  %v1780_v59 = vrot.slane %v5602_v10, 2 }
0x187b   :  { %v4718_v5 = vpop.eup %4717 }
0x187c   :  { %1722 = vrot.lane.b32.xlu2 %v4718_v5, %s5083_s6 }
0x18ca   :  { %v1416_v63 = vpop.permute.xlu1 %1415 }
0x18cb   :  { %v1418_v48 = vmul.f32 %v1416_v63, %v1396_v38 }
0x18cd   :  { %1420 = vrot.lane.b32.xlu0 %v1418_v48, %s5084_s18 }
0x18d6   :  { %v1723_v11 = vpop.permute.xlu2 %1722 }
0x18d7   :  { %v5607_v33 = vmul.f32 %v1723_v11, %v1703_v37 }
0x18d9   :  { %v1733_v3 = vrot.slane %v5607_v33, 2 }
0x18db   :  { %1734 = vrot.lane.b32.xlu1 %v1733_v3, %s5084_s18 }
0x193f   :  { %v1421_v36 = vpop.permute.xlu0 %1420 }
0x1940   :  { %1423 = vst.msk [vmem:[#allocation3 + $0x8] sm:$0x3] %vm6290_vm11, %v1421_v36  ;;  %4469 = vmatmul.msk.f32.vlgmr.msra.gmra.mxu3 %vm143_vm2, %v1421_v36 }
0x1941   :  { %2048 = vmatpush.msra.mxu3 %v5517_v51 }
0x1943   :  { %2049 = vmatpush.msra.mxu3 %v5519_v52 }
0x1945   :  { %2050 = vmatpush.msra.mxu3 %v5523_v54 }
0x1947   :  { %2051 = vmatpush.msra.mxu3 %v5528_v41 }
0x194d   :  { %v1735_v61 = vpop.permute.xlu1 %1734 }
0x194e   :  { %4479 = vmatmul.msk.f32.vlgmr.msrb.gmra.mxu3 %vm143_vm2, %v1735_v61 }
0x19c3   :  { %v1444_v12 = vpop.f32.mrf.mxu3 }
0x19c4   :  { %v1448_v13 = vrot.slane %v1444_v12, 6  ;;  %v1805_v12 = vld [vmem:[#allocation4 + $0x18] sm:$0xc0] }
0x19c6   :  { %v1450_v16 = vadd.f32 %v1448_v13, %v1424_v14 }
0x19c8   :  { %4719 = vtanh.f32 %v1450_v16  ;;  %v4470_v54 = vmul.f32 -1.442695, %v1450_v16 }
0x19ce   :  { %v4720_v17 = vpop.eup %4719 }
0x19cf   :  { %1476 = vrot.lane.b32.xlu2 %v4720_v17, %s5083_s6 }
0x19d1   :  { %v1755_v19 = vpop.f32.mrf.mxu3 }
0x19d2   :  { %v1758_v51 = vadd.f32 %v1755_v19, %v1732_v18 }
0x19d4   :  { %4721 = vtanh.f32 %v1758_v51  ;;  %v4480_v21 = vmul.f32 -1.442695, %v1758_v51 }
0x19d5   :  { %4723 = vpow2.f32 %v4470_v54 }
0x19da   :  { %v4722_v52 = vpop.eup %4721 }
0x19db   :  { %1784 = vrot.lane.b32.xlu0 %v4722_v52, %s5083_s6  ;;  %v4724_v41 = vpop.eup %4723 }
0x19dc   :  { %v1454_v4 = vadd.f32 1.0, %v4724_v41 }
0x19de   :  { %4725 = vrcp.f32 %v1454_v4  ;;  %v1466_v22 = vand.u32 2147483648, %v1454_v4  ;;  %vm1460_vm12 = vweird.f32 %v1454_v4  ;;  %v1464_v24 = vand.u32 2147483647, %v1454_v4 }
0x19df   :  { %4727 = vpow2.f32 %v4480_v21 }
0x19e0   :  { %v1467_v25 = vor.u32 1.1754944e-38, %v1466_v22  ;;  %vm1465_vm15 = vcmp.eq.f32.partialorder %v1464_v24, 8.507059e+37 }
0x19e4   :  { %v4726_v53 = vpop.eup %4725 }
0x19e5   :  { %v1456_v40 = vmul.f32 %v4726_v53, %v1454_v4  ;;  %vm1461_vm10 = vweird.f32 %v4726_v53  ;;  %v4728_v27 = vpop.eup %4727 }
0x19e6   :  { %vm1462_vm14 = vmor %vm1460_vm12, %vm1461_vm10  ;;  %v1762_v30 = vadd.f32 1.0, %v4728_v27 }
0x19e7   :  { %v1457_v55 = vsub.f32 1.0, %v1456_v40 }
0x19e8   :  { %4729 = vrcp.f32 %v1762_v30  ;;  %v1774_v43 = vand.u32 2147483648, %v1762_v30  ;;  %vm1768_vm1 = vweird.f32 %v1762_v30  ;;  %v1772_v44 = vand.u32 2147483647, %v1762_v30 }
0x19e9   :  { %v1458_v20 = vmul.f32 %v4726_v53, %v1457_v55 }
0x19ea   :  { %v1775_v29 = vor.u32 1.1754944e-38, %v1774_v43  ;;  %vm1773_vm4 = vcmp.eq.f32.partialorder %v1772_v44, 8.507059e+37 }
0x19eb   :  { %v1459_v6 = vadd.f32 %v4726_v53, %v1458_v20 }
0x19ed   :  { %v1463_v7 = vsel %vm1462_vm14, %v4726_v53, %v1459_v6 }
0x19ee   :  { %v1468_v26 = vsel %vm1465_vm15, %v1467_v25, %v1463_v7  ;;  %v4730_v31 = vpop.eup %4729 }
0x19ef   :  { %v1764_v32 = vmul.f32 %v4730_v31, %v1762_v30  ;;  %vm1769_vm0 = vweird.f32 %v4730_v31  ;;  %v1474_v56 = vmul.f32 %v1472_v42, %v1468_v26 }
0x19f0   :  { %vm1770_vm3 = vmor %vm1768_vm1, %vm1769_vm0 }
0x19f1   :  { %v1765_v34 = vsub.f32 1.0, %v1764_v32 }
0x19f3   :  { %v1766_v35 = vmul.f32 %v4730_v31, %v1765_v34  ;;  %v1880_v34 = vld [vmem:[#allocation4 + $0x18] sm:$0x30] }
0x19f5   :  { %v1767_v38 = vadd.f32 %v4730_v31, %v1766_v35 }
0x19f7   :  { %v1771_v47 = vsel %vm1770_vm3, %v4730_v31, %v1767_v38 }
0x19f8   :  { %v1776_v46 = vsel %vm1773_vm4, %v1775_v29, %v1771_v47 }
0x19f9   :  { %v1782_v60 = vmul.f32 %v1780_v59, %v1776_v46 }
0x1a29   :  { %v1477_v1 = vpop.permute.xlu2 %1476 }
0x1a2a   :  { %v1479_v28 = vmul.f32 %v1477_v1, %v1468_v26 }
0x1a2c   :  { %1481 = vrot.lane.b32.xlu1 %v1479_v28, %s5084_s18 }
0x1a4d   :  { %v1785_v15 = vpop.permute.xlu0 %1784 }
0x1a4e   :  { %v1787_v39 = vmul.f32 %v1785_v15, %v1776_v46 }
0x1a50   :  { %1789 = vrot.lane.b32.xlu2 %v1787_v39, %s5084_s18 }
0x1a9e   :  { %v1482_v37 = vpop.permute.xlu1 %1481 }
0x1a9f   :  { %v5623_v57 = vadd.f32 %v1482_v37, %v1474_v56 }
0x1aa1   :  { %4731 = vtanh.f32 %v5623_v57 }
0x1aa7   :  { %v4732_v58 = vpop.eup %4731 }
0x1aa8   :  { %1487 = vrot.lane.b32.xlu0 %v4732_v58, %s5083_s6 }
0x1aaa   :  { %v1790_v0 = vpop.permute.xlu2 %1789 }
0x1aab   :  { %v1792_v2 = vadd.f32 %v1790_v0, %v1782_v60 }
0x1aad   :  { %4733 = vtanh.f32 %v1792_v2  ;;  %v1855_v22 = vrot.slane %v1792_v2, 2 }
0x1ab3   :  { %v4734_v8 = vpop.eup %4733 }
0x1ab4   :  { %1795 = vrot.lane.b32.xlu1 %v4734_v8, %s5083_s6 }
0x1b1a   :  { %v1488_v9 = vpop.permute.xlu0 %1487 }
0x1b1b   :  { %v5629_v62 = vmul.f32 %v1488_v9, %v1468_v26 }
0x1b1d   :  { %v1497_v5 = vrot.slane %v5629_v62, 2 }
0x1b1f   :  { %1498 = vrot.lane.b32.xlu2 %v1497_v5, %s5084_s18 }
0x1b26   :  { %v1796_v63 = vpop.permute.xlu1 %1795 }
0x1b27   :  { %v5633_v48 = vmul.f32 %v1796_v63, %v1776_v46 }
0x1b29   :  { %1806 = vrot.lane.b32.xlu0 %v5633_v48, %s5084_s18 }
0x1b79   :  { %v1499_v10 = vpop.permute.xlu2 %1498 }
0x1b7a   :  { %4471 = vmatmul.msk.f32.vlgmr.msra.gmra.mxu0 %vm143_vm2, %v1499_v10 }
0x1b9b   :  { %v1807_v11 = vpop.permute.xlu0 %1806 }
0x1b9c   :  { %4481 = vmatmul.msk.f32.vlgmr.msrb.gmra.mxu0 %vm143_vm2, %v1807_v11 }
0x1bf7   :  { %v5639_v3 = vpop.f32.mrf.mxu0 }
0x1c19   :  { %v1827_v36 = vpop.f32.mrf.mxu0 }
0x1c1a   :  { %v1831_v61 = vrot.slane %v1827_v36, 2 }
0x1c1c   :  { %v1833_v13 = vadd.f32 %v1831_v61, %v1805_v12 }
0x1c1e   :  { %4735 = vtanh.f32 %v1833_v13  ;;  %v4482_v16 = vmul.f32 -1.442695, %v1833_v13 }
0x1c20   :  { %4737 = vpow2.f32 %v4482_v16  ;;  %v1955_v16 = vld [vmem:[#allocation4 + $0x18] sm:$0xc] }
0x1c24   :  { %v4736_v14 = vpop.eup %4735 }
0x1c25   :  { %1859 = vrot.lane.b32.xlu1 %v4736_v14, %s5083_s6 }
0x1c26   :  { %v4738_v17 = vpop.eup %4737 }
0x1c27   :  { %v1837_v18 = vadd.f32 1.0, %v4738_v17 }
0x1c29   :  { %4739 = vrcp.f32 %v1837_v18  ;;  %v1849_v4 = vand.u32 2147483648, %v1837_v18  ;;  %vm1843_vm6 = vweird.f32 %v1837_v18  ;;  %v1847_v53 = vand.u32 2147483647, %v1837_v18 }
0x1c2b   :  { %v1850_v55 = vor.u32 1.1754944e-38, %v1849_v4  ;;  %vm1848_vm7 = vcmp.eq.f32.partialorder %v1847_v53, 8.507059e+37 }
0x1c2f   :  { %v4740_v19 = vpop.eup %4739 }
0x1c30   :  { %v1839_v51 = vmul.f32 %v4740_v19, %v1837_v18  ;;  %vm1844_vm5 = vweird.f32 %v4740_v19 }
0x1c31   :  { %vm1845_vm8 = vmor %vm1843_vm6, %vm1844_vm5 }
0x1c32   :  { %v1840_v52 = vsub.f32 1.0, %v1839_v51 }
0x1c34   :  { %v1841_v54 = vmul.f32 %v4740_v19, %v1840_v52 }
0x1c36   :  { %v1842_v41 = vadd.f32 %v4740_v19, %v1841_v54 }
0x1c38   :  { %v1846_v40 = vsel %vm1845_vm8, %v4740_v19, %v1842_v41 }
0x1c39   :  { %v1851_v21 = vsel %vm1848_vm7, %v1850_v55, %v1846_v40  ;;  %vm1198_vm7 = vcmask 257026  }
0x1c3a   :  { %v1857_v24 = vmul.f32 %v1855_v22, %v1851_v21 }
0x1c97   :  { %v1860_v20 = vpop.permute.xlu1 %1859 }
0x1c98   :  { %v1862_v6 = vmul.f32 %v1860_v20, %v1851_v21 }
0x1c9a   :  { %1864 = vrot.lane.b32.xlu2 %v1862_v6, %s5084_s18 }
0x1cf4   :  { %v1865_v7 = vpop.permute.xlu2 %1864 }
0x1cf5   :  { %v1867_v25 = vadd.f32 %v1865_v7, %v1857_v24 }
0x1cf7   :  { %4741 = vtanh.f32 %v1867_v25  ;;  %v1931_v8 = vrot.slane %v1867_v25, 2 }
0x1cfd   :  { %v4742_v1 = vpop.eup %4741 }
0x1cfe   :  { %1870 = vrot.lane.b32.xlu0 %v4742_v1, %s5083_s6 }
0x1d70   :  { %v1871_v26 = vpop.permute.xlu0 %1870 }
0x1d71   :  { %v5644_v27 = vmul.f32 %v1871_v26, %v1851_v21 }
0x1d73   :  { %v1881_v28 = vrot.slane %v5644_v27, 6 }
0x1d75   :  { %1882 = vrot.lane.b32.xlu1 %v1881_v28, %s5084_s18 }
0x1de7   :  { %v1883_v30 = vpop.permute.xlu1 %1882 }
0x1de8   :  { %4483 = vmatmul.msk.f32.vlgmr.msrb.gmra.mxu1 %vm143_vm2, %v1883_v30 }
0x1e65   :  { %v1903_v31 = vpop.f32.mrf.mxu1 }
0x1e66   :  { %v1907_v32 = vrot.slane %v1903_v31, 4 }
0x1e68   :  { %v1909_v35 = vadd.f32 %v1907_v32, %v1880_v34 }
0x1e6a   :  { %4743 = vtanh.f32 %v1909_v35  ;;  %v4484_v43 = vmul.f32 -1.442695, %v1909_v35 }
0x1e6c   :  { %4745 = vpow2.f32 %v4484_v43 }
0x1e70   :  { %v4744_v38 = vpop.eup %4743 }
0x1e71   :  { %1935 = vrot.lane.b32.xlu2 %v4744_v38, %s5083_s6  ;;  %v2030_v38 = vld [vmem:[#allocation4 + $0x18] sm:$0x3] }
0x1e72   :  { %v4746_v44 = vpop.eup %4745 }
0x1e73   :  { %v1913_v47 = vadd.f32 1.0, %v4746_v44 }
0x1e75   :  { %4747 = vrcp.f32 %v1913_v47  ;;  %v1925_v56 = vand.u32 2147483648, %v1913_v47  ;;  %vm1919_vm10 = vweird.f32 %v1913_v47  ;;  %v1923_v37 = vand.u32 2147483647, %v1913_v47 }
0x1e77   :  { %v1926_v59 = vor.u32 1.1754944e-38, %v1925_v56  ;;  %vm1924_vm14 = vcmp.eq.f32.partialorder %v1923_v37, 8.507059e+37 }
0x1e7b   :  { %v4748_v29 = vpop.eup %4747 }
0x1e7c   :  { %v1915_v15 = vmul.f32 %v4748_v29, %v1913_v47  ;;  %vm1920_vm9 = vweird.f32 %v4748_v29 }
0x1e7d   :  { %vm1921_vm12 = vmor %vm1919_vm10, %vm1920_vm9  ;;  %vm1274_vm9 = vcmask 259076   ;;  %vm1654_vm10 = vcmask 521476  }
0x1e7e   :  { %v1916_v46 = vsub.f32 1.0, %v1915_v15 }
0x1e80   :  { %v1917_v39 = vmul.f32 %v4748_v29, %v1916_v46 }
0x1e82   :  { %v1918_v42 = vadd.f32 %v4748_v29, %v1917_v39 }
0x1e84   :  { %v1922_v58 = vsel %vm1921_vm12, %v4748_v29, %v1918_v42  ;;  %vm1350_vm12 = vcmask 261126  }
0x1e85   :  { %v1927_v0 = vsel %vm1924_vm14, %v1926_v59, %v1922_v58  ;;  %vm1878_vm14 = vcmask 523526  }
0x1e86   :  { %v1933_v9 = vmul.f32 %v1931_v8, %v1927_v0 }
0x1ecb   :  { %v1936_v60 = vpop.permute.xlu2 %1935 }
0x1ecc   :  { %v1938_v2 = vmul.f32 %v1936_v60, %v1927_v0 }
0x1ece   :  { %1940 = vrot.lane.b32.xlu0 %v1938_v2, %s5084_s18 }
0x1f40   :  { %v1941_v5 = vpop.permute.xlu0 %1940 }
0x1f41   :  { %v1943_v63 = vadd.f32 %v1941_v5, %v1933_v9 }
0x1f43   :  { %4749 = vtanh.f32 %v1943_v63  ;;  %v2006_v25 = vrot.slane %v1943_v63, 2 }
0x1f49   :  { %v4750_v10 = vpop.eup %4749 }
0x1f4a   :  { %1946 = vrot.lane.b32.xlu1 %v4750_v10, %s5083_s6 }
0x1fbc   :  { %v1947_v11 = vpop.permute.xlu1 %1946 }
0x1fbd   :  { %v5652_v36 = vmul.f32 %v1947_v11, %v1927_v0 }
0x1fbf   :  { %v1956_v61 = vrot.slane %v5652_v36, 4 }
0x1fc1   :  { %1957 = vrot.lane.b32.xlu2 %v1956_v61, %s5084_s18 }
0x201b   :  { %v1958_v12 = vpop.permute.xlu2 %1957 }
0x201c   :  { %4485 = vmatmul.msk.f32.vlgmr.msra.gmra.mxu2 %vm143_vm2, %v1958_v12 }
0x209f   :  { %v1978_v13 = vpop.f32.mrf.mxu2 }
0x20a0   :  { %v1982_v14 = vrot.slane %v1978_v13, 6 }
0x20a2   :  { %v1984_v17 = vadd.f32 %v1982_v14, %v1955_v16  ;;  %v2117_v14 = vld [vmem:[#allocation5 + $0xe0] sm:$0xff]  ;;  %v2118_v16 = vld [vmem:[#allocation5 + $0xe8] sm:$0xff] }
0x20a4   :  { %4751 = vtanh.f32 %v1984_v17  ;;  %v4486_v19 = vmul.f32 -1.442695, %v1984_v17  ;;  %v2115_v17 = vld [vmem:[#allocation5 + $0xd0] sm:$0xff] }
0x20a6   :  { %4753 = vpow2.f32 %v4486_v19  ;;  %v2113_v19 = vld [vmem:[#allocation5 + $0xc0] sm:$0xff] }
0x20aa   :  { %v4752_v18 = vpop.eup %4751 }
0x20ab   :  { %2010 = vrot.lane.b32.xlu0 %v4752_v18, %s5083_s6  ;;  %v2116_v18 = vld [vmem:[#allocation5 + $0xd8] sm:$0xff] }
0x20ac   :  { %v4754_v51 = vpop.eup %4753 }
0x20ad   :  { %v1988_v52 = vadd.f32 1.0, %v4754_v51  ;;  %v2114_v51 = vld [vmem:[#allocation5 + $0xc8] sm:$0xff] }
0x20af   :  { %4755 = vrcp.f32 %v1988_v52  ;;  %v2000_v55 = vand.u32 2147483648, %v1988_v52  ;;  %vm1994_vm0 = vweird.f32 %v1988_v52  ;;  %v1998_v20 = vand.u32 2147483647, %v1988_v52 }
0x20b1   :  { %v2001_v6 = vor.u32 1.1754944e-38, %v2000_v55  ;;  %vm1999_vm3 = vcmp.eq.f32.partialorder %v1998_v20, 8.507059e+37  ;;  %v2109_v55 = vld [vmem:[#allocation5 + $0xa0] sm:$0xff]  ;;  %v2110_v20 = vld [vmem:[#allocation5 + $0xa8] sm:$0xff] }
0x20b5   :  { %v4756_v54 = vpop.eup %4755 }
0x20b6   :  { %v1990_v41 = vmul.f32 %v4756_v54, %v1988_v52  ;;  %vm1995_vm15 = vweird.f32 %v4756_v54 }
0x20b7   :  { %vm1996_vm1 = vmor %vm1994_vm0, %vm1995_vm15  ;;  %vm1730_vm15 = vcmask 519426   ;;  %vm1803_vm0 = vcmask 517376  }
0x20b8   :  { %v1991_v4 = vsub.f32 1.0, %v1990_v41 }
0x20ba   :  { %v1992_v53 = vmul.f32 %v4756_v54, %v1991_v4 }
0x20bc   :  { %v1993_v40 = vadd.f32 %v4756_v54, %v1992_v53  ;;  %v2111_v53 = vld [vmem:[#allocation5 + $0xb0] sm:$0xff] }
0x20be   :  { %v1997_v21 = vsel %vm1996_vm1, %v4756_v54, %v1993_v40  ;;  %v2112_v40 = vld [vmem:[#allocation5 + $0xb8] sm:$0xff] }
0x20bf   :  { %v2002_v24 = vsel %vm1999_vm3, %v2001_v6, %v1997_v21  ;;  %v5683_v21 = vld [vmem:[#allocation8 + $0x58] sm:$0xff]  ;;  %v2107_v6 = vld [vmem:[#allocation5 + $0x90] sm:$0xff] }
0x20c0   :  { %v2008_v1 = vmul.f32 %v2006_v25, %v2002_v24  ;;  %2209 = vmatpush.msrb.mxu2 %v5683_v21  ;;  %2279 = vmatpush.msrb.mxu3 %v5683_v21  ;;  %v2106_v25 = vld [vmem:[#allocation5 + $0x88] sm:$0xff] }
0x211d   :  { %v2011_v22 = vpop.permute.xlu0 %2010 }
0x211e   :  { %v2013_v7 = vmul.f32 %v2011_v22, %v2002_v24  ;;  %v2108_v22 = vld [vmem:[#allocation5 + $0x98] sm:$0xff] }
0x2120   :  { %2015 = vrot.lane.b32.xlu1 %v2013_v7, %s5084_s18  ;;  %v2105_v7 = vld [vmem:[#allocation5 + $0x80] sm:$0xff] }
0x2192   :  { %v2016_v26 = vpop.permute.xlu1 %2015 }
0x2193   :  { %v2018_v28 = vadd.f32 %v2016_v26, %v2008_v1  ;;  %v5691_v1 = vld [vmem:[#allocation8 + $0x48] sm:$0xff]  ;;  %v5693_v26 = vld [vmem:[#allocation8 + $0x40] sm:$0xff] }
0x2195   :  { %4757 = vtanh.f32 %v2018_v28  ;;  %v2078_v5 = vrot.slane %v2018_v28, 2  ;;  %v4494_v28 = vld [vmem:[%s6287_s13 + $0x4] sm:$0x3] }
0x219b   :  { %v4758_v30 = vpop.eup %4757 }
0x219c   :  { %2021 = vrot.lane.b32.xlu2 %v4758_v30, %s5083_s6  ;;  %v4495_v30 = vld [vmem:[%s6288_s14 + $0x4] sm:$0x3] }
0x21f6   :  { %v2022_v31 = vpop.permute.xlu2 %2021 }
0x21f7   :  { %v2024_v32 = vmul.f32 %v2022_v31, %v2002_v24  ;;  %v5686_v24 = vld [vmem:[#allocation8 + $0x50] sm:$0xff] }
0x21f8   :  { %2210 = vmatpush.msrb.mxu2 %v5686_v24  ;;  %2280 = vmatpush.msrb.mxu3 %v5686_v24 }
0x21f9   :  { %v2031_v34 = vrot.slane %v2024_v32, 2 }
0x21fa   :  { %2211 = vmatpush.msrb.mxu2 %v5691_v1  ;;  %2281 = vmatpush.msrb.mxu3 %v5691_v1 }
0x21fb   :  { %2032 = vrot.lane.b32.xlu0 %v2031_v34, %s5084_s18  ;;  %v5729_v34 = vld [vmem:[%s6282_s8 + $0x2] sm:$0x3] }
0x21fc   :  { %2212 = vmatpush.msrb.mxu2 %v5693_v26  ;;  %2282 = vmatpush.msrb.mxu3 %v5693_v26 }
0x21fd   :  { %4496 = vmatmul.msk.f32.vlgmr.msrb.gmra.mxu2 %vm143_vm2, %v4494_v28 }
0x21fe   :  { %2354 = vmatpush.msra.mxu2 %v5683_v21 }
0x2200   :  { %2355 = vmatpush.msra.mxu2 %v5686_v24 }
0x2202   :  { %2356 = vmatpush.msra.mxu2 %v5691_v1 }
0x2204   :  { %2357 = vmatpush.msra.mxu2 %v5693_v26 }
0x2206   :  { %2504 = vmatpush.msrb.mxu2 %v5683_v21 }
0x2208   :  { %2505 = vmatpush.msrb.mxu2 %v5686_v24 }
0x220a   :  { %2506 = vmatpush.msrb.mxu2 %v5691_v1 }
0x220c   :  { %2507 = vmatpush.msrb.mxu2 %v5693_v26 }
0x226d   :  { %v2033_v35 = vpop.permute.xlu0 %2032 }
0x226e   :  { %4487 = vmatmul.msk.f32.vlgmr.msra.gmra.mxu3 %vm143_vm2, %v2033_v35  ;;  %v2124_v35 = vperm.slane %v5729_v34, 0 }
0x226f   :  { %2429 = vmatpush.msra.mxu3 %v5683_v21 }
0x2271   :  { %2430 = vmatpush.msra.mxu3 %v5686_v24 }
0x2273   :  { %2431 = vmatpush.msra.mxu3 %v5691_v1 }
0x2275   :  { %2432 = vmatpush.msra.mxu3 %v5693_v26 }
0x22f1   :  { %v2053_v43 = vpop.f32.mrf.mxu3 }
0x22f2   :  { %v2056_v44 = vadd.f32 %v2053_v43, %v2030_v38  ;;  %v2125_v38 = vperm.slane %v5729_v34, 1 }
0x22f4   :  { %4759 = vtanh.f32 %v2056_v44  ;;  %v4488_v29 = vmul.f32 -1.442695, %v2056_v44 }
0x22f6   :  { %4761 = vpow2.f32 %v4488_v29 }
0x22fa   :  { %v4760_v47 = vpop.eup %4759 }
0x22fb   :  { %2082 = vrot.lane.b32.xlu1 %v4760_v47, %s5083_s6 }
0x22fc   :  { %v4762_v15 = vpop.eup %4761 }
0x22fd   :  { %v2060_v46 = vadd.f32 1.0, %v4762_v15  ;;  %v2214_v15 = vpop.f32.mrf.mxu2 }
0x22ff   :  { %4763 = vrcp.f32 %v2060_v46  ;;  %v2072_v59 = vand.u32 2147483648, %v2060_v46  ;;  %vm2066_vm5 = vweird.f32 %v2060_v46  ;;  %v2070_v60 = vand.u32 2147483647, %v2060_v46 }
0x2301   :  { %vm2071_vm8 = vcmp.eq.f32.partialorder %v2070_v60, 8.507059e+37 }
0x2303   :  { %1195 = vrot.lane.b32.xlu1 %v5473_v23, %s5084_s18  ;;  %v2073_v23 = vor.u32 1.1754944e-38, %v2072_v59 }
0x2305   :  { %v4764_v39 = vpop.eup %4763 }
0x2306   :  { %v2062_v42 = vmul.f32 %v4764_v39, %v2060_v46  ;;  %vm2067_vm4 = vweird.f32 %v4764_v39 }
0x2307   :  { %vm2068_vm6 = vmor %vm2066_vm5, %vm2067_vm4 }
0x2308   :  { %v2063_v56 = vsub.f32 1.0, %v2062_v42 }
0x230a   :  { %v2064_v37 = vmul.f32 %v4764_v39, %v2063_v56 }
0x230b   :  { %1875 = vrot.lane.b32.xlu1 %v5644_v27, %s5083_s6 }
0x230c   :  { %v2065_v58 = vadd.f32 %v4764_v39, %v2064_v37 }
0x230e   :  { %v2069_v0 = vsel %vm2068_vm6, %v4764_v39, %v2065_v58 }
0x230f   :  { %v2074_v27 = vsel %vm2071_vm8, %v2073_v23, %v2069_v0 }
0x2310   :  { %v2080_v63 = vmul.f32 %v2078_v5, %v2074_v27 }
0x236d   :  { %v2083_v2 = vpop.permute.xlu1 %2082 }
0x236e   :  { %v2085_v8 = vmul.f32 %v2083_v2, %v2074_v27 }
0x2370   :  { %2087 = vrot.lane.b32.xlu2 %v2085_v8, %s5084_s18 }
0x2375   :  { %v1196_v9 = vpop.permute.xlu1 %1195 }
0x2376   :  { %1199 = vst.msk [vmem:[#allocation3] sm:$0xc] %vm1198_vm7, %v1196_v9 }
0x2378   :  { %1271 = vrot.lane.b32.xlu2 %v5513_v49, %s5084_s18  ;;  %v2119_v49 = vld [vmem:[#allocation5 + $0xf0] sm:$0xff] }
0x2379   :  { %2142 = vmatpush.msra.mxu0 %v2119_v49 }
0x237b   :  { %2143 = vmatpush.msra.mxu0 %v2117_v14 }
0x237d   :  { %2144 = vmatpush.msra.mxu0 %v2115_v17  ;;  %v1876_v41 = vpop.permute.xlu1 %1875 }
0x237f   :  { %2145 = vmatpush.msra.mxu0 %v2113_v19 }
0x2380   :  { %1951 = vrot.lane.b32.xlu2 %v5652_v36, %s5083_s6  ;;  %v2120_v36 = vld [vmem:[#allocation5 + $0xf8] sm:$0xff] }
0x2381   :  { %2165 = vmatpush.msra.mxu1 %v2120_v36  ;;  %2146 = vmatpush.msra.mxu0 %v2111_v53 }
0x2383   :  { %2166 = vmatpush.msra.mxu1 %v2118_v16  ;;  %2147 = vmatpush.msra.mxu0 %v2109_v55 }
0x2385   :  { %2167 = vmatpush.msra.mxu1 %v2116_v18  ;;  %2148 = vmatpush.msra.mxu0 %v2107_v6 }
0x2387   :  { %2168 = vmatpush.msra.mxu1 %v2114_v51  ;;  %2149 = vmatpush.msra.mxu0 %v2105_v7 }
0x2389   :  { %2169 = vmatpush.msra.mxu1 %v2112_v40  ;;  %2648 = vmatpush.msrb.mxu0 %v5683_v21 }
0x238b   :  { %2170 = vmatpush.msra.mxu1 %v2110_v20  ;;  %2649 = vmatpush.msrb.mxu0 %v5686_v24 }
0x238d   :  { %2171 = vmatpush.msra.mxu1 %v2108_v22  ;;  %2650 = vmatpush.msrb.mxu0 %v5691_v1 }
0x238f   :  { %2172 = vmatpush.msra.mxu1 %v2106_v25  ;;  %2651 = vmatpush.msrb.mxu0 %v5693_v26 }
0x23ca   :  { %v2088_v10 = vpop.permute.xlu2 %2087 }
0x23cb   :  { %v2090_v11 = vadd.f32 %v2088_v10, %v2080_v63 }
0x23cd   :  { %4765 = vtanh.f32 %v2090_v11 }
0x23d2   :  { %v1272_v61 = vpop.permute.xlu2 %1271 }
0x23d3   :  { %v4766_v12 = vpop.eup %4765  ;;  %1275 = vst.msk [vmem:[#allocation3] sm:$0x30] %vm1274_vm9, %v1272_v61 }
0x23d4   :  { %2093 = vrot.lane.b32.xlu0 %v4766_v12, %s5083_s6 }
0x23da   :  { %v1952_v13 = vpop.permute.xlu2 %1951 }
0x23db   :  { %1954 = vst.msk [vmem:[#allocation3] sm:$0x30] %vm1654_vm10, %v1952_v13 }
0x23dc   :  { %1347 = vrot.lane.b32.xlu0 %v5578_v45, %s5084_s18 }
0x23e4   :  { %2026 = vrot.lane.b32.xlu0 %v2024_v32, %s5083_s6 }
0x23ec   :  { %2239 = vrot.lane.b32.xlu0 %v4495_v30, %s5084_s18 }
0x2446   :  { %v2094_v52 = vpop.permute.xlu0 %2093 }
0x2447   :  { %v2096_v45 = vmul.f32 %v2094_v52, %v2074_v27 }
0x2449   :  { %2098 = vrot.lane.b32.xlu1 %v2096_v45, %s5083_s6 }
0x244e   :  { %v1348_v54 = vpop.permute.xlu0 %1347 }
0x244f   :  { %1351 = vst.msk [vmem:[#allocation3] sm:$0xc0] %vm1350_vm12, %v1348_v54 }
0x2450   :  { %1879 = vst.msk [vmem:[#allocation3] sm:$0xc0] %vm1878_vm14, %v1876_v41 }
0x2456   :  { %v2027_v4 = vpop.permute.xlu0 %2026 }
0x2457   :  { %2029 = vst.msk [vmem:[#allocation3] sm:$0xc] %vm1730_vm15, %v2027_v4 }
0x245e   :  { %v2240_v61 = vpop.permute.xlu0 %2239 }
0x24bb   :  { %v2099_v31 = vpop.permute.xlu1 %2098 }
0x24bc   :  { %2101 = vst.msk [vmem:[#allocation3] sm:$0x3] %vm1803_vm0, %v2099_v31 }
0x24c3   :  { %v2102_v32 = vld [vmem:[#allocation3] sm:$0xff] }
0x24c4   :  { %4490 = vmatmul.msk.f32.vlgmr.msra.gmra.mxu0 %vm6291_vm13, %v2102_v32  ;;  %4492 = vmatmul.msk.f32.vlgmr.msra.gmra.mxu1 %vm6291_vm13, %v2102_v32 }
0x2541   :  { %v2151_v43 = vpop.f32.mrf.mxu0  ;;  %v2174_v44 = vpop.f32.mrf.mxu1 }
0x2542   :  { %v2152_v47 = vadd.f32 %v2151_v43, %v2124_v35  ;;  %v2175_v29 = vadd.f32 %v2174_v44, %v2125_v38 }
0x2544   :  { %2180 = vst [vmem:[#allocation4 + $0x8] sm:$0xff] %v2152_v47 }
0x2545   :  { %2181 = vst [vmem:[#allocation4 + $0x18] sm:$0xff] %v2175_v29 }
0x254b   :  { %v2193_v46 = vld [vmem:[#allocation4 + $0x8] sm:$0x3]  ;;  %v2264_v51 = vld [vmem:[#allocation4 + $0x8] sm:$0xc] }
0x254c   :  { %v2217_v39 = vadd.f32 %v2214_v15, %v2193_v46 }
0x254e   :  { %4767 = vtanh.f32 %v2217_v39  ;;  %v4497_v56 = vmul.f32 -1.442695, %v2217_v39 }
0x2550   :  { %4769 = vpow2.f32 %v4497_v56 }
0x2554   :  { %v4768_v42 = vpop.eup %4767 }
0x2555   :  { %2244 = vrot.lane.b32.xlu2 %v4768_v42, %s5083_s6 }
0x2556   :  { %v4770_v37 = vpop.eup %4769 }
0x2557   :  { %v2221_v58 = vadd.f32 1.0, %v4770_v37 }
0x2559   :  { %4771 = vrcp.f32 %v2221_v58  ;;  %v2233_v27 = vand.u32 2147483648, %v2221_v58  ;;  %vm2227_vm3 = vweird.f32 %v2221_v58  ;;  %v2231_v8 = vand.u32 2147483647, %v2221_v58 }
0x255b   :  { %v2234_v5 = vor.u32 1.1754944e-38, %v2233_v27  ;;  %vm2232_vm5 = vcmp.eq.f32.partialorder %v2231_v8, 8.507059e+37 }
0x255f   :  { %v4772_v59 = vpop.eup %4771 }
0x2560   :  { %v2223_v60 = vmul.f32 %v4772_v59, %v2221_v58  ;;  %vm2228_vm1 = vweird.f32 %v4772_v59 }
0x2561   :  { %vm2229_vm4 = vmor %vm2227_vm3, %vm2228_vm1 }
0x2562   :  { %v2224_v0 = vsub.f32 1.0, %v2223_v60 }
0x2564   :  { %v2225_v23 = vmul.f32 %v4772_v59, %v2224_v0 }
0x2566   :  { %v2226_v2 = vadd.f32 %v4772_v59, %v2225_v23 }
0x2568   :  { %v2230_v9 = vsel %vm2229_vm4, %v4772_v59, %v2226_v2 }
0x2569   :  { %v2235_v63 = vsel %vm2232_vm5, %v2234_v5, %v2230_v9 }
0x256a   :  { %v2242_v12 = vmul.f32 %v2240_v61, %v2235_v63 }
0x25af   :  { %v2245_v10 = vpop.permute.xlu2 %2244 }
0x25b0   :  { %v2247_v11 = vmul.f32 %v2245_v10, %v2235_v63 }
0x25b2   :  { %2249 = vrot.lane.b32.xlu1 %v2247_v11, %s5084_s18 }
0x2624   :  { %v2250_v13 = vpop.permute.xlu1 %2249 }
0x2625   :  { %v2252_v49 = vadd.f32 %v2250_v13, %v2242_v12  ;;  %v2336_v13 = vld [vmem:[#allocation4 + $0x8] sm:$0x30] }
0x2627   :  { %4773 = vtanh.f32 %v2252_v49  ;;  %v2312_v43 = vrot.slane %v2252_v49, 6 }
0x262d   :  { %v4774_v36 = vpop.eup %4773 }
0x262e   :  { %2255 = vrot.lane.b32.xlu2 %v4774_v36, %s5083_s6  ;;  %v1547_v36 = vrot.slane %v5623_v57, 6 }
0x2688   :  { %v2256_v14 = vpop.permute.xlu2 %2255 }
0x2689   :  { %v2258_v16 = vmul.f32 %v2256_v14, %v2235_v63 }
0x268b   :  { %2260 = vrot.lane.b32.xlu0 %v2258_v16, %s5084_s18 }
0x26fd   :  { %v2261_v17 = vpop.permute.xlu0 %2260 }
0x26fe   :  { %2263 = vst.msk [vmem:[#allocation2] sm:$0x3] %vm6290_vm11, %v2261_v17  ;;  %4498 = vmatmul.msk.f32.vlgmr.msrb.gmra.mxu3 %vm143_vm2, %v2261_v17 }
0x26ff   :  { %2573 = vmatpush.msrb.mxu3 %v5683_v21 }
0x2701   :  { %2574 = vmatpush.msrb.mxu3 %v5686_v24  ;;  %v1523_v24 = vrot.slane %v5639_v3, 4 }
0x2703   :  { %2575 = vmatpush.msrb.mxu3 %v5691_v1  ;;  %v1496_v1 = vld [vmem:[#allocation4] sm:$0x30] }
0x2705   :  { %2576 = vmatpush.msrb.mxu3 %v5693_v26  ;;  %v1525_v26 = vadd.f32 %v1523_v24, %v1496_v1 }
0x2707   :  { %v4472_v15 = vmul.f32 -1.442695, %v1525_v26 }
0x2781   :  { %v2284_v18 = vpop.f32.mrf.mxu3 }
0x2782   :  { %v2288_v19 = vrot.slane %v2284_v18, 6 }
0x2784   :  { %v2290_v52 = vadd.f32 %v2288_v19, %v2264_v51 }
0x2786   :  { %4775 = vtanh.f32 %v2290_v52  ;;  %v4499_v54 = vmul.f32 -1.442695, %v2290_v52 }
0x2788   :  { %4777 = vpow2.f32 %v4499_v54 }
0x278c   :  { %v4776_v45 = vpop.eup %4775 }
0x278d   :  { %2316 = vrot.lane.b32.xlu1 %v4776_v45, %s5083_s6 }
0x278e   :  { %v4778_v41 = vpop.eup %4777 }
0x278f   :  { %v2294_v4 = vadd.f32 1.0, %v4778_v41 }
0x2791   :  { %4779 = vrcp.f32 %v2294_v4  ;;  %v2306_v6 = vand.u32 2147483648, %v2294_v4  ;;  %vm2300_vm8 = vweird.f32 %v2294_v4  ;;  %v2304_v22 = vand.u32 2147483647, %v2294_v4 }
0x2792   :  { %4781 = vtanh.f32 %v1525_v26 }
0x2793   :  { %v2307_v25 = vor.u32 1.1754944e-38, %v2306_v6  ;;  %vm2305_vm3 = vcmp.eq.f32.partialorder %v2304_v22, 8.507059e+37 }
0x2797   :  { %v4780_v53 = vpop.eup %4779 }
0x2798   :  { %v2296_v40 = vmul.f32 %v4780_v53, %v2294_v4  ;;  %vm2301_vm6 = vweird.f32 %v4780_v53  ;;  %v4782_v32 = vpop.eup %4781 }
0x2799   :  { %vm2302_vm1 = vmor %vm2300_vm8, %vm2301_vm6 }
0x279a   :  { %v2297_v55 = vsub.f32 1.0, %v2296_v40 }
0x279c   :  { %v2298_v20 = vmul.f32 %v4780_v53, %v2297_v55 }
0x279e   :  { %v2299_v21 = vadd.f32 %v4780_v53, %v2298_v20 }
0x27a0   :  { %v2303_v7 = vsel %vm2302_vm1, %v4780_v53, %v2299_v21 }
0x27a1   :  { %v2308_v30 = vsel %vm2305_vm3, %v2307_v25, %v2303_v7 }
0x27a2   :  { %v2314_v44 = vmul.f32 %v2312_v43, %v2308_v30  ;;  %v5783_v43 = vld [vmem:[#allocation8 + $0x78] sm:$0xff] }
0x27a3   :  { %2730 = vmatpush.msrb.mxu1 %v5783_v43  ;;  %2953 = vmatpush.msra.mxu0 %v5783_v43 }
0x27ff   :  { %v2317_v28 = vpop.permute.xlu1 %2316 }
0x2800   :  { %v2319_v31 = vmul.f32 %v2317_v28, %v2308_v30 }
0x2802   :  { %2321 = vrot.lane.b32.xlu2 %v2319_v31, %s5084_s18 }
0x280a   :  { %1551 = vrot.lane.b32.xlu2 %v4782_v32, %s5083_s6 }
0x285c   :  { %v2322_v47 = vpop.permute.xlu2 %2321 }
0x285d   :  { %v5751_v29 = vadd.f32 %v2322_v47, %v2314_v44  ;;  %v5785_v44 = vld [vmem:[#allocation8 + $0x70] sm:$0xff]  ;;  %v5789_v47 = vld [vmem:[#allocation8 + $0x68] sm:$0xff] }
0x285e   :  { %2731 = vmatpush.msrb.mxu1 %v5785_v44  ;;  %2954 = vmatpush.msra.mxu0 %v5785_v44 }
0x285f   :  { %4783 = vtanh.f32 %v5751_v29  ;;  %v2387_v1 = vrot.slane %v5751_v29, 6 }
0x2860   :  { %4785 = vpow2.f32 %v4472_v15  ;;  %2732 = vmatpush.msrb.mxu1 %v5789_v47  ;;  %2955 = vmatpush.msra.mxu0 %v5789_v47 }
0x2864   :  { %v1552_v5 = vpop.permute.xlu2 %1551 }
0x2865   :  { %v4784_v3 = vpop.eup %4783 }
0x2866   :  { %2327 = vrot.lane.b32.xlu0 %v4784_v3, %s5083_s6  ;;  %v4786_v46 = vpop.eup %4785 }
0x2867   :  { %v1529_v39 = vadd.f32 1.0, %v4786_v46 }
0x2869   :  { %4787 = vrcp.f32 %v1529_v39  ;;  %v1541_v2 = vand.u32 2147483648, %v1529_v39  ;;  %vm1535_vm5 = vweird.f32 %v1529_v39  ;;  %v1539_v27 = vand.u32 2147483647, %v1529_v39 }
0x286b   :  { %v1542_v9 = vor.u32 1.1754944e-38, %v1541_v2  ;;  %vm1540_vm8 = vcmp.eq.f32.partialorder %v1539_v27, 8.507059e+37 }
0x286f   :  { %v4788_v42 = vpop.eup %4787 }
0x2870   :  { %v1531_v56 = vmul.f32 %v4788_v42, %v1529_v39  ;;  %vm1536_vm4 = vweird.f32 %v4788_v42 }
0x2871   :  { %vm1537_vm6 = vmor %vm1535_vm5, %vm1536_vm4 }
0x2872   :  { %v1532_v37 = vsub.f32 1.0, %v1531_v56 }
0x2874   :  { %v1533_v58 = vmul.f32 %v4788_v42, %v1532_v37 }
0x2876   :  { %v1534_v0 = vadd.f32 %v4788_v42, %v1533_v58 }
0x2878   :  { %v1538_v8 = vsel %vm1537_vm6, %v4788_v42, %v1534_v0  ;;  %v4510_v42 = vld [vmem:[%s6287_s13 + $0x6] sm:$0x3] }
0x2879   :  { %v1543_v63 = vsel %vm1540_vm8, %v1542_v9, %v1538_v8 }
0x287a   :  { %v1554_v10 = vmul.f32 %v1552_v5, %v1543_v63  ;;  %v1549_v16 = vmul.f32 %v1547_v36, %v1543_v63  ;;  %v4511_v36 = vld [vmem:[%s6288_s14 + $0x6] sm:$0x3] }
0x28d8   :  { %v2328_v59 = vpop.permute.xlu0 %2327 }
0x28d9   :  { %v5755_v60 = vmul.f32 %v2328_v59, %v2308_v30 }
0x28db   :  { %v2337_v23 = vrot.slane %v5755_v60, 2 }
0x28dd   :  { %2338 = vrot.lane.b32.xlu1 %v2337_v23, %s5084_s18 }
0x28e5   :  { %1556 = vrot.lane.b32.xlu1 %v1554_v10, %s5084_s18 }
0x294f   :  { %v2339_v11 = vpop.permute.xlu1 %2338 }
0x2950   :  { %4500 = vmatmul.msk.f32.vlgmr.msra.gmra.mxu2 %vm143_vm2, %v2339_v11 }
0x2951   :  { %2807 = vmatpush.msra.mxu2 %v5783_v43 }
0x2953   :  { %2808 = vmatpush.msra.mxu2 %v5785_v44 }
0x2955   :  { %2809 = vmatpush.msra.mxu2 %v5789_v47 }
0x2957   :  { %v1557_v14 = vpop.permute.xlu1 %1556 }
0x2958   :  { %v1559_v17 = vadd.f32 %v1557_v14, %v1549_v16  ;;  %v2763_v16 = vrot.slane %v4511_v36, 4 }
0x29d3   :  { %v2359_v61 = vpop.f32.mrf.mxu2 }
0x29d4   :  { %v2363_v12 = vrot.slane %v2359_v61, 4  ;;  %v2411_v61 = vld [vmem:[#allocation4 + $0x8] sm:$0xc0] }
0x29d6   :  { %v2365_v49 = vadd.f32 %v2363_v12, %v2336_v13 }
0x29d8   :  { %4789 = vtanh.f32 %v2365_v49  ;;  %v4501_v51 = vmul.f32 -1.442695, %v2365_v49 }
0x29d9   :  { %4791 = vtanh.f32 %v1559_v17 }
0x29da   :  { %4793 = vpow2.f32 %v4501_v51 }
0x29de   :  { %v4790_v18 = vpop.eup %4789 }
0x29df   :  { %2391 = vrot.lane.b32.xlu0 %v4790_v18, %s5083_s6  ;;  %v4792_v19 = vpop.eup %4791 }
0x29e0   :  { %v4794_v52 = vpop.eup %4793 }
0x29e1   :  { %v2369_v45 = vadd.f32 1.0, %v4794_v52 }
0x29e3   :  { %4795 = vrcp.f32 %v2369_v45  ;;  %v2381_v40 = vand.u32 2147483648, %v2369_v45  ;;  %vm2375_vm3 = vweird.f32 %v2369_v45  ;;  %v2379_v55 = vand.u32 2147483647, %v2369_v45 }
0x29e5   :  { %v2382_v21 = vor.u32 1.1754944e-38, %v2381_v40  ;;  %vm2380_vm5 = vcmp.eq.f32.partialorder %v2379_v55, 8.507059e+37 }
0x29e7   :  { %1562 = vrot.lane.b32.xlu0 %v4792_v19, %s5083_s6 }
0x29e9   :  { %v4796_v54 = vpop.eup %4795 }
0x29ea   :  { %v2371_v41 = vmul.f32 %v4796_v54, %v2369_v45  ;;  %vm2376_vm1 = vweird.f32 %v4796_v54 }
0x29eb   :  { %vm2377_vm4 = vmor %vm2375_vm3, %vm2376_vm1 }
0x29ec   :  { %v2372_v4 = vsub.f32 1.0, %v2371_v41 }
0x29ee   :  { %v2373_v57 = vmul.f32 %v4796_v54, %v2372_v4 }
0x29f0   :  { %v2374_v53 = vadd.f32 %v4796_v54, %v2373_v57 }
0x29f2   :  { %v2378_v20 = vsel %vm2377_vm4, %v4796_v54, %v2374_v53 }
0x29f3   :  { %v2383_v22 = vsel %vm2380_vm5, %v2382_v21, %v2378_v20 }
0x29f4   :  { %v2389_v26 = vmul.f32 %v2387_v1, %v2383_v22 }
0x2a51   :  { %v2392_v6 = vpop.permute.xlu0 %2391 }
0x2a52   :  { %v2394_v24 = vmul.f32 %v2392_v6, %v2383_v22 }
0x2a54   :  { %2396 = vrot.lane.b32.xlu2 %v2394_v24, %s5084_s18 }
0x2a59   :  { %v1563_v7 = vpop.permute.xlu0 %1562 }
0x2a5a   :  { %v1565_v25 = vmul.f32 %v1563_v7, %v1543_v63 }
0x2a5c   :  { %1492 = vrot.lane.b32.xlu2 %v5629_v62, %s5084_s18  ;;  %1567 = vrot.lane.b32.xlu0 %v1565_v25, %s5084_s18 }
0x2a64   :  { %1727 = vrot.lane.b32.xlu2 %v5607_v33, %s5083_s6  ;;  %1800 = vrot.lane.b32.xlu0 %v5633_v48, %s5083_s6 }
0x2aae   :  { %v2397_v28 = vpop.permute.xlu2 %2396 }
0x2aaf   :  { %v5773_v30 = vadd.f32 %v2397_v28, %v2389_v26 }
0x2ab1   :  { %4797 = vtanh.f32 %v5773_v30 }
0x2ab6   :  { %v1493_v31 = vpop.permute.xlu2 %1492 }
0x2ab7   :  { %v4798_v32 = vpop.eup %4797  ;;  %1495 = vst.msk [vmem:[#allocation3 + $0x8] sm:$0xc] %vm1198_vm7, %v1493_v31 }
0x2ab8   :  { %2402 = vrot.lane.b32.xlu1 %v4798_v32, %s5083_s6 }
0x2abe   :  { %v1728_v62 = vpop.permute.xlu2 %1727 }
0x2abf   :  { %1731 = vst.msk [vmem:[#allocation3 + $0x8] sm:$0xc] %vm1730_vm15, %v1728_v62 }
0x2ac0   :  { %1651 = vrot.lane.b32.xlu1 %v5582_v50, %s5083_s6  ;;  %v5794_v50 = vld [vmem:[#allocation8 + $0x60] sm:$0xff] }
0x2ac1   :  { %2733 = vmatpush.msrb.mxu1 %v5794_v50  ;;  %2810 = vmatpush.msra.mxu2 %v5794_v50 }
0x2ac2   :  { %2956 = vmatpush.msra.mxu0 %v5794_v50 }
0x2ac3   :  { %3028 = vmatpush.msra.mxu1 %v5783_v43 }
0x2ac5   :  { %3029 = vmatpush.msra.mxu1 %v5785_v44 }
0x2ac7   :  { %3030 = vmatpush.msra.mxu1 %v5789_v47 }
0x2ac9   :  { %3031 = vmatpush.msra.mxu1 %v5794_v50 }
0x2ace   :  { %v1568_v33 = vpop.permute.xlu0 %1567 }
0x2acf   :  { %1570 = vst.msk [vmem:[#allocation3 + $0x8] sm:$0x30] %vm1274_vm9, %v1568_v33 }
0x2ad6   :  { %v1801_v48 = vpop.permute.xlu0 %1800 }
0x2ad7   :  { %1804 = vst.msk [vmem:[#allocation3 + $0x8] sm:$0x3] %vm1803_vm0, %v1801_v48 }
0x2b2a   :  { %v2403_v29 = vpop.permute.xlu1 %2402 }
0x2b2b   :  { %v5807_v3 = vmul.f32 %v2403_v29, %v2383_v22  ;;  %v2462_v29 = vrot.slane %v5773_v30, 6 }
0x2b2d   :  { %v2412_v15 = vrot.slane %v5807_v3, 4 }
0x2b2f   :  { %2413 = vrot.lane.b32.xlu1 %v2412_v15, %s5084_s18 }
0x2b32   :  { %v1652_v46 = vpop.permute.xlu1 %1651 }
0x2b33   :  { %1655 = vst.msk [vmem:[#allocation3 + $0x8] sm:$0x30] %vm1654_vm10, %v1652_v46 }
0x2b3a   :  { %v2103_v39 = vld [vmem:[#allocation3 + $0x8] sm:$0x3f] }
0x2b3b   :  { %4491 = vmatmul.msk.f32.gmra.mxu0 %vm6291_vm13, %v2103_v39  ;;  %4493 = vmatmul.msk.f32.gmra.mxu1 %vm6291_vm13, %v2103_v39 }
0x2b43   :  { %4512 = vmatmul.msk.f32.vlgmr.msrb.gmra.mxu1 %vm143_vm2, %v4510_v42 }
0x2ba1   :  { %v2414_v56 = vpop.permute.xlu1 %2413 }
0x2ba2   :  { %4502 = vmatmul.msk.f32.vlgmr.msra.gmra.mxu3 %vm143_vm2, %v2414_v56 }
0x2ba3   :  { %2882 = vmatpush.msra.mxu3 %v5783_v43 }
0x2ba5   :  { %2883 = vmatpush.msra.mxu3 %v5785_v44 }
0x2ba7   :  { %2884 = vmatpush.msra.mxu3 %v5789_v47 }
0x2ba9   :  { %2885 = vmatpush.msra.mxu3 %v5794_v50 }
0x2bb8   :  { %v2154_v37 = vpop.f32.mrf.mxu0  ;;  %v2177_v58 = vpop.f32.mrf.mxu1 }
0x2bb9   :  { %v2155_v59 = vadd.f32 %v2154_v37, %v2124_v35  ;;  %v2178_v0 = vadd.f32 %v2177_v58, %v2125_v38 }
0x2bbb   :  { %2182 = vst [vmem:[#allocation4] sm:$0x3f] %v2155_v59 }
0x2bbc   :  { %2183 = vst [vmem:[#allocation4 + $0x10] sm:$0x3f] %v2178_v0 }
0x2bc0   :  { %v2735_v23 = vpop.f32.mrf.mxu1 }
0x2bc1   :  { %v2739_v2 = vrot.slane %v2735_v23, 4 }
0x2bc3   :  { %v2714_v27 = vld [vmem:[#allocation4 + $0x10] sm:$0x30] }
0x2bc4   :  { %v2741_v8 = vadd.f32 %v2739_v2, %v2714_v27  ;;  %v2486_v27 = vld [vmem:[#allocation4] sm:$0x3] }
0x2bc6   :  { %4799 = vtanh.f32 %v2741_v8  ;;  %v4513_v5 = vmul.f32 -1.442695, %v2741_v8 }
0x2bc8   :  { %4801 = vpow2.f32 %v4513_v5 }
0x2bcc   :  { %v4800_v9 = vpop.eup %4799 }
0x2bcd   :  { %2769 = vrot.lane.b32.xlu0 %v4800_v9, %s5083_s6 }
0x2bce   :  { %v4802_v63 = vpop.eup %4801 }
0x2bcf   :  { %v2745_v10 = vadd.f32 1.0, %v4802_v63 }
0x2bd1   :  { %4803 = vrcp.f32 %v2745_v10  ;;  %v2757_v18 = vand.u32 2147483648, %v2745_v10  ;;  %vm2751_vm8 = vweird.f32 %v2745_v10  ;;  %v2755_v19 = vand.u32 2147483647, %v2745_v10 }
0x2bd3   :  { %v2758_v52 = vor.u32 1.1754944e-38, %v2757_v18  ;;  %vm2756_vm3 = vcmp.eq.f32.partialorder %v2755_v19, 8.507059e+37 }
0x2bd7   :  { %v4804_v38 = vpop.eup %4803 }
0x2bd8   :  { %v2747_v12 = vmul.f32 %v4804_v38, %v2745_v10  ;;  %vm2752_vm6 = vweird.f32 %v4804_v38 }
0x2bd9   :  { %vm2753_vm1 = vmor %vm2751_vm8, %vm2752_vm6 }
0x2bda   :  { %v2748_v49 = vsub.f32 1.0, %v2747_v12 }
0x2bdc   :  { %v2749_v14 = vmul.f32 %v4804_v38, %v2748_v49 }
0x2bde   :  { %v2750_v17 = vadd.f32 %v4804_v38, %v2749_v14 }
0x2be0   :  { %v2754_v51 = vsel %vm2753_vm1, %v4804_v38, %v2750_v17 }
0x2be1   :  { %v2759_v54 = vsel %vm2756_vm3, %v2758_v52, %v2754_v51 }
0x2c25   :  { %v2434_v11 = vpop.f32.mrf.mxu3 }
0x2c26   :  { %v2438_v35 = vrot.slane %v2434_v11, 2  ;;  %v2789_v11 = vld [vmem:[#allocation4 + $0x10] sm:$0xc] }
0x2c28   :  { %v2440_v34 = vadd.f32 %v2438_v35, %v2411_v61 }
0x2c2a   :  { %4805 = vtanh.f32 %v2440_v34  ;;  %v4503_v4 = vmul.f32 -1.442695, %v2440_v34 }
0x2c2c   :  { %4807 = vpow2.f32 %v4503_v4 }
0x2c30   :  { %v4806_v13 = vpop.eup %4805 }
0x2c31   :  { %2466 = vrot.lane.b32.xlu2 %v4806_v13, %s5083_s6 }
0x2c32   :  { %v4808_v57 = vpop.eup %4807 }
0x2c33   :  { %v2444_v53 = vadd.f32 1.0, %v4808_v57 }
0x2c35   :  { %4809 = vrcp.f32 %v2444_v53  ;;  %v2456_v22 = vand.u32 2147483648, %v2444_v53  ;;  %vm2450_vm5 = vweird.f32 %v2444_v53  ;;  %v2454_v24 = vand.u32 2147483647, %v2444_v53 }
0x2c37   :  { %v2457_v25 = vor.u32 1.1754944e-38, %v2456_v22  ;;  %vm2455_vm8 = vcmp.eq.f32.partialorder %v2454_v24, 8.507059e+37 }
0x2c39   :  { %2764 = vrot.lane.b32.xlu2 %v2763_v16, %s5084_s18 }
0x2c3b   :  { %v4810_v40 = vpop.eup %4809 }
0x2c3c   :  { %v2446_v55 = vmul.f32 %v4810_v40, %v2444_v53  ;;  %vm2451_vm4 = vweird.f32 %v4810_v40 }
0x2c3d   :  { %vm2452_vm6 = vmor %vm2450_vm5, %vm2451_vm4 }
0x2c3e   :  { %v2447_v20 = vsub.f32 1.0, %v2446_v55 }
0x2c3f   :  { %v2770_v45 = vpop.permute.xlu0 %2769 }
0x2c40   :  { %v2772_v41 = vmul.f32 %v2770_v45, %v2759_v54  ;;  %v2448_v21 = vmul.f32 %v4810_v40, %v2447_v20 }
0x2c42   :  { %2774 = vrot.lane.b32.xlu0 %v2772_v41, %s5084_s18  ;;  %v2449_v6 = vadd.f32 %v4810_v40, %v2448_v21 }
0x2c44   :  { %v2453_v7 = vsel %vm2452_vm6, %v4810_v40, %v2449_v6 }
0x2c45   :  { %v2458_v26 = vsel %vm2455_vm8, %v2457_v25, %v2453_v7 }
0x2c46   :  { %v2464_v15 = vmul.f32 %v2462_v29, %v2458_v26 }
0x2c8b   :  { %v2467_v1 = vpop.permute.xlu2 %2466 }
0x2c8c   :  { %v2469_v28 = vmul.f32 %v2467_v1, %v2458_v26 }
0x2c8e   :  { %2471 = vrot.lane.b32.xlu1 %v2469_v28, %s5084_s18 }
0x2c93   :  { %v2765_v31 = vpop.permute.xlu2 %2764 }
0x2c94   :  { %v2767_v32 = vmul.f32 %v2765_v31, %v2759_v54 }
0x2cb4   :  { %v2775_v62 = vpop.permute.xlu0 %2774 }
0x2cb5   :  { %v5835_v33 = vadd.f32 %v2775_v62, %v2767_v32 }
0x2cb7   :  { %4811 = vtanh.f32 %v5835_v33 }
0x2cbd   :  { %v4812_v48 = vpop.eup %4811 }
0x2cbe   :  { %2780 = vrot.lane.b32.xlu2 %v4812_v48, %s5083_s6  ;;  %v2840_v48 = vrot.slane %v5835_v33, 2 }
0x2d00   :  { %v2472_v46 = vpop.permute.xlu1 %2471 }
0x2d01   :  { %v5840_v39 = vadd.f32 %v2472_v46, %v2464_v15 }
0x2d03   :  { %4813 = vtanh.f32 %v5840_v39  ;;  %v2534_v28 = vrot.slane %v5840_v39, 6 }
0x2d09   :  { %v4814_v42 = vpop.eup %4813 }
0x2d0a   :  { %2477 = vrot.lane.b32.xlu1 %v4814_v42, %s5083_s6 }
0x2d18   :  { %v2781_v56 = vpop.permute.xlu2 %2780 }
0x2d19   :  { %v5844_v37 = vmul.f32 %v2781_v56, %v2759_v54 }
0x2d1b   :  { %v2790_v58 = vrot.slane %v5844_v37, 4 }
0x2d1d   :  { %2791 = vrot.lane.b32.xlu1 %v2790_v58, %s5084_s18 }
0x2d7c   :  { %v2478_v59 = vpop.permute.xlu1 %2477 }
0x2d7d   :  { %v5848_v0 = vmul.f32 %v2478_v59, %v2458_v26 }
0x2d7f   :  { %v2487_v30 = vrot.slane %v5848_v0, 6 }
0x2d81   :  { %2488 = vrot.lane.b32.xlu0 %v2487_v30, %s5084_s18 }
0x2d8f   :  { %v2792_v2 = vpop.permute.xlu1 %2791 }
0x2df3   :  { %v2489_v23 = vpop.permute.xlu0 %2488 }
0x2df4   :  { %4504 = vmatmul.msk.f32.vlgmr.msrb.gmra.mxu2 %vm143_vm2, %v2489_v23 }
0x2df5   :  { %3103 = vmatpush.msrb.mxu2 %v5783_v43 }
0x2df7   :  { %3104 = vmatpush.msrb.mxu2 %v5785_v44 }
0x2df9   :  { %3105 = vmatpush.msrb.mxu2 %v5789_v47 }
0x2dfb   :  { %3106 = vmatpush.msrb.mxu2 %v5794_v50 }
0x2dfc   :  { %4514 = vmatmul.msk.f32.vlgmr.msra.gmra.mxu2 %vm143_vm2, %v2792_v2 }
0x2e77   :  { %v2509_v8 = vpop.f32.mrf.mxu2 }
0x2e78   :  { %v2512_v9 = vadd.f32 %v2509_v8, %v2486_v27 }
0x2e7a   :  { %4815 = vtanh.f32 %v2512_v9  ;;  %v4505_v34 = vmul.f32 -1.442695, %v2512_v9  ;;  %v2558_v9 = vld [vmem:[#allocation4] sm:$0xc] }
0x2e7f   :  { %v2812_v5 = vpop.f32.mrf.mxu2 }
0x2e80   :  { %v4816_v63 = vpop.eup %4815  ;;  %v2816_v10 = vrot.slane %v2812_v5, 6 }
0x2e81   :  { %2538 = vrot.lane.b32.xlu2 %v4816_v63, %s5083_s6 }
0x2e82   :  { %v2818_v35 = vadd.f32 %v2816_v10, %v2789_v11  ;;  %v2864_v10 = vld [vmem:[#allocation4 + $0x10] sm:$0x3] }
0x2e84   :  { %4817 = vtanh.f32 %v2818_v35  ;;  %v4515_v14 = vmul.f32 -1.442695, %v2818_v35 }
0x2e85   :  { %4819 = vpow2.f32 %v4505_v34 }
0x2e8a   :  { %v4818_v61 = vpop.eup %4817 }
0x2e8b   :  { %2844 = vrot.lane.b32.xlu0 %v4818_v61, %s5083_s6  ;;  %v4820_v38 = vpop.eup %4819 }
0x2e8c   :  { %v2516_v12 = vadd.f32 1.0, %v4820_v38 }
0x2e8e   :  { %4821 = vrcp.f32 %v2516_v12  ;;  %v2528_v18 = vand.u32 2147483648, %v2516_v12  ;;  %vm2522_vm3 = vweird.f32 %v2516_v12  ;;  %v2526_v19 = vand.u32 2147483647, %v2516_v12 }
0x2e8f   :  { %4823 = vpow2.f32 %v4515_v14 }
0x2e90   :  { %v2529_v52 = vor.u32 1.1754944e-38, %v2528_v18  ;;  %vm2527_vm5 = vcmp.eq.f32.partialorder %v2526_v19, 8.507059e+37 }
0x2e94   :  { %v4822_v13 = vpop.eup %4821 }
0x2e95   :  { %v2518_v49 = vmul.f32 %v4822_v13, %v2516_v12  ;;  %vm2523_vm1 = vweird.f32 %v4822_v13  ;;  %v4824_v45 = vpop.eup %4823 }
0x2e96   :  { %vm2524_vm4 = vmor %vm2522_vm3, %vm2523_vm1  ;;  %v2822_v57 = vadd.f32 1.0, %v4824_v45 }
0x2e97   :  { %v2519_v36 = vsub.f32 1.0, %v2518_v49 }
0x2e98   :  { %4825 = vrcp.f32 %v2822_v57  ;;  %v2834_v6 = vand.u32 2147483648, %v2822_v57  ;;  %vm2828_vm8 = vweird.f32 %v2822_v57  ;;  %v2832_v22 = vand.u32 2147483647, %v2822_v57 }
0x2e99   :  { %v2520_v16 = vmul.f32 %v4822_v13, %v2519_v36 }
0x2e9a   :  { %v2835_v7 = vor.u32 1.1754944e-38, %v2834_v6  ;;  %vm2833_vm3 = vcmp.eq.f32.partialorder %v2832_v22, 8.507059e+37 }
0x2e9b   :  { %v2521_v17 = vadd.f32 %v4822_v13, %v2520_v16 }
0x2e9d   :  { %v2525_v51 = vsel %vm2524_vm4, %v4822_v13, %v2521_v17 }
0x2e9e   :  { %v2530_v41 = vsel %vm2527_vm5, %v2529_v52, %v2525_v51  ;;  %v4826_v53 = vpop.eup %4825 }
0x2e9f   :  { %v2824_v40 = vmul.f32 %v4826_v53, %v2822_v57  ;;  %vm2829_vm6 = vweird.f32 %v4826_v53  ;;  %v2536_v31 = vmul.f32 %v2534_v28, %v2530_v41 }
0x2ea0   :  { %vm2830_vm1 = vmor %vm2828_vm8, %vm2829_vm6 }
0x2ea1   :  { %v2825_v55 = vsub.f32 1.0, %v2824_v40 }
0x2ea3   :  { %v2826_v20 = vmul.f32 %v4826_v53, %v2825_v55 }
0x2ea5   :  { %v2827_v21 = vadd.f32 %v4826_v53, %v2826_v20 }
0x2ea7   :  { %v2831_v24 = vsel %vm2830_vm1, %v4826_v53, %v2827_v21 }
0x2ea8   :  { %v2836_v1 = vsel %vm2833_vm3, %v2835_v7, %v2831_v24 }
0x2ea9   :  { %v2842_v15 = vmul.f32 %v2840_v48, %v2836_v1 }
0x2edb   :  { %v2539_v54 = vpop.permute.xlu2 %2538 }
0x2edc   :  { %v2541_v4 = vmul.f32 %v2539_v54, %v2530_v41 }
0x2ede   :  { %2543 = vrot.lane.b32.xlu1 %v2541_v4, %s5084_s18 }
0x2efd   :  { %v2845_v25 = vpop.permute.xlu0 %2844 }
0x2efe   :  { %v2847_v26 = vmul.f32 %v2845_v25, %v2836_v1 }
0x2f00   :  { %2849 = vrot.lane.b32.xlu2 %v2847_v26, %s5084_s18 }
0x2f50   :  { %v2544_v32 = vpop.permute.xlu1 %2543 }
0x2f51   :  { %v5863_v62 = vadd.f32 %v2544_v32, %v2536_v31 }
0x2f53   :  { %4827 = vtanh.f32 %v5863_v62  ;;  %v2606_v7 = vrot.slane %v5863_v62, 6 }
0x2f59   :  { %v4828_v29 = vpop.eup %4827 }
0x2f5a   :  { %v2850_v46 = vpop.permute.xlu2 %2849  ;;  %2549 = vrot.lane.b32.xlu0 %v4828_v29, %s5083_s6 }
0x2f5b   :  { %v5868_v42 = vadd.f32 %v2850_v46, %v2842_v15 }
0x2f5d   :  { %4829 = vtanh.f32 %v5868_v42  ;;  %v2912_v28 = vrot.slane %v5868_v42, 2 }
0x2f63   :  { %v4830_v56 = vpop.eup %4829 }
0x2f64   :  { %2855 = vrot.lane.b32.xlu1 %v4830_v56, %s5083_s6 }
0x2fcc   :  { %v2550_v39 = vpop.permute.xlu0 %2549 }
0x2fcd   :  { %v2552_v58 = vmul.f32 %v2550_v39, %v2530_v41 }
0x2fcf   :  { %2554 = vrot.lane.b32.xlu2 %v2552_v58, %s5084_s18 }
0x2fd6   :  { %v2856_v59 = vpop.permute.xlu1 %2855 }
0x2fd7   :  { %v5873_v30 = vmul.f32 %v2856_v59, %v2836_v1 }
0x2fd9   :  { %v2865_v33 = vrot.slane %v5873_v30, 2 }
0x2fdb   :  { %2866 = vrot.lane.b32.xlu0 %v2865_v33, %s5084_s18 }
0x3029   :  { %v2555_v23 = vpop.permute.xlu2 %2554 }
0x302a   :  { %2557 = vst.msk [vmem:[#allocation2 + $0x8] sm:$0x3] %vm6290_vm11, %v2555_v23  ;;  %4506 = vmatmul.msk.f32.vlgmr.msrb.gmra.mxu3 %vm143_vm2, %v2555_v23 }
0x302b   :  { %3178 = vmatpush.msrb.mxu3 %v5783_v43 }
0x302d   :  { %3179 = vmatpush.msrb.mxu3 %v5785_v44 }
0x302f   :  { %3180 = vmatpush.msrb.mxu3 %v5789_v47 }
0x3031   :  { %3181 = vmatpush.msrb.mxu3 %v5794_v50 }
0x304d   :  { %v2867_v2 = vpop.permute.xlu0 %2866 }
0x304e   :  { %4516 = vmatmul.msk.f32.vlgmr.msra.gmra.mxu3 %vm143_vm2, %v2867_v2 }
0x30ad   :  { %v2578_v27 = vpop.f32.mrf.mxu3 }
0x30ae   :  { %v2582_v8 = vrot.slane %v2578_v27, 6  ;;  %v2936_v27 = vld [vmem:[#allocation4 + $0x18] sm:$0xc0] }
0x30b0   :  { %v2584_v5 = vadd.f32 %v2582_v8, %v2558_v9 }
0x30b2   :  { %4831 = vtanh.f32 %v2584_v5  ;;  %v4507_v47 = vmul.f32 -1.442695, %v2584_v5 }
0x30b8   :  { %v4832_v63 = vpop.eup %4831 }
0x30b9   :  { %2610 = vrot.lane.b32.xlu1 %v4832_v63, %s5083_s6 }
0x30d1   :  { %v2887_v11 = vpop.f32.mrf.mxu3 }
0x30d2   :  { %v2890_v43 = vadd.f32 %v2887_v11, %v2864_v10 }
0x30d4   :  { %4833 = vtanh.f32 %v2890_v43  ;;  %v4517_v35 = vmul.f32 -1.442695, %v2890_v43 }
0x30d5   :  { %4835 = vpow2.f32 %v4507_v47 }
0x30d6   :  { %4837 = vpow2.f32 %v4517_v35 }
0x30da   :  { %v4834_v44 = vpop.eup %4833 }
0x30db   :  { %2916 = vrot.lane.b32.xlu2 %v4834_v44, %s5083_s6  ;;  %v4836_v50 = vpop.eup %4835 }
0x30dc   :  { %v2588_v61 = vadd.f32 1.0, %v4836_v50  ;;  %v4838_v34 = vpop.eup %4837 }
0x30dd   :  { %v2894_v12 = vadd.f32 1.0, %v4838_v34 }
0x30de   :  { %4839 = vrcp.f32 %v2588_v61  ;;  %v2600_v18 = vand.u32 2147483648, %v2588_v61  ;;  %vm2594_vm5 = vweird.f32 %v2588_v61  ;;  %v2598_v19 = vand.u32 2147483647, %v2588_v61 }
0x30df   :  { %4841 = vrcp.f32 %v2894_v12  ;;  %v2906_v40 = vand.u32 2147483648, %v2894_v12  ;;  %vm2900_vm3 = vweird.f32 %v2894_v12  ;;  %v2904_v55 = vand.u32 2147483647, %v2894_v12 }
0x30e0   :  { %v2601_v45 = vor.u32 1.1754944e-38, %v2600_v18  ;;  %vm2599_vm8 = vcmp.eq.f32.partialorder %v2598_v19, 8.507059e+37 }
0x30e1   :  { %v2907_v21 = vor.u32 1.1754944e-38, %v2906_v40  ;;  %vm2905_vm13 = vcmp.eq.f32.partialorder %v2904_v55, 8.507059e+37 }
0x30e4   :  { %v4840_v38 = vpop.eup %4839 }
0x30e5   :  { %v2590_v13 = vmul.f32 %v4840_v38, %v2588_v61  ;;  %v4842_v36 = vpop.eup %4841  ;;  %vm2595_vm4 = vweird.f32 %v4840_v38 }
0x30e6   :  { %v2896_v16 = vmul.f32 %v4842_v36, %v2894_v12  ;;  %vm2596_vm6 = vmor %vm2594_vm5, %vm2595_vm4  ;;  %vm2901_vm1 = vweird.f32 %v4842_v36 }
0x30e7   :  { %v2591_v49 = vsub.f32 1.0, %v2590_v13  ;;  %vm2902_vm11 = vmor %vm2900_vm3, %vm2901_vm1 }
0x30e8   :  { %v2897_v51 = vsub.f32 1.0, %v2896_v16 }
0x30e9   :  { %v2592_v14 = vmul.f32 %v4840_v38, %v2591_v49 }
0x30ea   :  { %v2898_v54 = vmul.f32 %v4842_v36, %v2897_v51 }
0x30eb   :  { %v2593_v17 = vadd.f32 %v4840_v38, %v2592_v14 }
0x30ec   :  { %v2899_v53 = vadd.f32 %v4842_v36, %v2898_v54 }
0x30ed   :  { %v2597_v52 = vsel %vm2596_vm6, %v4840_v38, %v2593_v17 }
0x30ee   :  { %v2602_v41 = vsel %vm2599_vm8, %v2601_v45, %v2597_v52  ;;  %v2903_v20 = vsel %vm2902_vm11, %v4842_v36, %v2899_v53 }
0x30ef   :  { %v2908_v22 = vsel %vm2905_vm13, %v2907_v21, %v2903_v20  ;;  %v2608_v25 = vmul.f32 %v2606_v7, %v2602_v41 }
0x30f0   :  { %v2914_v32 = vmul.f32 %v2912_v28, %v2908_v22 }
0x312b   :  { %v2611_v4 = vpop.permute.xlu1 %2610 }
0x312c   :  { %v2613_v57 = vmul.f32 %v2611_v4, %v2602_v41  ;;  %v3010_v4 = vld [vmem:[#allocation4 + $0x18] sm:$0x30] }
0x312e   :  { %2615 = vrot.lane.b32.xlu0 %v2613_v57, %s5084_s18 }
0x3135   :  { %v2917_v6 = vpop.permute.xlu2 %2916 }
0x3136   :  { %v2919_v24 = vmul.f32 %v2917_v6, %v2908_v22 }
0x3138   :  { %2921 = vrot.lane.b32.xlu1 %v2919_v24, %s5084_s18 }
0x31a0   :  { %v2616_v1 = vpop.permute.xlu0 %2615 }
0x31a1   :  { %v5889_v26 = vadd.f32 %v2616_v1, %v2608_v25 }
0x31a3   :  { %4843 = vtanh.f32 %v5889_v26 }
0x31a9   :  { %v4844_v31 = vpop.eup %4843 }
0x31aa   :  { %2621 = vrot.lane.b32.xlu2 %v4844_v31, %s5083_s6  ;;  %v2922_v48 = vpop.permute.xlu1 %2921 }
0x31ab   :  { %v2924_v29 = vadd.f32 %v2922_v48, %v2914_v32 }
0x31ad   :  { %4845 = vtanh.f32 %v2924_v29  ;;  %v2986_v36 = vrot.slane %v2924_v29, 2 }
0x31b3   :  { %v4846_v15 = vpop.eup %4845 }
0x31b4   :  { %2927 = vrot.lane.b32.xlu0 %v4846_v15, %s5083_s6 }
0x3204   :  { %v2622_v46 = vpop.permute.xlu2 %2621 }
0x3205   :  { %v5895_v62 = vmul.f32 %v2622_v46, %v2602_v41 }
0x3207   :  { %v2631_v56 = vrot.slane %v5895_v62, 2 }
0x3209   :  { %2632 = vrot.lane.b32.xlu1 %v2631_v56, %s5084_s18 }
0x3226   :  { %v2928_v39 = vpop.permute.xlu0 %2927 }
0x3227   :  { %v5899_v58 = vmul.f32 %v2928_v39, %v2908_v22 }
0x3229   :  { %2937 = vrot.lane.b32.xlu2 %v5899_v58, %s5084_s18 }
0x327b   :  { %v2633_v42 = vpop.permute.xlu1 %2632 }
0x327c   :  { %4508 = vmatmul.msk.f32.vlgmr.msrb.gmra.mxu0 %vm143_vm2, %v2633_v42 }
0x3283   :  { %v2938_v59 = vpop.permute.xlu2 %2937 }
0x3284   :  { %4518 = vmatmul.msk.f32.vlgmr.msra.gmra.mxu0 %vm143_vm2, %v2938_v59 }
0x32f9   :  { %v5905_v33 = vpop.f32.mrf.mxu0 }
0x3301   :  { %v2958_v23 = vpop.f32.mrf.mxu0 }
0x3302   :  { %v2962_v2 = vrot.slane %v2958_v23, 2 }
0x3304   :  { %v2964_v8 = vadd.f32 %v2962_v2, %v2936_v27 }
0x3306   :  { %4847 = vtanh.f32 %v2964_v8  ;;  %v4519_v5 = vmul.f32 -1.442695, %v2964_v8 }
0x3308   :  { %4849 = vpow2.f32 %v4519_v5  ;;  %v3085_v5 = vld [vmem:[#allocation4 + $0x18] sm:$0xc] }
0x330c   :  { %v4848_v9 = vpop.eup %4847 }
0x330d   :  { %2990 = vrot.lane.b32.xlu0 %v4848_v9, %s5083_s6 }
0x330e   :  { %v4850_v63 = vpop.eup %4849 }
0x330f   :  { %v2968_v10 = vadd.f32 1.0, %v4850_v63 }
0x3311   :  { %4851 = vrcp.f32 %v2968_v10  ;;  %v2980_v35 = vand.u32 2147483648, %v2968_v10  ;;  %vm2974_vm11 = vweird.f32 %v2968_v10  ;;  %v2978_v61 = vand.u32 2147483647, %v2968_v10 }
0x3313   :  { %v2981_v38 = vor.u32 1.1754944e-38, %v2980_v35  ;;  %vm2979_vm5 = vcmp.eq.f32.partialorder %v2978_v61, 8.507059e+37 }
0x3317   :  { %v4852_v11 = vpop.eup %4851 }
0x3318   :  { %v2970_v43 = vmul.f32 %v4852_v11, %v2968_v10  ;;  %vm2975_vm13 = vweird.f32 %v4852_v11 }
0x3319   :  { %vm2976_vm4 = vmor %vm2974_vm11, %vm2975_vm13 }
0x331a   :  { %v2971_v44 = vsub.f32 1.0, %v2970_v43 }
0x331c   :  { %v2972_v47 = vmul.f32 %v4852_v11, %v2971_v44 }
0x331e   :  { %v2973_v50 = vadd.f32 %v4852_v11, %v2972_v47 }
0x3320   :  { %v2977_v34 = vsel %vm2976_vm4, %v4852_v11, %v2973_v50 }
0x3321   :  { %v2982_v13 = vsel %vm2979_vm5, %v2981_v38, %v2977_v34 }
0x3322   :  { %v2988_v14 = vmul.f32 %v2986_v36, %v2982_v13 }
0x337f   :  { %v2991_v12 = vpop.permute.xlu0 %2990 }
0x3380   :  { %v2993_v49 = vmul.f32 %v2991_v12, %v2982_v13 }
0x3382   :  { %2995 = vrot.lane.b32.xlu1 %v2993_v49, %s5084_s18 }
0x33f4   :  { %v2996_v16 = vpop.permute.xlu1 %2995 }
0x33f5   :  { %v2998_v17 = vadd.f32 %v2996_v16, %v2988_v14 }
0x33f7   :  { %4853 = vtanh.f32 %v2998_v17  ;;  %v3061_v15 = vrot.slane %v2998_v17, 2 }
0x33fd   :  { %v4854_v18 = vpop.eup %4853 }
0x33fe   :  { %3001 = vrot.lane.b32.xlu2 %v4854_v18, %s5083_s6 }
0x3458   :  { %v3002_v19 = vpop.permute.xlu2 %3001 }
0x3459   :  { %v5910_v51 = vmul.f32 %v3002_v19, %v2982_v13 }
0x345b   :  { %v3011_v52 = vrot.slane %v5910_v51, 6 }
0x345d   :  { %3012 = vrot.lane.b32.xlu0 %v3011_v52, %s5084_s18 }
0x34cf   :  { %v3013_v45 = vpop.permute.xlu0 %3012 }
0x34d0   :  { %4520 = vmatmul.msk.f32.vlgmr.msra.gmra.mxu1 %vm143_vm2, %v3013_v45 }
0x354d   :  { %v3033_v54 = vpop.f32.mrf.mxu1 }
0x354e   :  { %v3037_v41 = vrot.slane %v3033_v54, 4 }
0x3550   :  { %v3039_v57 = vadd.f32 %v3037_v41, %v3010_v4 }
0x3552   :  { %4855 = vtanh.f32 %v3039_v57  ;;  %v4521_v40 = vmul.f32 -1.442695, %v3039_v57 }
0x3554   :  { %4857 = vpow2.f32 %v4521_v40 }
0x3558   :  { %v4856_v53 = vpop.eup %4855 }
0x3559   :  { %3065 = vrot.lane.b32.xlu1 %v4856_v53, %s5083_s6  ;;  %v3160_v53 = vld [vmem:[#allocation4 + $0x18] sm:$0x3] }
0x355a   :  { %v4858_v55 = vpop.eup %4857 }
0x355b   :  { %v3043_v20 = vadd.f32 1.0, %v4858_v55 }
0x355d   :  { %4859 = vrcp.f32 %v3043_v20  ;;  %v3055_v25 = vand.u32 2147483648, %v3043_v20  ;;  %vm3049_vm8 = vweird.f32 %v3043_v20  ;;  %v3053_v1 = vand.u32 2147483647, %v3043_v20 }
0x355f   :  { %v3056_v31 = vor.u32 1.1754944e-38, %v3055_v25  ;;  %vm3054_vm3 = vcmp.eq.f32.partialorder %v3053_v1, 8.507059e+37 }
0x3563   :  { %v4860_v21 = vpop.eup %4859 }
0x3564   :  { %v3045_v6 = vmul.f32 %v4860_v21, %v3043_v20  ;;  %vm3050_vm6 = vweird.f32 %v4860_v21 }
0x3565   :  { %vm3051_vm1 = vmor %vm3049_vm8, %vm3050_vm6 }
0x3566   :  { %v3046_v22 = vsub.f32 1.0, %v3045_v6 }
0x3568   :  { %v3047_v24 = vmul.f32 %v4860_v21, %v3046_v22 }
0x356a   :  { %v3048_v7 = vadd.f32 %v4860_v21, %v3047_v24 }
0x356c   :  { %v3052_v28 = vsel %vm3051_vm1, %v4860_v21, %v3048_v7 }
0x356d   :  { %v3057_v48 = vsel %vm3054_vm3, %v3056_v31, %v3052_v28 }
0x356e   :  { %v3063_v46 = vmul.f32 %v3061_v15, %v3057_v48 }
0x35cb   :  { %v3066_v32 = vpop.permute.xlu1 %3065 }
0x35cc   :  { %v3068_v29 = vmul.f32 %v3066_v32, %v3057_v48 }
0x35ce   :  { %3070 = vrot.lane.b32.xlu2 %v3068_v29, %s5084_s18 }
0x3628   :  { %v3071_v56 = vpop.permute.xlu2 %3070 }
0x3629   :  { %v3073_v39 = vadd.f32 %v3071_v56, %v3063_v46 }
0x362b   :  { %4861 = vtanh.f32 %v3073_v39  ;;  %v3136_v17 = vrot.slane %v3073_v39, 2 }
0x3631   :  { %v4862_v42 = vpop.eup %4861 }
0x3632   :  { %3076 = vrot.lane.b32.xlu0 %v4862_v42, %s5083_s6 }
0x36a4   :  { %v3077_v59 = vpop.permute.xlu0 %3076 }
0x36a5   :  { %v5918_v23 = vmul.f32 %v3077_v59, %v3057_v48 }
0x36a7   :  { %v3086_v2 = vrot.slane %v5918_v23, 4 }
0x36a9   :  { %3087 = vrot.lane.b32.xlu1 %v3086_v2, %s5084_s18 }
0x371b   :  { %v3088_v27 = vpop.permute.xlu1 %3087 }
0x371c   :  { %4522 = vmatmul.msk.f32.vlgmr.msrb.gmra.mxu2 %vm143_vm2, %v3088_v27 }
0x379f   :  { %v3108_v8 = vpop.f32.mrf.mxu2 }
0x37a0   :  { %v3112_v9 = vrot.slane %v3108_v8, 6 }
0x37a2   :  { %v3114_v63 = vadd.f32 %v3112_v9, %v3085_v5  ;;  %v3247_v9 = vld [vmem:[#allocation5 + $0x160] sm:$0xff]  ;;  %v3248_v5 = vld [vmem:[#allocation5 + $0x168] sm:$0xff] }
0x37a4   :  { %4863 = vtanh.f32 %v3114_v63  ;;  %v4523_v11 = vmul.f32 -1.442695, %v3114_v63  ;;  %v3245_v63 = vld [vmem:[#allocation5 + $0x150] sm:$0xff] }
0x37a6   :  { %4865 = vpow2.f32 %v4523_v11  ;;  %v3243_v11 = vld [vmem:[#allocation5 + $0x140] sm:$0xff] }
0x37aa   :  { %v4864_v10 = vpop.eup %4863 }
0x37ab   :  { %3140 = vrot.lane.b32.xlu2 %v4864_v10, %s5083_s6  ;;  %v3246_v10 = vld [vmem:[#allocation5 + $0x158] sm:$0xff] }
0x37ac   :  { %v4866_v43 = vpop.eup %4865 }
0x37ad   :  { %v3118_v44 = vadd.f32 1.0, %v4866_v43  ;;  %v3244_v43 = vld [vmem:[#allocation5 + $0x148] sm:$0xff] }
0x37af   :  { %4867 = vrcp.f32 %v3118_v44  ;;  %v3130_v38 = vand.u32 2147483648, %v3118_v44  ;;  %vm3124_vm11 = vweird.f32 %v3118_v44  ;;  %v3128_v12 = vand.u32 2147483647, %v3118_v44 }
0x37b1   :  { %v3131_v49 = vor.u32 1.1754944e-38, %v3130_v38  ;;  %vm3129_vm5 = vcmp.eq.f32.partialorder %v3128_v12, 8.507059e+37  ;;  %v3239_v38 = vld [vmem:[#allocation5 + $0x120] sm:$0xff]  ;;  %v3240_v12 = vld [vmem:[#allocation5 + $0x128] sm:$0xff] }
0x37b5   :  { %v4868_v47 = vpop.eup %4867 }
0x37b6   :  { %v3120_v50 = vmul.f32 %v4868_v47, %v3118_v44  ;;  %vm3125_vm13 = vweird.f32 %v4868_v47 }
0x37b7   :  { %vm3126_vm4 = vmor %vm3124_vm11, %vm3125_vm13  ;;  %vm6292_vm13 = vcmask 523264  }
0x37b8   :  { %v3121_v35 = vsub.f32 1.0, %v3120_v50  ;;  %vm6293_vm11 = vmmov %vm6292_vm13 }
0x37ba   :  { %v3122_v61 = vmul.f32 %v4868_v47, %v3121_v35 }
0x37bc   :  { %v3123_v34 = vadd.f32 %v4868_v47, %v3122_v61  ;;  %v3241_v61 = vld [vmem:[#allocation5 + $0x130] sm:$0xff] }
0x37be   :  { %v3127_v13 = vsel %vm3126_vm4, %v4868_v47, %v3123_v34  ;;  %v3242_v34 = vld [vmem:[#allocation5 + $0x138] sm:$0xff] }
0x37bf   :  { %v3132_v14 = vsel %vm3129_vm5, %v3131_v49, %v3127_v13  ;;  %v5949_v13 = vld [vmem:[#allocation8 + $0x98] sm:$0xff]  ;;  %v3237_v49 = vld [vmem:[#allocation5 + $0x110] sm:$0xff] }
0x37c0   :  { %v3138_v18 = vmul.f32 %v3136_v17, %v3132_v14  ;;  %3339 = vmatpush.msra.mxu2 %v5949_v13  ;;  %3409 = vmatpush.msra.mxu3 %v5949_v13  ;;  %v3236_v17 = vld [vmem:[#allocation5 + $0x108] sm:$0xff] }
0x3805   :  { %v3141_v36 = vpop.permute.xlu2 %3140 }
0x3806   :  { %v3143_v16 = vmul.f32 %v3141_v36, %v3132_v14  ;;  %v3238_v36 = vld [vmem:[#allocation5 + $0x118] sm:$0xff] }
0x3808   :  { %3145 = vrot.lane.b32.xlu0 %v3143_v16, %s5084_s18  ;;  %v3235_v16 = vld [vmem:[#allocation5 + $0x100] sm:$0xff] }
0x387a   :  { %v3146_v19 = vpop.permute.xlu0 %3145 }
0x387b   :  { %v3148_v52 = vadd.f32 %v3146_v19, %v3138_v18  ;;  %v5957_v18 = vld [vmem:[#allocation8 + $0x88] sm:$0xff]  ;;  %v5959_v19 = vld [vmem:[#allocation8 + $0x80] sm:$0xff] }
0x387d   :  { %4869 = vtanh.f32 %v3148_v52  ;;  %v3208_v56 = vrot.slane %v3148_v52, 2  ;;  %v4531_v52 = vld [vmem:[%s6287_s13 + $0x8] sm:$0x3] }
0x3883   :  { %v4870_v45 = vpop.eup %4869 }
0x3884   :  { %3151 = vrot.lane.b32.xlu1 %v4870_v45, %s5083_s6  ;;  %v4532_v45 = vld [vmem:[%s6288_s14 + $0x8] sm:$0x3] }
0x38f6   :  { %v3152_v54 = vpop.permute.xlu1 %3151 }
0x38f7   :  { %v3154_v41 = vmul.f32 %v3152_v54, %v3132_v14  ;;  %v5952_v14 = vld [vmem:[#allocation8 + $0x90] sm:$0xff] }
0x38f8   :  { %3340 = vmatpush.msra.mxu2 %v5952_v14  ;;  %3410 = vmatpush.msra.mxu3 %v5952_v14 }
0x38f9   :  { %v3161_v4 = vrot.slane %v3154_v41, 2 }
0x38fa   :  { %3341 = vmatpush.msra.mxu2 %v5957_v18  ;;  %3411 = vmatpush.msra.mxu3 %v5957_v18 }
0x38fb   :  { %3162 = vrot.lane.b32.xlu2 %v3161_v4, %s5084_s18  ;;  %v5995_v4 = vld [vmem:[%s6282_s8 + $0x4] sm:$0x3] }
0x38fc   :  { %3342 = vmatpush.msra.mxu2 %v5959_v19  ;;  %3412 = vmatpush.msra.mxu3 %v5959_v19 }
0x38fd   :  { %4533 = vmatmul.msk.f32.vlgmr.msra.gmra.mxu2 %vm143_vm2, %v4531_v52 }
0x38fe   :  { %3484 = vmatpush.msrb.mxu2 %v5949_v13 }
0x3900   :  { %3485 = vmatpush.msrb.mxu2 %v5952_v14 }
0x3902   :  { %3486 = vmatpush.msrb.mxu2 %v5957_v18 }
0x3904   :  { %3487 = vmatpush.msrb.mxu2 %v5959_v19 }
0x3906   :  { %3634 = vmatpush.msra.mxu2 %v5949_v13 }
0x3908   :  { %3635 = vmatpush.msra.mxu2 %v5952_v14 }
0x390a   :  { %3636 = vmatpush.msra.mxu2 %v5957_v18 }
0x390c   :  { %3637 = vmatpush.msra.mxu2 %v5959_v19 }
0x3955   :  { %v3163_v57 = vpop.permute.xlu2 %3162 }
0x3956   :  { %4524 = vmatmul.msk.f32.vlgmr.msrb.gmra.mxu3 %vm143_vm2, %v3163_v57  ;;  %v3254_v57 = vperm.slane %v5995_v4, 0 }
0x3957   :  { %3559 = vmatpush.msrb.mxu3 %v5949_v13 }
0x3959   :  { %3560 = vmatpush.msrb.mxu3 %v5952_v14 }
0x395b   :  { %3561 = vmatpush.msrb.mxu3 %v5957_v18 }
0x395d   :  { %3562 = vmatpush.msrb.mxu3 %v5959_v19 }
0x39d9   :  { %v3183_v40 = vpop.f32.mrf.mxu3 }
0x39da   :  { %v3186_v55 = vadd.f32 %v3183_v40, %v3160_v53  ;;  %v3255_v53 = vperm.slane %v5995_v4, 1 }
0x39dc   :  { %4871 = vtanh.f32 %v3186_v55  ;;  %v4525_v21 = vmul.f32 -1.442695, %v3186_v55 }
0x39de   :  { %4873 = vpow2.f32 %v4525_v21 }
0x39e2   :  { %v4872_v20 = vpop.eup %4871 }
0x39e3   :  { %3212 = vrot.lane.b32.xlu0 %v4872_v20, %s5083_s6 }
0x39e4   :  { %v4874_v6 = vpop.eup %4873 }
0x39e5   :  { %v3190_v22 = vadd.f32 1.0, %v4874_v6  ;;  %v3344_v6 = vpop.f32.mrf.mxu2 }
0x39e7   :  { %4875 = vrcp.f32 %v3190_v22  ;;  %v3202_v31 = vand.u32 2147483648, %v3190_v22  ;;  %vm3196_vm8 = vweird.f32 %v3190_v22  ;;  %v3200_v32 = vand.u32 2147483647, %v3190_v22 }
0x39e9   :  { %vm3201_vm3 = vcmp.eq.f32.partialorder %v3200_v32, 8.507059e+37 }
0x39eb   :  { %2332 = vrot.lane.b32.xlu0 %v5755_v60, %s5084_s18  ;;  %v3203_v60 = vor.u32 1.1754944e-38, %v3202_v31 }
0x39ed   :  { %v4876_v24 = vpop.eup %4875 }
0x39ee   :  { %v3192_v7 = vmul.f32 %v4876_v24, %v3190_v22  ;;  %vm3197_vm6 = vweird.f32 %v4876_v24 }
0x39ef   :  { %vm3198_vm1 = vmor %vm3196_vm8, %vm3197_vm6 }
0x39f0   :  { %v3193_v25 = vsub.f32 1.0, %v3192_v7 }
0x39f2   :  { %v3194_v1 = vmul.f32 %v4876_v24, %v3193_v25 }
0x39f3   :  { %3006 = vrot.lane.b32.xlu0 %v5910_v51, %s5083_s6 }
0x39f4   :  { %v3195_v28 = vadd.f32 %v4876_v24, %v3194_v1 }
0x39f6   :  { %v3199_v48 = vsel %vm3198_vm1, %v4876_v24, %v3195_v28  ;;  %vm6294_vm1 = vcmask 254976  }
0x39f7   :  { %v3204_v51 = vsel %vm3201_vm3, %v3203_v60, %v3199_v48 }
0x39f8   :  { %v3210_v39 = vmul.f32 %v3208_v56, %v3204_v51 }
0x3a55   :  { %v3213_v29 = vpop.permute.xlu0 %3212 }
0x3a56   :  { %v3215_v15 = vmul.f32 %v3213_v29, %v3204_v51 }
0x3a58   :  { %3217 = vrot.lane.b32.xlu1 %v3215_v15, %s5084_s18 }
0x3a5d   :  { %v2333_v46 = vpop.permute.xlu0 %2332 }
0x3a5e   :  { %2335 = vst.msk [vmem:[#allocation2] sm:$0xc] %vm1198_vm7, %v2333_v46 }
0x3a60   :  { %2407 = vrot.lane.b32.xlu1 %v5807_v3, %s5084_s18  ;;  %v3249_v3 = vld [vmem:[#allocation5 + $0x170] sm:$0xff] }
0x3a61   :  { %3272 = vmatpush.msrb.mxu0 %v3249_v3 }
0x3a63   :  { %3273 = vmatpush.msrb.mxu0 %v3247_v9 }
0x3a65   :  { %3274 = vmatpush.msrb.mxu0 %v3245_v63  ;;  %v3007_v50 = vpop.permute.xlu0 %3006 }
0x3a67   :  { %3275 = vmatpush.msrb.mxu0 %v3243_v11 }
0x3a68   :  { %3081 = vrot.lane.b32.xlu1 %v5918_v23, %s5083_s6  ;;  %v3250_v23 = vld [vmem:[#allocation5 + $0x178] sm:$0xff] }
0x3a69   :  { %3295 = vmatpush.msrb.mxu1 %v3250_v23  ;;  %3276 = vmatpush.msrb.mxu0 %v3241_v61 }
0x3a6b   :  { %3296 = vmatpush.msrb.mxu1 %v3248_v5  ;;  %3277 = vmatpush.msrb.mxu0 %v3239_v38 }
0x3a6d   :  { %3297 = vmatpush.msrb.mxu1 %v3246_v10  ;;  %3278 = vmatpush.msrb.mxu0 %v3237_v49 }
0x3a6f   :  { %3298 = vmatpush.msrb.mxu1 %v3244_v43  ;;  %3279 = vmatpush.msrb.mxu0 %v3235_v16 }
0x3a71   :  { %3299 = vmatpush.msrb.mxu1 %v3242_v34  ;;  %3778 = vmatpush.msra.mxu0 %v5949_v13 }
0x3a73   :  { %3300 = vmatpush.msrb.mxu1 %v3240_v12  ;;  %3779 = vmatpush.msra.mxu0 %v5952_v14 }
0x3a75   :  { %3301 = vmatpush.msrb.mxu1 %v3238_v36  ;;  %3780 = vmatpush.msra.mxu0 %v5957_v18 }
0x3a77   :  { %3302 = vmatpush.msrb.mxu1 %v3236_v17  ;;  %3781 = vmatpush.msra.mxu0 %v5959_v19 }
0x3aca   :  { %v3218_v42 = vpop.permute.xlu1 %3217 }
0x3acb   :  { %v3220_v59 = vadd.f32 %v3218_v42, %v3210_v39 }
0x3acd   :  { %4877 = vtanh.f32 %v3220_v59 }
0x3ad2   :  { %v2408_v2 = vpop.permute.xlu1 %2407 }
0x3ad3   :  { %v4878_v27 = vpop.eup %4877  ;;  %2410 = vst.msk [vmem:[#allocation2] sm:$0x30] %vm1274_vm9, %v2408_v2 }
0x3ad4   :  { %3223 = vrot.lane.b32.xlu2 %v4878_v27, %s5083_s6 }
0x3ada   :  { %v3082_v8 = vpop.permute.xlu1 %3081 }
0x3adb   :  { %3084 = vst.msk [vmem:[#allocation2] sm:$0x30] %vm1654_vm10, %v3082_v8 }
0x3adc   :  { %2482 = vrot.lane.b32.xlu2 %v5848_v0, %s5084_s18 }
0x3ae4   :  { %3156 = vrot.lane.b32.xlu2 %v3154_v41, %s5083_s6 }
0x3aec   :  { %3369 = vrot.lane.b32.xlu2 %v4532_v45, %s5084_s18 }
0x3b2e   :  { %v3224_v44 = vpop.permute.xlu2 %3223 }
0x3b2f   :  { %v3226_v0 = vmul.f32 %v3224_v44, %v3204_v51 }
0x3b31   :  { %3228 = vrot.lane.b32.xlu0 %v3226_v0, %s5083_s6 }
0x3b36   :  { %v2483_v47 = vpop.permute.xlu2 %2482 }
0x3b37   :  { %2485 = vst.msk [vmem:[#allocation2] sm:$0xc0] %vm1350_vm12, %v2483_v47 }
0x3b38   :  { %3009 = vst.msk [vmem:[#allocation2] sm:$0xc0] %vm1878_vm14, %v3007_v50 }
0x3b3e   :  { %v3157_v35 = vpop.permute.xlu2 %3156 }
0x3b3f   :  { %3159 = vst.msk [vmem:[#allocation2] sm:$0xc] %vm1730_vm15, %v3157_v35 }
0x3b46   :  { %v3370_v2 = vpop.permute.xlu2 %3369 }
0x3ba3   :  { %v3229_v54 = vpop.permute.xlu0 %3228 }
0x3ba4   :  { %3231 = vst.msk [vmem:[#allocation2] sm:$0x3] %vm1803_vm0, %v3229_v54 }
0x3bab   :  { %v3232_v41 = vld [vmem:[#allocation2] sm:$0xff] }
0x3bac   :  { %4527 = vmatmul.msk.f32.vlgmr.msrb.gmra.mxu0 %vm6292_vm13, %v3232_v41  ;;  %4529 = vmatmul.msk.f32.vlgmr.msrb.gmra.mxu1 %vm6293_vm11, %v3232_v41 }
0x3c29   :  { %v3281_v40 = vpop.f32.mrf.mxu0  ;;  %v3304_v55 = vpop.f32.mrf.mxu1 }
0x3c2a   :  { %v3282_v20 = vadd.f32 %v3281_v40, %v3254_v57  ;;  %v3305_v21 = vadd.f32 %v3304_v55, %v3255_v53 }
0x3c2c   :  { %3310 = vst [vmem:[#allocation4 + $0x8] sm:$0xff] %v3282_v20 }
0x3c2d   :  { %3311 = vst [vmem:[#allocation4 + $0x18] sm:$0xff] %v3305_v21 }
0x3c33   :  { %v3323_v22 = vld [vmem:[#allocation4 + $0x8] sm:$0x3]  ;;  %v3394_v43 = vld [vmem:[#allocation4 + $0x8] sm:$0xc] }
0x3c34   :  { %v3347_v24 = vadd.f32 %v3344_v6, %v3323_v22 }
0x3c36   :  { %4879 = vtanh.f32 %v3347_v24  ;;  %v4534_v25 = vmul.f32 -1.442695, %v3347_v24 }
0x3c38   :  { %4881 = vpow2.f32 %v4534_v25 }
0x3c3c   :  { %v4880_v7 = vpop.eup %4879 }
0x3c3d   :  { %3374 = vrot.lane.b32.xlu1 %v4880_v7, %s5083_s6 }
0x3c3e   :  { %v4882_v1 = vpop.eup %4881 }
0x3c3f   :  { %v3351_v28 = vadd.f32 1.0, %v4882_v1 }
0x3c41   :  { %4883 = vrcp.f32 %v3351_v28  ;;  %v3363_v51 = vand.u32 2147483648, %v3351_v28  ;;  %vm3357_vm5 = vweird.f32 %v3351_v28  ;;  %v3361_v15 = vand.u32 2147483647, %v3351_v28 }
0x3c43   :  { %v3364_v56 = vor.u32 1.1754944e-38, %v3363_v51  ;;  %vm3362_vm8 = vcmp.eq.f32.partialorder %v3361_v15, 8.507059e+37 }
0x3c47   :  { %v4884_v31 = vpop.eup %4883 }
0x3c48   :  { %v3353_v32 = vmul.f32 %v4884_v31, %v3351_v28  ;;  %vm3358_vm4 = vweird.f32 %v4884_v31 }
0x3c49   :  { %vm3359_vm6 = vmor %vm3357_vm5, %vm3358_vm4 }
0x3c4a   :  { %v3354_v48 = vsub.f32 1.0, %v3353_v32 }
0x3c4c   :  { %v3355_v60 = vmul.f32 %v4884_v31, %v3354_v48 }
0x3c4e   :  { %v3356_v29 = vadd.f32 %v4884_v31, %v3355_v60 }
0x3c50   :  { %v3360_v46 = vsel %vm3359_vm6, %v4884_v31, %v3356_v29 }
0x3c51   :  { %v3365_v39 = vsel %vm3362_vm8, %v3364_v56, %v3360_v46 }
0x3c52   :  { %v3372_v27 = vmul.f32 %v3370_v2, %v3365_v39 }
0x3caf   :  { %v3375_v42 = vpop.permute.xlu1 %3374 }
0x3cb0   :  { %v3377_v59 = vmul.f32 %v3375_v42, %v3365_v39 }
0x3cb2   :  { %3379 = vrot.lane.b32.xlu0 %v3377_v59, %s5084_s18 }
0x3d24   :  { %v3380_v8 = vpop.permute.xlu0 %3379 }
0x3d25   :  { %v3382_v3 = vadd.f32 %v3380_v8, %v3372_v27  ;;  %v3466_v8 = vld [vmem:[#allocation4 + $0x8] sm:$0x30] }
0x3d27   :  { %4885 = vtanh.f32 %v3382_v3  ;;  %v3442_v40 = vrot.slane %v3382_v3, 6 }
0x3d2d   :  { %v4886_v23 = vpop.eup %4885 }
0x3d2e   :  { %3385 = vrot.lane.b32.xlu1 %v4886_v23, %s5083_s6  ;;  %v2681_v23 = vrot.slane %v5889_v26, 6 }
0x3da0   :  { %v3386_v9 = vpop.permute.xlu1 %3385 }
0x3da1   :  { %v3388_v5 = vmul.f32 %v3386_v9, %v3365_v39 }
0x3da3   :  { %3390 = vrot.lane.b32.xlu2 %v3388_v5, %s5084_s18 }
0x3dfd   :  { %v3391_v63 = vpop.permute.xlu2 %3390 }
0x3dfe   :  { %3393 = vst.msk [vmem:[#allocation3] sm:$0x3] %vm6294_vm1, %v3391_v63  ;;  %4535 = vmatmul.msk.f32.vlgmr.msra.gmra.mxu3 %vm143_vm2, %v3391_v63 }
0x3dff   :  { %3703 = vmatpush.msra.mxu3 %v5949_v13 }
0x3e01   :  { %3704 = vmatpush.msra.mxu3 %v5952_v14  ;;  %v2657_v14 = vrot.slane %v5905_v33, 4 }
0x3e03   :  { %3705 = vmatpush.msra.mxu3 %v5957_v18  ;;  %v2630_v18 = vld [vmem:[#allocation4] sm:$0x30] }
0x3e05   :  { %3706 = vmatpush.msra.mxu3 %v5959_v19  ;;  %v2659_v19 = vadd.f32 %v2657_v14, %v2630_v18 }
0x3e07   :  { %v4509_v6 = vmul.f32 -1.442695, %v2659_v19 }
0x3e81   :  { %v3414_v10 = vpop.f32.mrf.mxu3 }
0x3e82   :  { %v3418_v11 = vrot.slane %v3414_v10, 6 }
0x3e84   :  { %v3420_v44 = vadd.f32 %v3418_v11, %v3394_v43 }
0x3e86   :  { %4887 = vtanh.f32 %v3420_v44  ;;  %v4536_v47 = vmul.f32 -1.442695, %v3420_v44 }
0x3e88   :  { %4889 = vpow2.f32 %v4536_v47 }
0x3e8c   :  { %v4888_v0 = vpop.eup %4887 }
0x3e8d   :  { %3446 = vrot.lane.b32.xlu0 %v4888_v0, %s5083_s6 }
0x3e8e   :  { %v4890_v50 = vpop.eup %4889 }
0x3e8f   :  { %v3424_v35 = vadd.f32 1.0, %v4890_v50 }
0x3e91   :  { %4891 = vrcp.f32 %v3424_v35  ;;  %v3436_v49 = vand.u32 2147483648, %v3424_v35  ;;  %vm3430_vm13 = vweird.f32 %v3424_v35  ;;  %v3434_v36 = vand.u32 2147483647, %v3424_v35 }
0x3e92   :  { %4893 = vtanh.f32 %v2659_v19 }
0x3e93   :  { %v3437_v17 = vor.u32 1.1754944e-38, %v3436_v49  ;;  %vm3435_vm4 = vcmp.eq.f32.partialorder %v3434_v36, 8.507059e+37 }
0x3e97   :  { %v4892_v61 = vpop.eup %4891 }
0x3e98   :  { %v3426_v34 = vmul.f32 %v4892_v61, %v3424_v35  ;;  %vm3431_vm3 = vweird.f32 %v4892_v61  ;;  %v4894_v41 = vpop.eup %4893 }
0x3e99   :  { %vm3432_vm11 = vmor %vm3430_vm13, %vm3431_vm3 }
0x3e9a   :  { %v3427_v38 = vsub.f32 1.0, %v3426_v34 }
0x3e9c   :  { %v3428_v12 = vmul.f32 %v4892_v61, %v3427_v38 }
0x3e9e   :  { %v3429_v13 = vadd.f32 %v4892_v61, %v3428_v12 }
0x3ea0   :  { %v3433_v16 = vsel %vm3432_vm11, %v4892_v61, %v3429_v13 }
0x3ea1   :  { %v3438_v45 = vsel %vm3435_vm4, %v3437_v17, %v3433_v16 }
0x3ea2   :  { %v3444_v55 = vmul.f32 %v3442_v40, %v3438_v45 }
0x3eff   :  { %v3447_v52 = vpop.permute.xlu0 %3446 }
0x3f00   :  { %v3449_v54 = vmul.f32 %v3447_v52, %v3438_v45 }
0x3f02   :  { %3451 = vrot.lane.b32.xlu1 %v3449_v54, %s5084_s18 }
0x3f0a   :  { %2685 = vrot.lane.b32.xlu1 %v4894_v41, %s5083_s6 }
0x3f74   :  { %v3452_v20 = vpop.permute.xlu1 %3451 }
0x3f75   :  { %v6017_v21 = vadd.f32 %v3452_v20, %v3444_v55  ;;  %v6051_v55 = vld [vmem:[#allocation8 + $0xb0] sm:$0xff]  ;;  %v6055_v20 = vld [vmem:[#allocation8 + $0xa8] sm:$0xff] }
0x3f77   :  { %4895 = vtanh.f32 %v6017_v21  ;;  %v3517_v52 = vrot.slane %v6017_v21, 6  ;;  %v6060_v21 = vld [vmem:[#allocation8 + $0xa0] sm:$0xff] }
0x3f78   :  { %4897 = vpow2.f32 %v4509_v6 }
0x3f7c   :  { %v2686_v56 = vpop.permute.xlu1 %2685 }
0x3f7d   :  { %v4896_v33 = vpop.eup %4895 }
0x3f7e   :  { %3457 = vrot.lane.b32.xlu2 %v4896_v33, %s5083_s6  ;;  %v4898_v22 = vpop.eup %4897 }
0x3f7f   :  { %v2663_v24 = vadd.f32 1.0, %v4898_v22 }
0x3f81   :  { %4899 = vrcp.f32 %v2663_v24  ;;  %v2675_v29 = vand.u32 2147483648, %v2663_v24  ;;  %vm2669_vm6 = vweird.f32 %v2663_v24  ;;  %v2673_v51 = vand.u32 2147483647, %v2663_v24 }
0x3f83   :  { %v2676_v46 = vor.u32 1.1754944e-38, %v2675_v29  ;;  %vm2674_vm1 = vcmp.eq.f32.partialorder %v2673_v51, 8.507059e+37 }
0x3f87   :  { %v4900_v7 = vpop.eup %4899 }
0x3f88   :  { %v2665_v25 = vmul.f32 %v4900_v7, %v2663_v24  ;;  %vm2670_vm5 = vweird.f32 %v4900_v7 }
0x3f89   :  { %vm2671_vm8 = vmor %vm2669_vm6, %vm2670_vm5  ;;  %vm6295_vm5 = vcmask 523264  }
0x3f8a   :  { %v2666_v1 = vsub.f32 1.0, %v2665_v25  ;;  %vm6296_vm6 = vmmov %vm6295_vm5 }
0x3f8c   :  { %v2667_v28 = vmul.f32 %v4900_v7, %v2666_v1 }
0x3f8e   :  { %v2668_v48 = vadd.f32 %v4900_v7, %v2667_v28 }
0x3f90   :  { %v2672_v15 = vsel %vm2671_vm8, %v4900_v7, %v2668_v48  ;;  %v4547_v7 = vld [vmem:[%s6287_s13 + $0xa] sm:$0x3] }
0x3f91   :  { %v2677_v39 = vsel %vm2674_vm1, %v2676_v46, %v2672_v15 }
0x3f92   :  { %v2688_v42 = vmul.f32 %v2686_v56, %v2677_v39  ;;  %v2683_v5 = vmul.f32 %v2681_v23, %v2677_v39 }
0x3fd8   :  { %v3458_v31 = vpop.permute.xlu2 %3457 }
0x3fd9   :  { %v6021_v32 = vmul.f32 %v3458_v31, %v3438_v45 }
0x3fdb   :  { %v3467_v60 = vrot.slane %v6021_v32, 2 }
0x3fdd   :  { %3468 = vrot.lane.b32.xlu0 %v3467_v60, %s5084_s18 }
0x3fe5   :  { %2690 = vrot.lane.b32.xlu0 %v2688_v42, %s5084_s18 }
0x404f   :  { %v3469_v59 = vpop.permute.xlu0 %3468 }
0x4050   :  { %4537 = vmatmul.msk.f32.vlgmr.msrb.gmra.mxu2 %vm143_vm2, %v3469_v59 }
0x4057   :  { %v2691_v9 = vpop.permute.xlu0 %2690 }
0x4058   :  { %v2693_v63 = vadd.f32 %v2691_v9, %v2683_v5 }
0x40d3   :  { %v3489_v2 = vpop.f32.mrf.mxu2 }
0x40d4   :  { %v3493_v27 = vrot.slane %v3489_v2, 4 }
0x40d6   :  { %v3495_v3 = vadd.f32 %v3493_v27, %v3466_v8 }
0x40d8   :  { %4901 = vtanh.f32 %v3495_v3  ;;  %v4538_v43 = vmul.f32 -1.442695, %v3495_v3 }
0x40d9   :  { %4903 = vtanh.f32 %v2693_v63  ;;  %v3541_v63 = vld [vmem:[#allocation4 + $0x8] sm:$0xc0] }
0x40da   :  { %4905 = vpow2.f32 %v4538_v43 }
0x40de   :  { %v4902_v10 = vpop.eup %4901 }
0x40df   :  { %3521 = vrot.lane.b32.xlu2 %v4902_v10, %s5083_s6  ;;  %v4904_v11 = vpop.eup %4903 }
0x40e0   :  { %v4906_v44 = vpop.eup %4905 }
0x40e1   :  { %v3499_v0 = vadd.f32 1.0, %v4906_v44 }
0x40e3   :  { %4907 = vrcp.f32 %v3499_v0  ;;  %v3511_v34 = vand.u32 2147483648, %v3499_v0  ;;  %vm3505_vm13 = vweird.f32 %v3499_v0  ;;  %v3509_v38 = vand.u32 2147483647, %v3499_v0 }
0x40e5   :  { %v3512_v13 = vor.u32 1.1754944e-38, %v3511_v34  ;;  %vm3510_vm4 = vcmp.eq.f32.partialorder %v3509_v38, 8.507059e+37 }
0x40e7   :  { %2696 = vrot.lane.b32.xlu2 %v4904_v11, %s5083_s6 }
0x40e9   :  { %v4908_v47 = vpop.eup %4907 }
0x40ea   :  { %v3501_v50 = vmul.f32 %v4908_v47, %v3499_v0  ;;  %vm3506_vm3 = vweird.f32 %v4908_v47 }
0x40eb   :  { %vm3507_vm11 = vmor %vm3505_vm13, %vm3506_vm3 }
0x40ec   :  { %v3502_v35 = vsub.f32 1.0, %v3501_v50 }
0x40ee   :  { %v3503_v26 = vmul.f32 %v4908_v47, %v3502_v35 }
0x40f0   :  { %v3504_v61 = vadd.f32 %v4908_v47, %v3503_v26 }
0x40f2   :  { %v3508_v12 = vsel %vm3507_vm11, %v4908_v47, %v3504_v61  ;;  %v4548_v47 = vld [vmem:[%s6288_s14 + $0xa] sm:$0x3] }
0x40f3   :  { %v3513_v36 = vsel %vm3510_vm4, %v3512_v13, %v3508_v12  ;;  %v3893_v50 = vrot.slane %v4548_v47, 4 }
0x40f4   :  { %v3519_v45 = vmul.f32 %v3517_v52, %v3513_v36 }
0x4139   :  { %v3522_v49 = vpop.permute.xlu2 %3521 }
0x413a   :  { %v3524_v14 = vmul.f32 %v3522_v49, %v3513_v36 }
0x413c   :  { %3526 = vrot.lane.b32.xlu1 %v3524_v14, %s5084_s18 }
0x4141   :  { %v2697_v16 = vpop.permute.xlu2 %2696 }
0x4142   :  { %v2699_v17 = vmul.f32 %v2697_v16, %v2677_v39 }
0x4144   :  { %2626 = vrot.lane.b32.xlu1 %v5895_v62, %s5084_s18  ;;  %2701 = vrot.lane.b32.xlu2 %v2699_v17, %s5084_s18 }
0x414c   :  { %2860 = vrot.lane.b32.xlu1 %v5873_v30, %s5083_s6  ;;  %2932 = vrot.lane.b32.xlu2 %v5899_v58, %s5083_s6  ;;  %v6049_v58 = vld [vmem:[#allocation8 + $0xb8] sm:$0xff] }
0x414d   :  { %3860 = vmatpush.msra.mxu1 %v6049_v58  ;;  %3937 = vmatpush.msrb.mxu2 %v6049_v58 }
0x414e   :  { %4083 = vmatpush.msrb.mxu0 %v6049_v58 }
0x414f   :  { %3861 = vmatpush.msra.mxu1 %v6051_v55  ;;  %3938 = vmatpush.msrb.mxu2 %v6051_v55 }
0x4150   :  { %4084 = vmatpush.msrb.mxu0 %v6051_v55 }
0x4151   :  { %3862 = vmatpush.msra.mxu1 %v6055_v20  ;;  %3939 = vmatpush.msrb.mxu2 %v6055_v20 }
0x4152   :  { %4085 = vmatpush.msrb.mxu0 %v6055_v20 }
0x4153   :  { %3863 = vmatpush.msra.mxu1 %v6060_v21  ;;  %3940 = vmatpush.msrb.mxu2 %v6060_v21 }
0x4154   :  { %4086 = vmatpush.msrb.mxu0 %v6060_v21 }
0x4155   :  { %4158 = vmatpush.msrb.mxu1 %v6049_v58 }
0x4157   :  { %4159 = vmatpush.msrb.mxu1 %v6051_v55 }
0x4159   :  { %4160 = vmatpush.msrb.mxu1 %v6055_v20 }
0x415b   :  { %4161 = vmatpush.msrb.mxu1 %v6060_v21 }
0x419e   :  { %v2702_v18 = vpop.permute.xlu2 %2701 }
0x419f   :  { %2704 = vst.msk [vmem:[#allocation2 + $0x8] sm:$0x30] %vm1274_vm9, %v2702_v18 }
0x41a6   :  { %v2933_v19 = vpop.permute.xlu2 %2932 }
0x41a7   :  { %2935 = vst.msk [vmem:[#allocation2 + $0x8] sm:$0x3] %vm1803_vm0, %v2933_v19 }
0x41ae   :  { %v3527_v54 = vpop.permute.xlu1 %3526 }
0x41af   :  { %v6041_v41 = vadd.f32 %v3527_v54, %v3519_v45 }
0x41b1   :  { %4909 = vtanh.f32 %v6041_v41 }
0x41b6   :  { %v2627_v62 = vpop.permute.xlu1 %2626 }
0x41b7   :  { %v4910_v40 = vpop.eup %4909  ;;  %2629 = vst.msk [vmem:[#allocation2 + $0x8] sm:$0xc] %vm1198_vm7, %v2627_v62 }
0x41b8   :  { %3532 = vrot.lane.b32.xlu0 %v4910_v40, %s5083_s6 }
0x41be   :  { %v2861_v30 = vpop.permute.xlu1 %2860 }
0x41bf   :  { %2863 = vst.msk [vmem:[#allocation2 + $0x8] sm:$0xc] %vm1730_vm15, %v2861_v30 }
0x41c0   :  { %2785 = vrot.lane.b32.xlu0 %v5844_v37, %s5083_s6 }
0x422a   :  { %v3533_v37 = vpop.permute.xlu0 %3532 }
0x422b   :  { %v6073_v33 = vmul.f32 %v3533_v37, %v3513_v36  ;;  %v3592_v37 = vrot.slane %v6041_v41, 6 }
0x422d   :  { %v3542_v6 = vrot.slane %v6073_v33, 4 }
0x422f   :  { %3543 = vrot.lane.b32.xlu0 %v3542_v6, %s5084_s18 }
0x4232   :  { %v2786_v22 = vpop.permute.xlu0 %2785 }
0x4233   :  { %2788 = vst.msk [vmem:[#allocation2 + $0x8] sm:$0x30] %vm1654_vm10, %v2786_v22 }
0x423a   :  { %v3233_v24 = vld [vmem:[#allocation2 + $0x8] sm:$0x3f] }
0x423b   :  { %4528 = vmatmul.msk.f32.gmra.mxu0 %vm6295_vm5, %v3233_v24  ;;  %4530 = vmatmul.msk.f32.gmra.mxu1 %vm6296_vm6, %v3233_v24 }
0x4243   :  { %4549 = vmatmul.msk.f32.vlgmr.msra.gmra.mxu1 %vm143_vm2, %v4547_v7 }
0x42a1   :  { %v3544_v25 = vpop.permute.xlu0 %3543 }
0x42a2   :  { %4539 = vmatmul.msk.f32.vlgmr.msrb.gmra.mxu3 %vm143_vm2, %v3544_v25 }
0x42a3   :  { %4012 = vmatpush.msrb.mxu3 %v6049_v58 }
0x42a5   :  { %4013 = vmatpush.msrb.mxu3 %v6051_v55 }
0x42a7   :  { %4014 = vmatpush.msrb.mxu3 %v6055_v20 }
0x42a9   :  { %4015 = vmatpush.msrb.mxu3 %v6060_v21 }
0x42b8   :  { %v3284_v1 = vpop.f32.mrf.mxu0  ;;  %v3307_v28 = vpop.f32.mrf.mxu1 }
0x42b9   :  { %v3285_v31 = vadd.f32 %v3284_v1, %v3254_v57  ;;  %v3308_v48 = vadd.f32 %v3307_v28, %v3255_v53 }
0x42bb   :  { %3312 = vst [vmem:[#allocation4] sm:$0x3f] %v3285_v31 }
0x42bc   :  { %3313 = vst [vmem:[#allocation4 + $0x10] sm:$0x3f] %v3308_v48 }
0x42c0   :  { %v3865_v60 = vpop.f32.mrf.mxu1 }
0x42c1   :  { %v3869_v29 = vrot.slane %v3865_v60, 4 }
0x42c3   :  { %v3844_v51 = vld [vmem:[#allocation4 + $0x10] sm:$0x30] }
0x42c4   :  { %v3871_v15 = vadd.f32 %v3869_v29, %v3844_v51  ;;  %v3616_v51 = vld [vmem:[#allocation4] sm:$0x3] }
0x42c6   :  { %4911 = vtanh.f32 %v3871_v15  ;;  %v4550_v56 = vmul.f32 -1.442695, %v3871_v15 }
0x42c8   :  { %4913 = vpow2.f32 %v4550_v56 }
0x42cc   :  { %v4912_v46 = vpop.eup %4911 }
0x42cd   :  { %3899 = vrot.lane.b32.xlu2 %v4912_v46, %s5083_s6 }
0x42ce   :  { %v4914_v39 = vpop.eup %4913 }
0x42cf   :  { %v3875_v42 = vadd.f32 1.0, %v4914_v39 }
0x42d1   :  { %4915 = vrcp.f32 %v3875_v42  ;;  %v3887_v27 = vand.u32 2147483648, %v3875_v42  ;;  %vm3881_vm1 = vweird.f32 %v3875_v42  ;;  %v3885_v8 = vand.u32 2147483647, %v3875_v42 }
0x42d3   :  { %v3888_v9 = vor.u32 1.1754944e-38, %v3887_v27  ;;  %vm3886_vm13 = vcmp.eq.f32.partialorder %v3885_v8, 8.507059e+37 }
0x42d7   :  { %v4916_v59 = vpop.eup %4915 }
0x42d8   :  { %v3877_v57 = vmul.f32 %v4916_v59, %v3875_v42  ;;  %vm3882_vm8 = vweird.f32 %v4916_v59 }
0x42d9   :  { %vm3883_vm3 = vmor %vm3881_vm1, %vm3882_vm8 }
0x42da   :  { %v3878_v2 = vsub.f32 1.0, %v3877_v57 }
0x42dc   :  { %v3879_v4 = vmul.f32 %v4916_v59, %v3878_v2 }
0x42de   :  { %v3880_v53 = vadd.f32 %v4916_v59, %v3879_v4 }
0x42e0   :  { %v3884_v3 = vsel %vm3883_vm3, %v4916_v59, %v3880_v53  ;;  %v3919_v59 = vld [vmem:[#allocation4 + $0x10] sm:$0xc] }
0x42e1   :  { %v3889_v11 = vsel %vm3886_vm13, %v3888_v9, %v3884_v3 }
0x4325   :  { %v3564_v23 = vpop.f32.mrf.mxu3 }
0x4326   :  { %v3568_v5 = vrot.slane %v3564_v23, 2 }
0x4327   :  { %v3900_v10 = vpop.permute.xlu2 %3899 }
0x4328   :  { %v3570_v43 = vadd.f32 %v3568_v5, %v3541_v63  ;;  %v3902_v44 = vmul.f32 %v3900_v10, %v3889_v11 }
0x432a   :  { %4917 = vtanh.f32 %v3570_v43  ;;  %3904 = vrot.lane.b32.xlu2 %v3902_v44, %s5084_s18  ;;  %v4540_v35 = vmul.f32 -1.442695, %v3570_v43 }
0x432c   :  { %4919 = vpow2.f32 %v4540_v35 }
0x4330   :  { %v4918_v0 = vpop.eup %4917 }
0x4331   :  { %3596 = vrot.lane.b32.xlu1 %v4918_v0, %s5083_s6 }
0x4332   :  { %v4920_v26 = vpop.eup %4919 }
0x4333   :  { %v3574_v61 = vadd.f32 1.0, %v4920_v26 }
0x4335   :  { %4921 = vrcp.f32 %v3574_v61  ;;  %v3586_v36 = vand.u32 2147483648, %v3574_v61  ;;  %vm3580_vm4 = vweird.f32 %v3574_v61  ;;  %v3584_v14 = vand.u32 2147483647, %v3574_v61 }
0x4337   :  { %v3587_v17 = vor.u32 1.1754944e-38, %v3586_v36  ;;  %vm3585_vm6 = vcmp.eq.f32.partialorder %v3584_v14, 8.507059e+37 }
0x4339   :  { %3894 = vrot.lane.b32.xlu1 %v3893_v50, %s5084_s18 }
0x433b   :  { %v4922_v34 = vpop.eup %4921 }
0x433c   :  { %v3576_v38 = vmul.f32 %v4922_v34, %v3574_v61  ;;  %vm3581_vm11 = vweird.f32 %v4922_v34 }
0x433d   :  { %vm3582_vm5 = vmor %vm3580_vm4, %vm3581_vm11 }
0x433e   :  { %v3577_v12 = vsub.f32 1.0, %v3576_v38 }
0x4340   :  { %v3578_v13 = vmul.f32 %v4922_v34, %v3577_v12 }
0x4342   :  { %v3579_v49 = vadd.f32 %v4922_v34, %v3578_v13 }
0x4344   :  { %v3583_v16 = vsel %vm3582_vm5, %v4922_v34, %v3579_v49 }
0x4345   :  { %v3588_v19 = vsel %vm3585_vm6, %v3587_v17, %v3583_v16 }
0x4346   :  { %v3594_v6 = vmul.f32 %v3592_v37, %v3588_v19 }
0x4384   :  { %v3905_v62 = vpop.permute.xlu2 %3904 }
0x43a3   :  { %v3597_v18 = vpop.permute.xlu1 %3596 }
0x43a4   :  { %v3599_v52 = vmul.f32 %v3597_v18, %v3588_v19 }
0x43a6   :  { %3601 = vrot.lane.b32.xlu0 %v3599_v52, %s5084_s18 }
0x43ab   :  { %v3895_v45 = vpop.permute.xlu1 %3894 }
0x43ac   :  { %v3897_v54 = vmul.f32 %v3895_v45, %v3889_v11 }
0x43ae   :  { %v6101_v40 = vadd.f32 %v3905_v62, %v3897_v54 }
0x43b0   :  { %4923 = vtanh.f32 %v6101_v40  ;;  %v3970_v52 = vrot.slane %v6101_v40, 2 }
0x43b6   :  { %v4924_v30 = vpop.eup %4923 }
0x43b7   :  { %3910 = vrot.lane.b32.xlu1 %v4924_v30, %s5083_s6 }
0x4418   :  { %v3602_v22 = vpop.permute.xlu0 %3601 }
0x4419   :  { %v6106_v24 = vadd.f32 %v3602_v22, %v3594_v6 }
0x441b   :  { %4925 = vtanh.f32 %v6106_v24  ;;  %v3664_v37 = vrot.slane %v6106_v24, 6 }
0x4421   :  { %v4926_v7 = vpop.eup %4925 }
0x4422   :  { %3607 = vrot.lane.b32.xlu0 %v4926_v7, %s5083_s6 }
0x4429   :  { %v3911_v25 = vpop.permute.xlu1 %3910 }
0x442a   :  { %v6110_v1 = vmul.f32 %v3911_v25, %v3889_v11 }
0x442c   :  { %v3920_v28 = vrot.slane %v6110_v1, 4 }
0x442e   :  { %3921 = vrot.lane.b32.xlu0 %v3920_v28, %s5084_s18 }
0x4494   :  { %v3608_v31 = vpop.permute.xlu0 %3607 }
0x4495   :  { %v6114_v48 = vmul.f32 %v3608_v31, %v3588_v19 }
0x4497   :  { %v3617_v41 = vrot.slane %v6114_v48, 6 }
0x4499   :  { %3618 = vrot.lane.b32.xlu2 %v3617_v41, %s5084_s18 }
0x44a0   :  { %v3922_v29 = vpop.permute.xlu0 %3921 }
0x44f3   :  { %v3619_v60 = vpop.permute.xlu2 %3618 }
0x44f4   :  { %4541 = vmatmul.msk.f32.vlgmr.msra.gmra.mxu2 %vm143_vm2, %v3619_v60 }
0x44f5   :  { %4233 = vmatpush.msra.mxu2 %v6049_v58 }
0x44f7   :  { %4234 = vmatpush.msra.mxu2 %v6051_v55 }
0x44f9   :  { %4235 = vmatpush.msra.mxu2 %v6055_v20 }
0x44fb   :  { %4236 = vmatpush.msra.mxu2 %v6060_v21 }
0x44fc   :  { %4551 = vmatmul.msk.f32.vlgmr.msrb.gmra.mxu2 %vm143_vm2, %v3922_v29 }
0x4577   :  { %v3639_v15 = vpop.f32.mrf.mxu2 }
0x4578   :  { %v3642_v46 = vadd.f32 %v3639_v15, %v3616_v51 }
0x457a   :  { %4927 = vtanh.f32 %v3642_v46  ;;  %v4542_v8 = vmul.f32 -1.442695, %v3642_v46  ;;  %v3688_v46 = vld [vmem:[#allocation4] sm:$0xc] }
0x457f   :  { %v3942_v56 = vpop.f32.mrf.mxu2 }
0x4580   :  { %v4928_v39 = vpop.eup %4927  ;;  %v3946_v42 = vrot.slane %v3942_v56, 6 }
0x4581   :  { %3668 = vrot.lane.b32.xlu1 %v4928_v39, %s5083_s6  ;;  %v3994_v39 = vld [vmem:[#allocation4 + $0x10] sm:$0x3] }
0x4582   :  { %v3948_v57 = vadd.f32 %v3946_v42, %v3919_v59 }
0x4584   :  { %4929 = vtanh.f32 %v3948_v57  ;;  %v4552_v4 = vmul.f32 -1.442695, %v3948_v57 }
0x4586   :  { %4931 = vpow2.f32 %v4552_v4 }
0x458a   :  { %v4930_v2 = vpop.eup %4929 }
0x458b   :  { %3974 = vrot.lane.b32.xlu2 %v4930_v2, %s5083_s6 }
0x458c   :  { %v4932_v53 = vpop.eup %4931 }
0x458d   :  { %v3952_v27 = vadd.f32 1.0, %v4932_v53 }
0x458f   :  { %4933 = vrcp.f32 %v3952_v27  ;;  %v3964_v44 = vand.u32 2147483648, %v3952_v27  ;;  %vm3958_vm1 = vweird.f32 %v3952_v27  ;;  %v3962_v0 = vand.u32 2147483647, %v3952_v27 }
0x4590   :  { %4935 = vpow2.f32 %v4542_v8 }
0x4591   :  { %v3965_v35 = vor.u32 1.1754944e-38, %v3964_v44  ;;  %vm3963_vm13 = vcmp.eq.f32.partialorder %v3962_v0, 8.507059e+37 }
0x4595   :  { %v4934_v3 = vpop.eup %4933 }
0x4596   :  { %v4936_v23 = vpop.eup %4935  ;;  %v3954_v9 = vmul.f32 %v4934_v3, %v3952_v27  ;;  %vm3959_vm8 = vweird.f32 %v4934_v3 }
0x4597   :  { %v3646_v5 = vadd.f32 1.0, %v4936_v23  ;;  %vm3960_vm3 = vmor %vm3958_vm1, %vm3959_vm8  ;;  %vm6297_vm8 = vcmask 254976  }
0x4598   :  { %v3955_v63 = vsub.f32 1.0, %v3954_v9 }
0x4599   :  { %4937 = vrcp.f32 %v3646_v5  ;;  %v3658_v49 = vand.u32 2147483648, %v3646_v5  ;;  %vm3652_vm4 = vweird.f32 %v3646_v5  ;;  %v3656_v36 = vand.u32 2147483647, %v3646_v5 }
0x459a   :  { %v3956_v10 = vmul.f32 %v4934_v3, %v3955_v63 }
0x459b   :  { %v3659_v16 = vor.u32 1.1754944e-38, %v3658_v49  ;;  %vm3657_vm6 = vcmp.eq.f32.partialorder %v3656_v36, 8.507059e+37 }
0x459c   :  { %v3957_v43 = vadd.f32 %v4934_v3, %v3956_v10 }
0x459e   :  { %v3961_v50 = vsel %vm3960_vm3, %v4934_v3, %v3957_v43 }
0x459f   :  { %v4938_v11 = vpop.eup %4937  ;;  %v3966_v34 = vsel %vm3963_vm13, %v3965_v35, %v3961_v50 }
0x45a0   :  { %v3648_v47 = vmul.f32 %v4938_v11, %v3646_v5  ;;  %vm3653_vm11 = vweird.f32 %v4938_v11  ;;  %v3972_v45 = vmul.f32 %v3970_v52, %v3966_v34 }
0x45a1   :  { %vm3654_vm5 = vmor %vm3652_vm4, %vm3653_vm11 }
0x45a2   :  { %v3649_v26 = vsub.f32 1.0, %v3648_v47 }
0x45a4   :  { %v3650_v12 = vmul.f32 %v4938_v11, %v3649_v26 }
0x45a6   :  { %v3651_v13 = vadd.f32 %v4938_v11, %v3650_v12 }
0x45a8   :  { %v3655_v14 = vsel %vm3654_vm5, %v4938_v11, %v3651_v13 }
0x45a9   :  { %v3660_v18 = vsel %vm3657_vm6, %v3659_v16, %v3655_v14 }
0x45aa   :  { %v3666_v6 = vmul.f32 %v3664_v37, %v3660_v18 }
0x45e5   :  { %v3975_v61 = vpop.permute.xlu2 %3974 }
0x45e6   :  { %v3977_v38 = vmul.f32 %v3975_v61, %v3966_v34 }
0x45e8   :  { %3979 = vrot.lane.b32.xlu1 %v3977_v38, %s5084_s18 }
0x45f3   :  { %v3669_v17 = vpop.permute.xlu1 %3668 }
0x45f4   :  { %v3671_v19 = vmul.f32 %v3669_v17, %v3660_v18 }
0x45f6   :  { %3673 = vrot.lane.b32.xlu0 %v3671_v19, %s5084_s18 }
0x465a   :  { %v3980_v54 = vpop.permute.xlu1 %3979 }
0x465b   :  { %v6129_v62 = vadd.f32 %v3980_v54, %v3972_v45 }
0x465d   :  { %4939 = vtanh.f32 %v6129_v62  ;;  %v4042_v45 = vrot.slane %v6129_v62, 2 }
0x4663   :  { %v4940_v30 = vpop.eup %4939 }
0x4664   :  { %3985 = vrot.lane.b32.xlu0 %v4940_v30, %s5083_s6 }
0x4668   :  { %v3674_v22 = vpop.permute.xlu0 %3673 }
0x4669   :  { %v6134_v7 = vadd.f32 %v3674_v22, %v3666_v6 }
0x466b   :  { %4941 = vtanh.f32 %v6134_v7  ;;  %v3736_v16 = vrot.slane %v6134_v7, 6 }
0x4671   :  { %v4942_v25 = vpop.eup %4941 }
0x4672   :  { %3679 = vrot.lane.b32.xlu2 %v4942_v25, %s5083_s6 }
0x46cc   :  { %v3680_v40 = vpop.permute.xlu2 %3679 }
0x46cd   :  { %v3682_v28 = vmul.f32 %v3680_v40, %v3660_v18 }
0x46cf   :  { %3684 = vrot.lane.b32.xlu1 %v3682_v28, %s5084_s18 }
0x46d6   :  { %v3986_v31 = vpop.permute.xlu0 %3985 }
0x46d7   :  { %v6139_v41 = vmul.f32 %v3986_v31, %v3966_v34 }
0x46d9   :  { %v3995_v60 = vrot.slane %v6139_v41, 2 }
0x46db   :  { %3996 = vrot.lane.b32.xlu2 %v3995_v60, %s5084_s18 }
0x4735   :  { %v3997_v29 = vpop.permute.xlu2 %3996 }
0x4741   :  { %v3685_v24 = vpop.permute.xlu1 %3684 }
0x4742   :  { %3687 = vst.msk [vmem:[#allocation3 + $0x8] sm:$0x3] %vm6297_vm8, %v3685_v24  ;;  %4543 = vmatmul.msk.f32.vlgmr.msra.gmra.mxu3 %vm143_vm2, %v3685_v24 }
0x4743   :  { %4308 = vmatpush.msra.mxu3 %v6049_v58 }
0x4745   :  { %4309 = vmatpush.msra.mxu3 %v6051_v55 }
0x4747   :  { %4310 = vmatpush.msra.mxu3 %v6055_v20 }
0x4749   :  { %4311 = vmatpush.msra.mxu3 %v6060_v21 }
0x474a   :  { %4553 = vmatmul.msk.f32.vlgmr.msrb.gmra.mxu3 %vm143_vm2, %v3997_v29 }
0x47c5   :  { %v3708_v51 = vpop.f32.mrf.mxu3 }
0x47c6   :  { %v3712_v15 = vrot.slane %v3708_v51, 6  ;;  %v4066_v51 = vld [vmem:[#allocation4 + $0x18] sm:$0xc0] }
0x47c8   :  { %v3714_v56 = vadd.f32 %v3712_v15, %v3688_v46 }
0x47ca   :  { %4943 = vtanh.f32 %v3714_v56  ;;  %v4544_v55 = vmul.f32 -1.442695, %v3714_v56 }
0x47cd   :  { %v4017_v42 = vpop.f32.mrf.mxu3 }
0x47ce   :  { %v4020_v59 = vadd.f32 %v4017_v42, %v3994_v39 }
0x47d0   :  { %v4944_v57 = vpop.eup %4943  ;;  %4945 = vtanh.f32 %v4020_v59  ;;  %v4554_v20 = vmul.f32 -1.442695, %v4020_v59 }
0x47d1   :  { %3740 = vrot.lane.b32.xlu0 %v4944_v57, %s5083_s6  ;;  %4947 = vpow2.f32 %v4544_v55 }
0x47d2   :  { %4949 = vpow2.f32 %v4554_v20 }
0x47d6   :  { %v4946_v58 = vpop.eup %4945 }
0x47d7   :  { %4046 = vrot.lane.b32.xlu1 %v4946_v58, %s5083_s6  ;;  %v4948_v21 = vpop.eup %4947 }
0x47d8   :  { %v3718_v2 = vadd.f32 1.0, %v4948_v21  ;;  %v4950_v4 = vpop.eup %4949 }
0x47d9   :  { %v4024_v53 = vadd.f32 1.0, %v4950_v4 }
0x47da   :  { %4951 = vrcp.f32 %v3718_v2  ;;  %v3730_v11 = vand.u32 2147483648, %v3718_v2  ;;  %vm3724_vm3 = vweird.f32 %v3718_v2  ;;  %v3728_v43 = vand.u32 2147483647, %v3718_v2 }
0x47db   :  { %4953 = vrcp.f32 %v4024_v53  ;;  %v4036_v61 = vand.u32 2147483648, %v4024_v53  ;;  %vm4030_vm5 = vweird.f32 %v4024_v53  ;;  %v4034_v38 = vand.u32 2147483647, %v4024_v53 }
0x47dc   :  { %v3731_v47 = vor.u32 1.1754944e-38, %v3730_v11  ;;  %vm3729_vm11 = vcmp.eq.f32.partialorder %v3728_v43, 8.507059e+37 }
0x47dd   :  { %v4037_v13 = vor.u32 1.1754944e-38, %v4036_v61  ;;  %vm4035_vm8 = vcmp.eq.f32.partialorder %v4034_v38, 8.507059e+37 }
0x47e0   :  { %v4952_v27 = vpop.eup %4951 }
0x47e1   :  { %v3720_v8 = vmul.f32 %v4952_v27, %v3718_v2  ;;  %v4954_v3 = vpop.eup %4953  ;;  %vm3725_vm1 = vweird.f32 %v4952_v27 }
0x47e2   :  { %v4026_v9 = vmul.f32 %v4954_v3, %v4024_v53  ;;  %vm3726_vm13 = vmor %vm3724_vm3, %vm3725_vm1  ;;  %vm4031_vm4 = vweird.f32 %v4954_v3 }
0x47e3   :  { %v3721_v23 = vsub.f32 1.0, %v3720_v8  ;;  %vm4032_vm6 = vmor %vm4030_vm5, %vm4031_vm4 }
0x47e4   :  { %v4027_v63 = vsub.f32 1.0, %v4026_v9 }
0x47e5   :  { %v3722_v5 = vmul.f32 %v4952_v27, %v3721_v23 }
0x47e6   :  { %v4028_v44 = vmul.f32 %v4954_v3, %v4027_v63 }
0x47e7   :  { %v3723_v10 = vadd.f32 %v4952_v27, %v3722_v5 }
0x47e8   :  { %v4029_v50 = vadd.f32 %v4954_v3, %v4028_v44 }
0x47e9   :  { %v3727_v0 = vsel %vm3726_vm13, %v4952_v27, %v3723_v10 }
0x47ea   :  { %v3732_v35 = vsel %vm3729_vm11, %v3731_v47, %v3727_v0  ;;  %v4033_v12 = vsel %vm4032_vm6, %v4954_v3, %v4029_v50 }
0x47eb   :  { %v4038_v36 = vsel %vm4035_vm8, %v4037_v13, %v4033_v12  ;;  %v3738_v17 = vmul.f32 %v3736_v16, %v3732_v35 }
0x47ec   :  { %v4044_v54 = vmul.f32 %v4042_v45, %v4038_v36 }
0x4843   :  { %v3741_v26 = vpop.permute.xlu0 %3740 }
0x4844   :  { %v3743_v34 = vmul.f32 %v3741_v26, %v3732_v35 }
0x4846   :  { %3745 = vrot.lane.b32.xlu2 %v3743_v34, %s5084_s18 }
0x4849   :  { %v4047_v49 = vpop.permute.xlu1 %4046 }
0x484a   :  { %v4049_v14 = vmul.f32 %v4047_v49, %v4038_v36 }
0x484c   :  { %4051 = vrot.lane.b32.xlu0 %v4049_v14, %s5084_s18 }
0x48a0   :  { %v3746_v18 = vpop.permute.xlu2 %3745 }
0x48a1   :  { %v6155_v19 = vadd.f32 %v3746_v18, %v3738_v17 }
0x48a3   :  { %4955 = vtanh.f32 %v6155_v19 }
0x48a9   :  { %v4956_v52 = vpop.eup %4955 }
0x48aa   :  { %3751 = vrot.lane.b32.xlu1 %v4956_v52, %s5083_s6 }
0x48be   :  { %v4052_v30 = vpop.permute.xlu0 %4051 }
0x48bf   :  { %v4054_v37 = vadd.f32 %v4052_v30, %v4044_v54 }
0x48c1   :  { %4957 = vtanh.f32 %v4054_v37  ;;  %v4116_v23 = vrot.slane %v4054_v37, 2 }
0x48c7   :  { %v4958_v6 = vpop.eup %4957 }
0x48c8   :  { %4057 = vrot.lane.b32.xlu2 %v4958_v6, %s5083_s6 }
0x491c   :  { %v3752_v22 = vpop.permute.xlu1 %3751 }
0x491d   :  { %v6161_v7 = vmul.f32 %v3752_v22, %v3732_v35  ;;  %v4140_v35 = vld [vmem:[#allocation4 + $0x18] sm:$0x30] }
0x491f   :  { %v3761_v25 = vrot.slane %v6161_v7, 2 }
0x4921   :  { %3762 = vrot.lane.b32.xlu0 %v3761_v25, %s5084_s18 }
0x4922   :  { %v4058_v40 = vpop.permute.xlu2 %4057 }
0x4923   :  { %v6165_v28 = vmul.f32 %v4058_v40, %v4038_v36 }
0x4925   :  { %4067 = vrot.lane.b32.xlu1 %v6165_v28, %s5084_s18 }
0x4993   :  { %v3763_v62 = vpop.permute.xlu0 %3762 }
0x4994   :  { %4545 = vmatmul.msk.f32.vlgmr.msra.gmra.mxu0 %vm143_vm2, %v3763_v62 }
0x4997   :  { %v4068_v31 = vpop.permute.xlu1 %4067 }
0x499c   :  { %4555 = vmatmul.msk.f32.vlgmr.msrb.gmra.mxu0 %vm143_vm2, %v4068_v31 }
0x4a11   :  { %v6171_v60 = vpop.f32.mrf.mxu0 }
0x4a19   :  { %v4088_v24 = vpop.f32.mrf.mxu0 }
0x4a1a   :  { %v4092_v29 = vrot.slane %v4088_v24, 2 }
0x4a1c   :  { %v4094_v15 = vadd.f32 %v4092_v29, %v4066_v51 }
0x4a1e   :  { %4959 = vtanh.f32 %v4094_v15  ;;  %v4556_v56 = vmul.f32 -1.442695, %v4094_v15 }
0x4a20   :  { %4961 = vpow2.f32 %v4556_v56  ;;  %v4215_v56 = vld [vmem:[#allocation4 + $0x18] sm:$0xc] }
0x4a24   :  { %v4960_v46 = vpop.eup %4959 }
0x4a25   :  { %4120 = vrot.lane.b32.xlu2 %v4960_v46, %s5083_s6 }
0x4a26   :  { %v4962_v39 = vpop.eup %4961 }
0x4a27   :  { %v4098_v42 = vadd.f32 1.0, %v4962_v39 }
0x4a29   :  { %4963 = vrcp.f32 %v4098_v42  ;;  %v4110_v21 = vand.u32 2147483648, %v4098_v42  ;;  %vm4104_vm3 = vweird.f32 %v4098_v42  ;;  %v4108_v2 = vand.u32 2147483647, %v4098_v42 }
0x4a2b   :  { %v4111_v53 = vor.u32 1.1754944e-38, %v4110_v21  ;;  %vm4109_vm11 = vcmp.eq.f32.partialorder %v4108_v2, 8.507059e+37 }
0x4a2f   :  { %v4964_v59 = vpop.eup %4963 }
0x4a30   :  { %v4100_v57 = vmul.f32 %v4964_v59, %v4098_v42  ;;  %vm4105_vm1 = vweird.f32 %v4964_v59 }
0x4a31   :  { %vm4106_vm13 = vmor %vm4104_vm3, %vm4105_vm1 }
0x4a32   :  { %v4101_v58 = vsub.f32 1.0, %v4100_v57 }
0x4a34   :  { %v4102_v55 = vmul.f32 %v4964_v59, %v4101_v58 }
0x4a36   :  { %v4103_v20 = vadd.f32 %v4964_v59, %v4102_v55 }
0x4a38   :  { %v4107_v4 = vsel %vm4106_vm13, %v4964_v59, %v4103_v20 }
0x4a39   :  { %v4112_v8 = vsel %vm4109_vm11, %v4111_v53, %v4107_v4 }
0x4a3a   :  { %v4118_v9 = vmul.f32 %v4116_v23, %v4112_v8 }
0x4a7f   :  { %v4121_v27 = vpop.permute.xlu2 %4120 }
0x4a80   :  { %v4123_v3 = vmul.f32 %v4121_v27, %v4112_v8 }
0x4a82   :  { %4125 = vrot.lane.b32.xlu0 %v4123_v3, %s5084_s18 }
0x4af4   :  { %v4126_v5 = vpop.permute.xlu0 %4125 }
0x4af5   :  { %v4128_v63 = vadd.f32 %v4126_v5, %v4118_v9 }
0x4af7   :  { %4965 = vtanh.f32 %v4128_v63  ;;  %v4191_v6 = vrot.slane %v4128_v63, 2 }
0x4afd   :  { %v4966_v10 = vpop.eup %4965 }
0x4afe   :  { %4131 = vrot.lane.b32.xlu1 %v4966_v10, %s5083_s6 }
0x4b70   :  { %v4132_v11 = vpop.permute.xlu1 %4131 }
0x4b71   :  { %v6176_v43 = vmul.f32 %v4132_v11, %v4112_v8 }
0x4b73   :  { %v4141_v44 = vrot.slane %v6176_v43, 6 }
0x4b75   :  { %4142 = vrot.lane.b32.xlu2 %v4141_v44, %s5084_s18 }
0x4bcf   :  { %v4143_v0 = vpop.permute.xlu2 %4142 }
0x4bd0   :  { %4557 = vmatmul.msk.f32.vlgmr.msrb.gmra.mxu1 %vm143_vm2, %v4143_v0  ;;  %v3787_v0 = vrot.slane %v6171_v60, 4 }
0x4c4d   :  { %v4163_v47 = vpop.f32.mrf.mxu1 }
0x4c4e   :  { %v4167_v50 = vrot.slane %v4163_v47, 4  ;;  %v3760_v47 = vld [vmem:[#allocation4] sm:$0x30] }
0x4c50   :  { %v4169_v26 = vadd.f32 %v4167_v50, %v4140_v35  ;;  %v3789_v50 = vadd.f32 %v3787_v0, %v3760_v47 }
0x4c52   :  { %4967 = vtanh.f32 %v4169_v26  ;;  %v4558_v34 = vmul.f32 -1.442695, %v4169_v26  ;;  %v4546_v60 = vmul.f32 -1.442695, %v3789_v50 }
0x4c54   :  { %4969 = vpow2.f32 %v4558_v34 }
0x4c58   :  { %v4968_v61 = vpop.eup %4967 }
0x4c59   :  { %4195 = vrot.lane.b32.xlu0 %v4968_v61, %s5083_s6 }
0x4c5a   :  { %v4970_v38 = vpop.eup %4969 }
0x4c5b   :  { %v4173_v12 = vadd.f32 1.0, %v4970_v38 }
0x4c5d   :  { %4971 = vrcp.f32 %v4173_v12  ;;  %v4185_v17 = vand.u32 2147483648, %v4173_v12  ;;  %vm4179_vm5 = vweird.f32 %v4173_v12  ;;  %v4183_v18 = vand.u32 2147483647, %v4173_v12 }
0x4c5f   :  { %v4186_v45 = vor.u32 1.1754944e-38, %v4185_v17  ;;  %vm4184_vm8 = vcmp.eq.f32.partialorder %v4183_v18, 8.507059e+37  ;;  %v4290_v17 = vld [vmem:[#allocation4 + $0x18] sm:$0x3] }
0x4c63   :  { %v4972_v13 = vpop.eup %4971 }
0x4c64   :  { %v4175_v49 = vmul.f32 %v4972_v13, %v4173_v12  ;;  %vm4180_vm4 = vweird.f32 %v4972_v13 }
0x4c65   :  { %vm4181_vm6 = vmor %vm4179_vm5, %vm4180_vm4 }
0x4c66   :  { %v4176_v36 = vsub.f32 1.0, %v4175_v49 }
0x4c68   :  { %v4177_v14 = vmul.f32 %v4972_v13, %v4176_v36 }
0x4c6a   :  { %v4178_v16 = vadd.f32 %v4972_v13, %v4177_v14 }
0x4c6c   :  { %v4182_v52 = vsel %vm4181_vm6, %v4972_v13, %v4178_v16 }
0x4c6d   :  { %v4187_v30 = vsel %vm4184_vm8, %v4186_v45, %v4182_v52 }
0x4c6e   :  { %v4193_v22 = vmul.f32 %v4191_v6, %v4187_v30 }
0x4ccb   :  { %v4196_v54 = vpop.permute.xlu0 %4195 }
0x4ccc   :  { %v4198_v37 = vmul.f32 %v4196_v54, %v4187_v30 }
0x4cce   :  { %4200 = vrot.lane.b32.xlu1 %v4198_v37, %s5084_s18 }
0x4d40   :  { %v4201_v25 = vpop.permute.xlu1 %4200 }
0x4d41   :  { %v4203_v40 = vadd.f32 %v4201_v25, %v4193_v22 }
0x4d43   :  { %4973 = vtanh.f32 %v4203_v40  ;;  %v4266_v63 = vrot.slane %v4203_v40, 2 }
0x4d49   :  { %v4974_v62 = vpop.eup %4973 }
0x4d4a   :  { %4206 = vrot.lane.b32.xlu2 %v4974_v62, %s5083_s6 }
0x4da4   :  { %v4207_v31 = vpop.permute.xlu2 %4206 }
0x4da5   :  { %v6184_v24 = vmul.f32 %v4207_v31, %v4187_v30 }
0x4da7   :  { %v4216_v29 = vrot.slane %v6184_v24, 4 }
0x4da9   :  { %4217 = vrot.lane.b32.xlu0 %v4216_v29, %s5084_s18 }
0x4e1b   :  { %v4218_v51 = vpop.permute.xlu0 %4217 }
0x4e1c   :  { %4559 = vmatmul.msk.f32.vlgmr.msra.gmra.mxu2 %vm143_vm2, %v4218_v51 }
0x4e9f   :  { %v4238_v15 = vpop.f32.mrf.mxu2 }
0x4ea0   :  { %v4242_v46 = vrot.slane %v4238_v15, 6 }
0x4ea2   :  { %v4244_v39 = vadd.f32 %v4242_v46, %v4215_v56 }
0x4ea4   :  { %4975 = vtanh.f32 %v4244_v39  ;;  %v4560_v59 = vmul.f32 -1.442695, %v4244_v39 }
0x4ea6   :  { %4977 = vpow2.f32 %v4560_v59 }
0x4eaa   :  { %v4976_v42 = vpop.eup %4975 }
0x4eab   :  { %4270 = vrot.lane.b32.xlu1 %v4976_v42, %s5083_s6 }
0x4eac   :  { %v4978_v57 = vpop.eup %4977 }
0x4ead   :  { %v4248_v58 = vadd.f32 1.0, %v4978_v57 }
0x4eaf   :  { %4979 = vrcp.f32 %v4248_v58  ;;  %v4260_v53 = vand.u32 2147483648, %v4248_v58  ;;  %vm4254_vm3 = vweird.f32 %v4248_v58  ;;  %v4258_v27 = vand.u32 2147483647, %v4248_v58 }
0x4eb1   :  { %v4261_v3 = vor.u32 1.1754944e-38, %v4260_v53  ;;  %vm4259_vm11 = vcmp.eq.f32.partialorder %v4258_v27, 8.507059e+37 }
0x4eb5   :  { %v4980_v55 = vpop.eup %4979 }
0x4eb6   :  { %v4250_v20 = vmul.f32 %v4980_v55, %v4248_v58  ;;  %vm4255_vm1 = vweird.f32 %v4980_v55 }
0x4eb7   :  { %vm4256_vm13 = vmor %vm4254_vm3, %vm4255_vm1 }
0x4eb8   :  { %v4251_v21 = vsub.f32 1.0, %v4250_v20  ;;  %v3811_v20 = vrot.slane %v6155_v19, 6 }
0x4eba   :  { %v4252_v2 = vmul.f32 %v4980_v55, %v4251_v21 }
0x4ebc   :  { %v4253_v4 = vadd.f32 %v4980_v55, %v4252_v2 }
0x4ebe   :  { %v4257_v8 = vsel %vm4256_vm13, %v4980_v55, %v4253_v4 }
0x4ebf   :  { %v4262_v9 = vsel %vm4259_vm11, %v4261_v3, %v4257_v8 }
0x4ec0   :  { %v4268_v10 = vmul.f32 %v4266_v63, %v4262_v9 }
0x4f1d   :  { %v4271_v23 = vpop.permute.xlu1 %4270 }
0x4f1e   :  { %v4273_v5 = vmul.f32 %v4271_v23, %v4262_v9 }
0x4f20   :  { %4275 = vrot.lane.b32.xlu2 %v4273_v5, %s5084_s18 }
0x4f7a   :  { %v4276_v11 = vpop.permute.xlu2 %4275 }
0x4f7b   :  { %v6191_v44 = vadd.f32 %v4276_v11, %v4268_v10 }
0x4f7d   :  { %4981 = vtanh.f32 %v6191_v44  ;;  %v4338_v3 = vrot.slane %v6191_v44, 2 }
0x4f7e   :  { %4983 = vtanh.f32 %v3789_v50 }
0x4f7f   :  { %4985 = vpow2.f32 %v4546_v60 }
0x4f83   :  { %v4982_v35 = vpop.eup %4981 }
0x4f84   :  { %4281 = vrot.lane.b32.xlu0 %v4982_v35, %s5083_s6  ;;  %v4984_v26 = vpop.eup %4983  ;;  %v4383_v35 = vld [vmem:[%s6283_s9 + $0x38] sm:$0xff] }
0x4f85   :  { %v4986_v13 = vpop.eup %4985  ;;  %4399 = vmatpush.msra.mxu0 %v4383_v35 }
0x4f86   :  { %v3793_v49 = vadd.f32 1.0, %v4986_v13 }
0x4f88   :  { %4987 = vrcp.f32 %v3793_v49  ;;  %v3805_v37 = vand.u32 2147483648, %v3793_v49  ;;  %vm3799_vm5 = vweird.f32 %v3793_v49  ;;  %v3803_v6 = vand.u32 2147483647, %v3793_v49 }
0x4f8a   :  { %v3806_v40 = vor.u32 1.1754944e-38, %v3805_v37  ;;  %vm3804_vm6 = vcmp.eq.f32.partialorder %v3803_v6, 8.507059e+37 }
0x4f8c   :  { %3815 = vrot.lane.b32.xlu0 %v4984_v26, %s5083_s6  ;;  %v4381_v26 = vld [vmem:[%s6283_s9 + $0x28] sm:$0xff] }
0x4f8e   :  { %v4988_v36 = vpop.eup %4987 }
0x4f8f   :  { %v3795_v14 = vmul.f32 %v4988_v36, %v3793_v49  ;;  %vm3800_vm4 = vweird.f32 %v4988_v36 }
0x4f91   :  { %v3796_v16 = vsub.f32 1.0, %v3795_v14 }
0x4f93   :  { %v3797_v45 = vmul.f32 %v4988_v36, %v3796_v16 }
0x4f95   :  { %v3798_v54 = vadd.f32 %v4988_v36, %v3797_v45 }
0x4ff6   :  { %v4282_v61 = vpop.permute.xlu0 %4281 }
0x4ff7   :  { %v6197_v34 = vmul.f32 %v4282_v61, %v4262_v9  ;;  %v4379_v61 = vld [vmem:[%s6283_s9 + $0x18] sm:$0xff] }
0x4ff9   :  { %v4291_v38 = vrot.slane %v6197_v34, 2 }
0x4ffb   :  { %4292 = vrot.lane.b32.xlu1 %v4291_v38, %s5084_s18  ;;  %v4377_v38 = vld [vmem:[%s6283_s9 + $0x8] sm:$0xff] }
0x4ffe   :  { %v3816_v25 = vpop.permute.xlu0 %3815 }
0x506d   :  { %v4293_v12 = vpop.permute.xlu1 %4292 }
0x506e   :  { %4561 = vmatmul.msk.f32.vlgmr.msra.gmra.mxu3 %vm143_vm2, %v4293_v12  ;;  %vm3801_vm2 = vmor %vm3799_vm5, %vm3800_vm4  ;;  %v4376_v12 = vld [vmem:[%s6283_s9] sm:$0xff] }
0x506f   :  { %v3802_v22 = vsel %vm3801_vm2, %v4988_v36, %v3798_v54 }
0x5070   :  { %v3807_v62 = vsel %vm3804_vm6, %v3806_v40, %v3802_v22 }
0x5071   :  { %v3818_v31 = vmul.f32 %v3816_v25, %v3807_v62  ;;  %v3813_v21 = vmul.f32 %v3811_v20, %v3807_v62 }
0x50f1   :  { %v4313_v18 = vpop.f32.mrf.mxu3 }
0x50f2   :  { %v4316_v52 = vadd.f32 %v4313_v18, %v4290_v17 }
0x50f4   :  { %4989 = vtanh.f32 %v4316_v52  ;;  %v4562_v29 = vmul.f32 -1.442695, %v4316_v52 }
0x50f6   :  { %4991 = vpow2.f32 %v4562_v29 }
0x50fa   :  { %v4990_v30 = vpop.eup %4989 }
0x50fb   :  { %4342 = vrot.lane.b32.xlu2 %v4990_v30, %s5083_s6 }
0x50fc   :  { %v4992_v51 = vpop.eup %4991 }
0x50fd   :  { %v4320_v15 = vadd.f32 1.0, %v4992_v51 }
0x50ff   :  { %4993 = vrcp.f32 %v4320_v15  ;;  %vm4326_vm1 = vweird.f32 %v4320_v15 }
0x5103   :  { %3820 = vrot.lane.b32.xlu2 %v3818_v31, %s5084_s18 }
0x5105   :  { %v4994_v46 = vpop.eup %4993 }
0x5106   :  { %v4322_v56 = vmul.f32 %v4994_v46, %v4320_v15  ;;  %vm4327_vm8 = vweird.f32 %v4994_v46 }
0x5107   :  { %vm4328_vm3 = vmor %vm4326_vm1, %vm4327_vm8 }
0x5108   :  { %v4323_v39 = vsub.f32 1.0, %v4322_v56 }
0x510a   :  { %v4324_v42 = vmul.f32 %v4994_v46, %v4323_v39 }
0x510b   :  { %3462 = vrot.lane.b32.xlu2 %v6021_v32, %s5084_s18  ;;  %v4332_v32 = vand.u32 2147483648, %v4320_v15 }
0x510c   :  { %v4325_v59 = vadd.f32 %v4994_v46, %v4324_v42 }
0x510e   :  { %v4329_v57 = vsel %vm4328_vm3, %v4994_v46, %v4325_v59 }
0x5113   :  { %3537 = vrot.lane.b32.xlu2 %v6073_v33, %s5084_s18  ;;  %v4330_v33 = vand.u32 2147483647, %v4320_v15 }
0x5115   :  { %vm4331_vm13 = vcmp.eq.f32.partialorder %v4330_v33, 8.507059e+37 }
0x511b   :  { %4136 = vrot.lane.b32.xlu2 %v6176_v43, %s5083_s6  ;;  %v4333_v43 = vor.u32 1.1754944e-38, %v4332_v32 }
0x5123   :  { %3990 = vrot.lane.b32.xlu2 %v6139_v41, %s5083_s6  ;;  %v4334_v41 = vsel %vm4331_vm13, %v4333_v43, %v4329_v57 }
0x5124   :  { %v4340_v23 = vmul.f32 %v4338_v3, %v4334_v41 }
0x5155   :  { %v4343_v58 = vpop.permute.xlu2 %4342 }
0x5156   :  { %v4345_v55 = vmul.f32 %v4343_v58, %v4334_v41 }
0x5158   :  { %4347 = vrot.lane.b32.xlu1 %v4345_v55, %s5084_s18 }
0x515d   :  { %v3821_v2 = vpop.permute.xlu2 %3820 }
0x515e   :  { %v3823_v4 = vadd.f32 %v3821_v2, %v3813_v21 }
0x5160   :  { %4995 = vtanh.f32 %v3823_v4 }
0x5165   :  { %v3463_v53 = vpop.permute.xlu2 %3462 }
0x5166   :  { %v4996_v27 = vpop.eup %4995  ;;  %3465 = vst.msk [vmem:[#allocation3] sm:$0xc] %vm1198_vm7, %v3463_v53 }
0x5167   :  { %3826 = vrot.lane.b32.xlu1 %v4996_v27, %s5083_s6 }
0x516d   :  { %v3538_v8 = vpop.permute.xlu2 %3537 }
0x516e   :  { %3540 = vst.msk [vmem:[#allocation3] sm:$0x30] %vm1274_vm9, %v3538_v8 }
0x516f   :  { %3612 = vrot.lane.b32.xlu1 %v6114_v48, %s5084_s18 }
0x5175   :  { %v4137_v11 = vpop.permute.xlu2 %4136 }
0x517d   :  { %v3991_v14 = vpop.permute.xlu2 %3990 }
0x51ca   :  { %v4348_v19 = vpop.permute.xlu1 %4347 }
0x51cb   :  { %v4350_v9 = vadd.f32 %v4348_v19, %v4340_v23 }
0x51cd   :  { %4997 = vtanh.f32 %v4350_v9 }
0x51d3   :  { %v4998_v5 = vpop.eup %4997 }
0x51d4   :  { %4353 = vrot.lane.b32.xlu0 %v4998_v5, %s5083_s6 }
0x51d9   :  { %v3827_v63 = vpop.permute.xlu1 %3826 }
0x51da   :  { %v3829_v48 = vmul.f32 %v3827_v63, %v3807_v62  ;;  %v4578_v62 = vld [vmem:[%s6284_s10] ss:$0 sm:$0xff] }
0x51dc   :  { %4286 = vrot.lane.b32.xlu0 %v6197_v34, %s5083_s6  ;;  %v4378_v34 = vld [vmem:[%s6283_s9 + $0x10] sm:$0xff] }
0x51e1   :  { %v3613_v10 = vpop.permute.xlu1 %3612 }
0x51e2   :  { %3615 = vst.msk [vmem:[#allocation3] sm:$0xc0] %vm1350_vm12, %v3613_v10 }
0x51e3   :  { %4139 = vst.msk [vmem:[#allocation3] sm:$0xc0] %vm1878_vm14, %v4137_v11 }
0x51e4   :  { %4211 = vrot.lane.b32.xlu0 %v6184_v24, %s5083_s6 }
0x51ea   :  { %v4368_v52 = vld [vmem:[#allocation3 + $0x6] sm:$0x3] }
0x51ec   :  { %4062 = vrot.lane.b32.xlu0 %v6165_v28, %s5083_s6 }
0x51f4   :  { %3831 = vrot.lane.b32.xlu0 %v3829_v48, %s5084_s18 }
0x5246   :  { %v4354_v44 = vpop.permute.xlu0 %4353 }
0x5247   :  { %v4356_v0 = vmul.f32 %v4354_v44, %v4334_v41 }
0x5249   :  { %4358 = vrot.lane.b32.xlu1 %v4356_v0, %s5083_s6 }
0x524e   :  { %v4287_v47 = vpop.permute.xlu0 %4286 }
0x524f   :  { %4289 = vst.msk [vmem:[#allocation3] sm:$0xc] %vm1730_vm15, %v4287_v47 }
0x5251   :  { %3756 = vrot.lane.b32.xlu1 %v6161_v7, %s5084_s18  ;;  %v4382_v7 = vld [vmem:[%s6283_s9 + $0x30] sm:$0xff] }
0x5252   :  { %4400 = vmatpush.msra.mxu0 %v4382_v7 }
0x5254   :  { %4401 = vmatpush.msra.mxu0 %v4381_v26 }
0x5256   :  { %v4212_v50 = vpop.permute.xlu0 %4211  ;;  %v4364_v36 = vld [vmem:[#allocation3 + $0x2] sm:$0x3] }
0x5257   :  { %4214 = vst.msk [vmem:[#allocation3] sm:$0x30] %vm1654_vm10, %v4212_v50 }
0x5259   :  { %3915 = vrot.lane.b32.xlu1 %v6110_v1, %s5083_s6  ;;  %v4380_v1 = vld [vmem:[%s6283_s9 + $0x20] sm:$0xff] }
0x525a   :  { %4402 = vmatpush.msra.mxu0 %v4380_v1 }
0x525c   :  { %4403 = vmatpush.msra.mxu0 %v4379_v61 }
0x525e   :  { %v4063_v28 = vpop.permute.xlu0 %4062  ;;  %4404 = vmatpush.msra.mxu0 %v4378_v34  ;;  %v4366_v17 = vld [vmem:[#allocation3 + $0x4] sm:$0x3] }
0x525f   :  { %4065 = vst.msk [vmem:[#allocation3 + $0x8] sm:$0x3] %vm1803_vm0, %v4063_v28 }
0x5260   :  { %4405 = vmatpush.msra.mxu0 %v4377_v38 }
0x5262   :  { %4406 = vmatpush.msra.mxu0 %v4376_v12 }
0x5266   :  { %v3832_v24 = vpop.permute.xlu0 %3831  ;;  %v4370_v30 = vld [vmem:[#allocation3 + $0x8] sm:$0x3] }
0x5267   :  { %3834 = vst.msk [vmem:[#allocation3 + $0x8] sm:$0x30] %vm1274_vm9, %v3832_v24  ;;  %vm6298_vm9 = vcmask 523264  }
0x52bb   :  { %v4359_v60 = vpop.permute.xlu1 %4358 }
0x52bc   :  { %4361 = vst.msk [vmem:[#allocation3] sm:$0x3] %vm1803_vm0, %v4359_v60 }
0x52c3   :  { %v3757_v13 = vpop.permute.xlu1 %3756  ;;  %v4362_v49 = vld [vmem:[#allocation3] sm:$0x3] }
0x52c4   :  { %3759 = vst.msk [vmem:[#allocation3 + $0x8] sm:$0xc] %vm1198_vm7, %v3757_v13  ;;  %v4365_v16 = vadd.f32 %v4364_v36, %v4362_v49  ;;  %vm4411_vm7 = vcmask 484352  }
0x52c5   :  { %3993 = vst.msk [vmem:[#allocation3 + $0x8] sm:$0xc] %vm1730_vm15, %v3991_v14 }
0x52c6   :  { %v4367_v18 = vadd.f32 %v4366_v17, %v4365_v16 }
0x52c8   :  { %v4369_v45 = vadd.f32 %v4368_v52, %v4367_v18 }
0x52ca   :  { %v4371_v37 = vadd.f32 %v4370_v30, %v4369_v45 }
0x52cb   :  { %v3916_v54 = vpop.permute.xlu1 %3915 }
0x52cc   :  { %3918 = vst.msk [vmem:[#allocation3 + $0x8] sm:$0x30] %vm1654_vm10, %v3916_v54  ;;  %v4372_v6 = vld [vmem:[#allocation3 + $0xa] sm:$0x3] }
0x52cd   :  { %v4373_v22 = vadd.f32 %v4372_v6, %v4371_v37 }
0x52d3   :  { %v4374_v25 = vld [vmem:[#allocation3 + $0xc] sm:$0x3] }
0x52d4   :  { %v4375_v40 = vadd.f32 %v4374_v25, %v4373_v22 }
0x52d6   :  { %4563 = vmatmul.msk.f32.vlgmr.msra.gmra.mxu0 %vm6298_vm9, %v4375_v40 }
0x5353   :  { %v4408_v31 = vpop.f32.mrf.mxu0 }
0x5354   :  { %v4409_v29 = vadd.f32 %v4578_v62, %v4408_v31 }
0x5356   :  { %4412 = vst.msk [vmem:[#allocation10] sm:$0x3] %vm4411_vm7, %v4409_v29 }
0x5357   :  { %4423 = dma.vmem_to_hbm [thread:$0]  %s4419_s7, 32, %s4421_s19, [#allocation7]  }
0x5358   :  { %5075 = dma.done.wait [#allocation7], 32  }
0x5359   :  { %5076 = vsyncadd [#allocation7], 4294967264 }
0x535a   :  { %4428 = vsyncpa [#allocation6], 1 }
0x535b   :  { %4429 = vsyncpa [#allocation9], 1 }
0x535c   :  { %4430 = vsyncpa [#allocation7], 1 }

</bundles_post_ra>
